<compile_context>
chip_gen: v7x
topology: tpu7x:2x2x1
jax: 0.10.0
libtpu: 0.0.40
codegen_flags: <defaults>
</compile_context>

<pallas_src>
import functools

import jax
import jax.numpy as jnp
from jax.experimental import pallas as pl
from jax.experimental.pallas import tpu as pltpu


# ------------------------------ in-kernel helpers ------------------------------
def _zero_outside(scr, y0, y1, x0, x1):
    """Zero everything in a (Hs, Ws, C) scratch outside the box [y0:y1, x0:x1]."""
    Hs, Ws, C = scr.shape
    dt = scr.dtype
    if y0 > 0:
        scr[0:y0, :, :] = jnp.zeros((y0, Ws, C), dt)
    if y1 < Hs:
        scr[y1:Hs, :, :] = jnp.zeros((Hs - y1, Ws, C), dt)
    if x0 > 0:
        scr[y0:y1, 0:x0, :] = jnp.zeros((y1 - y0, x0, C), dt)
    if x1 < Ws:
        scr[y0:y1, x1:Ws, :] = jnp.zeros((y1 - y0, Ws - x1, C), dt)


# --------------------------------- fused kernel ---------------------------------
def _up_kernel(k, offy, offx,
               x1_ref, x2_ref, wup_ref, bup_ref,
               w1_ref, b1_ref, w2_ref, b2_ref, w3_ref, b3_ref,
               o_ref,
               x2p_scr, upp_scr, mid_scr):
    t = pl.program_id(1)
    T = pl.num_programs(1)

    _, H1, W1, Cin = x1_ref.shape
    _, TH, W2, Co = o_ref.shape
    C2 = x2p_scr.shape[-1]
    Cup = upp_scr.shape[-1]
    p = k // 2
    Wp = W2 + 2 * p
    H2 = x2p_scr.shape[0] - 4 * p
    THE = TH + 2 * p                      # output tile rows + conv3 halo
    cdt = x2p_scr.dtype                   # MXU operand dtype (bf16); accumulation f32
    f32 = jnp.float32

    # ------------- per-batch staging: runs only on the first row tile -------------
    @pl.when(t == 0)
    def _stage_batch():
        # Zero only the halo / diff-pad frames that the stores below never touch.
        _zero_outside(x2p_scr, 2 * p, 2 * p + H2, p, p + W2)
        _zero_outside(upp_scr, 2 * p + offy, 2 * p + offy + 2 * H1,
                      p + offx, p + offx + 2 * W1)
        if p > 0:
            mid_scr[:, 0:p, :] = jnp.zeros((THE, p, Co), cdt)
            mid_scr[:, p + W2:Wp, :] = jnp.zeros((THE, p, Co), cdt)

        # ConvTranspose2d(kernel=2, stride=2): ONE fat MXU matmul (f32 accumulate),
        # output columns ordered (a, b, c_out).
        x1f = x1_ref[0].reshape(H1 * W1, Cin)
        y = jnp.dot(x1f, wup_ref[...], preferred_element_type=f32) + bup_ref[...]

        # 2x2 sub-pixel interleave in registers (last-dim-preserving stacks/reshapes).
        row_blocks = []
        for a in range(2):
            col_blocks = [
                y[:, (2 * a + b) * Cup:(2 * a + b + 1) * Cup].reshape(H1, W1, Cup)
                for b in range(2)]
            row_blocks.append(jnp.stack(col_blocks, axis=2).reshape(H1, 2 * W1, Cup))
        up_img = jnp.stack(row_blocks, axis=1).reshape(2 * H1, 2 * W1, Cup)

        # torch.cat([x2, up], 1) stays implicit: the two channel groups live in their
        # own persistent padded scratches; conv1 pairs them with per-group weights.
        upp_scr[2 * p + offy:2 * p + offy + 2 * H1,
                p + offx:p + offx + 2 * W1, :] = up_img.astype(cdt)
        x2p_scr[2 * p:2 * p + H2, p:p + W2, :] = x2_ref[0]
        # TODO(synk): take x2 with memory_space=pl.ANY and DMA it straight into this
        # window (pltpu.make_async_copy) to kill the VMEM->VMEM staging copy.

    # ------------------- per-row-tile DoubleConv (halo recompute) -------------------
    r0 = pl.multiple_of(t * TH, TH)       # top scratch row of this tile's input window

    # conv1 (k x k, "same"): k*k per-tap matmuls per channel group, f32 accumulation
    # (no materialized im2col panel).
    acc1 = jnp.zeros((THE * W2, Co), f32)
    for dy in range(k):
        x2_rows = x2p_scr[pl.ds(r0 + dy, THE), :, :]      # (THE, Wp, C2)
        up_rows = upp_scr[pl.ds(r0 + dy, THE), :, :]      # (THE, Wp, Cup)
        for dx in range(k):
            w_tap = w1_ref[dy * k + dx]                   # (C2 + Cup, Co)
            # TODO(synk): realize the dx shifts with pltpu.roll (XLU slot) instead of
            # sublane-offset value slices.
            acc1 += jnp.dot(x2_rows[:, dx:dx + W2, :].reshape(THE * W2, C2),
                            w_tap[:C2, :], preferred_element_type=f32)
            acc1 += jnp.dot(up_rows[:, dx:dx + W2, :].reshape(THE * W2, Cup),
                            w_tap[C2:, :], preferred_element_type=f32)
    a1 = jnp.maximum(acc1 + b1_ref[...], 0.0)             # f32; dropout == identity

    # conv2 (1 x 1) + ReLU + residual (elementwise kept in f32).
    a2 = jnp.maximum(
        jnp.dot(a1.astype(cdt), w2_ref[...], preferred_element_type=f32)
        + b2_ref[...], 0.0) + a1

    # Stage the padded a2 window for conv3's halo taps.
    mid_scr[:, p:p + W2, :] = a2.reshape(THE, W2, Co).astype(cdt)
    if p > 0:
        @pl.when(t == 0)
        def _zero_top_halo():
            mid_scr[0:p, :, :] = jnp.zeros((p, Wp, Co), cdt)

        @pl.when(t == T - 1)
        def _zero_bottom_halo():
            mid_scr[THE - p:THE, :, :] = jnp.zeros((p, Wp, Co), cdt)

    # conv3 (k x k, "same"): per-tap matmuls over the padded a2 window.
    acc3 = jnp.zeros((TH * W2, Co), f32)
    for dy in range(k):
        mid_rows = mid_scr[dy:dy + TH, :, :]              # (TH, Wp, Co)
        for dx in range(k):
            acc3 += jnp.dot(mid_rows[:, dx:dx + W2, :].reshape(TH * W2, Co),
                            w3_ref[dy * k + dx], preferred_element_type=f32)

    lo, hi = p * W2, (p + TH) * W2                        # interior rows of the window
    a3 = jnp.maximum(acc3 + b3_ref[...], 0.0) + a1[lo:hi] + a2[lo:hi]
    o_ref[0] = a3.reshape(TH, W2, Co).astype(o_ref.dtype)


# ------------------------------------- wrapper -------------------------------------
def up_forward(x1_nchw, x2_nchw, params, k, *, row_tile=8,
               compute_dtype=jnp.bfloat16):
    N, Cin, H1, W1 = x1_nchw.shape
    N2, C2, H2, W2 = x2_nchw.shape
    assert N2 == N
    assert k % 2 == 1, "odd kernel_size required for 'same' padding"
    Cup = params["up_w"].shape[1]
    Co = params["w1"].shape[0]
    Ct = params["w1"].shape[1]
    assert Ct == C2 + Cup
    p = k // 2
    Wp = W2 + 2 * p
    diffY, diffX = H2 - 2 * H1, W2 - 2 * W1
    assert diffY >= 0 and diffX >= 0, "Up assumes x2 is at least as large as 2*x1"
    offy, offx = diffY // 2, diffX // 2

    TH = max(1, min(row_tile, H2))
    while H2 % TH:                      # largest divisor of H2 not exceeding row_tile
        TH -= 1
    T = H2 // TH
    THE = TH + 2 * p
    cdt = compute_dtype

    # NCHW -> NHWC at the boundary (channels-last / lane-dense inside the kernel).
    x1 = jnp.transpose(x1_nchw, (0, 2, 3, 1)).astype(cdt)
    x2 = jnp.transpose(x2_nchw, (0, 2, 3, 1)).astype(cdt)

    # ConvTranspose2d weight (Cin, Cup, 2, 2) -> (Cin, 4*Cup), cols ordered (a, b, cu).
    wup_r = jnp.transpose(params["up_w"], (0, 2, 3, 1)).reshape(Cin, 4 * Cup).astype(cdt)
    bup_r = jnp.tile(params["up_b"], 4).reshape(1, 4 * Cup).astype(jnp.float32)
    # Conv weights (O, I, kH, kW) -> (k*k, I, O) per-tap panels; biases stay f32.
    w1_r = jnp.transpose(params["w1"], (2, 3, 1, 0)).reshape(k * k, Ct, Co).astype(cdt)
    b1_r = params["b1"].reshape(1, Co).astype(jnp.float32)
    w2_r = jnp.transpose(params["w2"][:, :, 0, 0], (1, 0)).astype(cdt)
    b2_r = params["b2"].reshape(1, Co).astype(jnp.float32)
    w3_r = jnp.transpose(params["w3"], (2, 3, 1, 0)).reshape(k * k, Co, Co).astype(cdt)
    b3_r = params["b3"].reshape(1, Co).astype(jnp.float32)

    kern = functools.partial(_up_kernel, k, offy, offx)
    out_nhwc = pl.pallas_call(
        kern,
        out_shape=jax.ShapeDtypeStruct((N, H2, W2, Co), jnp.float32),
        grid=(N, T),
        in_specs=[
            pl.BlockSpec((1, H1, W1, Cin), lambda n, t: (n, 0, 0, 0)),
            pl.BlockSpec((1, H2, W2, C2), lambda n, t: (n, 0, 0, 0)),
            # Grid-invariant weights / biases (constant block index -> fetched once).
            # TODO(synk): pipeline_mode=pl.Buffered(1) to single-buffer them.
            pl.BlockSpec((Cin, 4 * Cup), lambda n, t: (0, 0)),
            pl.BlockSpec((1, 4 * Cup), lambda n, t: (0, 0)),
            pl.BlockSpec((k * k, Ct, Co), lambda n, t: (0, 0, 0)),
            pl.BlockSpec((1, Co), lambda n, t: (0, 0)),
            pl.BlockSpec((Co, Co), lambda n, t: (0, 0)),
            pl.BlockSpec((1, Co), lambda n, t: (0, 0)),
            pl.BlockSpec((k * k, Co, Co), lambda n, t: (0, 0, 0)),
            pl.BlockSpec((1, Co), lambda n, t: (0, 0)),
        ],
        out_specs=pl.BlockSpec((1, TH, W2, Co), lambda n, t: (n, t, 0, 0)),
        scratch_shapes=[
            pltpu.VMEM((H2 + 4 * p, Wp, C2), cdt),    # padded skip (x2) channel group
            pltpu.VMEM((H2 + 4 * p, Wp, Cup), cdt),   # padded upsampled channel group
            pltpu.VMEM((THE, Wp, Co), cdt),           # padded a2 window (per tile)
        ],
        compiler_params=pltpu.CompilerParams(
            # Batch axis may split across TensorCores (per-batch staging at t == 0
            # keeps each core self-contained); the row-tile axis reuses the
            # persistent scratches, so it must stay sequential.
            dimension_semantics=("parallel", "arbitrary"),
            # <= 48 MiB so the same kernel also fits v7x's 64 MiB/TC VMEM.
            vmem_limit_bytes=48 * 1024 * 1024),
    )(x1, x2, wup_r, bup_r, w1_r, b1_r, w2_r, b2_r, w3_r, b3_r)
    return jnp.transpose(out_nhwc, (0, 3, 1, 2))     # back to NCHW, f32


# ---------------------------- pure-JAX reference (for check) ----------------------------
def ref_forward(x1, x2, params, k, compute_dtype=jnp.float32):
    """compute_dtype=f32: exact module semantics.  compute_dtype=bf16: same rounding
    points as the kernel (bf16 matmul operands, f32 accumulation / elementwise)."""
    cdt = compute_dtype
    f32 = jnp.float32
    Wup, bup = params["up_w"], params["up_b"]
    N, Cin, H, W = x1.shape
    Cup = Wup.shape[1]
    up = jnp.einsum('nchw,cdab->ndhwab', x1.astype(cdt), Wup.astype(cdt),
                    preferred_element_type=f32)
    up = jnp.transpose(up, (0, 1, 2, 4, 3, 5)).reshape(N, Cup, 2 * H, 2 * W)
    up = up + bup[None, :, None, None]
    diffY = x2.shape[2] - up.shape[2]
    diffX = x2.shape[3] - up.shape[3]
    up = jnp.pad(up, ((0, 0), (0, 0),
                      (diffY // 2, diffY - diffY // 2),
                      (diffX // 2, diffX - diffX // 2)))
    x = jnp.concatenate([x2, up], axis=1)

    def conv(v, w, b, pad):
        y = jax.lax.conv_general_dilated(
            v.astype(cdt), w.astype(cdt), (1, 1), [(pad, pad), (pad, pad)],
            dimension_numbers=('NCHW', 'OIHW', 'NCHW'),
            preferred_element_type=f32)
        return y + b[None, :, None, None]

    a1 = jax.nn.relu(conv(x, params["w1"], params["b1"], k // 2))
    a2 = jax.nn.relu(conv(a1, params["w2"], params["b2"], 0)) + a1
    a3 = jax.nn.relu(conv(a2, params["w3"], params["b3"], k // 2)) + a1 + a2
    return a3


# ------------------------------------- test -------------------------------------
def _run_case(key, N, in_ch, out_ch, k, H1, W1, H2, W2, row_tile):
    ks = jax.random.split(key, 10)
    x1 = jax.random.normal(ks[0], (N, in_ch, H1, W1), jnp.float32)
    x2 = jax.random.normal(ks[1], (N, in_ch // 2, H2, W2), jnp.float32)
    params = {
        "up_w": 0.1 * jax.random.normal(ks[2], (in_ch, in_ch // 2, 2, 2), jnp.float32),
        "up_b": 0.1 * jax.random.normal(ks[3], (in_ch // 2,), jnp.float32),
        "w1": 0.1 * jax.random.normal(ks[4], (out_ch, in_ch, k, k), jnp.float32),
        "b1": 0.1 * jax.random.normal(ks[5], (out_ch,), jnp.float32),
        "w2": 0.1 * jax.random.normal(ks[6], (out_ch, out_ch, 1, 1), jnp.float32),
        "b2": 0.1 * jax.random.normal(ks[7], (out_ch,), jnp.float32),
        "w3": 0.1 * jax.random.normal(ks[8], (out_ch, out_ch, k, k), jnp.float32),
        "b3": 0.1 * jax.random.normal(ks[9], (out_ch,), jnp.float32),
    }

    ref32 = ref_forward(x1, x2, params, k, compute_dtype=jnp.float32)
    ref_bf = ref_forward(x1, x2, params, k, compute_dtype=jnp.bfloat16)

    # bf16-operand / f32-accumulate kernel (production path).
    out = jax.jit(functools.partial(up_forward, k=k, row_tile=row_tile))(x1, x2, params)
    out = jax.block_until_ready(out)
    assert out.shape == (N, out_ch, H2, W2), out.shape
    assert jnp.allclose(out, ref_bf, rtol=1e-2, atol=1e-2), \
        float(jnp.max(jnp.abs(out - ref_bf)))
    assert jnp.allclose(out, ref32, rtol=1e-1, atol=1e-1), \
        float(jnp.max(jnp.abs(out - ref32)))

    # f32 path: same structure, full-precision operands (tight structural check).
    out32 = jax.jit(functools.partial(up_forward, k=k, row_tile=row_tile,
                                      compute_dtype=jnp.float32))(x1, x2, params)
    out32 = jax.block_until_ready(out32)
    assert jnp.allclose(out32, ref32, rtol=1e-2, atol=1e-2), \
        float(jnp.max(jnp.abs(out32 - ref32)))


if __name__ == "__main__":
    key = jax.random.PRNGKey(0)
    k1, k2 = jax.random.split(key)
    # x1 upsamples exactly onto x2 (diff = 0); 4 row tiles exercise first/middle/last.
    _run_case(k1, N=2, in_ch=8, out_ch=4, k=3, H1=8, W1=8, H2=16, W2=16, row_tile=4)
    # x2 taller than the upsampled x1 (diffY = 2): exercises the diff-pad placement.
    _run_case(k2, N=1, in_ch=8, out_ch=4, k=3, H1=8, W1=8, H2=18, W2=16, row_tile=6)
    print("KERNEL_OK")
</pallas_src>

<mosaic_0001>
module attributes {stable_mosaic.version = 11 : i64} {
  func.func @_up_kernel(%arg0: i32, %arg1: i32, %arg2: memref<1x8x8x8xbf16, #tpu.memory_space<vmem>>, %arg3: memref<1x16x16x4xbf16, #tpu.memory_space<vmem>>, %arg4: memref<8x16xbf16, #tpu.memory_space<vmem>>, %arg5: memref<1x16xf32, #tpu.memory_space<vmem>>, %arg6: memref<9x8x4xbf16, #tpu.memory_space<vmem>>, %arg7: memref<1x4xf32, #tpu.memory_space<vmem>>, %arg8: memref<4x4xbf16, #tpu.memory_space<vmem>>, %arg9: memref<1x4xf32, #tpu.memory_space<vmem>>, %arg10: memref<9x4x4xbf16, #tpu.memory_space<vmem>>, %arg11: memref<1x4xf32, #tpu.memory_space<vmem>>, %arg12: memref<1x4x16x4xf32, #tpu.memory_space<vmem>>, %arg13: memref<20x18x4xbf16, #tpu.memory_space<vmem>>, %arg14: memref<20x18x4xbf16, #tpu.memory_space<vmem>>, %arg15: memref<6x18x4xbf16, #tpu.memory_space<vmem>>) attributes {dimension_semantics = [#tpu.dimension_semantics<parallel>, #tpu.dimension_semantics<arbitrary>], iteration_bounds = array<i64: 2, 4>, scalar_prefetch = 0 : i64, scratch_operands = 3 : i64, tpu.core_type = #tpu.core_type<tc>, window_params = [{transform_indices = @transform_0, window_bounds = array<i64: 1, 8, 8, 8>}, {transform_indices = @transform_1, window_bounds = array<i64: 1, 16, 16, 4>}, {pipeline_mode = #tpu.pipeline_mode<synchronous>, transform_indices = @transform_2, window_bounds = array<i64: 8, 16>}, {pipeline_mode = #tpu.pipeline_mode<synchronous>, transform_indices = @transform_3, window_bounds = array<i64: 1, 16>}, {pipeline_mode = #tpu.pipeline_mode<synchronous>, transform_indices = @transform_4, window_bounds = array<i64: 9, 8, 4>}, {pipeline_mode = #tpu.pipeline_mode<synchronous>, transform_indices = @transform_5, window_bounds = array<i64: 1, 4>}, {pipeline_mode = #tpu.pipeline_mode<synchronous>, transform_indices = @transform_6, window_bounds = array<i64: 4, 4>}, {pipeline_mode = #tpu.pipeline_mode<synchronous>, transform_indices = @transform_7, window_bounds = array<i64: 1, 4>}, {pipeline_mode = #tpu.pipeline_mode<synchronous>, transform_indices = @transform_8, window_bounds = array<i64: 9, 4, 4>}, {pipeline_mode = #tpu.pipeline_mode<synchronous>, transform_indices = @transform_9, window_bounds = array<i64: 1, 4>}, {transform_indices = @transform_10, window_bounds = array<i64: 1, 4, 16, 4>}]} {
    %c0_i32 = arith.constant 0 : i32
    %0 = arith.cmpi eq, %arg1, %c0_i32 : i32
    %1 = arith.extui %0 : i1 to i32
    %c0_i32_0 = arith.constant 0 : i32
    %2 = arith.cmpi ne, %1, %c0_i32_0 : i32
    scf.if %2 {
      %cst_121 = arith.constant 0.000000e+00 : bf16
      %226 = vector.broadcast %cst_121 : bf16 to vector<2x18x4xbf16>
      %c0_122 = arith.constant 0 : index
      %c0_123 = arith.constant 0 : index
      %c0_124 = arith.constant 0 : index
      %227 = vector.load %arg13[%c0_122, %c0_123, %c0_124] : memref<20x18x4xbf16, #tpu.memory_space<vmem>>, vector<2x18x4xbf16>
      tpu.vector_store %arg13[%c0_122, %c0_123, %c0_124], %226 {strides = array<i32>} : memref<20x18x4xbf16, #tpu.memory_space<vmem>>, vector<2x18x4xbf16>,
      %cst_125 = arith.constant 0.000000e+00 : bf16
      %228 = vector.broadcast %cst_125 : bf16 to vector<2x18x4xbf16>
      %c18 = arith.constant 18 : index
      %c0_126 = arith.constant 0 : index
      %c0_127 = arith.constant 0 : index
      %229 = vector.load %arg13[%c18, %c0_126, %c0_127] : memref<20x18x4xbf16, #tpu.memory_space<vmem>>, vector<2x18x4xbf16>
      tpu.vector_store %arg13[%c18, %c0_126, %c0_127], %228 {strides = array<i32>} : memref<20x18x4xbf16, #tpu.memory_space<vmem>>, vector<2x18x4xbf16>,
      %cst_128 = arith.constant 0.000000e+00 : bf16
      %230 = vector.broadcast %cst_128 : bf16 to vector<16x1x4xbf16>
      %c2_129 = arith.constant 2 : index
      %c0_130 = arith.constant 0 : index
      %c0_131 = arith.constant 0 : index
      %231 = vector.load %arg13[%c2_129, %c0_130, %c0_131] : memref<20x18x4xbf16, #tpu.memory_space<vmem>>, vector<16x1x4xbf16>
      tpu.vector_store %arg13[%c2_129, %c0_130, %c0_131], %230 {strides = array<i32>} : memref<20x18x4xbf16, #tpu.memory_space<vmem>>, vector<16x1x4xbf16>,
      %cst_132 = arith.constant 0.000000e+00 : bf16
      %232 = vector.broadcast %cst_132 : bf16 to vector<16x1x4xbf16>
      %c2_133 = arith.constant 2 : index
      %c17 = arith.constant 17 : index
      %c0_134 = arith.constant 0 : index
      %233 = vector.load %arg13[%c2_133, %c17, %c0_134] : memref<20x18x4xbf16, #tpu.memory_space<vmem>>, vector<16x1x4xbf16>
      tpu.vector_store %arg13[%c2_133, %c17, %c0_134], %232 {strides = array<i32>} : memref<20x18x4xbf16, #tpu.memory_space<vmem>>, vector<16x1x4xbf16>,
      %cst_135 = arith.constant 0.000000e+00 : bf16
      %234 = vector.broadcast %cst_135 : bf16 to vector<2x18x4xbf16>
      %c0_136 = arith.constant 0 : index
      %c0_137 = arith.constant 0 : index
      %c0_138 = arith.constant 0 : index
      %235 = vector.load %arg14[%c0_136, %c0_137, %c0_138] : memref<20x18x4xbf16, #tpu.memory_space<vmem>>, vector<2x18x4xbf16>
      tpu.vector_store %arg14[%c0_136, %c0_137, %c0_138], %234 {strides = array<i32>} : memref<20x18x4xbf16, #tpu.memory_space<vmem>>, vector<2x18x4xbf16>,
      %cst_139 = arith.constant 0.000000e+00 : bf16
      %236 = vector.broadcast %cst_139 : bf16 to vector<2x18x4xbf16>
      %c18_140 = arith.constant 18 : index
      %c0_141 = arith.constant 0 : index
      %c0_142 = arith.constant 0 : index
      %237 = vector.load %arg14[%c18_140, %c0_141, %c0_142] : memref<20x18x4xbf16, #tpu.memory_space<vmem>>, vector<2x18x4xbf16>
      tpu.vector_store %arg14[%c18_140, %c0_141, %c0_142], %236 {strides = array<i32>} : memref<20x18x4xbf16, #tpu.memory_space<vmem>>, vector<2x18x4xbf16>,
      %cst_143 = arith.constant 0.000000e+00 : bf16
      %238 = vector.broadcast %cst_143 : bf16 to vector<16x1x4xbf16>
      %c2_144 = arith.constant 2 : index
      %c0_145 = arith.constant 0 : index
      %c0_146 = arith.constant 0 : index
      %239 = vector.load %arg14[%c2_144, %c0_145, %c0_146] : memref<20x18x4xbf16, #tpu.memory_space<vmem>>, vector<16x1x4xbf16>
      tpu.vector_store %arg14[%c2_144, %c0_145, %c0_146], %238 {strides = array<i32>} : memref<20x18x4xbf16, #tpu.memory_space<vmem>>, vector<16x1x4xbf16>,
      %cst_147 = arith.constant 0.000000e+00 : bf16
      %240 = vector.broadcast %cst_147 : bf16 to vector<16x1x4xbf16>
      %c2_148 = arith.constant 2 : index
      %c17_149 = arith.constant 17 : index
      %c0_150 = arith.constant 0 : index
      %241 = vector.load %arg14[%c2_148, %c17_149, %c0_150] : memref<20x18x4xbf16, #tpu.memory_space<vmem>>, vector<16x1x4xbf16>
      tpu.vector_store %arg14[%c2_148, %c17_149, %c0_150], %240 {strides = array<i32>} : memref<20x18x4xbf16, #tpu.memory_space<vmem>>, vector<16x1x4xbf16>,
      %cst_151 = arith.constant 0.000000e+00 : bf16
      %242 = vector.broadcast %cst_151 : bf16 to vector<6x1x4xbf16>
      %c0_152 = arith.constant 0 : index
      %c0_153 = arith.constant 0 : index
      %c0_154 = arith.constant 0 : index
      %243 = vector.load %arg15[%c0_152, %c0_153, %c0_154] : memref<6x18x4xbf16, #tpu.memory_space<vmem>>, vector<6x1x4xbf16>
      tpu.vector_store %arg15[%c0_152, %c0_153, %c0_154], %242 {strides = array<i32>} : memref<6x18x4xbf16, #tpu.memory_space<vmem>>, vector<6x1x4xbf16>,
      %cst_155 = arith.constant 0.000000e+00 : bf16
      %244 = vector.broadcast %cst_155 : bf16 to vector<6x1x4xbf16>
      %c0_156 = arith.constant 0 : index
      %c17_157 = arith.constant 17 : index
      %c0_158 = arith.constant 0 : index
      %245 = vector.load %arg15[%c0_156, %c17_157, %c0_158] : memref<6x18x4xbf16, #tpu.memory_space<vmem>>, vector<6x1x4xbf16>
      tpu.vector_store %arg15[%c0_156, %c17_157, %c0_158], %244 {strides = array<i32>} : memref<6x18x4xbf16, #tpu.memory_space<vmem>>, vector<6x1x4xbf16>,
      %c0_159 = arith.constant 0 : index
      %c0_160 = arith.constant 0 : index
      %c0_161 = arith.constant 0 : index
      %c0_162 = arith.constant 0 : index
      %246 = vector.load %arg2[%c0_159, %c0_160, %c0_161, %c0_162] : memref<1x8x8x8xbf16, #tpu.memory_space<vmem>>, vector<1x8x8x8xbf16>
      %247 = vector.shape_cast %246 : vector<1x8x8x8xbf16> to vector<8x8x8xbf16>
      %248 = vector.shape_cast %247 : vector<8x8x8xbf16> to vector<64x8xbf16>
      %c0_163 = arith.constant 0 : index
      %c0_164 = arith.constant 0 : index
      %249 = vector.load %arg4[%c0_163, %c0_164] : memref<8x16xbf16, #tpu.memory_space<vmem>>, vector<8x16xbf16>
      %cst_165 = arith.constant dense<0.000000e+00> : vector<64x16xf32>
      %250 = tpu.matmul %248, %249, %cst_165 {dimension_numbers = #tpu.dot_dimension_numbers<[1], [0], [0], [1], [0, 0, 1, 1], [], []>} : vector<64x8xbf16>, vector<8x16xbf16>, vector<64x16xf32> -> vector<64x16xf32>
      %c0_166 = arith.constant 0 : index
      %c0_167 = arith.constant 0 : index
      %251 = vector.load %arg5[%c0_166, %c0_167] : memref<1x16xf32, #tpu.memory_space<vmem>>, vector<1x16xf32>
      %252 = vector.broadcast %251 : vector<1x16xf32> to vector<64x16xf32>
      %253 = arith.addf %250, %252 : vector<64x16xf32>
      %254 = vector.extract_strided_slice %253 {offsets = [0, 0], sizes = [64, 4], strides = [1, 1]} : vector<64x16xf32> to vector<64x4xf32>
      %255 = vector.shape_cast %254 : vector<64x4xf32> to vector<8x8x4xf32>
      %256 = vector.extract_strided_slice %253 {offsets = [0, 4], sizes = [64, 4], strides = [1, 1]} : vector<64x16xf32> to vector<64x4xf32>
      %257 = vector.shape_cast %256 : vector<64x4xf32> to vector<8x8x4xf32>
      %258 = vector.shape_cast %255 : vector<8x8x4xf32> to vector<8x8x1x4xf32>
      %259 = vector.shape_cast %257 : vector<8x8x4xf32> to vector<8x8x1x4xf32>
      %260 = tpu.concatenate %258, %259 in 2 : vector<8x8x1x4xf32>, vector<8x8x1x4xf32> -> vector<8x8x2x4xf32>
      %261 = vector.shape_cast %260 : vector<8x8x2x4xf32> to vector<8x16x4xf32>
      %262 = vector.extract_strided_slice %253 {offsets = [0, 8], sizes = [64, 4], strides = [1, 1]} : vector<64x16xf32> to vector<64x4xf32>
      %263 = vector.shape_cast %262 : vector<64x4xf32> to vector<8x8x4xf32>
      %264 = vector.extract_strided_slice %253 {offsets = [0, 12], sizes = [64, 4], strides = [1, 1]} : vector<64x16xf32> to vector<64x4xf32>
      %265 = vector.shape_cast %264 : vector<64x4xf32> to vector<8x8x4xf32>
      %266 = vector.shape_cast %263 : vector<8x8x4xf32> to vector<8x8x1x4xf32>
      %267 = vector.shape_cast %265 : vector<8x8x4xf32> to vector<8x8x1x4xf32>
      %268 = tpu.concatenate %266, %267 in 2 : vector<8x8x1x4xf32>, vector<8x8x1x4xf32> -> vector<8x8x2x4xf32>
      %269 = vector.shape_cast %268 : vector<8x8x2x4xf32> to vector<8x16x4xf32>
      %270 = vector.shape_cast %261 : vector<8x16x4xf32> to vector<8x1x16x4xf32>
      %271 = vector.shape_cast %269 : vector<8x16x4xf32> to vector<8x1x16x4xf32>
      %272 = tpu.concatenate %270, %271 in 1 : vector<8x1x16x4xf32>, vector<8x1x16x4xf32> -> vector<8x2x16x4xf32>
      %273 = vector.shape_cast %272 : vector<8x2x16x4xf32> to vector<16x16x4xf32>
      %274 = arith.truncf %273 : vector<16x16x4xf32> to vector<16x16x4xbf16>
      %c2_168 = arith.constant 2 : index
      %c1_169 = arith.constant 1 : index
      %c0_170 = arith.constant 0 : index
      %275 = vector.load %arg14[%c2_168, %c1_169, %c0_170] : memref<20x18x4xbf16, #tpu.memory_space<vmem>>, vector<16x16x4xbf16>
      tpu.vector_store %arg14[%c2_168, %c1_169, %c0_170], %274 {strides = array<i32>} : memref<20x18x4xbf16, #tpu.memory_space<vmem>>, vector<16x16x4xbf16>,
      %c0_171 = arith.constant 0 : index
      %c0_172 = arith.constant 0 : index
      %c0_173 = arith.constant 0 : index
      %c0_174 = arith.constant 0 : index
      %276 = vector.load %arg3[%c0_171, %c0_172, %c0_173, %c0_174] : memref<1x16x16x4xbf16, #tpu.memory_space<vmem>>, vector<1x16x16x4xbf16>
      %277 = vector.shape_cast %276 : vector<1x16x16x4xbf16> to vector<16x16x4xbf16>
      %c2_175 = arith.constant 2 : index
      %c1_176 = arith.constant 1 : index
      %c0_177 = arith.constant 0 : index
      %278 = vector.load %arg13[%c2_175, %c1_176, %c0_177] : memref<20x18x4xbf16, #tpu.memory_space<vmem>>, vector<16x16x4xbf16>
      tpu.vector_store %arg13[%c2_175, %c1_176, %c0_177], %277 {strides = array<i32>} : memref<20x18x4xbf16, #tpu.memory_space<vmem>>, vector<16x16x4xbf16>,
    } else {
    }
    %c4_i32 = arith.constant 4 : i32
    %3 = arith.muli %arg1, %c4_i32 : i32
    %4 = tpu.assume_multiple %3, 4 : i32
    %cst = arith.constant 0.000000e+00 : f32
    %5 = vector.broadcast %cst : f32 to vector<96x4xf32>
    %c0_i32_1 = arith.constant 0 : i32
    %6 = arith.addi %4, %c0_i32_1 : i32
    %7 = arith.index_cast %6 : i32 to index
    %c0 = arith.constant 0 : index
    %c0_2 = arith.constant 0 : index
    %8 = vector.load %arg13[%7, %c0, %c0_2] : memref<20x18x4xbf16, #tpu.memory_space<vmem>>, vector<6x18x4xbf16>
    %c0_i32_3 = arith.constant 0 : i32
    %9 = arith.addi %4, %c0_i32_3 : i32
    %10 = arith.index_cast %9 : i32 to index
    %c0_4 = arith.constant 0 : index
    %c0_5 = arith.constant 0 : index
    %11 = vector.load %arg14[%10, %c0_4, %c0_5] : memref<20x18x4xbf16, #tpu.memory_space<vmem>>, vector<6x18x4xbf16>
    %c0_6 = arith.constant 0 : index
    %c0_7 = arith.constant 0 : index
    %c0_8 = arith.constant 0 : index
    %12 = vector.load %arg6[%c0_6, %c0_7, %c0_8] : memref<9x8x4xbf16, #tpu.memory_space<vmem>>, vector<1x8x4xbf16>
    %13 = vector.shape_cast %12 : vector<1x8x4xbf16> to vector<8x4xbf16>
    %14 = vector.extract_strided_slice %8 {offsets = [0, 0, 0], sizes = [6, 16, 4], strides = [1, 1, 1]} : vector<6x18x4xbf16> to vector<6x16x4xbf16>
    %15 = vector.shape_cast %14 : vector<6x16x4xbf16> to vector<96x4xbf16>
    %16 = vector.extract_strided_slice %13 {offsets = [0, 0], sizes = [4, 4], strides = [1, 1]} : vector<8x4xbf16> to vector<4x4xbf16>
    %cst_9 = arith.constant dense<0.000000e+00> : vector<96x4xf32>
    %17 = tpu.matmul %15, %16, %cst_9 {dimension_numbers = #tpu.dot_dimension_numbers<[1], [0], [0], [1], [0, 0, 1, 1], [], []>} : vector<96x4xbf16>, vector<4x4xbf16>, vector<96x4xf32> -> vector<96x4xf32>
    %18 = arith.addf %5, %17 : vector<96x4xf32>
    %19 = vector.extract_strided_slice %11 {offsets = [0, 0, 0], sizes = [6, 16, 4], strides = [1, 1, 1]} : vector<6x18x4xbf16> to vector<6x16x4xbf16>
    %20 = vector.shape_cast %19 : vector<6x16x4xbf16> to vector<96x4xbf16>
    %21 = vector.extract_strided_slice %13 {offsets = [4, 0], sizes = [4, 4], strides = [1, 1]} : vector<8x4xbf16> to vector<4x4xbf16>
    %cst_10 = arith.constant dense<0.000000e+00> : vector<96x4xf32>
    %22 = tpu.matmul %20, %21, %cst_10 {dimension_numbers = #tpu.dot_dimension_numbers<[1], [0], [0], [1], [0, 0, 1, 1], [], []>} : vector<96x4xbf16>, vector<4x4xbf16>, vector<96x4xf32> -> vector<96x4xf32>
    %23 = arith.addf %18, %22 : vector<96x4xf32>
    %c1 = arith.constant 1 : index
    %c0_11 = arith.constant 0 : index
    %c0_12 = arith.constant 0 : index
    %24 = vector.load %arg6[%c1, %c0_11, %c0_12] : memref<9x8x4xbf16, #tpu.memory_space<vmem>>, vector<1x8x4xbf16>
    %25 = vector.shape_cast %24 : vector<1x8x4xbf16> to vector<8x4xbf16>
    %26 = vector.extract_strided_slice %8 {offsets = [0, 1, 0], sizes = [6, 16, 4], strides = [1, 1, 1]} : vector<6x18x4xbf16> to vector<6x16x4xbf16>
    %27 = vector.shape_cast %26 : vector<6x16x4xbf16> to vector<96x4xbf16>
    %28 = vector.extract_strided_slice %25 {offsets = [0, 0], sizes = [4, 4], strides = [1, 1]} : vector<8x4xbf16> to vector<4x4xbf16>
    %cst_13 = arith.constant dense<0.000000e+00> : vector<96x4xf32>
    %29 = tpu.matmul %27, %28, %cst_13 {dimension_numbers = #tpu.dot_dimension_numbers<[1], [0], [0], [1], [0, 0, 1, 1], [], []>} : vector<96x4xbf16>, vector<4x4xbf16>, vector<96x4xf32> -> vector<96x4xf32>
    %30 = arith.addf %23, %29 : vector<96x4xf32>
    %31 = vector.extract_strided_slice %11 {offsets = [0, 1, 0], sizes = [6, 16, 4], strides = [1, 1, 1]} : vector<6x18x4xbf16> to vector<6x16x4xbf16>
    %32 = vector.shape_cast %31 : vector<6x16x4xbf16> to vector<96x4xbf16>
    %33 = vector.extract_strided_slice %25 {offsets = [4, 0], sizes = [4, 4], strides = [1, 1]} : vector<8x4xbf16> to vector<4x4xbf16>
    %cst_14 = arith.constant dense<0.000000e+00> : vector<96x4xf32>
    %34 = tpu.matmul %32, %33, %cst_14 {dimension_numbers = #tpu.dot_dimension_numbers<[1], [0], [0], [1], [0, 0, 1, 1], [], []>} : vector<96x4xbf16>, vector<4x4xbf16>, vector<96x4xf32> -> vector<96x4xf32>
    %35 = arith.addf %30, %34 : vector<96x4xf32>
    %c2 = arith.constant 2 : index
    %c0_15 = arith.constant 0 : index
    %c0_16 = arith.constant 0 : index
    %36 = vector.load %arg6[%c2, %c0_15, %c0_16] : memref<9x8x4xbf16, #tpu.memory_space<vmem>>, vector<1x8x4xbf16>
    %37 = vector.shape_cast %36 : vector<1x8x4xbf16> to vector<8x4xbf16>
    %38 = vector.extract_strided_slice %8 {offsets = [0, 2, 0], sizes = [6, 16, 4], strides = [1, 1, 1]} : vector<6x18x4xbf16> to vector<6x16x4xbf16>
    %39 = vector.shape_cast %38 : vector<6x16x4xbf16> to vector<96x4xbf16>
    %40 = vector.extract_strided_slice %37 {offsets = [0, 0], sizes = [4, 4], strides = [1, 1]} : vector<8x4xbf16> to vector<4x4xbf16>
    %cst_17 = arith.constant dense<0.000000e+00> : vector<96x4xf32>
    %41 = tpu.matmul %39, %40, %cst_17 {dimension_numbers = #tpu.dot_dimension_numbers<[1], [0], [0], [1], [0, 0, 1, 1], [], []>} : vector<96x4xbf16>, vector<4x4xbf16>, vector<96x4xf32> -> vector<96x4xf32>
    %42 = arith.addf %35, %41 : vector<96x4xf32>
    %43 = vector.extract_strided_slice %11 {offsets = [0, 2, 0], sizes = [6, 16, 4], strides = [1, 1, 1]} : vector<6x18x4xbf16> to vector<6x16x4xbf16>
    %44 = vector.shape_cast %43 : vector<6x16x4xbf16> to vector<96x4xbf16>
    %45 = vector.extract_strided_slice %37 {offsets = [4, 0], sizes = [4, 4], strides = [1, 1]} : vector<8x4xbf16> to vector<4x4xbf16>
    %cst_18 = arith.constant dense<0.000000e+00> : vector<96x4xf32>
    %46 = tpu.matmul %44, %45, %cst_18 {dimension_numbers = #tpu.dot_dimension_numbers<[1], [0], [0], [1], [0, 0, 1, 1], [], []>} : vector<96x4xbf16>, vector<4x4xbf16>, vector<96x4xf32> -> vector<96x4xf32>
    %47 = arith.addf %42, %46 : vector<96x4xf32>
    %c1_i32 = arith.constant 1 : i32
    %48 = arith.addi %4, %c1_i32 : i32
    %49 = arith.index_cast %48 : i32 to index
    %c0_19 = arith.constant 0 : index
    %c0_20 = arith.constant 0 : index
    %50 = vector.load %arg13[%49, %c0_19, %c0_20] : memref<20x18x4xbf16, #tpu.memory_space<vmem>>, vector<6x18x4xbf16>
    %c1_i32_21 = arith.constant 1 : i32
    %51 = arith.addi %4, %c1_i32_21 : i32
    %52 = arith.index_cast %51 : i32 to index
    %c0_22 = arith.constant 0 : index
    %c0_23 = arith.constant 0 : index
    %53 = vector.load %arg14[%52, %c0_22, %c0_23] : memref<20x18x4xbf16, #tpu.memory_space<vmem>>, vector<6x18x4xbf16>
    %c3 = arith.constant 3 : index
    %c0_24 = arith.constant 0 : index
    %c0_25 = arith.constant 0 : index
    %54 = vector.load %arg6[%c3, %c0_24, %c0_25] : memref<9x8x4xbf16, #tpu.memory_space<vmem>>, vector<1x8x4xbf16>
    %55 = vector.shape_cast %54 : vector<1x8x4xbf16> to vector<8x4xbf16>
    %56 = vector.extract_strided_slice %50 {offsets = [0, 0, 0], sizes = [6, 16, 4], strides = [1, 1, 1]} : vector<6x18x4xbf16> to vector<6x16x4xbf16>
    %57 = vector.shape_cast %56 : vector<6x16x4xbf16> to vector<96x4xbf16>
    %58 = vector.extract_strided_slice %55 {offsets = [0, 0], sizes = [4, 4], strides = [1, 1]} : vector<8x4xbf16> to vector<4x4xbf16>
    %cst_26 = arith.constant dense<0.000000e+00> : vector<96x4xf32>
    %59 = tpu.matmul %57, %58, %cst_26 {dimension_numbers = #tpu.dot_dimension_numbers<[1], [0], [0], [1], [0, 0, 1, 1], [], []>} : vector<96x4xbf16>, vector<4x4xbf16>, vector<96x4xf32> -> vector<96x4xf32>
    %60 = arith.addf %47, %59 : vector<96x4xf32>
    %61 = vector.extract_strided_slice %53 {offsets = [0, 0, 0], sizes = [6, 16, 4], strides = [1, 1, 1]} : vector<6x18x4xbf16> to vector<6x16x4xbf16>
    %62 = vector.shape_cast %61 : vector<6x16x4xbf16> to vector<96x4xbf16>
    %63 = vector.extract_strided_slice %55 {offsets = [4, 0], sizes = [4, 4], strides = [1, 1]} : vector<8x4xbf16> to vector<4x4xbf16>
    %cst_27 = arith.constant dense<0.000000e+00> : vector<96x4xf32>
    %64 = tpu.matmul %62, %63, %cst_27 {dimension_numbers = #tpu.dot_dimension_numbers<[1], [0], [0], [1], [0, 0, 1, 1], [], []>} : vector<96x4xbf16>, vector<4x4xbf16>, vector<96x4xf32> -> vector<96x4xf32>
    %65 = arith.addf %60, %64 : vector<96x4xf32>
    %c4 = arith.constant 4 : index
    %c0_28 = arith.constant 0 : index
    %c0_29 = arith.constant 0 : index
    %66 = vector.load %arg6[%c4, %c0_28, %c0_29] : memref<9x8x4xbf16, #tpu.memory_space<vmem>>, vector<1x8x4xbf16>
    %67 = vector.shape_cast %66 : vector<1x8x4xbf16> to vector<8x4xbf16>
    %68 = vector.extract_strided_slice %50 {offsets = [0, 1, 0], sizes = [6, 16, 4], strides = [1, 1, 1]} : vector<6x18x4xbf16> to vector<6x16x4xbf16>
    %69 = vector.shape_cast %68 : vector<6x16x4xbf16> to vector<96x4xbf16>
    %70 = vector.extract_strided_slice %67 {offsets = [0, 0], sizes = [4, 4], strides = [1, 1]} : vector<8x4xbf16> to vector<4x4xbf16>
    %cst_30 = arith.constant dense<0.000000e+00> : vector<96x4xf32>
    %71 = tpu.matmul %69, %70, %cst_30 {dimension_numbers = #tpu.dot_dimension_numbers<[1], [0], [0], [1], [0, 0, 1, 1], [], []>} : vector<96x4xbf16>, vector<4x4xbf16>, vector<96x4xf32> -> vector<96x4xf32>
    %72 = arith.addf %65, %71 : vector<96x4xf32>
    %73 = vector.extract_strided_slice %53 {offsets = [0, 1, 0], sizes = [6, 16, 4], strides = [1, 1, 1]} : vector<6x18x4xbf16> to vector<6x16x4xbf16>
    %74 = vector.shape_cast %73 : vector<6x16x4xbf16> to vector<96x4xbf16>
    %75 = vector.extract_strided_slice %67 {offsets = [4, 0], sizes = [4, 4], strides = [1, 1]} : vector<8x4xbf16> to vector<4x4xbf16>
    %cst_31 = arith.constant dense<0.000000e+00> : vector<96x4xf32>
    %76 = tpu.matmul %74, %75, %cst_31 {dimension_numbers = #tpu.dot_dimension_numbers<[1], [0], [0], [1], [0, 0, 1, 1], [], []>} : vector<96x4xbf16>, vector<4x4xbf16>, vector<96x4xf32> -> vector<96x4xf32>
    %77 = arith.addf %72, %76 : vector<96x4xf32>
    %c5 = arith.constant 5 : index
    %c0_32 = arith.constant 0 : index
    %c0_33 = arith.constant 0 : index
    %78 = vector.load %arg6[%c5, %c0_32, %c0_33] : memref<9x8x4xbf16, #tpu.memory_space<vmem>>, vector<1x8x4xbf16>
    %79 = vector.shape_cast %78 : vector<1x8x4xbf16> to vector<8x4xbf16>
    %80 = vector.extract_strided_slice %50 {offsets = [0, 2, 0], sizes = [6, 16, 4], strides = [1, 1, 1]} : vector<6x18x4xbf16> to vector<6x16x4xbf16>
    %81 = vector.shape_cast %80 : vector<6x16x4xbf16> to vector<96x4xbf16>
    %82 = vector.extract_strided_slice %79 {offsets = [0, 0], sizes = [4, 4], strides = [1, 1]} : vector<8x4xbf16> to vector<4x4xbf16>
    %cst_34 = arith.constant dense<0.000000e+00> : vector<96x4xf32>
    %83 = tpu.matmul %81, %82, %cst_34 {dimension_numbers = #tpu.dot_dimension_numbers<[1], [0], [0], [1], [0, 0, 1, 1], [], []>} : vector<96x4xbf16>, vector<4x4xbf16>, vector<96x4xf32> -> vector<96x4xf32>
    %84 = arith.addf %77, %83 : vector<96x4xf32>
    %85 = vector.extract_strided_slice %53 {offsets = [0, 2, 0], sizes = [6, 16, 4], strides = [1, 1, 1]} : vector<6x18x4xbf16> to vector<6x16x4xbf16>
    %86 = vector.shape_cast %85 : vector<6x16x4xbf16> to vector<96x4xbf16>
    %87 = vector.extract_strided_slice %79 {offsets = [4, 0], sizes = [4, 4], strides = [1, 1]} : vector<8x4xbf16> to vector<4x4xbf16>
    %cst_35 = arith.constant dense<0.000000e+00> : vector<96x4xf32>
    %88 = tpu.matmul %86, %87, %cst_35 {dimension_numbers = #tpu.dot_dimension_numbers<[1], [0], [0], [1], [0, 0, 1, 1], [], []>} : vector<96x4xbf16>, vector<4x4xbf16>, vector<96x4xf32> -> vector<96x4xf32>
    %89 = arith.addf %84, %88 : vector<96x4xf32>
    %c2_i32 = arith.constant 2 : i32
    %90 = arith.addi %4, %c2_i32 : i32
    %91 = arith.index_cast %90 : i32 to index
    %c0_36 = arith.constant 0 : index
    %c0_37 = arith.constant 0 : index
    %92 = vector.load %arg13[%91, %c0_36, %c0_37] : memref<20x18x4xbf16, #tpu.memory_space<vmem>>, vector<6x18x4xbf16>
    %c2_i32_38 = arith.constant 2 : i32
    %93 = arith.addi %4, %c2_i32_38 : i32
    %94 = arith.index_cast %93 : i32 to index
    %c0_39 = arith.constant 0 : index
    %c0_40 = arith.constant 0 : index
    %95 = vector.load %arg14[%94, %c0_39, %c0_40] : memref<20x18x4xbf16, #tpu.memory_space<vmem>>, vector<6x18x4xbf16>
    %c6 = arith.constant 6 : index
    %c0_41 = arith.constant 0 : index
    %c0_42 = arith.constant 0 : index
    %96 = vector.load %arg6[%c6, %c0_41, %c0_42] : memref<9x8x4xbf16, #tpu.memory_space<vmem>>, vector<1x8x4xbf16>
    %97 = vector.shape_cast %96 : vector<1x8x4xbf16> to vector<8x4xbf16>
    %98 = vector.extract_strided_slice %92 {offsets = [0, 0, 0], sizes = [6, 16, 4], strides = [1, 1, 1]} : vector<6x18x4xbf16> to vector<6x16x4xbf16>
    %99 = vector.shape_cast %98 : vector<6x16x4xbf16> to vector<96x4xbf16>
    %100 = vector.extract_strided_slice %97 {offsets = [0, 0], sizes = [4, 4], strides = [1, 1]} : vector<8x4xbf16> to vector<4x4xbf16>
    %cst_43 = arith.constant dense<0.000000e+00> : vector<96x4xf32>
    %101 = tpu.matmul %99, %100, %cst_43 {dimension_numbers = #tpu.dot_dimension_numbers<[1], [0], [0], [1], [0, 0, 1, 1], [], []>} : vector<96x4xbf16>, vector<4x4xbf16>, vector<96x4xf32> -> vector<96x4xf32>
    %102 = arith.addf %89, %101 : vector<96x4xf32>
    %103 = vector.extract_strided_slice %95 {offsets = [0, 0, 0], sizes = [6, 16, 4], strides = [1, 1, 1]} : vector<6x18x4xbf16> to vector<6x16x4xbf16>
    %104 = vector.shape_cast %103 : vector<6x16x4xbf16> to vector<96x4xbf16>
    %105 = vector.extract_strided_slice %97 {offsets = [4, 0], sizes = [4, 4], strides = [1, 1]} : vector<8x4xbf16> to vector<4x4xbf16>
    %cst_44 = arith.constant dense<0.000000e+00> : vector<96x4xf32>
    %106 = tpu.matmul %104, %105, %cst_44 {dimension_numbers = #tpu.dot_dimension_numbers<[1], [0], [0], [1], [0, 0, 1, 1], [], []>} : vector<96x4xbf16>, vector<4x4xbf16>, vector<96x4xf32> -> vector<96x4xf32>
    %107 = arith.addf %102, %106 : vector<96x4xf32>
    %c7 = arith.constant 7 : index
    %c0_45 = arith.constant 0 : index
    %c0_46 = arith.constant 0 : index
    %108 = vector.load %arg6[%c7, %c0_45, %c0_46] : memref<9x8x4xbf16, #tpu.memory_space<vmem>>, vector<1x8x4xbf16>
    %109 = vector.shape_cast %108 : vector<1x8x4xbf16> to vector<8x4xbf16>
    %110 = vector.extract_strided_slice %92 {offsets = [0, 1, 0], sizes = [6, 16, 4], strides = [1, 1, 1]} : vector<6x18x4xbf16> to vector<6x16x4xbf16>
    %111 = vector.shape_cast %110 : vector<6x16x4xbf16> to vector<96x4xbf16>
    %112 = vector.extract_strided_slice %109 {offsets = [0, 0], sizes = [4, 4], strides = [1, 1]} : vector<8x4xbf16> to vector<4x4xbf16>
    %cst_47 = arith.constant dense<0.000000e+00> : vector<96x4xf32>
    %113 = tpu.matmul %111, %112, %cst_47 {dimension_numbers = #tpu.dot_dimension_numbers<[1], [0], [0], [1], [0, 0, 1, 1], [], []>} : vector<96x4xbf16>, vector<4x4xbf16>, vector<96x4xf32> -> vector<96x4xf32>
    %114 = arith.addf %107, %113 : vector<96x4xf32>
    %115 = vector.extract_strided_slice %95 {offsets = [0, 1, 0], sizes = [6, 16, 4], strides = [1, 1, 1]} : vector<6x18x4xbf16> to vector<6x16x4xbf16>
    %116 = vector.shape_cast %115 : vector<6x16x4xbf16> to vector<96x4xbf16>
    %117 = vector.extract_strided_slice %109 {offsets = [4, 0], sizes = [4, 4], strides = [1, 1]} : vector<8x4xbf16> to vector<4x4xbf16>
    %cst_48 = arith.constant dense<0.000000e+00> : vector<96x4xf32>
    %118 = tpu.matmul %116, %117, %cst_48 {dimension_numbers = #tpu.dot_dimension_numbers<[1], [0], [0], [1], [0, 0, 1, 1], [], []>} : vector<96x4xbf16>, vector<4x4xbf16>, vector<96x4xf32> -> vector<96x4xf32>
    %119 = arith.addf %114, %118 : vector<96x4xf32>
    %c8 = arith.constant 8 : index
    %c0_49 = arith.constant 0 : index
    %c0_50 = arith.constant 0 : index
    %120 = vector.load %arg6[%c8, %c0_49, %c0_50] : memref<9x8x4xbf16, #tpu.memory_space<vmem>>, vector<1x8x4xbf16>
    %121 = vector.shape_cast %120 : vector<1x8x4xbf16> to vector<8x4xbf16>
    %122 = vector.extract_strided_slice %92 {offsets = [0, 2, 0], sizes = [6, 16, 4], strides = [1, 1, 1]} : vector<6x18x4xbf16> to vector<6x16x4xbf16>
    %123 = vector.shape_cast %122 : vector<6x16x4xbf16> to vector<96x4xbf16>
    %124 = vector.extract_strided_slice %121 {offsets = [0, 0], sizes = [4, 4], strides = [1, 1]} : vector<8x4xbf16> to vector<4x4xbf16>
    %cst_51 = arith.constant dense<0.000000e+00> : vector<96x4xf32>
    %125 = tpu.matmul %123, %124, %cst_51 {dimension_numbers = #tpu.dot_dimension_numbers<[1], [0], [0], [1], [0, 0, 1, 1], [], []>} : vector<96x4xbf16>, vector<4x4xbf16>, vector<96x4xf32> -> vector<96x4xf32>
    %126 = arith.addf %119, %125 : vector<96x4xf32>
    %127 = vector.extract_strided_slice %95 {offsets = [0, 2, 0], sizes = [6, 16, 4], strides = [1, 1, 1]} : vector<6x18x4xbf16> to vector<6x16x4xbf16>
    %128 = vector.shape_cast %127 : vector<6x16x4xbf16> to vector<96x4xbf16>
    %129 = vector.extract_strided_slice %121 {offsets = [4, 0], sizes = [4, 4], strides = [1, 1]} : vector<8x4xbf16> to vector<4x4xbf16>
    %cst_52 = arith.constant dense<0.000000e+00> : vector<96x4xf32>
    %130 = tpu.matmul %128, %129, %cst_52 {dimension_numbers = #tpu.dot_dimension_numbers<[1], [0], [0], [1], [0, 0, 1, 1], [], []>} : vector<96x4xbf16>, vector<4x4xbf16>, vector<96x4xf32> -> vector<96x4xf32>
    %131 = arith.addf %126, %130 : vector<96x4xf32>
    %c0_53 = arith.constant 0 : index
    %c0_54 = arith.constant 0 : index
    %132 = vector.load %arg7[%c0_53, %c0_54] : memref<1x4xf32, #tpu.memory_space<vmem>>, vector<1x4xf32>
    %133 = vector.broadcast %132 : vector<1x4xf32> to vector<96x4xf32>
    %134 = arith.addf %131, %133 : vector<96x4xf32>
    %cst_55 = arith.constant 0.000000e+00 : f32
    %135 = vector.broadcast %cst_55 : f32 to vector<96x4xf32>
    %136 = arith.maximumf %134, %135 : vector<96x4xf32>
    %137 = arith.truncf %136 : vector<96x4xf32> to vector<96x4xbf16>
    %c0_56 = arith.constant 0 : index
    %c0_57 = arith.constant 0 : index
    %138 = vector.load %arg8[%c0_56, %c0_57] : memref<4x4xbf16, #tpu.memory_space<vmem>>, vector<4x4xbf16>
    %cst_58 = arith.constant dense<0.000000e+00> : vector<96x4xf32>
    %139 = tpu.matmul %137, %138, %cst_58 {dimension_numbers = #tpu.dot_dimension_numbers<[1], [0], [0], [1], [0, 0, 1, 1], [], []>} : vector<96x4xbf16>, vector<4x4xbf16>, vector<96x4xf32> -> vector<96x4xf32>
    %c0_59 = arith.constant 0 : index
    %c0_60 = arith.constant 0 : index
    %140 = vector.load %arg9[%c0_59, %c0_60] : memref<1x4xf32, #tpu.memory_space<vmem>>, vector<1x4xf32>
    %141 = vector.broadcast %140 : vector<1x4xf32> to vector<96x4xf32>
    %142 = arith.addf %139, %141 : vector<96x4xf32>
    %cst_61 = arith.constant 0.000000e+00 : f32
    %143 = vector.broadcast %cst_61 : f32 to vector<96x4xf32>
    %144 = arith.maximumf %142, %143 : vector<96x4xf32>
    %145 = arith.addf %144, %136 : vector<96x4xf32>
    %146 = vector.shape_cast %145 : vector<96x4xf32> to vector<6x16x4xf32>
    %147 = arith.truncf %146 : vector<6x16x4xf32> to vector<6x16x4xbf16>
    %c0_62 = arith.constant 0 : index
    %c1_63 = arith.constant 1 : index
    %c0_64 = arith.constant 0 : index
    %148 = vector.load %arg15[%c0_62, %c1_63, %c0_64] : memref<6x18x4xbf16, #tpu.memory_space<vmem>>, vector<6x16x4xbf16>
    tpu.vector_store %arg15[%c0_62, %c1_63, %c0_64], %147 {strides = array<i32>} : memref<6x18x4xbf16, #tpu.memory_space<vmem>>, vector<6x16x4xbf16>,
    %c0_i32_65 = arith.constant 0 : i32
    %149 = arith.cmpi eq, %arg1, %c0_i32_65 : i32
    %150 = arith.extui %149 : i1 to i32
    %c0_i32_66 = arith.constant 0 : i32
    %151 = arith.cmpi ne, %150, %c0_i32_66 : i32
    scf.if %151 {
      %cst_121 = arith.constant 0.000000e+00 : bf16
      %226 = vector.broadcast %cst_121 : bf16 to vector<1x18x4xbf16>
      %c0_122 = arith.constant 0 : index
      %c0_123 = arith.constant 0 : index
      %c0_124 = arith.constant 0 : index
      %227 = vector.load %arg15[%c0_122, %c0_123, %c0_124] : memref<6x18x4xbf16, #tpu.memory_space<vmem>>, vector<1x18x4xbf16>
      tpu.vector_store %arg15[%c0_122, %c0_123, %c0_124], %226 {strides = array<i32>} : memref<6x18x4xbf16, #tpu.memory_space<vmem>>, vector<1x18x4xbf16>,
    } else {
    }
    %c3_i32 = arith.constant 3 : i32
    %152 = arith.cmpi eq, %arg1, %c3_i32 : i32
    %153 = arith.extui %152 : i1 to i32
    %c0_i32_67 = arith.constant 0 : i32
    %154 = arith.cmpi ne, %153, %c0_i32_67 : i32
    scf.if %154 {
      %cst_121 = arith.constant 0.000000e+00 : bf16
      %226 = vector.broadcast %cst_121 : bf16 to vector<1x18x4xbf16>
      %c5_122 = arith.constant 5 : index
      %c0_123 = arith.constant 0 : index
      %c0_124 = arith.constant 0 : index
      %227 = vector.load %arg15[%c5_122, %c0_123, %c0_124] : memref<6x18x4xbf16, #tpu.memory_space<vmem>>, vector<1x18x4xbf16>
      tpu.vector_store %arg15[%c5_122, %c0_123, %c0_124], %226 {strides = array<i32>} : memref<6x18x4xbf16, #tpu.memory_space<vmem>>, vector<1x18x4xbf16>,
    } else {
    }
    %cst_68 = arith.constant 0.000000e+00 : f32
    %155 = vector.broadcast %cst_68 : f32 to vector<64x4xf32>
    %c0_69 = arith.constant 0 : index
    %c0_70 = arith.constant 0 : index
    %c0_71 = arith.constant 0 : index
    %156 = vector.load %arg15[%c0_69, %c0_70, %c0_71] : memref<6x18x4xbf16, #tpu.memory_space<vmem>>, vector<4x18x4xbf16>
    %157 = vector.extract_strided_slice %156 {offsets = [0, 0, 0], sizes = [4, 16, 4], strides = [1, 1, 1]} : vector<4x18x4xbf16> to vector<4x16x4xbf16>
    %158 = vector.shape_cast %157 : vector<4x16x4xbf16> to vector<64x4xbf16>
    %c0_72 = arith.constant 0 : index
    %c0_73 = arith.constant 0 : index
    %c0_74 = arith.constant 0 : index
    %159 = vector.load %arg10[%c0_72, %c0_73, %c0_74] : memref<9x4x4xbf16, #tpu.memory_space<vmem>>, vector<1x4x4xbf16>
    %160 = vector.shape_cast %159 : vector<1x4x4xbf16> to vector<4x4xbf16>
    %cst_75 = arith.constant dense<0.000000e+00> : vector<64x4xf32>
    %161 = tpu.matmul %158, %160, %cst_75 {dimension_numbers = #tpu.dot_dimension_numbers<[1], [0], [0], [1], [0, 0, 1, 1], [], []>} : vector<64x4xbf16>, vector<4x4xbf16>, vector<64x4xf32> -> vector<64x4xf32>
    %162 = arith.addf %155, %161 : vector<64x4xf32>
    %163 = vector.extract_strided_slice %156 {offsets = [0, 1, 0], sizes = [4, 16, 4], strides = [1, 1, 1]} : vector<4x18x4xbf16> to vector<4x16x4xbf16>
    %164 = vector.shape_cast %163 : vector<4x16x4xbf16> to vector<64x4xbf16>
    %c1_76 = arith.constant 1 : index
    %c0_77 = arith.constant 0 : index
    %c0_78 = arith.constant 0 : index
    %165 = vector.load %arg10[%c1_76, %c0_77, %c0_78] : memref<9x4x4xbf16, #tpu.memory_space<vmem>>, vector<1x4x4xbf16>
    %166 = vector.shape_cast %165 : vector<1x4x4xbf16> to vector<4x4xbf16>
    %cst_79 = arith.constant dense<0.000000e+00> : vector<64x4xf32>
    %167 = tpu.matmul %164, %166, %cst_79 {dimension_numbers = #tpu.dot_dimension_numbers<[1], [0], [0], [1], [0, 0, 1, 1], [], []>} : vector<64x4xbf16>, vector<4x4xbf16>, vector<64x4xf32> -> vector<64x4xf32>
    %168 = arith.addf %162, %167 : vector<64x4xf32>
    %169 = vector.extract_strided_slice %156 {offsets = [0, 2, 0], sizes = [4, 16, 4], strides = [1, 1, 1]} : vector<4x18x4xbf16> to vector<4x16x4xbf16>
    %170 = vector.shape_cast %169 : vector<4x16x4xbf16> to vector<64x4xbf16>
    %c2_80 = arith.constant 2 : index
    %c0_81 = arith.constant 0 : index
    %c0_82 = arith.constant 0 : index
    %171 = vector.load %arg10[%c2_80, %c0_81, %c0_82] : memref<9x4x4xbf16, #tpu.memory_space<vmem>>, vector<1x4x4xbf16>
    %172 = vector.shape_cast %171 : vector<1x4x4xbf16> to vector<4x4xbf16>
    %cst_83 = arith.constant dense<0.000000e+00> : vector<64x4xf32>
    %173 = tpu.matmul %170, %172, %cst_83 {dimension_numbers = #tpu.dot_dimension_numbers<[1], [0], [0], [1], [0, 0, 1, 1], [], []>} : vector<64x4xbf16>, vector<4x4xbf16>, vector<64x4xf32> -> vector<64x4xf32>
    %174 = arith.addf %168, %173 : vector<64x4xf32>
    %c1_84 = arith.constant 1 : index
    %c0_85 = arith.constant 0 : index
    %c0_86 = arith.constant 0 : index
    %175 = vector.load %arg15[%c1_84, %c0_85, %c0_86] : memref<6x18x4xbf16, #tpu.memory_space<vmem>>, vector<4x18x4xbf16>
    %176 = vector.extract_strided_slice %175 {offsets = [0, 0, 0], sizes = [4, 16, 4], strides = [1, 1, 1]} : vector<4x18x4xbf16> to vector<4x16x4xbf16>
    %177 = vector.shape_cast %176 : vector<4x16x4xbf16> to vector<64x4xbf16>
    %c3_87 = arith.constant 3 : index
    %c0_88 = arith.constant 0 : index
    %c0_89 = arith.constant 0 : index
    %178 = vector.load %arg10[%c3_87, %c0_88, %c0_89] : memref<9x4x4xbf16, #tpu.memory_space<vmem>>, vector<1x4x4xbf16>
    %179 = vector.shape_cast %178 : vector<1x4x4xbf16> to vector<4x4xbf16>
    %cst_90 = arith.constant dense<0.000000e+00> : vector<64x4xf32>
    %180 = tpu.matmul %177, %179, %cst_90 {dimension_numbers = #tpu.dot_dimension_numbers<[1], [0], [0], [1], [0, 0, 1, 1], [], []>} : vector<64x4xbf16>, vector<4x4xbf16>, vector<64x4xf32> -> vector<64x4xf32>
    %181 = arith.addf %174, %180 : vector<64x4xf32>
    %182 = vector.extract_strided_slice %175 {offsets = [0, 1, 0], sizes = [4, 16, 4], strides = [1, 1, 1]} : vector<4x18x4xbf16> to vector<4x16x4xbf16>
    %183 = vector.shape_cast %182 : vector<4x16x4xbf16> to vector<64x4xbf16>
    %c4_91 = arith.constant 4 : index
    %c0_92 = arith.constant 0 : index
    %c0_93 = arith.constant 0 : index
    %184 = vector.load %arg10[%c4_91, %c0_92, %c0_93] : memref<9x4x4xbf16, #tpu.memory_space<vmem>>, vector<1x4x4xbf16>
    %185 = vector.shape_cast %184 : vector<1x4x4xbf16> to vector<4x4xbf16>
    %cst_94 = arith.constant dense<0.000000e+00> : vector<64x4xf32>
    %186 = tpu.matmul %183, %185, %cst_94 {dimension_numbers = #tpu.dot_dimension_numbers<[1], [0], [0], [1], [0, 0, 1, 1], [], []>} : vector<64x4xbf16>, vector<4x4xbf16>, vector<64x4xf32> -> vector<64x4xf32>
    %187 = arith.addf %181, %186 : vector<64x4xf32>
    %188 = vector.extract_strided_slice %175 {offsets = [0, 2, 0], sizes = [4, 16, 4], strides = [1, 1, 1]} : vector<4x18x4xbf16> to vector<4x16x4xbf16>
    %189 = vector.shape_cast %188 : vector<4x16x4xbf16> to vector<64x4xbf16>
    %c5_95 = arith.constant 5 : index
    %c0_96 = arith.constant 0 : index
    %c0_97 = arith.constant 0 : index
    %190 = vector.load %arg10[%c5_95, %c0_96, %c0_97] : memref<9x4x4xbf16, #tpu.memory_space<vmem>>, vector<1x4x4xbf16>
    %191 = vector.shape_cast %190 : vector<1x4x4xbf16> to vector<4x4xbf16>
    %cst_98 = arith.constant dense<0.000000e+00> : vector<64x4xf32>
    %192 = tpu.matmul %189, %191, %cst_98 {dimension_numbers = #tpu.dot_dimension_numbers<[1], [0], [0], [1], [0, 0, 1, 1], [], []>} : vector<64x4xbf16>, vector<4x4xbf16>, vector<64x4xf32> -> vector<64x4xf32>
    %193 = arith.addf %187, %192 : vector<64x4xf32>
    %c2_99 = arith.constant 2 : index
    %c0_100 = arith.constant 0 : index
    %c0_101 = arith.constant 0 : index
    %194 = vector.load %arg15[%c2_99, %c0_100, %c0_101] : memref<6x18x4xbf16, #tpu.memory_space<vmem>>, vector<4x18x4xbf16>
    %195 = vector.extract_strided_slice %194 {offsets = [0, 0, 0], sizes = [4, 16, 4], strides = [1, 1, 1]} : vector<4x18x4xbf16> to vector<4x16x4xbf16>
    %196 = vector.shape_cast %195 : vector<4x16x4xbf16> to vector<64x4xbf16>
    %c6_102 = arith.constant 6 : index
    %c0_103 = arith.constant 0 : index
    %c0_104 = arith.constant 0 : index
    %197 = vector.load %arg10[%c6_102, %c0_103, %c0_104] : memref<9x4x4xbf16, #tpu.memory_space<vmem>>, vector<1x4x4xbf16>
    %198 = vector.shape_cast %197 : vector<1x4x4xbf16> to vector<4x4xbf16>
    %cst_105 = arith.constant dense<0.000000e+00> : vector<64x4xf32>
    %199 = tpu.matmul %196, %198, %cst_105 {dimension_numbers = #tpu.dot_dimension_numbers<[1], [0], [0], [1], [0, 0, 1, 1], [], []>} : vector<64x4xbf16>, vector<4x4xbf16>, vector<64x4xf32> -> vector<64x4xf32>
    %200 = arith.addf %193, %199 : vector<64x4xf32>
    %201 = vector.extract_strided_slice %194 {offsets = [0, 1, 0], sizes = [4, 16, 4], strides = [1, 1, 1]} : vector<4x18x4xbf16> to vector<4x16x4xbf16>
    %202 = vector.shape_cast %201 : vector<4x16x4xbf16> to vector<64x4xbf16>
    %c7_106 = arith.constant 7 : index
    %c0_107 = arith.constant 0 : index
    %c0_108 = arith.constant 0 : index
    %203 = vector.load %arg10[%c7_106, %c0_107, %c0_108] : memref<9x4x4xbf16, #tpu.memory_space<vmem>>, vector<1x4x4xbf16>
    %204 = vector.shape_cast %203 : vector<1x4x4xbf16> to vector<4x4xbf16>
    %cst_109 = arith.constant dense<0.000000e+00> : vector<64x4xf32>
    %205 = tpu.matmul %202, %204, %cst_109 {dimension_numbers = #tpu.dot_dimension_numbers<[1], [0], [0], [1], [0, 0, 1, 1], [], []>} : vector<64x4xbf16>, vector<4x4xbf16>, vector<64x4xf32> -> vector<64x4xf32>
    %206 = arith.addf %200, %205 : vector<64x4xf32>
    %207 = vector.extract_strided_slice %194 {offsets = [0, 2, 0], sizes = [4, 16, 4], strides = [1, 1, 1]} : vector<4x18x4xbf16> to vector<4x16x4xbf16>
    %208 = vector.shape_cast %207 : vector<4x16x4xbf16> to vector<64x4xbf16>
    %c8_110 = arith.constant 8 : index
    %c0_111 = arith.constant 0 : index
    %c0_112 = arith.constant 0 : index
    %209 = vector.load %arg10[%c8_110, %c0_111, %c0_112] : memref<9x4x4xbf16, #tpu.memory_space<vmem>>, vector<1x4x4xbf16>
    %210 = vector.shape_cast %209 : vector<1x4x4xbf16> to vector<4x4xbf16>
    %cst_113 = arith.constant dense<0.000000e+00> : vector<64x4xf32>
    %211 = tpu.matmul %208, %210, %cst_113 {dimension_numbers = #tpu.dot_dimension_numbers<[1], [0], [0], [1], [0, 0, 1, 1], [], []>} : vector<64x4xbf16>, vector<4x4xbf16>, vector<64x4xf32> -> vector<64x4xf32>
    %212 = arith.addf %206, %211 : vector<64x4xf32>
    %c0_114 = arith.constant 0 : index
    %c0_115 = arith.constant 0 : index
    %213 = vector.load %arg11[%c0_114, %c0_115] : memref<1x4xf32, #tpu.memory_space<vmem>>, vector<1x4xf32>
    %214 = vector.broadcast %213 : vector<1x4xf32> to vector<64x4xf32>
    %215 = arith.addf %212, %214 : vector<64x4xf32>
    %cst_116 = arith.constant 0.000000e+00 : f32
    %216 = vector.broadcast %cst_116 : f32 to vector<64x4xf32>
    %217 = arith.maximumf %215, %216 : vector<64x4xf32>
    %218 = vector.extract_strided_slice %136 {offsets = [16, 0], sizes = [64, 4], strides = [1, 1]} : vector<96x4xf32> to vector<64x4xf32>
    %219 = arith.addf %217, %218 : vector<64x4xf32>
    %220 = vector.extract_strided_slice %145 {offsets = [16, 0], sizes = [64, 4], strides = [1, 1]} : vector<96x4xf32> to vector<64x4xf32>
    %221 = arith.addf %219, %220 : vector<64x4xf32>
    %222 = vector.shape_cast %221 : vector<64x4xf32> to vector<4x16x4xf32>
    %c0_117 = arith.constant 0 : index
    %c0_118 = arith.constant 0 : index
    %c0_119 = arith.constant 0 : index
    %c0_120 = arith.constant 0 : index
    %223 = vector.load %arg12[%c0_117, %c0_118, %c0_119, %c0_120] : memref<1x4x16x4xf32, #tpu.memory_space<vmem>>, vector<1x4x16x4xf32>
    %224 = vector.shape_cast %223 : vector<1x4x16x4xf32> to vector<4x16x4xf32>
    %225 = vector.shape_cast %222 : vector<4x16x4xf32> to vector<1x4x16x4xf32>
    tpu.vector_store %arg12[%c0_117, %c0_118, %c0_119, %c0_120], %225 {strides = array<i32>} : memref<1x4x16x4xf32, #tpu.memory_space<vmem>>, vector<1x4x16x4xf32>,
    return
  }
  func.func @transform_0(%arg0: i32, %arg1: i32) -> (i32, i32, i32, i32) {
    %c0_i32 = arith.constant 0 : i32
    %c0_i32_0 = arith.constant 0 : i32
    %c0_i32_1 = arith.constant 0 : i32
    %c0_i32_2 = arith.constant 0 : i32
    return %arg0, %c0_i32, %c0_i32_0, %c0_i32_1 : i32, i32, i32, i32
  }
  func.func @transform_1(%arg0: i32, %arg1: i32) -> (i32, i32, i32, i32) {
    %c0_i32 = arith.constant 0 : i32
    %c0_i32_0 = arith.constant 0 : i32
    %c0_i32_1 = arith.constant 0 : i32
    %c0_i32_2 = arith.constant 0 : i32
    return %arg0, %c0_i32, %c0_i32_0, %c0_i32_1 : i32, i32, i32, i32
  }
  func.func @transform_2(%arg0: i32, %arg1: i32) -> (i32, i32) {
    %c0_i32 = arith.constant 0 : i32
    %c0_i32_0 = arith.constant 0 : i32
    %c0_i32_1 = arith.constant 0 : i32
    return %c0_i32, %c0_i32_0 : i32, i32
  }
  func.func @transform_3(%arg0: i32, %arg1: i32) -> (i32, i32) {
    %c0_i32 = arith.constant 0 : i32
    %c0_i32_0 = arith.constant 0 : i32
    %c0_i32_1 = arith.constant 0 : i32
    return %c0_i32, %c0_i32_0 : i32, i32
  }
  func.func @transform_4(%arg0: i32, %arg1: i32) -> (i32, i32, i32) {
    %c0_i32 = arith.constant 0 : i32
    %c0_i32_0 = arith.constant 0 : i32
    %c0_i32_1 = arith.constant 0 : i32
    %c0_i32_2 = arith.constant 0 : i32
    return %c0_i32, %c0_i32_0, %c0_i32_1 : i32, i32, i32
  }
  func.func @transform_5(%arg0: i32, %arg1: i32) -> (i32, i32) {
    %c0_i32 = arith.constant 0 : i32
    %c0_i32_0 = arith.constant 0 : i32
    %c0_i32_1 = arith.constant 0 : i32
    return %c0_i32, %c0_i32_0 : i32, i32
  }
  func.func @transform_6(%arg0: i32, %arg1: i32) -> (i32, i32) {
    %c0_i32 = arith.constant 0 : i32
    %c0_i32_0 = arith.constant 0 : i32
    %c0_i32_1 = arith.constant 0 : i32
    return %c0_i32, %c0_i32_0 : i32, i32
  }
  func.func @transform_7(%arg0: i32, %arg1: i32) -> (i32, i32) {
    %c0_i32 = arith.constant 0 : i32
    %c0_i32_0 = arith.constant 0 : i32
    %c0_i32_1 = arith.constant 0 : i32
    return %c0_i32, %c0_i32_0 : i32, i32
  }
  func.func @transform_8(%arg0: i32, %arg1: i32) -> (i32, i32, i32) {
    %c0_i32 = arith.constant 0 : i32
    %c0_i32_0 = arith.constant 0 : i32
    %c0_i32_1 = arith.constant 0 : i32
    %c0_i32_2 = arith.constant 0 : i32
    return %c0_i32, %c0_i32_0, %c0_i32_1 : i32, i32, i32
  }
  func.func @transform_9(%arg0: i32, %arg1: i32) -> (i32, i32) {
    %c0_i32 = arith.constant 0 : i32
    %c0_i32_0 = arith.constant 0 : i32
    %c0_i32_1 = arith.constant 0 : i32
    return %c0_i32, %c0_i32_0 : i32, i32
  }
  func.func @transform_10(%arg0: i32, %arg1: i32) -> (i32, i32, i32, i32) {
    %c0_i32 = arith.constant 0 : i32
    %c0_i32_0 = arith.constant 0 : i32
    %c0_i32_1 = arith.constant 0 : i32
    return %arg0, %arg1, %c0_i32, %c0_i32_0 : i32, i32, i32, i32
  }
}

</mosaic_0001>

<bundles_post_ra>
// kernel: tile.9
= control target key start
LH: loop header
LB: loop body
LE: loop exit
PB: predicated region body
PF: predicated region fallthrough
CT: control target
= control target key end

     0   :  { %vm7_vm0 = vcmask 31744   ;;  %s37_s8 = smov 4   ;;  %s38_s9 = smov 8   ;;  %vm13_vm1 = vcmask 130144   ;;  %vm19_vm2 = vcmask 97344   ;;  %vm25_vm3 = vcmask 64544   ;;  %s55_s0 = inlined_call_operand.vmem [shape: f32[4,4], index: 0, kind: input, shape index: {}]   ;;  %s56_s1 = inlined_call_operand.vmem [shape: f32[1,16], index: 1, kind: output, shape index: {}]  }
   0x1   :  { %v4_v0 = vld [vmem:[%s55_s0] sm:$0xf]  ;;  %s36_s0 = smov 12  }
   0x2   :  { %5 = vst [vmem:[#allocation1] sm:$0xf] %v4_v0 }
   0x9   :  { %v10_v1 = vld [vmem:[#allocation1 + $0x3] sm:$0x1]   ;;  %v22_v2 = vld [vmem:[#allocation1 + $0x1] sm:$0x1]   ;;  %v6_v3 = vld [vmem:[#allocation1] sm:$0x1]  }
   0xa   :  { %11 = vrot.lane.b32.xlu0 %v10_v1, %s36_s0  ;;  %23 = vrot.lane.b32.xlu1 %v22_v2, %s37_s8  ;;  %v16_v4 = vld [vmem:[#allocation1 + $0x2] sm:$0x1]   ;;  %8 = vst.msk [vmem:[#allocation0] sm:$0x1] %vm7_vm0, %v6_v3  }
   0xe   :  { %17 = vrot.lane.b32.xlu0 %v16_v4, %s38_s9 }
  0x7c   :  { %v12_v5 = vpop.permute.xlu0 %11   ;;  %v24_v6 = vpop.permute.xlu1 %23  }
  0x7d   :  { %14 = vst.msk [vmem:[#allocation0] sm:$0x1] %vm13_vm1, %v12_v5  }
  0x80   :  { %v18_v7 = vpop.permute.xlu0 %17  }
  0x81   :  { %20 = vst.msk [vmem:[#allocation0] sm:$0x1] %vm19_vm2, %v18_v7  }
  0x82   :  { %26 = vst.msk [vmem:[#allocation0] sm:$0x1] %vm25_vm3, %v24_v6  }
  0x89   :  { %v30_v8 = vld [vmem:[#allocation0] sm:$0x1] }
  0x8a   :  { %32 = vst [vmem:[%s56_s1] sm:$0x1] %v30_v8 }

// kernel: tile.8
= control target key start
LH: loop header
LB: loop body
LE: loop exit
PB: predicated region body
PF: predicated region fallthrough
CT: control target
= control target key end

     0   :  { %s22_s0 = inlined_call_operand.vmem [shape: f32[4], index: 0, kind: input, shape index: {}]   ;;  %s23_s1 = inlined_call_operand.vmem [shape: f32[4,4], index: 1, kind: output, shape index: {}]  }
   0x1   :  { %v4_v0 = vld [vmem:[%s22_s0] ss:$0 sm:$0xff] }
   0x2   :  { %5 = vst [vmem:[%s23_s1] sm:$0xf] %v4_v0 }

// kernel: up_forward.1
= control target key start
LH: loop header
LB: loop body
LE: loop exit
PB: predicated region body
PF: predicated region fallthrough
CT: control target
= control target key end

     0   :  { %s10862_s13 = smov 0   ;;  %s10864_s14 = smov 0   ;;  %s15371_s0 = inlined_call_operand.vmem [shape: bf16[2,8,8,8], index: 0, kind: input, shape index: {}]   ;;  %s15372_s1 = inlined_call_operand.vmem [shape: bf16[2,16,16,4], index: 1, kind: input, shape index: {}]   ;;  %s15373_s2 = inlined_call_operand.vmem [shape: bf16[8,16], index: 2, kind: input, shape index: {}]   ;;  %s15374_s3 = inlined_call_operand.vmem [shape: f32[1,16], index: 3, kind: input, shape index: {}]   ;;  %s15375_s4 = inlined_call_operand.vmem [shape: bf16[9,8,4], index: 4, kind: input, shape index: {}]   ;;  %s15376_s5 = inlined_call_operand.vmem [shape: f32[1,4], index: 5, kind: input, shape index: {}]   ;;  %s15377_s6 = inlined_call_operand.vmem [shape: bf16[4,4], index: 6, kind: input, shape index: {}]   ;;  %s15378_s7 = inlined_call_operand.vmem [shape: f32[1,4], index: 7, kind: input, shape index: {}]   ;;  %s15379_s8 = inlined_call_operand.vmem [shape: bf16[9,4,4], index: 8, kind: input, shape index: {}]   ;;  %s15380_s9 = inlined_call_operand.vmem [shape: f32[1,4], index: 9, kind: input, shape index: {}]   ;;  %s15381_s10 = inlined_call_operand.vmem [shape: f32[2,16,16,4], index: 10, kind: output, shape index: {}]  }
   0x1   :  { %s10866_s15 = smov 0   ;;  %s10868_s16 = smov 0  }
   0x2   :  { %s10870_s17 = smov 0  }
   0x3 LB: > { %s29_s18 = sadd.s32 1, %s10790_s15  ;;  %s32_s19 = sadd.s32 1, %s10794_s16  ;;  %s10798_s17 = sphi %s10870_s17, %s20_s17   ;;  %s10794_s16 = sphi %s10868_s16, %s15987_s16   ;;  %s10790_s15 = sphi %s10866_s15, %s15986_s15   ;;  %s10786_s14 = sphi %s10864_s14, %s15985_s14   ;;  %s10782_s13 = sphi %s10862_s13, %s15984_s13  }
   0x4   : > { %p30_p0 = scmp.ge.s32.totalorder %s29_s18, 4  ;;  %p9209_p1 = scmp.ge.s32.totalorder %s10798_s17, 1 }
   0x5   : > { %p336_p2 = scmp.lt.s32.totalorder %s10798_s17, 9 }
   0x6   : > { %s15989_s18 = smov (%p30_p0, %s29_s18), 0  ;;  %s15991_s19 = smov (!%p30_p0, %s32_s19), %s10794_s16 }
   0x7   : > { %15541 = sst [smem:[#allocation5_spill]] %s15989_s18  ;;  %p337_p3 = pnand %p9209_p1, %p336_p2 }
   0x8   : > { %p34_p4 = scmp.ge.s32.totalorder %s15991_s19, 2 }
   0x9   : > { %340 = sbr.rel (%p337_p3) target bundleno = 1847 (0x737), region = 60 }
   0xa   : > { %s15993_s19 = smov (%p34_p4, %s15991_s19), 0 }
   0xb   : > { %15542 = sst [smem:[#allocation6_spill]] %s15993_s19 }
  0x10   : > { %p384_p5 = scmp.lt.s32.totalorder %s10786_s14, 1  ;;  %s9214_s20 = sshll.u32 %s10782_s13, 2 }
  0x11   : > { %p397_p6 = scmp.lt.s32.totalorder %s9214_s20, 15  ;;  %p9218_p7 = scmp.ne.s32.totalorder %s10782_s13, 0 }
  0x12   : > { %s15995_s14 = smov (!%p384_p5, %s10786_s14), 1 }
  0x13   : > { %s15997_s20 = smov (!%p397_p6, %s9214_s20), 15  ;;  %s9730_s21 = sshll.u32 %s15995_s14, 5 }
  0x14   : > { %s9731_s22 = sshll.u32 %s15995_s14, 7  ;;  %s388_s25 = scalar_lea.vmem %s15371_s0, %s9730_s21 }
  0x15   : > { %s10901_s28 = scalar_lea.vmem %s15372_s1, %s9731_s22  ;;  %s9215_s29 = sshll.u32 %s15997_s20, 1 }
  0x16   : > { %s401_s30 = sadd.s32 %s9730_s21, %s9215_s29  ;;  %409 = sbr.rel (%p9218_p7) target bundleno = 692 (0x2b4), region = 64 }
  0x17   : > { %s9217_s11 = sshll.u32 %s401_s30, 3 }
  0x18   : > { %s10906_s18 = scalar_lea.vmem %s15381_s10, %s9217_s11 }
  0x1d   : > { %v681_v0 = vld [vmem:[%s15373_s2] sm:$0xf]  ;;  %vm722_vm0 = vcmask 1043456   ;;  %vm709_vm1 = vcmask 64512   ;;  %v10678_v3 = vld [vmem:[%s388_s25 + $0x8] sm:$0xff]   ;;  %v10679_v4 = vld [vmem:[%s388_s25 + $0x10] sm:$0xff]   ;;  %v803_v8 = vlaneseq }
  0x1e   : > { %v10677_v1 = vld [vmem:[%s388_s25] sm:$0xff]   ;;  %10599 = vmatprep.subr.msk.bf16.mxu0 %vm722_vm0, %v681_v0  ;;  %10600 = vmatprep.subr.msk.bf16.mxu1 %vm722_vm0, %v681_v0  ;;  %v724_v2 = vsel %vm722_vm0, %v681_v0, 0  ;;  %v10680_v5 = vld [vmem:[%s388_s25 + $0x18] sm:$0xff]   ;;  %v10800_v6 = vmov 1966171168   ;;  %s10801_s21 = smov 124  }
  0x1f   : > { %9962 = vmatpush3.bf16.msra.mxu0 %v724_v2  ;;  %10328 = vmatpush3.bf16.msra.mxu1 %v724_v2  ;;  %v801_v7 = vunpack.c.l.s4 %v10800_v6  ;;  %v9219_v12 = vld [vmem:[%s15374_s3] ss:$0 sm:$0xff]  ;;  %v10917_v14 = vshrl.u32 %v803_v8, 7  ;;  %vm413_vm2 = vcmask 24576   ;;  %vm427_vm3 = vsmask.f32 256 }
  0x20   : > { %9963 = vmatprep.mubr.msk.bf16.mxu0 %vm709_vm1, %v10677_v1  ;;  %9967 = vmatprep.mubr.msk.bf16.mxu1 %vm709_vm1, %v10679_v4  ;;  %vm11129_vm4 = vmand %vm413_vm2, %vm427_vm3  ;;  %vm410_vm5 = vcmask 27648   ;;  %vm477_vm6 = vsmask.f32 7938  ;;  %vm2632_vm9 = vsmask.f32 4368  ;;  %vm1703_vm11 = vcmask 1040384  }
  0x21   : > { %v802_v13 = vunpack.c.0.s8 %v801_v7  ;;  %15543 = vst [vmem:[#allocation7_spill] sm:$0xff] %v10917_v14  ;;  %v10952_v38 = vsub.s32 0, %v10917_v14  ;;  %vm11509_vm7 = vmand %vm413_vm2, %vm477_vm6  ;;  %s10804_s22 = smov 120  }
  0x22   : > { %9964 = vmatmul.mubr.msk.bf16.vlgmr.msra.gmra.mrb[0].mxu0 %vm709_vm1, %v10678_v3  ;;  %9968 = vmatmul.mubr.msk.bf16.vlgmr.msra.gmra.mrb[0].mxu1 %vm709_vm1, %v10680_v5  ;;  %vm11543_vm8 = vmand %vm410_vm5, %vm477_vm6 }
  0x23   : > { %v10926_v24 = vsub.s32 %v802_v13, %v10917_v14  ;;  %vm11958_vm10 = vmor %vm427_vm3, %vm2632_vm9 }
  0xf5   : > { %v9965_v9 = vpop.f32.mrb[0].mxu0  ;;  %v9969_v11 = vpop.f32.mrb[0].mxu1 }
  0xf6   : > { %v760_v10 = vpop.f32.mrb[1].mxu0  ;;  %v776_v16 = vpop.f32.mrb[1].mxu1  ;;  %v10921_v21 = vadd.f32 %v9969_v11, %v9219_v12  ;;  %v769_v23 = vadd.f32 %v9965_v9, %v9219_v12 }
  0xf7   : > { %v9966_v15 = vpop.f32.mrb[2].mxu0  ;;  %v9970_v19 = vpop.f32.mrb[2].mxu1  ;;  %v10936_v30 = vadd.f32 %v9219_v12, %v760_v10  ;;  %v10958_v40 = vadd.f32 %v9219_v12, %v776_v16 }
  0xf8   : > { %v10919_v17 = vadd.f32 %v9966_v15, %v9219_v12  ;;  %v763_v18 = vpop.f32.mrb[3].mxu0  ;;  %v779_v20 = vpop.f32.mrb[3].mxu1  ;;  %v1100_v25 = vrot.slane %v10921_v21, %v10926_v24  ;;  %v904_v27 = vrot.slane %v769_v23, %v10926_v24  ;;  %v10934_v29 = vadd.f32 %v9970_v19, %v9219_v12 }
  0xf9   : > { %v10932_v28 = vadd.f32 %v9219_v12, %v763_v18  ;;  %v10956_v39 = vrot.slane %v10936_v30, %v10926_v24  ;;  %v780_v44 = vadd.f32 %v9219_v12, %v779_v20  ;;  %v1002_v52 = vrot.slane %v10958_v40, %v10926_v24 }
  0xfa   : > { %v946_v22 = vcombine.high %v10919_v17, %v10919_v17  ;;  %v1108_v33 = vcombine.high %v1100_v25, %v1100_v25  ;;  %v1142_v34 = vcombine.high %v10934_v29, %v10934_v29  ;;  %v912_v35 = vcombine.high %v904_v27, %v904_v27 }
  0xfb   : > { %v848_v32 = vcombine.high %v10932_v28, %v10932_v28  ;;  %v10946_v36 = vrot.slane %v904_v27, %v10926_v24  ;;  %v10962_v42 = vrot.slane %v1100_v25, %v10926_v24  ;;  %v1044_v47 = vcombine.high %v780_v44, %v780_v44 }
  0xfc   : > { %v960_v26 = vrot.slane %v946_v22, %v10926_v24  ;;  %v1156_v41 = vrot.slane %v1142_v34, %v10926_v24  ;;  %v10969_v45 = vrot.slane %v1108_v33, %v10926_v24  ;;  %v10975_v48 = vrot.slane %v780_v44, %v10926_v24 }
  0xfd   : > { %15545 = vst [vmem:[#allocation9_spill] sm:$0xff] %v10946_v36  ;;  %v10949_v37 = vrot.slane %v848_v32, %v10926_v24  ;;  %15546 = vst [vmem:[#allocation10_spill] sm:$0xff] %v10962_v42  ;;  %v1322_v49 = vrot.slane %v10946_v36, %v10952_v38  ;;  %v10980_v50 = vrot.slane %v912_v35, %v10926_v24 }
  0xfe   : > { %v10939_v31 = vrot.slane %v960_v26, %v10926_v24  ;;  %15548 = vst [vmem:[#allocation12_spill] sm:$0xff] %v10969_v45  ;;  %v10972_v46 = vrot.slane %v1156_v41, %v10926_v24  ;;  %v10984_v51 = vrot.slane %v10956_v39, %v10926_v24  ;;  %v1058_v53 = vrot.slane %v1044_v47, %v10926_v24 }
  0xff   : > { %v10966_v43 = vrot.slane %v10949_v37, %v10926_v24  ;;  %15550 = vst [vmem:[#allocation14_spill] sm:$0xff] %v10980_v50  ;;  %v1059_v54 = vcombine.high %v10975_v48, %v10975_v48  ;;  %1543 = vrot.lane.b32.xlu0 %v1322_v49, %s10801_s21  ;;  %v1326_v55 = vrot.slane %v10980_v50, %v10952_v38 }
 0x100   : > { %15544 = vst [vmem:[#allocation8_spill] sm:$0xff] %v10939_v31  ;;  %15549 = vst [vmem:[#allocation13_spill] sm:$0xff] %v10972_v46  ;;  %v1450_v56 = vrot.slane %v10962_v42, %v10952_v38  ;;  %v10997_v57 = vrot.slane %v1058_v53, %v10926_v24  ;;  %v1454_v59 = vrot.slane %v10969_v45, %v10952_v38  ;;  %v11462_v31 = vld [vmem:[#allocation4 + $0x2c] sm:$0x1] }
 0x101   : > { %15547 = vst [vmem:[#allocation11_spill] sm:$0xff] %v10966_v43  ;;  %15551 = vst [vmem:[#allocation15_spill] sm:$0xff] %v10984_v51  ;;  %v11000_v58 = vrot.slane %v1059_v54, %v10926_v24  ;;  %1545 = vrot.lane.b32.xlu1 %v1326_v55, %s10801_s21  ;;  %v897_v60 = vcombine.high %v769_v23, %v769_v23  ;;  %v1010_v61 = vcombine.high %v1002_v52, %v1002_v52  ;;  %v471_v43 = vld [vmem:[#allocation2 + $0xc0] sm:$0x1] }
 0x102   : > { %15552 = vst [vmem:[#allocation16_spill] sm:$0xff] %v10997_v57  ;;  %v11008_v62 = vcombine.high %v10984_v51, %v10984_v51  ;;  %v11011_v63 = vrot.slane %v1002_v52, %v10926_v24  ;;  %v1258_v0 = vrot.slane %v10984_v51, %v10952_v38  ;;  %v962_v2 = vcombine.high %v960_v26, %v960_v26 }
 0x103   : > { %15553 = vst [vmem:[#allocation17_spill] sm:$0xff] %v11000_v58  ;;  %1607 = vrot.lane.b32.xlu0 %v1450_v56, %s10801_s21  ;;  %v911_v1 = vrot.slane %v897_v60, %v10926_v24  ;;  %v11018_v3 = vrot.slane %v1010_v61, %v10926_v24  ;;  %v11028_v6 = vcombine.high %v10946_v36, %v10946_v36 }
 0x104   : > { %15554 = vst [vmem:[#allocation18_spill] sm:$0xff] %v11008_v62  ;;  %15555 = vst [vmem:[#allocation19_spill] sm:$0xff] %v11011_v63  ;;  %v1266_v4 = vrot.slane %v11008_v62, %v10952_v38  ;;  %v1386_v5 = vrot.slane %v11011_v63, %v10952_v38  ;;  %v1158_v8 = vcombine.high %v1156_v41, %v1156_v41  ;;  %v3084_v62 = vld [vmem:[%s10901_s28 + $0x40] sm:$0xf] }
 0x105   : > { %1609 = vrot.lane.b32.xlu1 %v1454_v59, %s10801_s21  ;;  %15556 = vst [vmem:[#allocation20_spill] sm:$0xff] %v11018_v3  ;;  %15557 = vst [vmem:[#allocation21_spill] sm:$0xff] %v11028_v6  ;;  %v913_v7 = vcombine.high %v911_v1, %v911_v1  ;;  %v953_v9 = vrot.slane %v10919_v17, %v10926_v24  ;;  %v1390_v10 = vrot.slane %v11018_v3, %v10952_v38 }
 0x106   : > { %v11037_v11 = vcombine.high %v10980_v50, %v10980_v50  ;;  %v11040_v12 = vrot.slane %v962_v2, %v10926_v24  ;;  %v11043_v13 = vrot.slane %v911_v1, %v10926_v24  ;;  %v864_v15 = vcombine.high %v10949_v37, %v10949_v37 }
 0x107   : > { %1511 = vrot.lane.b32.xlu0 %v1258_v0, %s10801_s21  ;;  %v1330_v16 = vrot.slane %v11028_v6, %v10952_v38  ;;  %v1093_v17 = vcombine.high %v10921_v21, %v10921_v21  ;;  %v11053_v18 = vrot.slane %v1158_v8, %v10926_v24  ;;  %v961_v19 = vcombine.high %v953_v9, %v953_v9 }
 0x108   : > { %15558 = vst [vmem:[#allocation22_spill] sm:$0xff] %v11037_v11  ;;  %15559 = vst [vmem:[#allocation23_spill] sm:$0xff] %v11040_v12  ;;  %v1060_v20 = vcombine.high %v1058_v53, %v1058_v53  ;;  %v1334_v22 = vrot.slane %v11037_v11, %v10952_v38  ;;  %v11059_v23 = vrot.slane %v913_v7, %v10926_v24 }
 0x109   : > { %1515 = vrot.lane.b32.xlu1 %v1266_v4, %s10801_s21  ;;  %15560 = vst [vmem:[#allocation24_spill] sm:$0xff] %v11043_v13  ;;  %15561 = vst [vmem:[#allocation25_spill] sm:$0xff] %v11053_v18  ;;  %v11062_v25 = vrot.slane %v953_v9, %v10926_v24  ;;  %v1338_v21 = vrot.slane %v11043_v13, %v10952_v38  ;;  %v11068_v26 = vrot.slane %v864_v15, %v10926_v24  ;;  %v15573_v4 = vmov 0 }
 0x10a   : > { %15562 = vst [vmem:[#allocation26_spill] sm:$0xff] %v11059_v23  ;;  %v1107_v27 = vrot.slane %v1093_v17, %v10926_v24  ;;  %v11072_v32 = vrot.slane %v961_v19, %v10926_v24  ;;  %v1342_v33 = vrot.slane %v11059_v23, %v10952_v38  ;;  %v11078_v34 = vrot.slane %v1060_v20, %v10926_v24 }
 0x10b   : > { %1575 = vrot.lane.b32.xlu0 %v1386_v5, %s10801_s21  ;;  %15563 = vst [vmem:[#allocation27_spill] sm:$0xff] %v11062_v25  ;;  %15564 = vst [vmem:[#allocation28_spill] sm:$0xff] %v11068_v26  ;;  %v799_v35 = vcombine.high %v10936_v30, %v10936_v30  ;;  %v1354_v37 = vrot.slane %v11062_v25, %v10952_v38  ;;  %v11087_v41 = vcombine.high %v10962_v42, %v10962_v42  ;;  %v553_v5 = vld [vmem:[#allocation3 + $0x48] sm:$0x1]  ;;  %v11402_v26 = vld [vmem:[#allocation4 + $0x24] sm:$0x1] }
 0x10c   : > { %15565 = vst [vmem:[#allocation29_spill] sm:$0xff] %v11072_v32  ;;  %15566 = vst [vmem:[#allocation30_spill] sm:$0xff] %v11078_v34  ;;  %v995_v44 = vcombine.high %v10958_v40, %v10958_v40  ;;  %v1149_v47 = vrot.slane %v10934_v29, %v10926_v24  ;;  %v1109_v49 = vcombine.high %v1107_v27, %v1107_v27  ;;  %v15574_v4 = vsel %vm11129_vm4, 4294967295, %v15573_v4  ;;  %v11386_v34 = vld [vmem:[#allocation4] sm:$0x1] }
 0x10d   : > { %1577 = vrot.lane.b32.xlu1 %v1390_v10, %s10801_s21  ;;  %15567 = vst [vmem:[#allocation31_spill] sm:$0xff] %v11087_v41  ;;  %v1358_v30 = vrot.slane %v11072_v32, %v10952_v38  ;;  %v11098_v52 = vcombine.high %v10969_v45, %v10969_v45  ;;  %v814_v53 = vcombine.high %v10956_v39, %v10956_v39  ;;  %15575 = vst [vmem:[#allocation37_spill] sm:$0xff] %v15574_v4  ;;  %v10802_v18 = vmov 0  }
 0x10e   : > { %v855_v54 = vrot.slane %v10932_v28, %v10926_v24  ;;  %v813_v40 = vrot.slane %v799_v35, %v10926_v24  ;;  %v11106_v29 = vrot.slane %v1107_v27, %v10926_v24  ;;  %v1458_v55 = vrot.slane %v11087_v41, %v10952_v38  ;;  %411 = vst.msk [vmem:[#allocation2] sm:$0xf] %vm410_vm5, %v10802_v18 }
 0x10f   : > { %1547 = vrot.lane.b32.xlu0 %v1330_v16, %s10801_s21  ;;  %15568 = vst [vmem:[#allocation32_spill] sm:$0xff] %v11098_v52  ;;  %v1009_v56 = vrot.slane %v995_v44, %v10926_v24  ;;  %v1157_v59 = vcombine.high %v1149_v47, %v1149_v47  ;;  %v1462_v39 = vrot.slane %v11098_v52, %v10952_v38  ;;  %v554_v9 = vsel %vm11129_vm4, 0, %v553_v5  ;;  %v3090_v52 = vld [vmem:[%s10901_s28 + $0x58] sm:$0xf] }
 0x110   : > { %15569 = vst [vmem:[#allocation33_spill] sm:$0xff] %v11106_v29  ;;  %v11116_v28 = vrot.slane %v1109_v49, %v10926_v24  ;;  %v11119_v60 = vrot.slane %v814_v53, %v10926_v24  ;;  %v863_v61 = vcombine.high %v855_v54, %v855_v54  ;;  %v815_v0 = vcombine.high %v813_v40, %v813_v40 }
 0x111   : > { %1549 = vrot.lane.b32.xlu1 %v1334_v22, %s10801_s21  ;;  %v11122_v1 = vrot.slane %v1149_v47, %v10926_v24  ;;  %v1466_v2 = vrot.slane %v11106_v29, %v10952_v38  ;;  %v1011_v7 = vcombine.high %v1009_v56, %v1009_v56  ;;  %v11134_v8 = vrot.slane %v1157_v59, %v10926_v24 }
 0x112   : > { %15570 = vst [vmem:[#allocation34_spill] sm:$0xff] %v11116_v28  ;;  %15571 = vst [vmem:[#allocation35_spill] sm:$0xff] %v11119_v60  ;;  %v11139_v10 = vrot.slane %v813_v40, %v10926_v24  ;;  %v1470_v15 = vrot.slane %v11116_v28, %v10952_v38  ;;  %v11145_v16 = vrot.slane %v1009_v56, %v10926_v24  ;;  %v3288_v50 = vshrl.u32 %v3090_v52, 16 }
 0x113   : > { %1551 = vrot.lane.b32.xlu0 %v1338_v21, %s10801_s21  ;;  %15572 = vst [vmem:[#allocation36_spill] sm:$0xff] %v11122_v1  ;;  %15576 = vst [vmem:[#allocation38_spill] sm:$0xff] %v11134_v8  ;;  %v11148_v17 = vrot.slane %v855_v54, %v10926_v24  ;;  %v11151_v19 = vrot.slane %v863_v61, %v10926_v24  ;;  %v11155_v20 = vcombine.high %v11119_v60, %v11119_v60  ;;  %v3078_v61 = vld [vmem:[%s10901_s28 + $0x28] sm:$0xf] }
 0x114   : > { %15577 = vst [vmem:[#allocation39_spill] sm:$0xff] %v11139_v10  ;;  %555 = vst [vmem:[#allocation3 + $0x48] sm:$0x1] %v554_v9  ;;  %v1482_v22 = vrot.slane %v11122_v1, %v10952_v38  ;;  %v11161_v21 = vrot.slane %v815_v0, %v10926_v24  ;;  %v11165_v27 = vcombine.high %v11011_v63, %v11011_v63  ;;  %v3068_v0 = vld [vmem:[%s10901_s28] sm:$0xf] }
 0x115   : > { %1553 = vrot.lane.b32.xlu1 %v1342_v33, %s10801_s21  ;;  %15578 = vst [vmem:[#allocation40_spill] sm:$0xff] %v11145_v16  ;;  %15579 = vst [vmem:[#allocation41_spill] sm:$0xff] %v11148_v17  ;;  %v11169_v33 = vcombine.high %v11018_v3, %v11018_v3  ;;  %v11173_v35 = vrot.slane %v10975_v48, %v10926_v24  ;;  %v1262_v44 = vrot.slane %v11119_v60, %v10952_v38  ;;  %v3086_v60 = vld [vmem:[%s10901_s28 + $0x48] sm:$0xf]  ;;  %v11285_v63 = vld [vmem:[%s10901_s28 + $0x60] sm:$0xf] }
 0x116   : > { %15580 = vst [vmem:[#allocation42_spill] sm:$0xff] %v11151_v19  ;;  %15581 = vst [vmem:[#allocation43_spill] sm:$0xff] %v11155_v20  ;;  %v11180_v47 = vrot.slane %v1011_v7, %v10926_v24  ;;  %v1274_v49 = vrot.slane %v11139_v10, %v10952_v38  ;;  %v11187_v48 = vcombine.high %v11043_v13, %v11043_v13  ;;  %v3101_v59 = vshrl.u32 %v3068_v0, 16  ;;  %v3080_v7 = vld [vmem:[%s10901_s28 + $0x30] sm:$0xf] }
 0x117   : > { %1559 = vrot.lane.b32.xlu0 %v1354_v37, %s10801_s21  ;;  %15582 = vst [vmem:[#allocation44_spill] sm:$0xff] %v11161_v21  ;;  %15583 = vst [vmem:[#allocation45_spill] sm:$0xff] %v11165_v27  ;;  %v1486_v37 = vrot.slane %v11134_v8, %v10952_v38  ;;  %v11195_v53 = vcombine.high %v11062_v25, %v11062_v25  ;;  %v1270_v24 = vrot.slane %v11155_v20, %v10952_v38 }
 0x118   : > { %15584 = vst [vmem:[#allocation46_spill] sm:$0xff] %v11169_v33  ;;  %15585 = vst [vmem:[#allocation47_spill] sm:$0xff] %v11173_v35  ;;  %v1290_v54 = vrot.slane %v11148_v17, %v10952_v38  ;;  %v1278_v56 = vrot.slane %v11161_v21, %v10952_v38  ;;  %v11239_v9 = vcombine.high %v11106_v29, %v11106_v29  ;;  %v3104_v40 = vshll.u32 %v3068_v0, 16 }
 0x119   : > { %1561 = vrot.lane.b32.xlu1 %v1358_v30, %s10801_s21  ;;  %15586 = vst [vmem:[#allocation48_spill] sm:$0xff] %v11180_v47  ;;  %15587 = vst [vmem:[#allocation49_spill] sm:$0xff] %v11187_v48  ;;  %v11191_v30 = vcombine.high %v11059_v23, %v11059_v23  ;;  %v11254_v29 = vrot.slane %v3101_v59, 7  ;;  %v3203_v13 = vshrl.u32 %v3080_v7, 16  ;;  %v3254_v6 = vshrl.u32 %v3086_v60, 16 }
 0x11a   : > { %15589 = vst [vmem:[#allocation51_spill] sm:$0xff] %v11195_v53  ;;  %15591 = vst [vmem:[#allocation53_spill] sm:$0xff] %v11239_v9  ;;  %v3257_v14 = vshll.u32 %v3086_v60, 16  ;;  %v3305_v60 = vshrl.u32 %v11285_v63, 16  ;;  %v15608_v57 = vrot.slane %v11145_v16, %v10952_v38  ;;  %v11404_v9 = vld [vmem:[#allocation4 + $0x30] sm:$0x1]  ;;  %v15609_v12 = vrot.slane %v11180_v47, %v10952_v38 }
 0x11b   : > { %1611 = vrot.lane.b32.xlu0 %v1458_v55, %s10801_s21  ;;  %15588 = vst [vmem:[#allocation50_spill] sm:$0xff] %v11191_v30  ;;  %v11205_v55 = vcombine.high %v11072_v32, %v11072_v32  ;;  %15593 = vst [vmem:[#allocation55_spill] sm:$0xff] %v11254_v29  ;;  %v11277_v0 = vor.u32 %v3104_v40, %v11254_v29  ;;  %v11294_v40 = vld [vmem:[%s10901_s28 + $0x68] sm:$0xf]  ;;  %v11296_v11 = vrot.slane %v3203_v13, 7  ;;  %v11312_v13 = vrot.slane %v3254_v6, 7 }
 0x11c   : > { %v11384_v29 = vld [vmem:[#allocation2 + $0xa8] sm:$0x1]  ;;  %412 = vst.msk [vmem:[#allocation2 + $0x4] sm:$0xf] %vm410_vm5, %v10802_v18  ;;  %415 = vst.msk [vmem:[#allocation2 + $0xc] sm:$0xf] %vm410_vm5, %v10802_v18 }
 0x11d   : > { %1613 = vrot.lane.b32.xlu1 %v1462_v39, %s10801_s21  ;;  %15590 = vst [vmem:[#allocation52_spill] sm:$0xff] %v11205_v55  ;;  %v11242_v39 = vld [vmem:[%s10901_s28 + $0x20] sm:$0xf]  ;;  %15599 = vst [vmem:[#allocation61_spill] sm:$0xff] %v11296_v11  ;;  %v11464_v47 = vld [vmem:[#allocation4 + $0x38] sm:$0x1] }
 0x11e   : > { %v3169_v20 = vshrl.u32 %v11242_v39, 16  ;;  %15603 = vst [vmem:[#allocation64_spill] sm:$0xff] %v11312_v13  ;;  %414 = vst.msk [vmem:[#allocation2 + $0x8] sm:$0x1] %vm413_vm2, %v10802_v18 }
 0x11f   : > { %1615 = vrot.lane.b32.xlu0 %v1466_v2, %s10801_s21  ;;  %v3070_v2 = vld [vmem:[%s10901_s28 + $0x8] sm:$0xf]  ;;  %416 = vst.msk [vmem:[#allocation2 + $0x10] sm:$0xf] %vm410_vm5, %v10802_v18  ;;  %419 = vst.msk [vmem:[#allocation2 + $0xd8] sm:$0xf] %vm410_vm5, %v10802_v18 }
 0x120   : > { %v3118_v5 = vshrl.u32 %v3070_v2, 16  ;;  %v3121_v32 = vshll.u32 %v3070_v2, 16  ;;  %v3082_v2 = vld [vmem:[%s10901_s28 + $0x38] sm:$0xf]  ;;  %v11282_v41 = vrot.slane %v3169_v20, 7  ;;  %v3237_v20 = vshrl.u32 %v3084_v62, 16 }
 0x121   : > { %1617 = vrot.lane.b32.xlu1 %v1470_v15, %s10801_s21  ;;  %v3220_v51 = vshrl.u32 %v3082_v2, 16  ;;  %417 = vst.msk [vmem:[#allocation2 + $0x14] sm:$0x1] %vm413_vm2, %v10802_v18  ;;  %421 = vst.msk [vmem:[#allocation2 + $0xe0] sm:$0x1] %vm413_vm2, %v10802_v18 }
 0x122   : > { %v11256_v15 = vrot.slane %v3118_v5, 7  ;;  %v3186_v5 = vshrl.u32 %v3078_v61, 16  ;;  %15597 = vst [vmem:[#allocation59_spill] sm:$0xff] %v11282_v41  ;;  %420 = vst.msk [vmem:[#allocation2 + $0xdc] sm:$0xf] %vm410_vm5, %v10802_v18 }
 0x123   : > { %1623 = vrot.lane.b32.xlu0 %v1482_v22, %s10801_s21  ;;  %v3072_v22 = vld [vmem:[%s10901_s28 + $0x10] sm:$0xf]  ;;  %v11301_v45 = vrot.slane %v3220_v51, 7  ;;  %422 = vst.msk [vmem:[#allocation2 + $0xe4] sm:$0xf] %vm410_vm5, %v10802_v18 }
 0x124   : > { %v3135_v23 = vshrl.u32 %v3072_v22, 16  ;;  %15594 = vst [vmem:[#allocation56_spill] sm:$0xff] %v11256_v15  ;;  %423 = vst.msk [vmem:[#allocation2 + $0xe8] sm:$0xf] %vm410_vm5, %v10802_v18 }
 0x125   : > { %1625 = vrot.lane.b32.xlu1 %v1486_v37, %s10801_s21  ;;  %v11228_v37 = vld [vmem:[%s10901_s28 + $0x18] sm:$0xf]  ;;  %15600 = vst [vmem:[#allocation62_spill] sm:$0xff] %v11301_v45  ;;  %424 = vst.msk [vmem:[#allocation2 + $0xec] sm:$0x1] %vm413_vm2, %v10802_v18 }
 0x126   : > { %v3152_v3 = vshrl.u32 %v11228_v37, 16  ;;  %v11266_v59 = vrot.slane %v3135_v23, 7  ;;  %v11280_v23 = vor.u32 %v3121_v32, %v11256_v15  ;;  %v3223_v32 = vshll.u32 %v3082_v2, 16  ;;  %v11382_v15 = vld [vmem:[#allocation2 + $0x9c] sm:$0x1] }
 0x127   : > { %1513 = vrot.lane.b32.xlu0 %v1262_v44, %s10801_s21  ;;  %v11248_v44 = vcombine.high %v11116_v28, %v11116_v28  ;;  %v3138_v28 = vshll.u32 %v3072_v22, 16  ;;  %v3155_v22 = vshll.u32 %v11228_v37, 16  ;;  %527 = vst.msk [vmem:[#allocation3] sm:$0xf] %vm410_vm5, %v10802_v18  ;;  %528 = vst.msk [vmem:[#allocation3 + $0x4] sm:$0xf] %vm410_vm5, %v10802_v18 }
 0x128   : > { %15595 = vst [vmem:[#allocation57_spill] sm:$0xff] %v11266_v59  ;;  %v11269_v25 = vrot.slane %v3152_v3, 7  ;;  %v3189_v3 = vshll.u32 %v3078_v61, 16  ;;  %v11299_v61 = vld [vmem:[%s10901_s28 + $0x70] sm:$0xf] }
 0x129   : > { %15592 = vst [vmem:[#allocation54_spill] sm:$0xff] %v11248_v44  ;;  %1517 = vrot.lane.b32.xlu1 %v1270_v24, %s10801_s21  ;;  %v3088_v24 = vld [vmem:[%s10901_s28 + $0x50] sm:$0xf]  ;;  %v11288_v37 = vor.u32 %v3138_v28, %v11266_v59  ;;  %v3240_v28 = vshll.u32 %v3084_v62, 16  ;;  %v3291_v62 = vshll.u32 %v3090_v52, 16 }
 0x12a   : > { %15596 = vst [vmem:[#allocation58_spill] sm:$0xff] %v11269_v25  ;;  %v3271_v42 = vshrl.u32 %v3088_v24, 16  ;;  %v3274_v2 = vshll.u32 %v3088_v24, 16  ;;  %v11315_v36 = vor.u32 %v3155_v22, %v11269_v25  ;;  %v429_v59 = vld [vmem:[#allocation2 + $0x18] sm:$0x1] }
 0x12b   : > { %1519 = vrot.lane.b32.xlu0 %v1274_v49, %s10801_s21  ;;  %v3172_v49 = vshll.u32 %v11242_v39, 16  ;;  %v11290_v39 = vrot.slane %v3186_v5, 7  ;;  %v11310_v5 = vrot.slane %v3237_v20, 7  ;;  %v11335_v52 = vld [vmem:[#allocation2 + $0x24] sm:$0x1] }
 0x12c   : > { %v11317_v51 = vrot.slane %v3271_v42, 7  ;;  %v11333_v42 = vrot.slane %v3288_v50, 7  ;;  %v11337_v22 = vld [vmem:[#allocation2 + $0x30] sm:$0x1]  ;;  %v11339_v25 = vld [vmem:[#allocation2 + $0x3c] sm:$0x1] }
 0x12d   : > { %1521 = vrot.lane.b32.xlu1 %v1278_v56, %s10801_s21  ;;  %15598 = vst [vmem:[#allocation60_spill] sm:$0xff] %v11290_v39  ;;  %v3206_v56 = vshll.u32 %v3080_v7, 16  ;;  %v15601_v7 = vrot.slane %v11151_v19, %v10952_v38  ;;  %15602 = vst [vmem:[#allocation63_spill] sm:$0xff] %v11310_v5  ;;  %v11325_v20 = vor.u32 %v3172_v49, %v11282_v41  ;;  %v11353_v50 = vld [vmem:[#allocation2 + $0x54] sm:$0x1] }
 0x12e   : > { %15604 = vst [vmem:[#allocation65_spill] sm:$0xff] %v11317_v51  ;;  %v11328_v6 = vor.u32 %v3189_v3, %v11290_v39  ;;  %15606 = vst [vmem:[#allocation66_spill] sm:$0xff] %v11333_v42  ;;  %v11345_v49 = vor.u32 %v3240_v28, %v11310_v5  ;;  %v11348_v3 = vor.u32 %v3257_v14, %v11312_v13  ;;  %v3339_v5 = vshrl.u32 %v11299_v61, 16  ;;  %v11365_v13 = vld [vmem:[#allocation2 + $0x60] sm:$0x1] }
 0x12f   : > { %1527 = vrot.lane.b32.xlu0 %v1290_v54, %s10801_s21  ;;  %v11308_v54 = vld [vmem:[%s10901_s28 + $0x78] sm:$0xf]  ;;  %v11331_v24 = vor.u32 %v3206_v56, %v11296_v11  ;;  %v3322_v56 = vshrl.u32 %v11294_v40, 16  ;;  %v15607_v11 = vrot.slane %v11169_v33, %v10952_v38  ;;  %v11371_v41 = vld [vmem:[#allocation2 + $0x84] sm:$0x1]  ;;  %v11374_v33 = vor.u32 %v3291_v62, %v11333_v42 }
 0x130   : > { %v3356_v14 = vshrl.u32 %v11308_v54, 16  ;;  %v11369_v39 = vld [vmem:[#allocation2 + $0x78] sm:$0x1]  ;;  %v11396_v28 = vld [vmem:[#allocation2 + $0xb4] sm:$0x1]  ;;  %v11452_v16 = vrot.slane %v3339_v5, 7 }
 0x131   : > { %1529 = vrot.lane.b32.xlu1 %v15601_v7, %s10801_s21  ;;  %v15605_v7 = vrot.slane %v11165_v27, %v10952_v38  ;;  %v11342_v27 = vor.u32 %v3223_v32, %v11301_v45  ;;  %v11360_v32 = vor.u32 %v3274_v2, %v11317_v51  ;;  %v11367_v45 = vld [vmem:[#allocation2 + $0x6c] sm:$0x1]  ;;  %v11380_v51 = vld [vmem:[#allocation2 + $0x90] sm:$0x1]  ;;  %v11392_v62 = vrot.slane %v3322_v56, 7 }
 0x132   : > { %v11398_v2 = vld [vmem:[#allocation4 + $0xc] sm:$0x1]  ;;  %v11400_v42 = vld [vmem:[#allocation4 + $0x18] sm:$0x1]  ;;  %v439_v56 = vsel %vm11129_vm4, 0, %v11339_v25  ;;  %v11454_v19 = vrot.slane %v3356_v14, 7 }
 0x133   : > { %1579 = vrot.lane.b32.xlu0 %v15605_v7, %s10801_s21  ;;  %v11351_v7 = vld [vmem:[#allocation2 + $0x48] sm:$0x1]  ;;  %529 = vst.msk [vmem:[#allocation3 + $0x8] sm:$0x1] %vm413_vm2, %v10802_v18  ;;  %532 = vst.msk [vmem:[#allocation3 + $0x14] sm:$0x1] %vm413_vm2, %v10802_v18 }
 0x134   : > { %530 = vst.msk [vmem:[#allocation3 + $0xc] sm:$0xf] %vm410_vm5, %v10802_v18  ;;  %531 = vst.msk [vmem:[#allocation3 + $0x10] sm:$0xf] %vm410_vm5, %v10802_v18  ;;  %v11440_v25 = vld [vmem:[#allocation4 + $0x3c] sm:$0x1] }
 0x135   : > { %1581 = vrot.lane.b32.xlu1 %v15607_v11, %s10801_s21  ;;  %v11376_v11 = vrot.slane %v3305_v60, 7  ;;  %v430_v60 = vsel %vm11129_vm4, 0, %v429_v59  ;;  %v436_v59 = vsel %vm11129_vm4, 0, %v11337_v22  ;;  %534 = vst.msk [vmem:[#allocation3 + $0xd8] sm:$0xf] %vm410_vm5, %v10802_v18  ;;  %v445_v46 = vsel %vm11129_vm4, 0, %v11353_v50 }
 0x136   : > { %431 = vst [vmem:[#allocation2 + $0x18] sm:$0x1] %v430_v60  ;;  %535 = vst.msk [vmem:[#allocation3 + $0xdc] sm:$0xf] %vm410_vm5, %v10802_v18  ;;  %v11444_v22 = vld [vmem:[#allocation4 + $0x14] sm:$0x1] }
 0x137   : > { %1583 = vrot.lane.b32.xlu0 %v15608_v57, %s10801_s21  ;;  %v433_v57 = vsel %vm11129_vm4, 0, %v11335_v52  ;;  %536 = vst.msk [vmem:[#allocation3 + $0xe0] sm:$0x1] %vm413_vm2, %v10802_v18  ;;  %539 = vst.msk [vmem:[#allocation3 + $0xec] sm:$0x1] %vm413_vm2, %v10802_v18  ;;  %v448_v5 = vsel %vm11129_vm4, 0, %v11365_v13 }
 0x138   : > { %537 = vst.msk [vmem:[#allocation3 + $0xe4] sm:$0xf] %vm410_vm5, %v10802_v18  ;;  %538 = vst.msk [vmem:[#allocation3 + $0xe8] sm:$0xf] %vm410_vm5, %v10802_v18  ;;  %v11442_v52 = vld [vmem:[#allocation4 + $0x8] sm:$0x1] }
 0x139   : > { %v11446_v60 = vld [vmem:[#allocation4 + $0x20] sm:$0x1]  ;;  %1585 = vrot.lane.b32.xlu1 %v15609_v12, %s10801_s21  ;;  %434 = vst [vmem:[#allocation2 + $0x24] sm:$0x1] %v433_v57  ;;  %437 = vst [vmem:[#allocation2 + $0x30] sm:$0x1] %v436_v59 }
 0x13a   : > { %440 = vst [vmem:[#allocation2 + $0x3c] sm:$0x1] %v439_v56  ;;  %v442_v18 = vsel %vm11129_vm4, 0, %v11351_v7  ;;  %v474_v44 = vld [vmem:[#allocation2 + $0xcc] sm:$0x1]  ;;  %v451_v7 = vsel %vm11129_vm4, 0, %v11367_v45 }
 0x13b   : > { %v11466_v12 = vld [vmem:[#allocation4 + $0x44] sm:$0x1]  ;;  %443 = vst [vmem:[#allocation2 + $0x48] sm:$0x1] %v442_v18  ;;  %446 = vst [vmem:[#allocation2 + $0x54] sm:$0x1] %v445_v46  ;;  %v15610_v46 = vrot.slane %v11173_v35, %v10952_v38 }
 0x13c   : > { %v454_v50 = vsel %vm11129_vm4, 0, %v11369_v39  ;;  %v457_v14 = vsel %vm11129_vm4, 0, %v11371_v41  ;;  %449 = vst [vmem:[#allocation2 + $0x60] sm:$0x1] %v448_v5  ;;  %452 = vst [vmem:[#allocation2 + $0x6c] sm:$0x1] %v451_v7 }
 0x13d   : > { %1591 = vrot.lane.b32.xlu0 %v15610_v46, %s10801_s21  ;;  %455 = vst [vmem:[#allocation2 + $0x78] sm:$0x1] %v454_v50  ;;  %458 = vst [vmem:[#allocation2 + $0x84] sm:$0x1] %v457_v14  ;;  %v460_v45 = vsel %vm11129_vm4, 0, %v11380_v51  ;;  %v463_v39 = vsel %vm11129_vm4, 0, %v11382_v15  ;;  %v15611_v15 = vrot.slane %v11000_v58, %v10952_v38 }
 0x13e   : > { %v466_v41 = vsel %vm11129_vm4, 0, %v11384_v29  ;;  %v469_v13 = vsel %vm11129_vm4, 0, %v11396_v28  ;;  %v577_v57 = vld [vmem:[#allocation3 + $0xa8] sm:$0x1]  ;;  %461 = vst [vmem:[#allocation2 + $0x90] sm:$0x1] %v460_v45 }
 0x13f   : > { %464 = vst [vmem:[#allocation2 + $0x9c] sm:$0x1] %v463_v39  ;;  %467 = vst [vmem:[#allocation2 + $0xa8] sm:$0x1] %v466_v41  ;;  %v472_v51 = vsel %vm11129_vm4, 0, %v471_v43  ;;  %v475_v59 = vsel %vm11129_vm4, 0, %v474_v44  ;;  %1593 = vrot.lane.b32.xlu1 %v15611_v15, %s10801_s21 }
 0x140   : > { %470 = vst [vmem:[#allocation2 + $0xb4] sm:$0x1] %v469_v13  ;;  %v638_v29 = vsel %vm11129_vm4, 0, %v11386_v34  ;;  %473 = vst [vmem:[#allocation2 + $0xc0] sm:$0x1] %v472_v51  ;;  %v641_v43 = vsel %vm11129_vm4, 0, %v11398_v2 }
 0x141   : > { %476 = vst [vmem:[#allocation2 + $0xcc] sm:$0x1] %v475_v59  ;;  %v644_v34 = vsel %vm11129_vm4, 0, %v11400_v42  ;;  %v647_v44 = vsel %vm11129_vm4, 0, %v11402_v26  ;;  %v650_v56 = vsel %vm11129_vm4, 0, %v11404_v9  ;;  %v653_v18 = vsel %vm11129_vm4, 0, %v11440_v25 }
 0x142   : > { %639 = vst [vmem:[#allocation4] sm:$0x1] %v638_v29  ;;  %v656_v2 = vsel %vm11509_vm7, 0, %v11442_v52  ;;  %v659_v42 = vsel %vm11509_vm7, 0, %v11444_v22  ;;  %v662_v26 = vsel %vm11509_vm7, 0, %v11446_v60  ;;  %v15614_v25 = vrot.slane %v11187_v48, %v10952_v38 }
 0x143   : > { %642 = vst [vmem:[#allocation4 + $0xc] sm:$0x1] %v641_v43  ;;  %645 = vst [vmem:[#allocation4 + $0x18] sm:$0x1] %v644_v34  ;;  %v559_v9 = vld [vmem:[#allocation3 + $0x60] sm:$0x1]  ;;  %v11593_v43 = vcombine.high %v11122_v1, %v11122_v1 }
 0x144   : > { %648 = vst [vmem:[#allocation4 + $0x24] sm:$0x1] %v647_v44  ;;  %651 = vst [vmem:[#allocation4 + $0x30] sm:$0x1] %v650_v56  ;;  %1555 = vrot.lane.b32.xlu0 %v15614_v25, %s10801_s21  ;;  %v15615_v52 = vmov 0  ;;  %v665_v60 = vsel %vm11509_vm7, 0, %v11462_v31 }
 0x145   : > { %v15616_v52 = vsel %vm11543_vm8, 4294967295, %v15615_v52  ;;  %v3420_v22 = vld [vmem:[#allocation2 + $0x18] sm:$0xf]  ;;  %v668_v5 = vsel %vm11509_vm7, 0, %v11464_v47  ;;  %v671_v7 = vsel %vm11509_vm7, 0, %v11466_v12  ;;  %v578_v50 = vsel %vm11129_vm4, 0, %v577_v57 }
 0x146   : > { %15617 = vst [vmem:[#allocation67_spill] sm:$0xff] %v15616_v52  ;;  %654 = vst [vmem:[#allocation4 + $0x3c] sm:$0x1] %v653_v18  ;;  %v15618_v14 = vshll.u32 %v11285_v63, 16  ;;  %v15619_v31 = vshll.u32 %v11294_v40, 16  ;;  %v15620_v12 = vshll.u32 %v11299_v61, 16  ;;  %v3421_v39 = vsel %vm11543_vm8, %v11277_v0, %v3420_v22 }
 0x147   : > { %657 = vst [vmem:[#allocation4 + $0x8] sm:$0x1] %v656_v2  ;;  %660 = vst [vmem:[#allocation4 + $0x14] sm:$0x1] %v659_v42  ;;  %v3427_v41 = vld [vmem:[#allocation2 + $0x24] sm:$0xf]  ;;  %v15621_v40 = vrot.slane %v11191_v30, %v10952_v38  ;;  %v11610_v2 = vcombine.high %v11134_v8, %v11134_v8  ;;  %v11623_v22 = vcombine.high %v11139_v10, %v11139_v10 }
 0x148   : > { %663 = vst [vmem:[#allocation4 + $0x20] sm:$0x1] %v662_v26  ;;  %v11561_v46 = vor.u32 %v15618_v14, %v11376_v11  ;;  %v11566_v47 = vor.u32 %v15619_v31, %v11392_v62  ;;  %v11571_v45 = vor.u32 %v15620_v12, %v11452_v16  ;;  %v3434_v13 = vld [vmem:[#allocation2 + $0x30] sm:$0xf]  ;;  %v3441_v57 = vld [vmem:[#allocation2 + $0x3c] sm:$0xf]  ;;  %v3428_v61 = vsel %vm11543_vm8, %v11280_v23, %v3427_v41 }
 0x149   : > { %666 = vst [vmem:[#allocation4 + $0x2c] sm:$0x1] %v665_v60  ;;  %669 = vst [vmem:[#allocation4 + $0x38] sm:$0x1] %v668_v5  ;;  %v541_v63 = vld [vmem:[#allocation3 + $0x18] sm:$0x1]  ;;  %1557 = vrot.lane.b32.xlu1 %v15621_v40, %s10801_s21  ;;  %v3435_v0 = vsel %vm11543_vm8, %v11288_v37, %v3434_v13  ;;  %v3442_v51 = vsel %vm11543_vm8, %v11315_v36, %v3441_v57 }
 0x14a   : > { %672 = vst [vmem:[#allocation4 + $0x44] sm:$0x1] %v671_v7  ;;  %579 = vst [vmem:[#allocation3 + $0xa8] sm:$0x1] %v578_v50  ;;  %v3448_v59 = vld [vmem:[#allocation2 + $0x48] sm:$0xf]  ;;  %v15627_v50 = vrot.slane %v11205_v55, %v10952_v38 }
 0x14b   : > { %3422 = vst [vmem:[#allocation2 + $0x18] sm:$0xf] %v3421_v39  ;;  %v3455_v29 = vld [vmem:[#allocation2 + $0x54] sm:$0xf]  ;;  %v560_v15 = vsel %vm11129_vm4, 0, %v559_v9  ;;  %15622 = vst [vmem:[#allocation68_spill] sm:$0xff] %v11593_v43  ;;  %v3449_v36 = vsel %vm11543_vm8, %v11325_v20, %v3448_v59  ;;  %v11651_v39 = vcombine.high %v11161_v21, %v11161_v21 }
 0x14c   : > { %v15623_v23 = vshll.u32 %v11308_v54, 16  ;;  %3429 = vst [vmem:[#allocation2 + $0x24] sm:$0xf] %v3428_v61  ;;  %3436 = vst [vmem:[#allocation2 + $0x30] sm:$0xf] %v3435_v0  ;;  %v3456_v37 = vsel %vm11543_vm8, %v11328_v6, %v3455_v29  ;;  %v15624_v54 = vrot.slane %v11195_v53, %v10952_v38  ;;  %v542_v31 = vsel %vm11129_vm4, 0, %v541_v63 }
 0x14d   : > { %3443 = vst [vmem:[#allocation2 + $0x3c] sm:$0xf] %v3442_v51  ;;  %v3462_v44 = vld [vmem:[#allocation2 + $0x60] sm:$0xf]  ;;  %v3469_v56 = vld [vmem:[#allocation2 + $0x6c] sm:$0xf]  ;;  %1565 = vrot.lane.b32.xlu1 %v15627_v50, %s10801_s21 }
 0x14e   : > { %v3361_v34 = vor.u32 %v15623_v23, %v11454_v19  ;;  %v3476_v18 = vld [vmem:[#allocation2 + $0x78] sm:$0xf]  ;;  %561 = vst [vmem:[#allocation3 + $0x60] sm:$0x1] %v560_v15  ;;  %1563 = vrot.lane.b32.xlu0 %v15624_v54, %s10801_s21  ;;  %15625 = vst [vmem:[#allocation69_spill] sm:$0xff] %v11610_v2  ;;  %v3463_v20 = vsel %vm11543_vm8, %v11331_v24, %v3462_v44  ;;  %v3470_v6 = vsel %vm11543_vm8, %v11342_v27, %v3469_v56  ;;  %v15632_v57 = vld [vmem:[#allocation54_spill] sm:$0xff] }
 0x14f   : > { %3450 = vst [vmem:[#allocation2 + $0x48] sm:$0xf] %v3449_v36  ;;  %3457 = vst [vmem:[#allocation2 + $0x54] sm:$0xf] %v3456_v37  ;;  %v3477_v42 = vsel %vm11543_vm8, %v11345_v49, %v3476_v18  ;;  %v3483_v26 = vld [vmem:[#allocation2 + $0x84] sm:$0xf]  ;;  %v1478_v63 = vrot.slane %v15632_v57, %v10952_v38  ;;  %v1490_v15 = vrot.slane %v11593_v43, %v10952_v38 }
 0x150   : > { %v3490_v9 = vld [vmem:[#allocation2 + $0x90] sm:$0xf]  ;;  %v3497_v25 = vld [vmem:[#allocation2 + $0x9c] sm:$0xf]  ;;  %15626 = vst [vmem:[#allocation70_spill] sm:$0xff] %v11623_v22  ;;  %v3484_v24 = vsel %vm11543_vm8, %v11348_v3, %v3483_v26  ;;  %15628 = vst [vmem:[#allocation71_spill] sm:$0xff] %v11651_v39  ;;  %v11685_v36 = vcombine.high %v11173_v35, %v11173_v35  ;;  %v11689_v37 = vcombine.high %v11000_v58, %v11000_v58 }
 0x151   : > { %3464 = vst [vmem:[#allocation2 + $0x60] sm:$0xf] %v3463_v20  ;;  %3471 = vst [vmem:[#allocation2 + $0x6c] sm:$0xf] %v3470_v6  ;;  %v3491_v27 = vsel %vm11543_vm8, %v11360_v32, %v3490_v9  ;;  %v3498_v49 = vsel %vm11543_vm8, %v11374_v33, %v3497_v25  ;;  %v3504_v60 = vld [vmem:[#allocation2 + $0xa8] sm:$0xf]  ;;  %v1494_v18 = vrot.slane %v11610_v2, %v10952_v38 }
 0x152   : > { %3478 = vst [vmem:[#allocation2 + $0x78] sm:$0xf] %v3477_v42  ;;  %v3511_v5 = vld [vmem:[#allocation2 + $0xb4] sm:$0xf]  ;;  %v3518_v7 = vld [vmem:[#allocation2 + $0xc0] sm:$0xf]  ;;  %v3505_v3 = vsel %vm11543_vm8, %v11561_v46, %v3504_v60  ;;  %v11655_v46 = vcombine.high %v11148_v17, %v11148_v17 }
 0x153   : > { %3485 = vst [vmem:[#allocation2 + $0x84] sm:$0xf] %v3484_v24  ;;  %3492 = vst [vmem:[#allocation2 + $0x90] sm:$0xf] %v3491_v27  ;;  %v3512_v32 = vsel %vm11543_vm8, %v11566_v47, %v3511_v5  ;;  %v3519_v33 = vsel %vm11543_vm8, %v11571_v45, %v3518_v7  ;;  %v3525_v14 = vld [vmem:[#allocation2 + $0xcc] sm:$0xf] }
 0x154   : > { %3499 = vst [vmem:[#allocation2 + $0x9c] sm:$0xf] %v3498_v49  ;;  %v565_v12 = vld [vmem:[#allocation3 + $0x78] sm:$0x1]  ;;  %15629 = vst [vmem:[#allocation72_spill] sm:$0xff] %v11655_v46  ;;  %v3526_v47 = vsel %vm11543_vm8, %v3361_v34, %v3525_v14  ;;  %v15630_v41 = vld [vmem:[#allocation8_spill] sm:$0xff] }
 0x155   : > { %3506 = vst [vmem:[#allocation2 + $0xa8] sm:$0xf] %v3505_v3  ;;  %3513 = vst [vmem:[#allocation2 + $0xb4] sm:$0xf] %v3512_v32  ;;  %v566_v45 = vsel %vm11129_vm4, 0, %v565_v12  ;;  %v15631_v13 = vrot.slane %v15630_v41, %v10952_v38  ;;  %v15633_v40 = vld [vmem:[#allocation13_spill] sm:$0xff]  ;;  %v11701_v6 = vcombine.high %v15630_v41, %v15630_v41 }
 0x156   : > { %3520 = vst [vmem:[#allocation2 + $0xc0] sm:$0xf] %v3519_v33  ;;  %543 = vst [vmem:[#allocation3 + $0x18] sm:$0x1] %v542_v31  ;;  %v1498_v61 = vrot.slane %v15633_v40, %v10952_v38  ;;  %v15634_v0 = vld [vmem:[#allocation42_spill] sm:$0xff]  ;;  %v15636_v59 = vld [vmem:[#allocation40_spill] sm:$0xff]  ;;  %v11745_v12 = vcombine.high %v15633_v40, %v15633_v40 }
 0x157   : > { %1567 = vrot.lane.b32.xlu0 %v15631_v13, %s10801_s21  ;;  %v11671_v51 = vcombine.high %v15634_v0, %v15634_v0  ;;  %v11675_v29 = vcombine.high %v15636_v59, %v15636_v59  ;;  %3527 = vst [vmem:[#allocation2 + $0xcc] sm:$0xf] %v3526_v47  ;;  %567 = vst [vmem:[#allocation3 + $0x78] sm:$0x1] %v566_v45  ;;  %v15638_v23 = vld [vmem:[#allocation48_spill] sm:$0xff]  ;;  %v15639_v44 = vld [vmem:[#allocation23_spill] sm:$0xff] }
 0x158   : > { %v11681_v34 = vcombine.high %v15638_v23, %v15638_v23  ;;  %v15640_v56 = vrot.slane %v15639_v44, %v10952_v38  ;;  %v15641_v54 = vld [vmem:[#allocation25_spill] sm:$0xff]  ;;  %15642 = vst [vmem:[#allocation75_spill] sm:$0xff] %v11701_v6  ;;  %v11705_v42 = vcombine.high %v15639_v44, %v15639_v44  ;;  %v15644_v24 = vld [vmem:[#allocation11_spill] sm:$0xff]  ;;  %v15647_v7 = vld [vmem:[#allocation28_spill] sm:$0xff] }
 0x159   : > { %15635 = vst [vmem:[#allocation73_spill] sm:$0xff] %v11671_v51  ;;  %15637 = vst [vmem:[#allocation74_spill] sm:$0xff] %v11675_v29  ;;  %v1502_v20 = vrot.slane %v15641_v54, %v10952_v38  ;;  %v15645_v49 = vld [vmem:[#allocation53_spill] sm:$0xff]  ;;  %v15648_v32 = vld [vmem:[#allocation16_spill] sm:$0xff]  ;;  %v11749_v47 = vcombine.high %v15641_v54, %v15641_v54 }
 0x15a   : > { %1569 = vrot.lane.b32.xlu1 %v15640_v56, %s10801_s21  ;;  %15643 = vst [vmem:[#allocation76_spill] sm:$0xff] %v11705_v42  ;;  %v15646_v60 = vrot.slane %v15645_v49, %v10952_v38  ;;  %v3069_v14 = vld [vmem:[%s10901_s28 + $0x4] sm:$0xf]  ;;  %v15649_v45 = vld [vmem:[#allocation30_spill] sm:$0xff]  ;;  %15650 = vst [vmem:[#allocation16_spill] sm:$0xff] %v11745_v12 }
 0x15b   : > { %v3071_v56 = vld [vmem:[%s10901_s28 + $0xc] sm:$0xf]  ;;  %15651 = vst [vmem:[#allocation30_spill] sm:$0xff] %v11749_v47  ;;  %v3075_v3 = vld [vmem:[%s10901_s28 + $0x1c] sm:$0xf]  ;;  %v15652_v13 = vld [vmem:[#allocation55_spill] sm:$0xff] }
 0x15c   : > { %1619 = vrot.lane.b32.xlu0 %v15646_v60, %s10801_s21  ;;  %v3073_v60 = vld [vmem:[%s10901_s28 + $0x14] sm:$0xf]  ;;  %v3109_v27 = vshrl.u32 %v3069_v14, 16  ;;  %v3112_v5 = vshll.u32 %v3069_v14, 16  ;;  %v3077_v33 = vld [vmem:[%s10901_s28 + $0x24] sm:$0xf] }
 0x15d   : > { %v3126_v31 = vshrl.u32 %v3071_v56, 16  ;;  %v3129_v9 = vshll.u32 %v3071_v56, 16  ;;  %v15654_v26 = vld [vmem:[#allocation57_spill] sm:$0xff]  ;;  %v3143_v40 = vshrl.u32 %v3073_v60, 16  ;;  %v3146_v54 = vshll.u32 %v3073_v60, 16  ;;  %v15655_v23 = vld [vmem:[#allocation58_spill] sm:$0xff] }
 0x15e   : > { %1621 = vrot.lane.b32.xlu1 %v1478_v63, %s10801_s21  ;;  %v15653_v63 = vld [vmem:[#allocation56_spill] sm:$0xff]  ;;  %v11757_v58 = vrot.slane %v3109_v27, 7  ;;  %v3160_v50 = vshrl.u32 %v3075_v3, 16  ;;  %v15658_v2 = vld [vmem:[#allocation59_spill] sm:$0xff]  ;;  %v3079_v43 = vld [vmem:[%s10901_s28 + $0x2c] sm:$0xf] }
 0x15f   : > { %v11761_v14 = vrot.slane %v3126_v31, 7  ;;  %v11763_v25 = vrot.slane %v3143_v40, 7  ;;  %v3177_v41 = vshrl.u32 %v3077_v33, 16  ;;  %v3083_v56 = vld [vmem:[%s10901_s28 + $0x3c] sm:$0xf]  ;;  %v3194_v49 = vshrl.u32 %v3079_v43, 16 }
 0x160   : > { %1627 = vrot.lane.b32.xlu0 %v1490_v15, %s10801_s21  ;;  %v3163_v15 = vshll.u32 %v3075_v3, 16  ;;  %v11768_v44 = vor.u32 %v3112_v5, %v11757_v58  ;;  %v11771_v60 = vrot.slane %v3160_v50, 7  ;;  %v15661_v57 = vld [vmem:[#allocation60_spill] sm:$0xff]  ;;  %v15662_v21 = vld [vmem:[#allocation61_spill] sm:$0xff]  ;;  %v3228_v35 = vshrl.u32 %v3083_v56, 16  ;;  %v15676_v30 = vld [vmem:[#allocation66_spill] sm:$0xff] }
 0x161   : > { %15656 = vst [vmem:[#allocation55_spill] sm:$0xff] %v11761_v14  ;;  %15657 = vst [vmem:[#allocation56_spill] sm:$0xff] %v11763_v25  ;;  %v11776_v31 = vor.u32 %v3129_v9, %v11761_v14  ;;  %v11780_v3 = vor.u32 %v3146_v54, %v11763_v25  ;;  %v11788_v0 = vrot.slane %v3177_v41, 7  ;;  %v3085_v9 = vld [vmem:[%s10901_s28 + $0x44] sm:$0xf]  ;;  %v3197_v54 = vshll.u32 %v3079_v43, 16 }
 0x162   : > { %1629 = vrot.lane.b32.xlu1 %v1494_v18, %s10801_s21  ;;  %15659 = vst [vmem:[#allocation57_spill] sm:$0xff] %v11771_v60  ;;  %v3081_v18 = vld [vmem:[%s10901_s28 + $0x34] sm:$0xf]  ;;  %v11785_v27 = vor.u32 %v3163_v15, %v11771_v60  ;;  %v15663_v41 = vrot.slane %v11623_v22, %v10952_v38  ;;  %v15665_v43 = vld [vmem:[#allocation62_spill] sm:$0xff]  ;;  %v3231_v53 = vshll.u32 %v3083_v56, 16  ;;  %v3245_v59 = vshrl.u32 %v3085_v9, 16 }
 0x163   : > { %15660 = vst [vmem:[#allocation58_spill] sm:$0xff] %v11788_v0  ;;  %v3211_v55 = vshrl.u32 %v3081_v18, 16  ;;  %v3214_v50 = vshll.u32 %v3081_v18, 16  ;;  %v3248_v18 = vshll.u32 %v3085_v9, 16  ;;  %v15668_v22 = vrot.slane %v11651_v39, %v10952_v38  ;;  %v3091_v48 = vld [vmem:[%s10901_s28 + $0x5c] sm:$0xf] }
 0x164   : > { %1631 = vrot.lane.b32.xlu0 %v1498_v61, %s10801_s21  ;;  %v3180_v61 = vshll.u32 %v3077_v33, 16  ;;  %v11803_v33 = vrot.slane %v3194_v49, 7  ;;  %v11818_v56 = vrot.slane %v3228_v35, 7  ;;  %v11826_v39 = vrot.slane %v3245_v59, 7  ;;  %v3093_v40 = vld [vmem:[%s10901_s28 + $0x64] sm:$0xf] }
 0x165   : > { %v11806_v8 = vrot.slane %v3211_v55, 7  ;;  %v15670_v55 = vld [vmem:[#allocation64_spill] sm:$0xff]  ;;  %v15673_v17 = vld [vmem:[#allocation65_spill] sm:$0xff]  ;;  %v3095_v1 = vld [vmem:[%s10901_s28 + $0x6c] sm:$0xf]  ;;  %v3296_v12 = vshrl.u32 %v3091_v48, 16 }
 0x166   : > { %1633 = vrot.lane.b32.xlu1 %v1502_v20, %s10801_s21  ;;  %v11795_v5 = vor.u32 %v3180_v61, %v11788_v0  ;;  %v3087_v20 = vld [vmem:[%s10901_s28 + $0x4c] sm:$0xf]  ;;  %15664 = vst [vmem:[#allocation59_spill] sm:$0xff] %v11803_v33  ;;  %v15667_v61 = vld [vmem:[#allocation63_spill] sm:$0xff]  ;;  %v11815_v49 = vor.u32 %v3197_v54, %v11803_v33  ;;  %15669 = vst [vmem:[#allocation61_spill] sm:$0xff] %v11818_v56  ;;  %v15672_v54 = vrot.slane %v11655_v46, %v10952_v38 }
 0x167   : > { %15666 = vst [vmem:[#allocation60_spill] sm:$0xff] %v11806_v8  ;;  %v11823_v15 = vor.u32 %v3214_v50, %v11806_v8  ;;  %15671 = vst [vmem:[#allocation62_spill] sm:$0xff] %v11826_v39  ;;  %v11834_v35 = vor.u32 %v3231_v53, %v11818_v56  ;;  %v3265_v50 = vshll.u32 %v3087_v20, 16  ;;  %v11840_v59 = vor.u32 %v3248_v18, %v11826_v39  ;;  %v11852_v42 = vld [vmem:[%s10901_s28 + $0x7c] sm:$0xf] }
 0x168   : > { %1523 = vrot.lane.b32.xlu0 %v15663_v41, %s10801_s21  ;;  %v3089_v41 = vld [vmem:[%s10901_s28 + $0x54] sm:$0xf]  ;;  %v15675_v53 = vrot.slane %v11671_v51, %v10952_v38  ;;  %v3299_v10 = vshll.u32 %v3091_v48, 16  ;;  %v3313_v48 = vshrl.u32 %v3093_v40, 16  ;;  %v479_v56 = vld [vmem:[#allocation2 + $0x20] sm:$0x1] }
 0x169   : > { %v3279_v46 = vshrl.u32 %v3089_v41, 16  ;;  %v3282_v47 = vshll.u32 %v3089_v41, 16  ;;  %v15678_v41 = vrot.slane %v15644_v24, %v10952_v38  ;;  %v482_v39 = vld [vmem:[#allocation2 + $0x2c] sm:$0x1]  ;;  %v485_v8 = vld [vmem:[#allocation2 + $0x38] sm:$0x1] }
 0x16a   : > { %1525 = vrot.lane.b32.xlu1 %v15668_v22, %s10801_s21  ;;  %v3262_v22 = vshrl.u32 %v3087_v20, 16  ;;  %v3316_v20 = vshll.u32 %v3093_v40, 16  ;;  %v488_v33 = vld [vmem:[#allocation2 + $0x44] sm:$0x1]  ;;  %v11880_v51 = vrot.slane %v3313_v48, 7 }
 0x16b   : > { %v11858_v9 = vrot.slane %v3279_v46, 7  ;;  %v491_v46 = vld [vmem:[#allocation2 + $0x50] sm:$0x1]  ;;  %v497_v6 = vld [vmem:[#allocation2 + $0x68] sm:$0x1]  ;;  %v489_v14 = vsel %vm11509_vm7, 0, %v488_v33 }
 0x16c   : > { %1531 = vrot.lane.b32.xlu0 %v15672_v54, %s10801_s21  ;;  %v11843_v52 = vrot.slane %v3262_v22, 7  ;;  %v3097_v54 = vld [vmem:[%s10901_s28 + $0x74] sm:$0xf]  ;;  %v3330_v22 = vshrl.u32 %v3095_v1, 16  ;;  %15681 = vst [vmem:[#allocation66_spill] sm:$0xff] %v11880_v51  ;;  %v11891_v48 = vor.u32 %v3316_v20, %v11880_v51  ;;  %v480_v20 = vsel %vm11509_vm7, 0, %v479_v56 }
 0x16d   : > { %15677 = vst [vmem:[#allocation64_spill] sm:$0xff] %v11858_v9  ;;  %v3347_v24 = vshrl.u32 %v3097_v54, 16  ;;  %v3350_v0 = vshll.u32 %v3097_v54, 16  ;;  %v506_v54 = vld [vmem:[#allocation2 + $0x8c] sm:$0x1] }
 0x16e   : > { %15674 = vst [vmem:[#allocation63_spill] sm:$0xff] %v11843_v52  ;;  %1533 = vrot.lane.b32.xlu1 %v15675_v53, %s10801_s21  ;;  %v11855_v18 = vor.u32 %v3265_v50, %v11843_v52  ;;  %v11865_v53 = vrot.slane %v3296_v12, 7  ;;  %v11869_v50 = vor.u32 %v3282_v47, %v11858_v9  ;;  %v3333_v52 = vshll.u32 %v3095_v1, 16  ;;  %v494_v9 = vld [vmem:[#allocation2 + $0x5c] sm:$0x1] }
 0x16f   : > { %v15680_v12 = vrot.slane %v15647_v7, %v10952_v38  ;;  %v11883_v1 = vrot.slane %v3330_v22, 7  ;;  %v500_v7 = vld [vmem:[#allocation2 + $0x74] sm:$0x1]  ;;  %v3367_v22 = vshll.u32 %v11852_v42, 16  ;;  %v503_v47 = vld [vmem:[#allocation2 + $0x80] sm:$0x1] }
 0x170   : > { %1535 = vrot.lane.b32.xlu0 %v15678_v41, %s10801_s21  ;;  %15679 = vst [vmem:[#allocation65_spill] sm:$0xff] %v11865_v53  ;;  %v11877_v40 = vor.u32 %v3299_v10, %v11865_v53  ;;  %v15683_v10 = vrot.slane %v11675_v29, %v10952_v38  ;;  %v3364_v41 = vshrl.u32 %v11852_v42, 16  ;;  %v509_v53 = vld [vmem:[#allocation2 + $0x98] sm:$0x1]  ;;  %v512_v60 = vld [vmem:[#allocation2 + $0xa4] sm:$0x1]  ;;  %v15684_v42 = vrot.slane %v11681_v34, %v10952_v38 }
 0x171   : > { %15682 = vst [vmem:[#allocation77_spill] sm:$0xff] %v11883_v1  ;;  %v11897_v25 = vor.u32 %v3333_v52, %v11883_v1  ;;  %v11900_v29 = vrot.slane %v3347_v24, 7  ;;  %481 = vst [vmem:[#allocation2 + $0x20] sm:$0x1] %v480_v20  ;;  %v483_v52 = vsel %vm11509_vm7, 0, %v482_v39  ;;  %v486_v24 = vsel %vm11509_vm7, 0, %v485_v8 }
 0x172   : > { %1537 = vrot.lane.b32.xlu1 %v15680_v12, %s10801_s21  ;;  %v518_v12 = vld [vmem:[#allocation2 + $0xbc] sm:$0x1]  ;;  %v11908_v51 = vrot.slane %v3364_v41, 7  ;;  %v521_v56 = vld [vmem:[#allocation2 + $0xc8] sm:$0x1]  ;;  %v492_v41 = vsel %vm11509_vm7, 0, %v491_v46  ;;  %v15685_v8 = vrot.slane %v11685_v36, %v10952_v38 }
 0x173   : > { %v11917_v1 = vor.u32 %v3350_v0, %v11900_v29  ;;  %v3354_v4 = vrot.slane %v11900_v29, 4  ;;  %484 = vst [vmem:[#allocation2 + $0x2c] sm:$0x1] %v483_v52  ;;  %487 = vst [vmem:[#allocation2 + $0x38] sm:$0x1] %v486_v24  ;;  %v495_v39 = vsel %vm11509_vm7, 0, %v494_v9 }
 0x174   : > { %1587 = vrot.lane.b32.xlu0 %v15683_v10, %s10801_s21  ;;  %v515_v10 = vld [vmem:[#allocation2 + $0xb0] sm:$0x1]  ;;  %490 = vst [vmem:[#allocation2 + $0x44] sm:$0x1] %v489_v14  ;;  %v524_v20 = vld [vmem:[#allocation2 + $0xd4] sm:$0x1]  ;;  %v11929_v0 = vor.u32 %v3367_v22, %v11908_v51 }
 0x175   : > { %v3371_v33 = vrot.slane %v11908_v51, 4  ;;  %493 = vst [vmem:[#allocation2 + $0x50] sm:$0x1] %v492_v41  ;;  %496 = vst [vmem:[#allocation2 + $0x5c] sm:$0x1] %v495_v39  ;;  %v498_v14 = vsel %vm11509_vm7, 0, %v497_v6  ;;  %v15686_v6 = vrot.slane %v11689_v37, %v10952_v38 }
 0x176   : > { %1589 = vrot.lane.b32.xlu1 %v15684_v42, %s10801_s21  ;;  %v501_v46 = vsel %vm11509_vm7, 0, %v500_v7  ;;  %v625_v9 = vld [vmem:[#allocation3 + $0xb0] sm:$0x1]  ;;  %499 = vst [vmem:[#allocation2 + $0x68] sm:$0x1] %v498_v14  ;;  %v504_v42 = vsel %vm11509_vm7, 0, %v503_v47  ;;  %v15692_v14 = vrot.slane %v15648_v32, %v10952_v38 }
 0x177   : > { %502 = vst [vmem:[#allocation2 + $0x74] sm:$0x1] %v501_v46  ;;  %v507_v22 = vsel %vm11509_vm7, 0, %v506_v54  ;;  %v510_v52 = vsel %vm11509_vm7, 0, %v509_v53  ;;  %v513_v24 = vsel %vm11509_vm7, 0, %v512_v60  ;;  %v516_v7 = vsel %vm11509_vm7, 0, %v515_v10 }
 0x178   : > { %1595 = vrot.lane.b32.xlu0 %v15685_v8, %s10801_s21  ;;  %505 = vst [vmem:[#allocation2 + $0x80] sm:$0x1] %v504_v42  ;;  %508 = vst [vmem:[#allocation2 + $0x8c] sm:$0x1] %v507_v22  ;;  %v519_v47 = vsel %vm11509_vm7, 0, %v518_v12  ;;  %v522_v53 = vsel %vm11509_vm7, 0, %v521_v56 }
 0x179   : > { %511 = vst [vmem:[#allocation2 + $0x98] sm:$0x1] %v510_v52  ;;  %514 = vst [vmem:[#allocation2 + $0xa4] sm:$0x1] %v513_v24  ;;  %v525_v60 = vsel %vm11509_vm7, 0, %v524_v20  ;;  %v626_v10 = vsel %vm11509_vm7, 0, %v625_v9 }
 0x17a   : > { %1597 = vrot.lane.b32.xlu1 %v15686_v6, %s10801_s21  ;;  %517 = vst [vmem:[#allocation2 + $0xb0] sm:$0x1] %v516_v7  ;;  %520 = vst [vmem:[#allocation2 + $0xbc] sm:$0x1] %v519_v47  ;;  %v15689_v12 = vrot.slane %v15652_v13, 4  ;;  %v15690_v41 = vrot.slane %v15653_v63, 4 }
 0x17b   : > { %523 = vst [vmem:[#allocation2 + $0xc8] sm:$0x1] %v522_v53  ;;  %526 = vst [vmem:[#allocation2 + $0xd4] sm:$0x1] %v525_v60  ;;  %v15691_v20 = vrot.slane %v15654_v26, 4  ;;  %v15694_v63 = vrot.slane %v15658_v2, 4 }
 0x17c   : > { %v3115_v56 = vsel %vm11958_vm10, %v15689_v12, %v11768_v44  ;;  %v3132_v39 = vsel %vm11958_vm10, %v15690_v41, %v11776_v31  ;;  %1599 = vrot.lane.b32.xlu0 %v15692_v14, %s10801_s21  ;;  %627 = vst [vmem:[#allocation3 + $0xb0] sm:$0x1] %v626_v10  ;;  %v15693_v44 = vrot.slane %v15655_v23, 4  ;;  %v15695_v31 = vrot.slane %v15661_v57, 4  ;;  %v3424_v9 = vld [vmem:[#allocation2 + $0x20] sm:$0x1] }
 0x17d   : > { %v3149_v8 = vsel %vm11958_vm10, %v15691_v20, %v11780_v3  ;;  %v3183_v26 = vsel %vm11958_vm10, %v15694_v63, %v11795_v5  ;;  %v15696_v46 = vrot.slane %v15662_v21, 4  ;;  %3423 = vst.msk [vmem:[#allocation2 + $0x1c] sm:$0xf] %vm410_vm5, %v3115_v56  ;;  %3430 = vst.msk [vmem:[#allocation2 + $0x28] sm:$0xf] %vm410_vm5, %v3132_v39  ;;  %v15697_v2 = vrot.slane %v15665_v43, 4 }
 0x17e   : > { %v3166_v13 = vsel %vm11958_vm10, %v15693_v44, %v11785_v27  ;;  %v3200_v3 = vsel %vm11958_vm10, %v15695_v31, %v11815_v49  ;;  %3437 = vst.msk [vmem:[#allocation2 + $0x34] sm:$0xf] %vm410_vm5, %v3149_v8  ;;  %v15698_v27 = vrot.slane %v15667_v61, 4  ;;  %v15699_v5 = vrot.slane %v15670_v55, 4  ;;  %3451 = vst.msk [vmem:[#allocation2 + $0x4c] sm:$0xf] %vm410_vm5, %v3183_v26 }
 0x17f   : > { %v3217_v23 = vsel %vm11958_vm10, %v15696_v46, %v11823_v15  ;;  %v3234_v57 = vsel %vm11958_vm10, %v15697_v2, %v11834_v35  ;;  %v15700_v49 = vrot.slane %v15673_v17, 4  ;;  %3444 = vst.msk [vmem:[#allocation2 + $0x40] sm:$0xf] %vm410_vm5, %v3166_v13  ;;  %3458 = vst.msk [vmem:[#allocation2 + $0x58] sm:$0xf] %vm410_vm5, %v3200_v3  ;;  %v15701_v55 = vrot.slane %v15649_v45, %v10952_v38  ;;  %v15711_v47 = vld [vmem:[#allocation56_spill] sm:$0xff] }
 0x180   : > { %v3251_v21 = vsel %vm11958_vm10, %v15698_v27, %v11840_v59  ;;  %v3268_v15 = vsel %vm11958_vm10, %v15699_v5, %v11855_v18  ;;  %3465 = vst.msk [vmem:[#allocation2 + $0x64] sm:$0xf] %vm410_vm5, %v3217_v23  ;;  %v583_v61 = vld [vmem:[#allocation3 + $0xc0] sm:$0x1]  ;;  %v15702_v17 = vrot.slane %v15676_v30, 4  ;;  %v15703_v59 = vrot.slane %v11376_v11, 4 }
 0x181   : > { %v3285_v43 = vsel %vm11958_vm10, %v15700_v49, %v11869_v50  ;;  %1601 = vrot.lane.b32.xlu1 %v15701_v55, %s10801_s21  ;;  %v15704_v50 = vrot.slane %v11392_v62, 4  ;;  %v15705_v22 = vrot.slane %v11452_v16, 4  ;;  %v3431_v52 = vld [vmem:[#allocation2 + $0x2c] sm:$0x1]  ;;  %v3445_v24 = vld [vmem:[#allocation2 + $0x44] sm:$0x1] }
 0x182   : > { %v3302_v35 = vsel %vm11958_vm10, %v15702_v17, %v11877_v40  ;;  %v3319_v18 = vsel %vm11958_vm10, %v15703_v59, %v11891_v48  ;;  %v3438_v40 = vld [vmem:[#allocation2 + $0x38] sm:$0x1]  ;;  %3472 = vst.msk [vmem:[#allocation2 + $0x70] sm:$0xf] %vm410_vm5, %v3234_v57  ;;  %3479 = vst.msk [vmem:[#allocation2 + $0x7c] sm:$0xf] %vm410_vm5, %v3251_v21 }
 0x183   : > { %v3336_v42 = vsel %vm11958_vm10, %v15704_v50, %v11897_v25  ;;  %v3353_v30 = vsel %vm11958_vm10, %v15705_v22, %v11917_v1  ;;  %3486 = vst.msk [vmem:[#allocation2 + $0x88] sm:$0xf] %vm410_vm5, %v3268_v15  ;;  %3493 = vst.msk [vmem:[#allocation2 + $0x94] sm:$0xf] %vm410_vm5, %v3285_v43  ;;  %v15706_v11 = vrot.slane %v11454_v19, 4  ;;  %v15707_v62 = vrot.slane %v11757_v58, 4  ;;  %v12114_v50 = vpop.permute.xlu0 %1543 }
 0x184   : > { %v15709_v48 = vld [vmem:[#allocation55_spill] sm:$0xff]  ;;  %v15712_v53 = vrot.slane %v15711_v47, 4  ;;  %v3459_v19 = vld [vmem:[#allocation2 + $0x5c] sm:$0x1]  ;;  %3500 = vst.msk [vmem:[#allocation2 + $0xa0] sm:$0xf] %vm410_vm5, %v3302_v35 }
 0x185   : > { %v3370_v16 = vsel %vm11958_vm10, %v15706_v11, %v11929_v0  ;;  %v3425_v1 = vsel %vm11129_vm4, %v15707_v62, %v3424_v9  ;;  %v15710_v6 = vrot.slane %v15709_v48, 4  ;;  %v3452_v10 = vld [vmem:[#allocation2 + $0x50] sm:$0x1]  ;;  %3507 = vst.msk [vmem:[#allocation2 + $0xac] sm:$0xf] %vm410_vm5, %v3319_v18  ;;  %v15715_v41 = vld [vmem:[#allocation57_spill] sm:$0xff] }
 0x186   : > { %v3439_v60 = vsel %vm11129_vm4, %v15712_v53, %v3438_v40  ;;  %3514 = vst.msk [vmem:[#allocation2 + $0xb8] sm:$0xf] %vm410_vm5, %v3336_v42  ;;  %3521 = vst.msk [vmem:[#allocation2 + $0xc4] sm:$0xf] %vm410_vm5, %v3353_v30  ;;  %v589_v58 = vld [vmem:[#allocation3 + $0x20] sm:$0x1] }
 0x187   : > { %v3432_v7 = vsel %vm11129_vm4, %v15710_v6, %v3431_v52  ;;  %v547_v0 = vld [vmem:[#allocation3 + $0x30] sm:$0x1]  ;;  %v15713_v12 = vld [vmem:[#allocation75_spill] sm:$0xff]  ;;  %3426 = vst [vmem:[#allocation2 + $0x20] sm:$0x1] %v3425_v1  ;;  %v15716_v39 = vrot.slane %v15715_v41, 4 }
 0x188   : > { %v15714_v56 = vrot.slane %v15713_v12, %v10952_v38  ;;  %3433 = vst [vmem:[#allocation2 + $0x2c] sm:$0x1] %v3432_v7  ;;  %3440 = vst [vmem:[#allocation2 + $0x38] sm:$0x1] %v3439_v60  ;;  %v15717_v8 = vld [vmem:[#allocation58_spill] sm:$0xff]  ;;  %v15719_v13 = vld [vmem:[#allocation59_spill] sm:$0xff] }
 0x189   : > { %v3446_v20 = vsel %vm11129_vm4, %v15716_v39, %v3445_v24  ;;  %v15718_v14 = vrot.slane %v15717_v8, 4  ;;  %v15720_v63 = vrot.slane %v15719_v13, 4  ;;  %v3466_v31 = vld [vmem:[#allocation2 + $0x68] sm:$0x1]  ;;  %v3473_v3 = vld [vmem:[#allocation2 + $0x74] sm:$0x1] }
 0x18a   : > { %1571 = vrot.lane.b32.xlu0 %v15714_v56, %s10801_s21  ;;  %3528 = vst.msk [vmem:[#allocation2 + $0xd0] sm:$0xf] %vm410_vm5, %v3370_v16  ;;  %v584_v46 = vsel %vm11129_vm4, 0, %v583_v61  ;;  %v601_v23 = vld [vmem:[#allocation3 + $0x50] sm:$0x1]  ;;  %v15721_v27 = vld [vmem:[#allocation11_spill] sm:$0xff] }
 0x18b   : > { %v3453_v44 = vsel %vm11129_vm4, %v15718_v14, %v3452_v10  ;;  %v3460_v26 = vsel %vm11129_vm4, %v15720_v63, %v3459_v19  ;;  %v613_v2 = vld [vmem:[#allocation3 + $0x80] sm:$0x1]  ;;  %v571_v57 = vld [vmem:[#allocation3 + $0x90] sm:$0x1]  ;;  %v12100_v21 = vcombine.high %v15721_v27, %v15721_v27  ;;  %v15722_v5 = vld [vmem:[#allocation28_spill] sm:$0xff]  ;;  %v602_v29 = vsel %vm11509_vm7, 0, %v601_v23 }
 0x18c   : > { %v12104_v15 = vcombine.high %v15722_v5, %v15722_v5  ;;  %3447 = vst [vmem:[#allocation2 + $0x44] sm:$0x1] %v3446_v20  ;;  %3454 = vst [vmem:[#allocation2 + $0x50] sm:$0x1] %v3453_v44  ;;  %v15723_v49 = vld [vmem:[#allocation60_spill] sm:$0xff]  ;;  %v15725_v61 = vld [vmem:[#allocation61_spill] sm:$0xff] }
 0x18d   : > { %3461 = vst [vmem:[#allocation2 + $0x5c] sm:$0x1] %v3460_v26  ;;  %v15724_v43 = vrot.slane %v15723_v49, 4  ;;  %v15726_v55 = vrot.slane %v15725_v61, 4  ;;  %v3480_v35 = vld [vmem:[#allocation2 + $0x80] sm:$0x1] }
 0x18e   : > { %v3487_v59 = vld [vmem:[#allocation2 + $0x8c] sm:$0x1]  ;;  %v3494_v18 = vld [vmem:[#allocation2 + $0x98] sm:$0x1]  ;;  %585 = vst [vmem:[#allocation3 + $0xc0] sm:$0x1] %v584_v46  ;;  %v1546_v46 = vpop.permute.xlu1 %1545 }
 0x18f   : > { %v3467_v9 = vsel %vm11129_vm4, %v15724_v43, %v3466_v31  ;;  %v3474_v17 = vsel %vm11129_vm4, %v15726_v55, %v3473_v3  ;;  %v15727_v42 = vld [vmem:[#allocation76_spill] sm:$0xff]  ;;  %v15730_v40 = vld [vmem:[#allocation62_spill] sm:$0xff]  ;;  %v15732_v16 = vld [vmem:[#allocation63_spill] sm:$0xff]  ;;  %v548_v61 = vsel %vm11129_vm4, 0, %v547_v0  ;;  %v572_v51 = vsel %vm11129_vm4, 0, %v571_v57 }
 0x190   : > { %v15728_v22 = vrot.slane %v15727_v42, %v10952_v38  ;;  %v15729_v30 = vld [vmem:[#allocation16_spill] sm:$0xff]  ;;  %3468 = vst [vmem:[#allocation2 + $0x68] sm:$0x1] %v3467_v9  ;;  %3475 = vst [vmem:[#allocation2 + $0x74] sm:$0x1] %v3474_v17  ;;  %v15731_v24 = vrot.slane %v15730_v40, 4  ;;  %v12172_v0 = vcombine.high %v15648_v32, %v15648_v32  ;;  %v1318_v17 = vrot.slane %v12104_v15, %v10952_v38 }
 0x191   : > { %v1506_v52 = vrot.slane %v15729_v30, %v10952_v38  ;;  %v15733_v62 = vrot.slane %v15732_v16, 4  ;;  %v15734_v48 = vld [vmem:[#allocation64_spill] sm:$0xff]  ;;  %v3501_v47 = vld [vmem:[#allocation2 + $0xa4] sm:$0x1]  ;;  %v3508_v53 = vld [vmem:[#allocation2 + $0xb0] sm:$0x1] }
 0x192   : > { %1573 = vrot.lane.b32.xlu1 %v15728_v22, %s10801_s21  ;;  %v3481_v11 = vsel %vm11129_vm4, %v15731_v24, %v3480_v35  ;;  %v15735_v6 = vrot.slane %v15734_v48, 4  ;;  %v3515_v60 = vld [vmem:[#allocation2 + $0xbc] sm:$0x1]  ;;  %v15736_v10 = vld [vmem:[#allocation30_spill] sm:$0xff]  ;;  %v15737_v56 = vld [vmem:[#allocation65_spill] sm:$0xff]  ;;  %v590_v9 = vsel %vm11509_vm7, 0, %v589_v58  ;;  %v1314_v58 = vrot.slane %v12100_v21, %v10952_v38  ;;  %v1610_v55 = vpop.permute.xlu1 %1609 }
 0x193   : > { %v3488_v1 = vsel %vm11129_vm4, %v15733_v62, %v3487_v59  ;;  %v1510_v19 = vrot.slane %v15736_v10, %v10952_v38  ;;  %3482 = vst [vmem:[#allocation2 + $0x80] sm:$0x1] %v3481_v11  ;;  %v15738_v41 = vrot.slane %v15737_v56, 4  ;;  %v15739_v20 = vld [vmem:[#allocation66_spill] sm:$0xff]  ;;  %v15741_v44 = vld [vmem:[#allocation77_spill] sm:$0xff]  ;;  %1635 = vrot.lane.b32.xlu0 %v1506_v52, %s10801_s21  ;;  %v12183_v35 = vcombine.high %v15649_v45, %v15649_v45 }
 0x194   : > { %v3495_v7 = vsel %vm11129_vm4, %v15735_v6, %v3494_v18  ;;  %3489 = vst [vmem:[#allocation2 + $0x8c] sm:$0x1] %v3488_v1  ;;  %v15740_v8 = vrot.slane %v15739_v20, 4  ;;  %v15742_v13 = vrot.slane %v15741_v44, 4  ;;  %v3522_v26 = vld [vmem:[#allocation2 + $0xc8] sm:$0x1]  ;;  %v1442_v22 = vrot.slane %v12172_v0, %v10952_v38 }
 0x195   : > { %3496 = vst [vmem:[#allocation2 + $0x98] sm:$0x1] %v3495_v7  ;;  %v3502_v39 = vsel %vm11129_vm4, %v15738_v41, %v3501_v47  ;;  %v3529_v31 = vld [vmem:[#allocation2 + $0xd4] sm:$0x1]  ;;  %v607_v3 = vld [vmem:[#allocation3 + $0x68] sm:$0x1]  ;;  %v3523_v49 = vsel %vm11129_vm4, %v3354_v4, %v3522_v26  ;;  %v1446_v16 = vrot.slane %v12183_v35, %v10952_v38 }
 0x196   : > { %v3509_v14 = vsel %vm11129_vm4, %v15740_v8, %v3508_v53  ;;  %v3516_v63 = vsel %vm11129_vm4, %v15742_v13, %v3515_v60  ;;  %3503 = vst [vmem:[#allocation2 + $0xa4] sm:$0x1] %v3502_v39  ;;  %v3530_v43 = vsel %vm11129_vm4, %v3371_v33, %v3529_v31  ;;  %3524 = vst [vmem:[#allocation2 + $0xc8] sm:$0x1] %v3523_v49  ;;  %v614_v4 = vsel %vm11509_vm7, 0, %v613_v2  ;;  %v1608_v33 = vpop.permute.xlu0 %1607  ;;  %v12190_v11 = vpop.permute.xlu1 %1515  ;;  %v15743_v48 = vld [vmem:[#allocation9_spill] sm:$0xff] }
 0x197   : > { %3510 = vst [vmem:[#allocation2 + $0xb0] sm:$0x1] %v3509_v14  ;;  %3517 = vst [vmem:[#allocation2 + $0xbc] sm:$0x1] %v3516_v63  ;;  %1637 = vrot.lane.b32.xlu1 %v1510_v19, %s10801_s21  ;;  %v608_v23 = vsel %vm11509_vm7, 0, %v607_v3  ;;  %1539 = vrot.lane.b32.xlu0 %v1314_v58, %s10801_s21  ;;  %v1720_v6 = vsel %vm1703_vm11, %v15743_v48, %v12114_v50  ;;  %v15744_v38 = vld [vmem:[#allocation14_spill] sm:$0xff] }
 0x198   : > { %3531 = vst [vmem:[#allocation2 + $0xd4] sm:$0x1] %v3530_v43  ;;  %591 = vst [vmem:[#allocation3 + $0x20] sm:$0x1] %v590_v9  ;;  %v631_v2 = vld [vmem:[#allocation3 + $0xc8] sm:$0x1]  ;;  %v1721_v60 = vsel %vm1703_vm11, %v15744_v38, %v1546_v46 }
 0x199   : > { %549 = vst [vmem:[#allocation3 + $0x30] sm:$0x1] %v548_v61  ;;  %603 = vst [vmem:[#allocation3 + $0x50] sm:$0x1] %v602_v29  ;;  %v632_v57 = vsel %vm11509_vm7, 0, %v631_v2  ;;  %v15745_v56 = vld [vmem:[#allocation10_spill] sm:$0xff]  ;;  %v2096_v20 = vcombine.low %v1720_v6, %v1721_v60 }
 0x19a   : > { %615 = vst [vmem:[#allocation3 + $0x80] sm:$0x1] %v614_v4  ;;  %573 = vst [vmem:[#allocation3 + $0x90] sm:$0x1] %v572_v51  ;;  %v595_v59 = vld [vmem:[#allocation3 + $0x38] sm:$0x1]  ;;  %v1512_v18 = vpop.permute.xlu0 %1511  ;;  %v12201_v53 = vpop.permute.xlu1 %1577  ;;  %v1752_v41 = vsel %vm1703_vm11, %v15745_v56, %v1608_v33 }
 0x19b   : > { %609 = vst [vmem:[#allocation3 + $0x68] sm:$0x1] %v608_v23  ;;  %633 = vst [vmem:[#allocation3 + $0xc8] sm:$0x1] %v632_v57  ;;  %1541 = vrot.lane.b32.xlu1 %v1318_v17, %s10801_s21  ;;  %v596_v52 = vsel %vm11509_vm7, 0, %v595_v59  ;;  %1603 = vrot.lane.b32.xlu0 %v1442_v22, %s10801_s21  ;;  %v15746_v50 = vld [vmem:[#allocation7_spill] sm:$0xff] }
 0x19c   : > { %597 = vst [vmem:[#allocation3 + $0x38] sm:$0x1] %v596_v52  ;;  %v10803_v40 = vmov 1983009808   ;;  %v619_v1 = vld [vmem:[#allocation3 + $0x98] sm:$0x1] }
 0x19d   : > { %v1963_v24 = vunpack.c.l.s4 %v10803_v40  ;;  %v620_v7 = vsel %vm11509_vm7, 0, %v619_v1  ;;  %v15747_v14 = vld [vmem:[#allocation12_spill] sm:$0xff]  ;;  %v15748_v13 = vld [vmem:[#allocation21_spill] sm:$0xff]  ;;  %v15749_v26 = vld [vmem:[#allocation22_spill] sm:$0xff] }
 0x19e   : > { %v1576_v62 = vpop.permute.xlu0 %1575  ;;  %621 = vst [vmem:[#allocation3 + $0x98] sm:$0x1] %v620_v7  ;;  %v1550_v8 = vpop.permute.xlu1 %1549  ;;  %v1753_v44 = vsel %vm1703_vm11, %v15747_v14, %v1610_v55  ;;  %v15750_v49 = vld [vmem:[#allocation15_spill] sm:$0xff]  ;;  %v15754_v7 = vld [vmem:[#allocation24_spill] sm:$0xff] }
 0x19f   : > { %1605 = vrot.lane.b32.xlu1 %v1446_v16, %s10801_s21  ;;  %v1964_v47 = vunpack.c.0.s8 %v1963_v24  ;;  %1864 = vrot.lane.b32.xlu0 %v1720_v6, %s10804_s22  ;;  %v12219_v31 = vsel %vm1703_vm11, %v15749_v26, %v1550_v8  ;;  %v1704_v43 = vsel %vm1703_vm11, %v15750_v49, %v1512_v18  ;;  %v15751_v33 = vld [vmem:[#allocation19_spill] sm:$0xff]  ;;  %v2368_v17 = vcombine.low %v1752_v41, %v1753_v44  ;;  %v2984_v24 = vld [vmem:[#allocation3 + $0x48] sm:$0xf]  ;;  %v556_v8 = vld [vmem:[#allocation3 + $0x54] sm:$0x1] }
 0x1a0   : > { %v12232_v58 = vsel %vm1703_vm11, %v15751_v33, %v1576_v62  ;;  %v15752_v52 = vld [vmem:[#allocation31_spill] sm:$0xff]  ;;  %v15753_v16 = vld [vmem:[#allocation32_spill] sm:$0xff] }
 0x1a1   : > { %v12210_v39 = vsub.s32 %v1964_v47, %v15746_v50  ;;  %v15756_v14 = vld [vmem:[#allocation27_spill] sm:$0xff] }
 0x1a2   : > { %v1548_v19 = vpop.permute.xlu0 %1547  ;;  %v12226_v61 = vpop.permute.xlu1 %1553  ;;  %v15757_v49 = vld [vmem:[#allocation35_spill] sm:$0xff] }
 0x1a3   : > { %1866 = vrot.lane.b32.xlu1 %v1721_v60, %s10804_s22  ;;  %1928 = vrot.lane.b32.xlu0 %v1752_v41, %s10804_s22  ;;  %v1722_v63 = vsel %vm1703_vm11, %v15748_v13, %v1548_v19  ;;  %v2104_v9 = vrot.slane %v2096_v20, %v12210_v39  ;;  %v2376_v38 = vrot.slane %v2368_v17, %v12210_v39  ;;  %v557_v13 = vsel %vm11129_vm4, 0, %v556_v8  ;;  %v15759_v17 = vld [vmem:[#allocation43_spill] sm:$0xff] }
 0x1a4   : > { %v2097_v46 = vcombine.low %v1722_v63, %v12219_v31  ;;  %558 = vst [vmem:[#allocation3 + $0x54] sm:$0x1] %v557_v13 }
 0x1a6   : > { %v1552_v3 = vpop.permute.xlu0 %1551  ;;  %v2111_v29 = vrot.slane %v2097_v46, %v12210_v39  ;;  %v12234_v23 = vpop.permute.xlu1 %1561 }
 0x1a7   : > { %1930 = vrot.lane.b32.xlu1 %v1753_v44, %s10804_s22  ;;  %1832 = vrot.lane.b32.xlu0 %v1704_v43, %s10804_s22  ;;  %v12251_v47 = vsel %vm1703_vm11, %v15754_v7, %v1552_v3 }
 0x1a8   : > { %v2112_v51 = vcombine.low %v2104_v9, %v2111_v29 }
 0x1aa   : > { %v1560_v4 = vpop.permute.xlu0 %1559  ;;  %v9740_v2 = vpack.c.bf16 %v2112_v51, %v2112_v51  ;;  %v1614_v59 = vpop.permute.xlu1 %1613 }
 0x1ab   : > { %1896 = vrot.lane.b32.xlu0 %v12232_v58, %s10804_s22  ;;  %v12245_v62 = vsel %vm1703_vm11, %v15753_v16, %v1614_v59  ;;  %v12263_v44 = vsel %vm1703_vm11, %v15756_v14, %v1560_v4  ;;  %v15761_v16 = vld [vmem:[#allocation20_spill] sm:$0xff] }
 0x1ac   : > { %v2703_v55 = vshrl.u32 %v9740_v2, 16  ;;  %v2706_v22 = vshll.u32 %v9740_v2, 16  ;;  %v15758_v2 = vld [vmem:[#allocation18_spill] sm:$0xff] }
 0x1ae   : > { %v1612_v57 = vpop.permute.xlu0 %1611  ;;  %v12239_v18 = vrot.slane %v2703_v55, 7  ;;  %v12254_v60 = vpop.permute.xlu1 %1617  ;;  %v3040_v55 = vld [vmem:[#allocation3 + $0xa8] sm:$0xf] }
 0x1af   : > { %1868 = vrot.lane.b32.xlu0 %v1722_v63, %s10804_s22  ;;  %v1754_v40 = vsel %vm1703_vm11, %v15752_v52, %v1612_v57  ;;  %v1706_v57 = vsel %vm1703_vm11, %v15758_v2, %v12190_v11  ;;  %v2956_v2 = vld [vmem:[#allocation3 + $0x18] sm:$0xf] }
 0x1b0   : > { %v2708_v48 = vor.u32 %v2706_v22, %v12239_v18  ;;  %v2369_v6 = vcombine.low %v1754_v40, %v12245_v62 }
 0x1b2   : > { %v1616_v1 = vpop.permute.xlu0 %1615  ;;  %v2985_v56 = vsel %vm11543_vm8, %v2708_v48, %v2984_v24  ;;  %v2383_v41 = vrot.slane %v2369_v6, %v12210_v39  ;;  %v12267_v63 = vpop.permute.xlu1 %1625  ;;  %v1737_v48 = vsel %vm1703_vm11, %v15761_v16, %v12201_v53 }
 0x1b3   : > { %1872 = vrot.lane.b32.xlu0 %v12251_v47, %s10804_s22  ;;  %2986 = vst [vmem:[#allocation3 + $0x48] sm:$0xf] %v2985_v56 }
 0x1b4   : > { %v2384_v20 = vcombine.low %v2376_v38, %v2383_v41  ;;  %v15762_v41 = vld [vmem:[#allocation36_spill] sm:$0xff] }
 0x1b6   : > { %v1624_v50 = vpop.permute.xlu0 %1623  ;;  %v9756_v26 = vpack.c.bf16 %v2384_v20, %v2384_v20  ;;  %v1518_v29 = vpop.permute.xlu1 %1517 }
 0x1b7   : > { %1880 = vrot.lane.b32.xlu0 %v12263_v44, %s10804_s22  ;;  %v12282_v59 = vsel %vm1703_vm11, %v15759_v17, %v1518_v29  ;;  %v12304_v53 = vsel %vm1703_vm11, %v15762_v41, %v1624_v50  ;;  %v15768_v41 = vld [vmem:[#allocation41_spill] sm:$0xff] }
 0x1b8   : > { %v2839_v46 = vshrl.u32 %v9756_v26, 16  ;;  %v2842_v33 = vshll.u32 %v9756_v26, 16  ;;  %v580_v26 = vld [vmem:[#allocation3 + $0xb4] sm:$0x1] }
 0x1b9   : > { %v581_v50 = vsel %vm11129_vm4, 0, %v580_v26 }
 0x1ba   : > { %v1514_v3 = vpop.permute.xlu0 %1513  ;;  %v12275_v51 = vrot.slane %v2839_v46, 7  ;;  %v12296_v6 = vpop.permute.xlu1 %1521  ;;  %582 = vst [vmem:[#allocation3 + $0xb4] sm:$0x1] %v581_v50 }
 0x1bb   : > { %v1705_v9 = vsel %vm1703_vm11, %v15757_v49, %v1514_v3  ;;  %1932 = vrot.lane.b32.xlu0 %v1754_v40, %s10804_s22  ;;  %v1961_v40 = vcombine.low %v1706_v57, %v12282_v59  ;;  %v15763_v3 = vld [vmem:[#allocation26_spill] sm:$0xff]  ;;  %v2232_v49 = vcombine.low %v12232_v58, %v1737_v48 }
 0x1bc   : > { %v1960_v4 = vcombine.low %v1704_v43, %v1705_v9  ;;  %1834 = vrot.lane.b32.xlu1 %v1705_v9, %s10804_s22  ;;  %v2844_v52 = vor.u32 %v2842_v33, %v12275_v51  ;;  %v15760_v43 = vld [vmem:[#allocation33_spill] sm:$0xff]  ;;  %v1725_v46 = vsel %vm1703_vm11, %v15763_v3, %v12226_v61  ;;  %v544_v3 = vld [vmem:[#allocation3 + $0x24] sm:$0x1] }
 0x1bd   : > { %v12288_v24 = vsel %vm1703_vm11, %v15760_v43, %v1616_v1  ;;  %v1975_v38 = vrot.slane %v1961_v40, %v12210_v39  ;;  %v15767_v43 = vld [vmem:[#allocation29_spill] sm:$0xff]  ;;  %v2113_v50 = vcombine.low %v12251_v47, %v1725_v46  ;;  %v3012_v47 = vld [vmem:[#allocation3 + $0x78] sm:$0xf] }
 0x1be   : > { %v1520_v22 = vpop.permute.xlu0 %1519  ;;  %v1968_v11 = vrot.slane %v1960_v4, %v12210_v39  ;;  %v3041_v7 = vsel %vm11543_vm8, %v2844_v52, %v3040_v55  ;;  %v12308_v20 = vpop.permute.xlu1 %1529  ;;  %v15764_v4 = vld [vmem:[#allocation45_spill] sm:$0xff]  ;;  %v15765_v55 = vld [vmem:[#allocation46_spill] sm:$0xff]  ;;  %v15766_v52 = vld [vmem:[#allocation39_spill] sm:$0xff]  ;;  %v1729_v16 = vsel %vm1703_vm11, %v15767_v43, %v12234_v23 }
 0x1bf   : > { %1936 = vrot.lane.b32.xlu0 %v12288_v24, %s10804_s22  ;;  %3042 = vst [vmem:[#allocation3 + $0xa8] sm:$0xf] %v3041_v7  ;;  %v12332_v40 = vsel %vm1703_vm11, %v15766_v52, %v1520_v22  ;;  %v2121_v52 = vrot.slane %v2113_v50, %v12210_v39  ;;  %v15772_v43 = vld [vmem:[#allocation40_spill] sm:$0xff] }
 0x1c0   : > { %1898 = vrot.lane.b32.xlu1 %v1737_v48, %s10804_s22  ;;  %v1976_v56 = vcombine.low %v1968_v11, %v1975_v38  ;;  %v2240_v48 = vrot.slane %v2232_v49, %v12210_v39  ;;  %v15769_v49 = vld [vmem:[#allocation34_spill] sm:$0xff] }
 0x1c2   : > { %v1528_v1 = vpop.permute.xlu0 %1527  ;;  %v9732_v8 = vpack.c.bf16 %v1976_v56, %v1976_v56  ;;  %v1582_v9 = vpop.permute.xlu1 %1581 }
 0x1c3   : > { %1944 = vrot.lane.b32.xlu0 %v12304_v53, %s10804_s22  ;;  %v12326_v61 = vsel %vm1703_vm11, %v15765_v55, %v1582_v9  ;;  %v12348_v23 = vsel %vm1703_vm11, %v15768_v41, %v1528_v1  ;;  %v1757_v9 = vsel %vm1703_vm11, %v15769_v49, %v12254_v60  ;;  %v545_v1 = vsel %vm11129_vm4, 0, %v544_v3  ;;  %v15775_v3 = vld [vmem:[#allocation52_spill] sm:$0xff]  ;;  %v15776_v49 = vld [vmem:[#allocation47_spill] sm:$0xff] }
 0x1c4   : > { %1870 = vrot.lane.b32.xlu1 %v12219_v31, %s10804_s22  ;;  %v2635_v13 = vshrl.u32 %v9732_v8, 16  ;;  %v2638_v31 = vshll.u32 %v9732_v8, 16  ;;  %546 = vst [vmem:[#allocation3 + $0x24] sm:$0x1] %v545_v1 }
 0x1c6   : > { %v1580_v14 = vpop.permute.xlu0 %1579  ;;  %v12320_v29 = vrot.slane %v2635_v13, 7  ;;  %v12340_v11 = vpop.permute.xlu1 %1585 }
 0x1c7   : > { %1836 = vrot.lane.b32.xlu0 %v1706_v57, %s10804_s22  ;;  %v1738_v33 = vsel %vm1703_vm11, %v15764_v4, %v1580_v14 }
 0x1c8   : > { %1874 = vrot.lane.b32.xlu1 %v1725_v46, %s10804_s22  ;;  %v2640_v58 = vor.u32 %v2638_v31, %v12320_v29  ;;  %v2233_v57 = vcombine.low %v1738_v33, %v12326_v61  ;;  %v15771_v46 = vld [vmem:[#allocation50_spill] sm:$0xff] }
 0x1ca   : > { %v1584_v17 = vpop.permute.xlu0 %1583  ;;  %v2957_v7 = vsel %vm11543_vm8, %v2640_v58, %v2956_v2  ;;  %v2247_v38 = vrot.slane %v2233_v57, %v12210_v39  ;;  %v12352_v8 = vpop.permute.xlu1 %1593  ;;  %v15770_v2 = vld [vmem:[#allocation49_spill] sm:$0xff] }
 0x1cb   : > { %1840 = vrot.lane.b32.xlu0 %v12332_v40, %s10804_s22  ;;  %2958 = vst [vmem:[#allocation3 + $0x18] sm:$0xf] %v2957_v7  ;;  %v15773_v7 = vld [vmem:[#allocation38_spill] sm:$0xff] }
 0x1cc   : > { %1882 = vrot.lane.b32.xlu1 %v1729_v16, %s10804_s22  ;;  %v2248_v56 = vcombine.low %v2240_v48, %v2247_v38  ;;  %v12377_v48 = vsel %vm1703_vm11, %v15772_v43, %v1584_v17  ;;  %v12382_v38 = vsel %vm1703_vm11, %v15773_v7, %v12267_v63 }
 0x1ce   : > { %v1592_v22 = vpop.permute.xlu0 %1591  ;;  %v9748_v14 = vpack.c.bf16 %v2248_v56, %v2248_v56  ;;  %v1558_v31 = vpop.permute.xlu1 %1557  ;;  %v2164_v56 = vcombine.low %v12263_v44, %v1729_v16 }
 0x1cf   : > { %1848 = vrot.lane.b32.xlu0 %v12348_v23, %s10804_s22  ;;  %v12370_v58 = vsel %vm1703_vm11, %v15771_v46, %v1558_v31  ;;  %v12401_v1 = vsel %vm1703_vm11, %v15776_v49, %v1592_v22  ;;  %v2385_v22 = vcombine.low %v12288_v24, %v1757_v9  ;;  %v2988_v49 = vld [vmem:[#allocation3 + $0x50] sm:$0x1] }
 0x1d0   : > { %1934 = vrot.lane.b32.xlu1 %v12245_v62, %s10804_s22  ;;  %v2771_v26 = vshrl.u32 %v9748_v14, 16  ;;  %v2774_v62 = vshll.u32 %v9748_v14, 16  ;;  %v2172_v31 = vrot.slane %v2164_v56, %v12210_v39 }
 0x1d2   : > { %v1556_v13 = vpop.permute.xlu0 %1555  ;;  %v12364_v4 = vrot.slane %v2771_v26, 7  ;;  %v1566_v41 = vpop.permute.xlu1 %1565 }
 0x1d3   : > { %1900 = vrot.lane.b32.xlu0 %v1738_v33, %s10804_s22  ;;  %v1726_v55 = vsel %vm1703_vm11, %v15770_v2, %v1556_v13  ;;  %v15774_v13 = vld [vmem:[#allocation51_spill] sm:$0xff]  ;;  %v12396_v63 = vsel %vm1703_vm11, %v15775_v3, %v1566_v41 }
 0x1d4   : > { %1938 = vrot.lane.b32.xlu1 %v1757_v9, %s10804_s22  ;;  %v2776_v57 = vor.u32 %v2774_v62, %v12364_v4  ;;  %v2114_v33 = vcombine.low %v1726_v55, %v12370_v58  ;;  %v15779_v9 = vld [vmem:[#allocation54_spill] sm:$0xff] }
 0x1d6   : > { %v1564_v60 = vpop.permute.xlu0 %1563  ;;  %v3013_v14 = vsel %vm11543_vm8, %v2776_v57, %v3012_v47  ;;  %v2128_v17 = vrot.slane %v2114_v33, %v12210_v39  ;;  %v12407_v2 = vpop.permute.xlu1 %1569  ;;  %v568_v33 = vld [vmem:[#allocation3 + $0x84] sm:$0x1] }
 0x1d7   : > { %1904 = vrot.lane.b32.xlu0 %v12377_v48, %s10804_s22  ;;  %v1730_v26 = vsel %vm1703_vm11, %v15774_v13, %v1564_v60  ;;  %3014 = vst [vmem:[#allocation3 + $0x78] sm:$0xf] %v3013_v14  ;;  %v569_v7 = vsel %vm11129_vm4, 0, %v568_v33  ;;  %v2709_v13 = vrot.slane %v12239_v18, 4 }
 0x1d8   : > { %1946 = vrot.lane.b32.xlu1 %v12382_v38, %s10804_s22  ;;  %v2165_v44 = vcombine.low %v1730_v26, %v12396_v63  ;;  %v2129_v50 = vcombine.low %v2121_v52, %v2128_v17  ;;  %v15777_v52 = vld [vmem:[#allocation44_spill] sm:$0xff]  ;;  %570 = vst [vmem:[#allocation3 + $0x84] sm:$0x1] %v569_v7  ;;  %v15778_v17 = vld [vmem:[#allocation53_spill] sm:$0xff] }
 0x1d9   : > { %v12415_v43 = vsel %vm1703_vm11, %v15777_v52, %v12296_v6  ;;  %v15782_v7 = vld [vmem:[#allocation69_spill] sm:$0xff] }
 0x1da   : > { %v1568_v16 = vpop.permute.xlu0 %1567  ;;  %v2179_v62 = vrot.slane %v2165_v44, %v12210_v39  ;;  %v9741_v47 = vpack.c.bf16 %v2129_v50, %v2129_v50  ;;  %v1622_v41 = vpop.permute.xlu1 %1621 }
 0x1db   : > { %1912 = vrot.lane.b32.xlu0 %v12401_v1, %s10804_s22  ;;  %v12426_v6 = vsel %vm1703_vm11, %v15779_v9, %v1622_v41 }
 0x1dc   : > { %1838 = vrot.lane.b32.xlu1 %v12282_v59, %s10804_s22  ;;  %v2180_v46 = vcombine.low %v2172_v31, %v2179_v62  ;;  %v2711_v57 = vshrl.u32 %v9741_v47, 16  ;;  %v2714_v14 = vshll.u32 %v9741_v47, 16  ;;  %v2393_v31 = vrot.slane %v2385_v22, %v12210_v39  ;;  %v15780_v47 = vld [vmem:[#allocation42_spill] sm:$0xff]  ;;  %v15781_v22 = vld [vmem:[#allocation68_spill] sm:$0xff] }
 0x1dd   : > { %v2436_v62 = vcombine.low %v12304_v53, %v12382_v38  ;;  %v2998_v38 = vld [vmem:[#allocation3 + $0x60] sm:$0xf] }
 0x1de   : > { %v1620_v60 = vpop.permute.xlu0 %1619  ;;  %v9744_v56 = vpack.c.bf16 %v2180_v46, %v2180_v46  ;;  %v2713_v59 = vrot.slane %v2711_v57, 7  ;;  %v12436_v46 = vsel %vm1703_vm11, %v15780_v47, %v12308_v20  ;;  %v1630_v52 = vpop.permute.xlu1 %1629 }
 0x1df   : > { %1876 = vrot.lane.b32.xlu0 %v1726_v55, %s10804_s22  ;;  %v1758_v24 = vsel %vm1703_vm11, %v15778_v17, %v1620_v60  ;;  %v12450_v41 = vsel %vm1703_vm11, %v15782_v7, %v1630_v52  ;;  %v2444_v9 = vrot.slane %v2436_v62, %v12210_v39  ;;  %v3044_v7 = vld [vmem:[#allocation3 + $0xb0] sm:$0x1] }
 0x1e0   : > { %1842 = vrot.lane.b32.xlu1 %v12415_v43, %s10804_s22  ;;  %v2737_v3 = vshrl.u32 %v9744_v56, 16  ;;  %v2386_v44 = vcombine.low %v1758_v24, %v12426_v6  ;;  %v2716_v50 = vor.u32 %v2714_v14, %v2713_v59  ;;  %v2718_v60 = vrot.slane %v2713_v59, 4 }
 0x1e1   : > { %v2740_v18 = vshll.u32 %v9744_v56, 16 }
 0x1e2   : > { %v1628_v55 = vpop.permute.xlu0 %1627  ;;  %v12438_v57 = vrot.slane %v2737_v3, 7  ;;  %v2400_v33 = vrot.slane %v2386_v44, %v12210_v39  ;;  %v2717_v53 = vsel %vm11958_vm10, %v2709_v13, %v2716_v50  ;;  %v15783_v13 = vld [vmem:[#allocation8_spill] sm:$0xff] }
 0x1e3   : > { %1884 = vrot.lane.b32.xlu0 %v1730_v26, %s10804_s22  ;;  %v1762_v20 = vsel %vm1703_vm11, %v15781_v22, %v1628_v55  ;;  %2987 = vst.msk [vmem:[#allocation3 + $0x4c] sm:$0xf] %vm410_vm5, %v2717_v53  ;;  %v2989_v26 = vsel %vm11129_vm4, %v2718_v60, %v2988_v49  ;;  %v12460_v3 = vsel %vm1703_vm11, %v15783_v13, %v1568_v16  ;;  %v12467_v49 = vpop.permute.xlu1 %1633  ;;  %v604_v16 = vld [vmem:[#allocation3 + $0x5c] sm:$0x1]  ;;  %v15784_v60 = vld [vmem:[#allocation48_spill] sm:$0xff]  ;;  %v2845_v22 = vrot.slane %v12275_v51, 4 }
 0x1e4   : > { %1850 = vrot.lane.b32.xlu1 %v12436_v46, %s10804_s22  ;;  %v2742_v56 = vor.u32 %v2740_v18, %v12438_v57  ;;  %v2401_v59 = vcombine.low %v2393_v31, %v2400_v33  ;;  %v2437_v14 = vcombine.low %v1762_v20, %v12450_v41  ;;  %2990 = vst [vmem:[#allocation3 + $0x50] sm:$0x1] %v2989_v26  ;;  %v605_v33 = vsel %vm11509_vm7, 0, %v604_v16  ;;  %v15785_v26 = vld [vmem:[#allocation71_spill] sm:$0xff]  ;;  %v15786_v13 = vld [vmem:[#allocation70_spill] sm:$0xff] }
 0x1e5   : > { %v12474_v18 = vsel %vm1703_vm11, %v15784_v60, %v12340_v11  ;;  %606 = vst [vmem:[#allocation3 + $0x5c] sm:$0x1] %v605_v33  ;;  %v1977_v11 = vcombine.low %v12332_v40, %v12415_v43  ;;  %v15788_v60 = vld [vmem:[#allocation72_spill] sm:$0xff] }
 0x1e6   : > { %v1632_v17 = vpop.permute.xlu0 %1631  ;;  %v2999_v44 = vsel %vm11543_vm8, %v2742_v56, %v2998_v38  ;;  %v9757_v55 = vpack.c.bf16 %v2401_v59, %v2401_v59  ;;  %v2451_v50 = vrot.slane %v2437_v14, %v12210_v39 }
 0x1e7   : > { %1888 = vrot.lane.b32.xlu0 %v12460_v3, %s10804_s22  ;;  %3000 = vst [vmem:[#allocation3 + $0x60] sm:$0xf] %v2999_v44 }
 0x1e8   : > { %1902 = vrot.lane.b32.xlu1 %v12326_v61, %s10804_s22  ;;  %v2847_v31 = vshrl.u32 %v9757_v55, 16  ;;  %v2452_v62 = vcombine.low %v2444_v9, %v2451_v50  ;;  %v2850_v53 = vshll.u32 %v9757_v55, 16  ;;  %v1526_v61 = vpop.permute.xlu1 %1525  ;;  %v2028_v55 = vcombine.low %v12348_v23, %v12436_v46  ;;  %v15787_v50 = vld [vmem:[#allocation17_spill] sm:$0xff]  ;;  %v3054_v46 = vld [vmem:[#allocation3 + $0xc0] sm:$0xf] }
 0x1e9   : > { %v12486_v56 = vsel %vm1703_vm11, %v15785_v26, %v1526_v61  ;;  %v12496_v40 = vsel %vm1703_vm11, %v15787_v50, %v12352_v8  ;;  %v1985_v8 = vrot.slane %v1977_v11, %v12210_v39 }
 0x1ea   : > { %v1524_v47 = vpop.permute.xlu0 %1523  ;;  %v2849_v52 = vrot.slane %v2847_v31, 7  ;;  %v9760_v38 = vpack.c.bf16 %v2452_v62, %v2452_v62 }
 0x1eb   : > { %1940 = vrot.lane.b32.xlu0 %v1758_v24, %s10804_s22  ;;  %v1710_v24 = vsel %vm1703_vm11, %v15786_v13, %v1524_v47 }
 0x1ec   : > { %1906 = vrot.lane.b32.xlu1 %v12474_v18, %s10804_s22  ;;  %v2852_v59 = vor.u32 %v2850_v53, %v2849_v52  ;;  %v2854_v14 = vrot.slane %v2849_v52, 4  ;;  %v2873_v9 = vshrl.u32 %v9760_v38, 16  ;;  %v1978_v51 = vcombine.low %v1710_v24, %v12486_v56  ;;  %v1534_v23 = vpop.permute.xlu1 %1533  ;;  %v15789_v52 = vld [vmem:[#allocation73_spill] sm:$0xff] }
 0x1ed   : > { %v2876_v47 = vshll.u32 %v9760_v38, 16  ;;  %v12514_v53 = vsel %vm1703_vm11, %v15789_v52, %v1534_v23 }
 0x1ee   : > { %v1532_v44 = vpop.permute.xlu0 %1531  ;;  %v2853_v43 = vsel %vm11958_vm10, %v2845_v22, %v2852_v59  ;;  %v3045_v31 = vsel %vm11129_vm4, %v2854_v14, %v3044_v7  ;;  %v12502_v62 = vrot.slane %v2873_v9, 7  ;;  %v1992_v16 = vrot.slane %v1978_v51, %v12210_v39  ;;  %v15790_v22 = vld [vmem:[#allocation13_spill] sm:$0xff]  ;;  %v562_v51 = vld [vmem:[#allocation3 + $0x6c] sm:$0x1] }
 0x1ef   : > { %1948 = vrot.lane.b32.xlu0 %v1762_v20, %s10804_s22  ;;  %3043 = vst.msk [vmem:[#allocation3 + $0xac] sm:$0xf] %vm410_vm5, %v2853_v43  ;;  %3046 = vst [vmem:[#allocation3 + $0xb0] sm:$0x1] %v3045_v31  ;;  %v1714_v33 = vsel %vm1703_vm11, %v15788_v60, %v1532_v44  ;;  %v12520_v7 = vsel %vm1703_vm11, %v15790_v22, %v1632_v17  ;;  %v2036_v59 = vrot.slane %v2028_v55, %v12210_v39 }
 0x1f0   : > { %1914 = vrot.lane.b32.xlu1 %v12496_v40, %s10804_s22  ;;  %v2878_v20 = vor.u32 %v2876_v47, %v12502_v62  ;;  %v2029_v38 = vcombine.low %v1714_v33, %v12514_v53  ;;  %v1993_v11 = vcombine.low %v1985_v8, %v1992_v16  ;;  %v12530_v9 = vpop.permute.xlu1 %1537  ;;  %v563_v43 = vsel %vm11129_vm4, 0, %v562_v51  ;;  %v15791_v8 = vld [vmem:[#allocation74_spill] sm:$0xff] }
 0x1f1   : > { %v2249_v55 = vcombine.low %v12377_v48, %v12474_v18  ;;  %564 = vst [vmem:[#allocation3 + $0x6c] sm:$0x1] %v563_v43  ;;  %v2641_v60 = vrot.slane %v12320_v29, 4  ;;  %v2960_v48 = vld [vmem:[#allocation3 + $0x20] sm:$0x1]  ;;  %v2300_v18 = vcombine.low %v12401_v1, %v12496_v40 }
 0x1f2   : > { %v1536_v61 = vpop.permute.xlu0 %1535  ;;  %v3055_v26 = vsel %vm11543_vm8, %v2878_v20, %v3054_v46  ;;  %v2043_v14 = vrot.slane %v2029_v38, %v12210_v39  ;;  %v9733_v13 = vpack.c.bf16 %v1993_v11, %v1993_v11  ;;  %v628_v20 = vld [vmem:[#allocation3 + $0xbc] sm:$0x1]  ;;  %v15792_v38 = vld [vmem:[#allocation23_spill] sm:$0xff] }
 0x1f3   : > { %1952 = vrot.lane.b32.xlu0 %v12520_v7, %s10804_s22  ;;  %3056 = vst [vmem:[#allocation3 + $0xc0] sm:$0xf] %v3055_v26  ;;  %v12552_v22 = vsel %vm1703_vm11, %v15792_v38, %v12407_v2  ;;  %v2257_v29 = vrot.slane %v2249_v55, %v12210_v39 }
 0x1f4   : > { %1878 = vrot.lane.b32.xlu1 %v12370_v58, %s10804_s22  ;;  %v2044_v17 = vcombine.low %v2036_v59, %v2043_v14  ;;  %v2643_v50 = vshrl.u32 %v9733_v13, 16  ;;  %v1590_v58 = vpop.permute.xlu1 %1589  ;;  %v2646_v23 = vshll.u32 %v9733_v13, 16  ;;  %v2181_v38 = vcombine.low %v12460_v3, %v12552_v22 }
 0x1f5   : > { %v12543_v16 = vsel %vm1703_vm11, %v11681_v34, %v1590_v58  ;;  %v629_v34 = vsel %vm11509_vm7, 0, %v628_v20  ;;  %v12579_v58 = vsel %vm1703_vm11, %v15721_v27, %v1536_v61  ;;  %v15793_v27 = vld [vmem:[#allocation25_spill] sm:$0xff] }
 0x1f6   : > { %v1588_v44 = vpop.permute.xlu0 %1587  ;;  %v9736_v31 = vpack.c.bf16 %v2044_v17, %v2044_v17  ;;  %v2645_v47 = vrot.slane %v2643_v50, 7  ;;  %630 = vst [vmem:[#allocation3 + $0xbc] sm:$0x1] %v629_v34  ;;  %v2970_v17 = vld [vmem:[#allocation3 + $0x30] sm:$0xf]  ;;  %v1765_v61 = vsel %vm1703_vm11, %v15793_v27, %v12467_v49 }
 0x1f7   : > { %1844 = vrot.lane.b32.xlu0 %v1710_v24, %s10804_s22  ;;  %v1742_v46 = vsel %vm1703_vm11, %v15791_v8, %v1588_v44 }
 0x1f8   : > { %1886 = vrot.lane.b32.xlu1 %v12396_v63, %s10804_s22  ;;  %v2669_v24 = vshrl.u32 %v9736_v31, 16  ;;  %v2250_v63 = vcombine.low %v1742_v46, %v12543_v16  ;;  %v2648_v11 = vor.u32 %v2646_v23, %v2645_v47  ;;  %v2650_v26 = vrot.slane %v2645_v47, 4  ;;  %v1598_v14 = vpop.permute.xlu1 %1597 }
 0x1f9   : > { %v2672_v1 = vshll.u32 %v9736_v31, 16  ;;  %v12571_v51 = vsel %vm1703_vm11, %v11689_v37, %v1598_v14  ;;  %v2308_v31 = vrot.slane %v2300_v18, %v12210_v39  ;;  %v586_v18 = vld [vmem:[#allocation3 + $0xcc] sm:$0x1]  ;;  %v2453_v14 = vcombine.low %v12520_v7, %v1765_v61 }
 0x1fa   : > { %v1596_v52 = vpop.permute.xlu0 %1595  ;;  %v12557_v59 = vrot.slane %v2669_v24, 7  ;;  %v2264_v40 = vrot.slane %v2250_v63, %v12210_v39  ;;  %v2649_v2 = vsel %vm11958_vm10, %v2641_v60, %v2648_v11  ;;  %v2961_v13 = vsel %vm11129_vm4, %v2650_v26, %v2960_v48  ;;  %v3016_v26 = vld [vmem:[#allocation3 + $0x80] sm:$0x1] }
 0x1fb   : > { %1852 = vrot.lane.b32.xlu0 %v1714_v33, %s10804_s22  ;;  %v1746_v44 = vsel %vm1703_vm11, %v11685_v36, %v1596_v52  ;;  %2959 = vst.msk [vmem:[#allocation3 + $0x1c] sm:$0xf] %vm410_vm5, %v2649_v2  ;;  %2962 = vst [vmem:[#allocation3 + $0x20] sm:$0x1] %v2961_v13  ;;  %v2777_v11 = vrot.slane %v12364_v4, 4  ;;  %v12609_v4 = vsel %vm1703_vm11, %v15722_v5, %v12530_v9 }
 0x1fc   : > { %1890 = vrot.lane.b32.xlu1 %v12552_v22, %s10804_s22  ;;  %v2674_v33 = vor.u32 %v2672_v1, %v12557_v59  ;;  %v2265_v50 = vcombine.low %v2257_v29, %v2264_v40  ;;  %v2301_v43 = vcombine.low %v1746_v44, %v12571_v51  ;;  %v1602_v23 = vpop.permute.xlu1 %1601  ;;  %v592_v40 = vld [vmem:[#allocation3 + $0x2c] sm:$0x1]  ;;  %v2189_v7 = vrot.slane %v2181_v38, %v12210_v39  ;;  %v3026_v9 = vld [vmem:[#allocation3 + $0x90] sm:$0xf] }
 0x1fe   : > { %v1600_v55 = vpop.permute.xlu0 %1599  ;;  %v2971_v36 = vsel %vm11543_vm8, %v2674_v33, %v2970_v17  ;;  %v9749_v37 = vpack.c.bf16 %v2265_v50, %v2265_v50  ;;  %v2315_v47 = vrot.slane %v2301_v43, %v12210_v39 }
 0x1ff   : > { %1856 = vrot.lane.b32.xlu0 %v12579_v58, %s10804_s22  ;;  %2972 = vst [vmem:[#allocation3 + $0x30] sm:$0xf] %v2971_v36  ;;  %v2045_v36 = vcombine.low %v12579_v58, %v12609_v4  ;;  %v12649_v58 = vsel %vm1703_vm11, %v15649_v45, %v1602_v23 }
 0x200   : > { %1942 = vrot.lane.b32.xlu1 %v12426_v6, %s10804_s22  ;;  %v2779_v8 = vshrl.u32 %v9749_v37, 16  ;;  %v2316_v60 = vcombine.low %v2308_v31, %v2315_v47  ;;  %v2782_v63 = vshll.u32 %v9749_v37, 16  ;;  %v587_v6 = vsel %vm11129_vm4, 0, %v586_v18 }
 0x201   : > { %588 = vst [vmem:[#allocation3 + $0xcc] sm:$0x1] %v587_v6  ;;  %v1748_v37 = vsel %vm1703_vm11, %v15648_v32, %v1600_v55 }
 0x202   : > { %v1572_v48 = vpop.permute.xlu0 %1571  ;;  %v2781_v24 = vrot.slane %v2779_v8, 7  ;;  %v9752_v52 = vpack.c.bf16 %v2316_v60, %v2316_v60  ;;  %v2317_v23 = vcombine.low %v1748_v37, %v12649_v58 }
 0x203   : > { %1908 = vrot.lane.b32.xlu0 %v1742_v46, %s10804_s22 }
 0x204   : > { %1950 = vrot.lane.b32.xlu1 %v12450_v41, %s10804_s22  ;;  %v1574_v20 = vpop.permute.xlu1 %1573  ;;  %v2784_v34 = vor.u32 %v2782_v63, %v2781_v24  ;;  %v2786_v46 = vrot.slane %v2781_v24, 4  ;;  %v2805_v29 = vshrl.u32 %v9752_v52, 16  ;;  %v1734_v41 = vsel %vm1703_vm11, %v15713_v12, %v1572_v48  ;;  %v550_v24 = vld [vmem:[#allocation3 + $0x3c] sm:$0x1] }
 0x205   : > { %v12601_v49 = vsel %vm1703_vm11, %v15727_v42, %v1574_v20  ;;  %v593_v42 = vsel %vm11509_vm7, 0, %v592_v40  ;;  %v2808_v13 = vshll.u32 %v9752_v52, 16  ;;  %v551_v45 = vsel %vm11129_vm4, 0, %v550_v24 }
 0x206   : > { %v1636_v1 = vpop.permute.xlu0 %1635  ;;  %v2182_v3 = vcombine.low %v1734_v41, %v12601_v49  ;;  %v2785_v22 = vsel %vm11958_vm10, %v2777_v11, %v2784_v34  ;;  %v3017_v12 = vsel %vm11129_vm4, %v2786_v46, %v3016_v26  ;;  %v12618_v2 = vrot.slane %v2805_v29, 7  ;;  %594 = vst [vmem:[#allocation3 + $0x2c] sm:$0x1] %v593_v42  ;;  %552 = vst [vmem:[#allocation3 + $0x3c] sm:$0x1] %v551_v45 }
 0x207   : > { %1916 = vrot.lane.b32.xlu0 %v1746_v44, %s10804_s22  ;;  %3015 = vst.msk [vmem:[#allocation3 + $0x7c] sm:$0xf] %vm410_vm5, %v2785_v22  ;;  %3018 = vst [vmem:[#allocation3 + $0x80] sm:$0x1] %v3017_v12  ;;  %v12627_v33 = vsel %vm1703_vm11, %v15729_v30, %v1636_v1  ;;  %v2461_v30 = vrot.slane %v2453_v14, %v12210_v39  ;;  %v3002_v26 = vld [vmem:[#allocation3 + $0x68] sm:$0x1]  ;;  %v2325_v12 = vrot.slane %v2317_v23, %v12210_v39 }
 0x208   : > { %1954 = vrot.lane.b32.xlu1 %v1765_v61, %s10804_s22  ;;  %v2196_v17 = vrot.slane %v2182_v3, %v12210_v39  ;;  %v2810_v44 = vor.u32 %v2808_v13, %v12618_v2  ;;  %v616_v1 = vld [vmem:[#allocation3 + $0x8c] sm:$0x1]  ;;  %v610_v45 = vld [vmem:[#allocation3 + $0x74] sm:$0x1]  ;;  %v2811_v23 = vrot.slane %v12618_v2, 4 }
 0x209   : > { %v1638_v5 = vpop.permute.xlu1 %1637  ;;  %v617_v3 = vsel %vm11509_vm7, 0, %v616_v1 }
 0x20a   : > { %v12631_v50 = vsel %vm1703_vm11, %v15736_v10, %v1638_v5  ;;  %v1540_v31 = vpop.permute.xlu0 %1539  ;;  %v2197_v47 = vcombine.low %v2189_v7, %v2196_v17  ;;  %v3027_v8 = vsel %vm11543_vm8, %v2810_v44, %v3026_v9  ;;  %618 = vst [vmem:[#allocation3 + $0x8c] sm:$0x1] %v617_v3  ;;  %v3058_v5 = vld [vmem:[#allocation3 + $0xc8] sm:$0x1]  ;;  %v2879_v7 = vrot.slane %v12502_v62, 4 }
 0x20b   : > { %v2454_v43 = vcombine.low %v12627_v33, %v12631_v50  ;;  %1920 = vrot.lane.b32.xlu0 %v1748_v37, %s10804_s22  ;;  %3028 = vst [vmem:[#allocation3 + $0x90] sm:$0xf] %v3027_v8  ;;  %v1718_v55 = vsel %vm1703_vm11, %v12100_v21, %v1540_v31  ;;  %v2974_v62 = vld [vmem:[#allocation3 + $0x38] sm:$0x1]  ;;  %v2675_v8 = vrot.slane %v12557_v59, 4 }
 0x20c   : > { %1846 = vrot.lane.b32.xlu1 %v12486_v56, %s10804_s22  ;;  %v9745_v32 = vpack.c.bf16 %v2197_v47, %v2197_v47  ;;  %v2053_v56 = vrot.slane %v2045_v36, %v12210_v39 }
 0x20d   : > { %v2468_v10 = vrot.slane %v2454_v43, %v12210_v39  ;;  %v1542_v60 = vpop.permute.xlu1 %1541 }
 0x20e   : > { %v12655_v48 = vsel %vm1703_vm11, %v12104_v15, %v1542_v60  ;;  %v1604_v18 = vpop.permute.xlu0 %1603  ;;  %v2745_v63 = vshrl.u32 %v9745_v32, 16  ;;  %v2748_v6 = vshll.u32 %v9745_v32, 16 }
 0x20f   : > { %v2469_v27 = vcombine.low %v2461_v30, %v2468_v10  ;;  %v2046_v61 = vcombine.low %v1718_v55, %v12655_v48  ;;  %1892 = vrot.lane.b32.xlu0 %v1734_v41, %s10804_s22  ;;  %v1750_v38 = vsel %vm1703_vm11, %v12172_v0, %v1604_v18 }
 0x210   : > { %1854 = vrot.lane.b32.xlu1 %v12514_v53, %s10804_s22  ;;  %v2747_v20 = vrot.slane %v2745_v63, 7  ;;  %v2743_v53 = vrot.slane %v12438_v57, 4 }
 0x211   : > { %v9761_v52 = vpack.c.bf16 %v2469_v27, %v2469_v27  ;;  %v2060_v21 = vrot.slane %v2046_v61, %v12210_v39  ;;  %v1606_v15 = vpop.permute.xlu1 %1605  ;;  %v574_v27 = vld [vmem:[#allocation3 + $0x9c] sm:$0x1] }
 0x212   : > { %v12670_v11 = vsel %vm1703_vm11, %v12183_v35, %v1606_v15  ;;  %v12673_v41 = vpop.permute.xlu0 %1864  ;;  %v2750_v40 = vor.u32 %v2748_v6, %v2747_v20  ;;  %v2752_v14 = vrot.slane %v2747_v20, 4 }
 0x213   : > { %v2881_v34 = vshrl.u32 %v9761_v52, 16  ;;  %v2061_v46 = vcombine.low %v2053_v56, %v2060_v21  ;;  %v2318_v29 = vcombine.low %v1750_v38, %v12670_v11  ;;  %v2884_v42 = vshll.u32 %v9761_v52, 16  ;;  %1860 = vrot.lane.b32.xlu0 %v1718_v55, %s10804_s22  ;;  %v3030_v56 = vld [vmem:[#allocation3 + $0x98] sm:$0x1] }
 0x214   : > { %1858 = vrot.lane.b32.xlu1 %v12609_v4, %s10804_s22  ;;  %v2751_v57 = vsel %vm11958_vm10, %v2743_v53, %v2750_v40  ;;  %v3003_v13 = vsel %vm11129_vm4, %v2752_v14, %v3002_v26  ;;  %v634_v53 = vld [vmem:[#allocation3 + $0xd4] sm:$0x1] }
 0x215   : > { %v2883_v0 = vrot.slane %v2881_v34, 7  ;;  %v9737_v22 = vpack.c.bf16 %v2061_v46, %v2061_v46  ;;  %v2332_v35 = vrot.slane %v2318_v29, %v12210_v39  ;;  %3001 = vst.msk [vmem:[#allocation3 + $0x64] sm:$0xf] %vm410_vm5, %v2751_v57  ;;  %3004 = vst [vmem:[#allocation3 + $0x68] sm:$0x1] %v3003_v13  ;;  %v1867_v2 = vpop.permute.xlu1 %1866 }
 0x216   : > { %v12689_v43 = vpop.permute.xlu0 %1928  ;;  %v622_v46 = vld [vmem:[#allocation3 + $0xa4] sm:$0x1]  ;;  %v2130_v3 = vcombine.low %v12673_v41, %v1867_v2 }
 0x217   : > { %v2886_v9 = vor.u32 %v2884_v42, %v2883_v0  ;;  %v2888_v17 = vrot.slane %v2883_v0, 4  ;;  %v2677_v44 = vshrl.u32 %v9737_v22, 16  ;;  %v2333_v4 = vcombine.low %v2325_v12, %v2332_v35  ;;  %1924 = vrot.lane.b32.xlu0 %v1750_v38, %s10804_s22  ;;  %v598_v38 = vld [vmem:[#allocation3 + $0x44] sm:$0x1] }
 0x218   : > { %v2680_v47 = vshll.u32 %v9737_v22, 16  ;;  %1910 = vrot.lane.b32.xlu1 %v12543_v16, %s10804_s22  ;;  %v575_v16 = vsel %vm11129_vm4, 0, %v574_v27  ;;  %v623_v29 = vsel %vm11509_vm7, 0, %v622_v46  ;;  %v2138_v22 = vrot.slane %v2130_v3, %v12210_v39 }
 0x219   : > { %v2887_v31 = vsel %vm11958_vm10, %v2879_v7, %v2886_v9  ;;  %v3059_v36 = vsel %vm11129_vm4, %v2888_v17, %v3058_v5  ;;  %v2679_v37 = vrot.slane %v2677_v44, 7  ;;  %v9753_v30 = vpack.c.bf16 %v2333_v4, %v2333_v4  ;;  %576 = vst [vmem:[#allocation3 + $0x9c] sm:$0x1] %v575_v16  ;;  %v1931_v26 = vpop.permute.xlu1 %1930  ;;  %624 = vst [vmem:[#allocation3 + $0xa4] sm:$0x1] %v623_v29 }
 0x21a   : > { %3057 = vst.msk [vmem:[#allocation3 + $0xc4] sm:$0xf] %vm410_vm5, %v2887_v31  ;;  %3060 = vst [vmem:[#allocation3 + $0xc8] sm:$0x1] %v3059_v36  ;;  %v12700_v32 = vpop.permute.xlu0 %1832  ;;  %v2402_v41 = vcombine.low %v12689_v43, %v1931_v26  ;;  %v2991_v44 = vld [vmem:[#allocation3 + $0x54] sm:$0xf] }
 0x21b   : > { %v2682_v10 = vor.u32 %v2680_v47, %v2679_v37  ;;  %v2684_v60 = vrot.slane %v2679_v37, 4  ;;  %v2813_v55 = vshrl.u32 %v9753_v30, 16  ;;  %1956 = vrot.lane.b32.xlu0 %v12627_v33, %s10804_s22  ;;  %v2816_v24 = vshll.u32 %v9753_v30, 16 }
 0x21c   : > { %1918 = vrot.lane.b32.xlu1 %v12571_v51, %s10804_s22  ;;  %v611_v51 = vsel %vm11509_vm7, 0, %v610_v45  ;;  %v2410_v47 = vrot.slane %v2402_v41, %v12210_v39 }
 0x21d   : > { %v2683_v61 = vsel %vm11958_vm10, %v2675_v8, %v2682_v10  ;;  %v2975_v18 = vsel %vm11129_vm4, %v2684_v60, %v2974_v62  ;;  %v2815_v59 = vrot.slane %v2813_v55, 7  ;;  %612 = vst [vmem:[#allocation3 + $0x74] sm:$0x1] %v611_v51 }
 0x21e   : > { %2973 = vst.msk [vmem:[#allocation3 + $0x34] sm:$0xf] %vm410_vm5, %v2683_v61  ;;  %2976 = vst [vmem:[#allocation3 + $0x38] sm:$0x1] %v2975_v18  ;;  %v12713_v63 = vpop.permute.xlu0 %1896 }
 0x21f   : > { %v2818_v52 = vor.u32 %v2816_v24, %v2815_v59  ;;  %v2820_v33 = vrot.slane %v2815_v59, 4  ;;  %v3047_v24 = vld [vmem:[#allocation3 + $0xb4] sm:$0xf] }
 0x220   : > { %1922 = vrot.lane.b32.xlu1 %v12649_v58, %s10804_s22  ;;  %v599_v58 = vsel %vm11509_vm7, 0, %v598_v38 }
 0x221   : > { %v2819_v21 = vsel %vm11958_vm10, %v2811_v23, %v2818_v52  ;;  %v3031_v15 = vsel %vm11129_vm4, %v2820_v33, %v3030_v56  ;;  %600 = vst [vmem:[#allocation3 + $0x44] sm:$0x1] %v599_v58 }
 0x222   : > { %3029 = vst.msk [vmem:[#allocation3 + $0x94] sm:$0xf] %vm410_vm5, %v2819_v21  ;;  %3032 = vst [vmem:[#allocation3 + $0x98] sm:$0x1] %v3031_v15  ;;  %v1869_v20 = vpop.permute.xlu0 %1868 }
 0x224   : > { %1894 = vrot.lane.b32.xlu1 %v12601_v49, %s10804_s22 }
 0x226   : > { %v12727_v6 = vpop.permute.xlu0 %1872 }
 0x228   : > { %1862 = vrot.lane.b32.xlu1 %v12655_v48, %s10804_s22  ;;  %v635_v48 = vsel %vm11509_vm7, 0, %v634_v53 }
 0x229   : > { %636 = vst [vmem:[#allocation3 + $0xd4] sm:$0x1] %v635_v48 }
 0x22a   : > { %v12733_v34 = vpop.permute.xlu0 %1880 }
 0x22c   : > { %1926 = vrot.lane.b32.xlu1 %v12670_v11, %s10804_s22 }
 0x22e   : > { %v1933_v49 = vpop.permute.xlu0 %1932  ;;  %v1835_v1 = vpop.permute.xlu1 %1834 }
 0x22f   : > { %v1994_v18 = vcombine.low %v12700_v32, %v1835_v1  ;;  %v2963_v1 = vld [vmem:[#allocation3 + $0x24] sm:$0xf] }
 0x230   : > { %1958 = vrot.lane.b32.xlu1 %v12631_v50, %s10804_s22 }
 0x231   : > { %v2002_v33 = vrot.slane %v1994_v18, %v12210_v39 }
 0x232   : > { %v12743_v40 = vpop.permute.xlu0 %1936  ;;  %v1899_v14 = vpop.permute.xlu1 %1898 }
 0x233   : > { %v2266_v46 = vcombine.low %v12713_v63, %v1899_v14 }
 0x236   : > { %v12746_v0 = vpop.permute.xlu0 %1944  ;;  %v1871_v42 = vpop.permute.xlu1 %1870 }
 0x237   : > { %v2131_v11 = vcombine.low %v1869_v20, %v1871_v42 }
 0x239   : > { %v2145_v35 = vrot.slane %v2131_v11, %v12210_v39  ;;  %v2274_v11 = vrot.slane %v2266_v46, %v12210_v39 }
 0x23a   : > { %v1837_v12 = vpop.permute.xlu0 %1836  ;;  %v12750_v57 = vpop.permute.xlu1 %1874 }
 0x23b   : > { %v2146_v50 = vcombine.low %v2138_v22, %v2145_v35 }
 0x23d   : > { %v9742_v28 = vpack.c.bf16 %v2146_v50, %v2146_v50 }
 0x23e   : > { %v12752_v13 = vpop.permute.xlu0 %1840  ;;  %v12754_v5 = vpop.permute.xlu1 %1882 }
 0x23f   : > { %v2720_v7 = vshrl.u32 %v9742_v28, 16  ;;  %v2723_v17 = vshll.u32 %v9742_v28, 16 }
 0x241   : > { %v12757_v9 = vrot.slane %v2720_v7, 7 }
 0x242   : > { %v12759_v4 = vpop.permute.xlu0 %1848  ;;  %v1935_v31 = vpop.permute.xlu1 %1934 }
 0x243   : > { %v2725_v36 = vor.u32 %v2723_v17, %v12757_v9  ;;  %v2403_v37 = vcombine.low %v1933_v49, %v1935_v31  ;;  %v2147_v17 = vcombine.low %v12727_v6, %v12750_v57 }
 0x245   : > { %v2992_v62 = vsel %vm11543_vm8, %v2725_v36, %v2991_v44  ;;  %v2417_v30 = vrot.slane %v2403_v37, %v12210_v39  ;;  %v3019_v36 = vld [vmem:[#allocation3 + $0x84] sm:$0xf] }
 0x246   : > { %2993 = vst [vmem:[#allocation3 + $0x54] sm:$0xf] %v2992_v62  ;;  %v1901_v8 = vpop.permute.xlu0 %1900  ;;  %v12766_v43 = vpop.permute.xlu1 %1938 }
 0x247   : > { %v2418_v10 = vcombine.low %v2410_v47, %v2417_v30 }
 0x249   : > { %v9758_v60 = vpack.c.bf16 %v2418_v10, %v2418_v10  ;;  %v2198_v10 = vcombine.low %v12733_v34, %v12754_v5 }
 0x24a   : > { %v12768_v55 = vpop.permute.xlu0 %1904  ;;  %v12770_v27 = vpop.permute.xlu1 %1946 }
 0x24b   : > { %v2856_v61 = vshrl.u32 %v9758_v60, 16  ;;  %v2859_v59 = vshll.u32 %v9758_v60, 16 }
 0x24d   : > { %v12773_v16 = vrot.slane %v2856_v61, 7 }
 0x24e   : > { %v12775_v56 = vpop.permute.xlu0 %1912  ;;  %v1839_v45 = vpop.permute.xlu1 %1838 }
 0x24f   : > { %v2861_v23 = vor.u32 %v2859_v59, %v12773_v16  ;;  %v1995_v52 = vcombine.low %v1837_v12, %v1839_v45  ;;  %v2206_v59 = vrot.slane %v2198_v10, %v12210_v39 }
 0x251   : > { %v3048_v51 = vsel %vm11543_vm8, %v2861_v23, %v3047_v24  ;;  %v2009_v21 = vrot.slane %v1995_v52, %v12210_v39 }
 0x252   : > { %3049 = vst [vmem:[#allocation3 + $0xb4] sm:$0xf] %v3048_v51  ;;  %v1877_v15 = vpop.permute.xlu0 %1876  ;;  %v12782_v32 = vpop.permute.xlu1 %1842 }
 0x253   : > { %v2010_v20 = vcombine.low %v2002_v33, %v2009_v21 }
 0x255   : > { %v9734_v2 = vpack.c.bf16 %v2010_v20, %v2010_v20  ;;  %v2995_v20 = vld [vmem:[#allocation3 + $0x5c] sm:$0x1] }
 0x256   : > { %v1885_v38 = vpop.permute.xlu0 %1884  ;;  %v12784_v58 = vpop.permute.xlu1 %1850 }
 0x257   : > { %v2652_v26 = vshrl.u32 %v9734_v2, 16  ;;  %v2655_v49 = vshll.u32 %v9734_v2, 16 }
 0x259   : > { %v12787_v29 = vrot.slane %v2652_v26, 7 }
 0x25a   : > { %v12789_v53 = vpop.permute.xlu0 %1888  ;;  %v1903_v48 = vpop.permute.xlu1 %1902 }
 0x25b   : > { %v2657_v3 = vor.u32 %v2655_v49, %v12787_v29  ;;  %v2267_v42 = vcombine.low %v1901_v8, %v1903_v48  ;;  %v2155_v8 = vrot.slane %v2147_v17, %v12210_v39  ;;  %v2470_v48 = vcombine.low %v12746_v0, %v12770_v27 }
 0x25d   : > { %v2964_v22 = vsel %vm11543_vm8, %v2657_v3, %v2963_v1  ;;  %v2281_v35 = vrot.slane %v2267_v42, %v12210_v39 }
 0x25e   : > { %2965 = vst [vmem:[#allocation3 + $0x24] sm:$0xf] %v2964_v22  ;;  %v1941_v12 = vpop.permute.xlu0 %1940  ;;  %v12796_v63 = vpop.permute.xlu1 %1906 }
 0x25f   : > { %v2282_v14 = vcombine.low %v2274_v11, %v2281_v35 }
 0x261   : > { %v9750_v50 = vpack.c.bf16 %v2282_v14, %v2282_v14 }
 0x262   : > { %v1949_v28 = vpop.permute.xlu0 %1948  ;;  %v12798_v7 = vpop.permute.xlu1 %1914 }
 0x263   : > { %v2788_v41 = vshrl.u32 %v9750_v50, 16  ;;  %v2791_v31 = vshll.u32 %v9750_v50, 16  ;;  %v2478_v50 = vrot.slane %v2470_v48, %v12210_v39 }
 0x265   : > { %v12802_v44 = vrot.slane %v2788_v41, 7 }
 0x266   : > { %v1879_v37 = vpop.permute.xlu1 %1878  ;;  %v12805_v62 = vpop.permute.xlu0 %1952 }
 0x267   : > { %v2793_v47 = vor.u32 %v2791_v31, %v12802_v44  ;;  %v2148_v30 = vcombine.low %v1877_v15, %v1879_v37  ;;  %v2419_v15 = vcombine.low %v12743_v40, %v12766_v43 }
 0x269   : > { %v3020_v60 = vsel %vm11543_vm8, %v2793_v47, %v3019_v36  ;;  %v2162_v6 = vrot.slane %v2148_v30, %v12210_v39  ;;  %v2427_v43 = vrot.slane %v2419_v15, %v12210_v39  ;;  %v2011_v30 = vcombine.low %v12752_v13, %v12782_v32  ;;  %v3061_v15 = vld [vmem:[#allocation3 + $0xcc] sm:$0xf] }
 0x26a   : > { %3021 = vst [vmem:[#allocation3 + $0x84] sm:$0xf] %v3020_v60  ;;  %v1887_v57 = vpop.permute.xlu1 %1886  ;;  %v1845_v45 = vpop.permute.xlu0 %1844 }
 0x26b   : > { %v2163_v61 = vcombine.low %v2155_v8, %v2162_v6  ;;  %v2199_v18 = vcombine.low %v1885_v38, %v1887_v57  ;;  %v2726_v38 = vrot.slane %v12757_v9, 4  ;;  %v3005_v9 = vld [vmem:[#allocation3 + $0x6c] sm:$0xf]  ;;  %v3051_v57 = vld [vmem:[#allocation3 + $0xbc] sm:$0x1] }
 0x26d   : > { %v9743_v24 = vpack.c.bf16 %v2163_v61, %v2163_v61  ;;  %v2213_v23 = vrot.slane %v2199_v18, %v12210_v39 }
 0x26e   : > { %v12815_v52 = vpop.permute.xlu1 %1890  ;;  %v1853_v1 = vpop.permute.xlu0 %1852 }
 0x26f   : > { %v2728_v33 = vshrl.u32 %v9743_v24, 16  ;;  %v2214_v51 = vcombine.low %v2206_v59, %v2213_v23  ;;  %v2731_v5 = vshll.u32 %v9743_v24, 16  ;;  %v2862_v24 = vrot.slane %v12773_v16, 4 }
 0x270   : > { %v2019_v23 = vrot.slane %v2011_v30, %v12210_v39  ;;  %v2977_v30 = vld [vmem:[#allocation3 + $0x3c] sm:$0xf] }
 0x271   : > { %v2730_v34 = vrot.slane %v2728_v33, 7  ;;  %v9746_v21 = vpack.c.bf16 %v2214_v51, %v2214_v51 }
 0x272   : > { %v1943_v2 = vpop.permute.xlu1 %1942  ;;  %v12835_v17 = vpop.permute.xlu0 %1856 }
 0x273   : > { %v2733_v26 = vor.u32 %v2731_v5, %v2730_v34  ;;  %v2735_v46 = vrot.slane %v2730_v34, 4  ;;  %v2754_v49 = vshrl.u32 %v9746_v21, 16  ;;  %v2420_v3 = vcombine.low %v1941_v12, %v1943_v2 }
 0x274   : > { %v2757_v40 = vshll.u32 %v9746_v21, 16  ;;  %v2062_v34 = vcombine.low %v12759_v4, %v12784_v58 }
 0x275   : > { %v2734_v42 = vsel %vm11958_vm10, %v2726_v38, %v2733_v26  ;;  %v2996_v11 = vsel %vm11129_vm4, %v2735_v46, %v2995_v20  ;;  %v12826_v22 = vrot.slane %v2754_v49, 7  ;;  %v2434_v35 = vrot.slane %v2420_v3, %v12210_v39 }
 0x276   : > { %2994 = vst.msk [vmem:[#allocation3 + $0x58] sm:$0xf] %vm410_vm5, %v2734_v42  ;;  %2997 = vst [vmem:[#allocation3 + $0x5c] sm:$0x1] %v2996_v11  ;;  %v1951_v14 = vpop.permute.xlu1 %1950  ;;  %v1909_v61 = vpop.permute.xlu0 %1908  ;;  %v2070_v58 = vrot.slane %v2062_v34, %v12210_v39 }
 0x277   : > { %v2759_v0 = vor.u32 %v2757_v40, %v12826_v22  ;;  %v2471_v27 = vcombine.low %v1949_v28, %v1951_v14  ;;  %v2435_v12 = vcombine.low %v2427_v43, %v2434_v35  ;;  %v2658_v14 = vrot.slane %v12787_v29, 4 }
 0x279   : > { %v3006_v41 = vsel %vm11543_vm8, %v2759_v0, %v3005_v9  ;;  %v2485_v31 = vrot.slane %v2471_v27, %v12210_v39  ;;  %v9759_v36 = vpack.c.bf16 %v2435_v12, %v2435_v12  ;;  %v2967_v9 = vld [vmem:[#allocation3 + $0x2c] sm:$0x1] }
 0x27a   : > { %3007 = vst [vmem:[#allocation3 + $0x6c] sm:$0xf] %v3006_v41  ;;  %v12838_v37 = vpop.permute.xlu1 %1954  ;;  %v1917_v26 = vpop.permute.xlu0 %1916  ;;  %v2334_v41 = vcombine.low %v12775_v56, %v12798_v7 }
 0x27b   : > { %v2486_v47 = vcombine.low %v2478_v50, %v2485_v31  ;;  %v2864_v8 = vshrl.u32 %v9759_v36, 16  ;;  %v2867_v60 = vshll.u32 %v9759_v36, 16 }
 0x27d   : > { %v9762_v28 = vpack.c.bf16 %v2486_v47, %v2486_v47  ;;  %v2866_v10 = vrot.slane %v2864_v8, 7 }
 0x27e   : > { %v1847_v6 = vpop.permute.xlu1 %1846  ;;  %v12864_v0 = vpop.permute.xlu0 %1920 }
 0x27f   : > { %v2890_v18 = vshrl.u32 %v9762_v28, 16  ;;  %v2012_v59 = vcombine.low %v1845_v45, %v1847_v6  ;;  %v2869_v33 = vor.u32 %v2867_v60, %v2866_v10  ;;  %v2871_v51 = vrot.slane %v2866_v10, 4 }
 0x280   : > { %v2893_v13 = vshll.u32 %v9762_v28, 16  ;;  %v2342_v60 = vrot.slane %v2334_v41, %v12210_v39 }
 0x281   : > { %v12846_v5 = vrot.slane %v2890_v18, 7  ;;  %v2026_v32 = vrot.slane %v2012_v59, %v12210_v39  ;;  %v2870_v21 = vsel %vm11958_vm10, %v2862_v24, %v2869_v33  ;;  %v3052_v45 = vsel %vm11129_vm4, %v2871_v51, %v3051_v57 }
 0x282   : > { %v1855_v16 = vpop.permute.xlu1 %1854  ;;  %3050 = vst.msk [vmem:[#allocation3 + $0xb8] sm:$0xf] %vm410_vm5, %v2870_v21  ;;  %3053 = vst [vmem:[#allocation3 + $0xbc] sm:$0x1] %v3052_v45  ;;  %v1893_v6 = vpop.permute.xlu0 %1892  ;;  %v3023_v45 = vld [vmem:[#allocation3 + $0x8c] sm:$0x1] }
 0x283   : > { %v2895_v20 = vor.u32 %v2893_v13, %v12846_v5  ;;  %v2027_v2 = vcombine.low %v2019_v23, %v2026_v32  ;;  %v2063_v4 = vcombine.low %v1853_v1, %v1855_v16  ;;  %v2283_v1 = vcombine.low %v12768_v55, %v12796_v63 }
 0x284   : > { %v2215_v23 = vcombine.low %v12789_v53, %v12815_v52 }
 0x285   : > { %v3062_v38 = vsel %vm11543_vm8, %v2895_v20, %v3061_v15  ;;  %v9735_v46 = vpack.c.bf16 %v2027_v2, %v2027_v2  ;;  %v2077_v49 = vrot.slane %v2063_v4, %v12210_v39  ;;  %v2291_v29 = vrot.slane %v2283_v1, %v12210_v39 }
 0x286   : > { %3063 = vst [vmem:[#allocation3 + $0xcc] sm:$0xf] %v3062_v38  ;;  %v12859_v48 = vpop.permute.xlu1 %1858  ;;  %v1861_v21 = vpop.permute.xlu0 %1860  ;;  %v2794_v20 = vrot.slane %v12802_v44, 4  ;;  %v2223_v2 = vrot.slane %v2215_v23, %v12210_v39 }
 0x287   : > { %v2660_v3 = vshrl.u32 %v9735_v46, 16  ;;  %v2078_v42 = vcombine.low %v2070_v58, %v2077_v49  ;;  %v2663_v40 = vshll.u32 %v9735_v46, 16  ;;  %v2079_v38 = vcombine.low %v12835_v17, %v12859_v48 }
 0x289   : > { %v2662_v11 = vrot.slane %v2660_v3, 7  ;;  %v9738_v43 = vpack.c.bf16 %v2078_v42, %v2078_v42  ;;  %v3033_v3 = vld [vmem:[#allocation3 + $0x9c] sm:$0xf]  ;;  %v2087_v48 = vrot.slane %v2079_v38, %v12210_v39 }
 0x28a   : > { %v1911_v35 = vpop.permute.xlu1 %1910 }
 0x28b   : > { %v2665_v27 = vor.u32 %v2663_v40, %v2662_v11  ;;  %v2667_v12 = vrot.slane %v2662_v11, 4  ;;  %v2686_v50 = vshrl.u32 %v9738_v43, 16  ;;  %v2284_v31 = vcombine.low %v1909_v61, %v1911_v35  ;;  %v1925_v40 = vpop.permute.xlu0 %1924 }
 0x28c   : > { %v2689_v63 = vshll.u32 %v9738_v43, 16 }
 0x28d   : > { %v2666_v36 = vsel %vm11958_vm10, %v2658_v14, %v2665_v27  ;;  %v2968_v47 = vsel %vm11129_vm4, %v2667_v12, %v2967_v9  ;;  %v12872_v55 = vrot.slane %v2686_v50, 7  ;;  %v2298_v8 = vrot.slane %v2284_v31, %v12210_v39 }
 0x28e   : > { %2966 = vst.msk [vmem:[#allocation3 + $0x28] sm:$0xf] %vm410_vm5, %v2666_v36  ;;  %2969 = vst [vmem:[#allocation3 + $0x2c] sm:$0x1] %v2968_v47  ;;  %v1919_v28 = vpop.permute.xlu1 %1918 }
 0x28f   : > { %v2691_v56 = vor.u32 %v2689_v63, %v12872_v55  ;;  %v2335_v7 = vcombine.low %v1917_v26, %v1919_v28  ;;  %v2299_v10 = vcombine.low %v2291_v29, %v2298_v8  ;;  %v2487_v63 = vcombine.low %v12805_v62, %v12838_v37  ;;  %v3009_v29 = vld [vmem:[#allocation3 + $0x74] sm:$0x1]  ;;  %v1957_v28 = vpop.permute.xlu0 %1956 }
 0x290   : > { %v2760_v8 = vrot.slane %v12826_v22, 4  ;;  %v2981_v22 = vld [vmem:[#allocation3 + $0x44] sm:$0x1] }
 0x291   : > { %v2978_v57 = vsel %vm11543_vm8, %v2691_v56, %v2977_v30  ;;  %v2349_v61 = vrot.slane %v2335_v7, %v12210_v39  ;;  %v9751_v18 = vpack.c.bf16 %v2299_v10, %v2299_v10  ;;  %v2495_v37 = vrot.slane %v2487_v63, %v12210_v39 }
 0x292   : > { %2979 = vst [vmem:[#allocation3 + $0x3c] sm:$0xf] %v2978_v57  ;;  %v1923_v59 = vpop.permute.xlu1 %1922 }
 0x293   : > { %v2350_v24 = vcombine.low %v2342_v60, %v2349_v61  ;;  %v2796_v33 = vshrl.u32 %v9751_v18, 16  ;;  %v2799_v13 = vshll.u32 %v9751_v18, 16  ;;  %v2351_v35 = vcombine.low %v12864_v0, %v1923_v59 }
 0x295   : > { %v9754_v51 = vpack.c.bf16 %v2350_v24, %v2350_v24  ;;  %v2798_v34 = vrot.slane %v2796_v33, 7  ;;  %v2359_v19 = vrot.slane %v2351_v35, %v12210_v39  ;;  %v2692_v24 = vrot.slane %v12872_v55, 4 }
 0x296   : > { %v1895_v32 = vpop.permute.xlu1 %1894 }
 0x297   : > { %v2822_v15 = vshrl.u32 %v9754_v51, 16  ;;  %v2216_v16 = vcombine.low %v1893_v6, %v1895_v32  ;;  %v2801_v4 = vor.u32 %v2799_v13, %v2798_v34  ;;  %v2803_v58 = vrot.slane %v2798_v34, 4 }
 0x298   : > { %v2825_v53 = vshll.u32 %v9754_v51, 16 }
 0x299   : > { %v12888_v26 = vrot.slane %v2822_v15, 7  ;;  %v2230_v52 = vrot.slane %v2216_v16, %v12210_v39  ;;  %v2802_v46 = vsel %vm11958_vm10, %v2794_v20, %v2801_v4  ;;  %v3024_v49 = vsel %vm11129_vm4, %v2803_v58, %v3023_v45  ;;  %v3037_v16 = vld [vmem:[#allocation3 + $0xa4] sm:$0x1] }
 0x29a   : > { %v1863_v44 = vpop.permute.xlu1 %1862  ;;  %3022 = vst.msk [vmem:[#allocation3 + $0x88] sm:$0xf] %vm410_vm5, %v2802_v46  ;;  %3025 = vst [vmem:[#allocation3 + $0x8c] sm:$0x1] %v3024_v49  ;;  %v2896_v46 = vrot.slane %v12846_v5, 4 }
 0x29b   : > { %v2827_v42 = vor.u32 %v2825_v53, %v12888_v26  ;;  %v2231_v11 = vcombine.low %v2223_v2, %v2230_v52  ;;  %v2080_v17 = vcombine.low %v1861_v21, %v1863_v44  ;;  %v3065_v52 = vld [vmem:[#allocation3 + $0xd4] sm:$0x1] }
 0x29d   : > { %v3034_v43 = vsel %vm11543_vm8, %v2827_v42, %v3033_v3  ;;  %v9747_v1 = vpack.c.bf16 %v2231_v11, %v2231_v11  ;;  %v2094_v9 = vrot.slane %v2080_v17, %v12210_v39 }
 0x29e   : > { %3035 = vst [vmem:[#allocation3 + $0x9c] sm:$0xf] %v3034_v43  ;;  %v1927_v14 = vpop.permute.xlu1 %1926 }
 0x29f   : > { %v2762_v27 = vshrl.u32 %v9747_v1, 16  ;;  %v2095_v12 = vcombine.low %v2087_v48, %v2094_v9  ;;  %v2352_v50 = vcombine.low %v1925_v40, %v1927_v14  ;;  %v2765_v31 = vshll.u32 %v9747_v1, 16 }
 0x2a1   : > { %v2764_v41 = vrot.slane %v2762_v27, 7  ;;  %v9739_v36 = vpack.c.bf16 %v2095_v12, %v2095_v12  ;;  %v2366_v47 = vrot.slane %v2352_v50, %v12210_v39 }
 0x2a2   : > { %v1959_v30 = vpop.permute.xlu1 %1958 }
 0x2a3   : > { %v2767_v0 = vor.u32 %v2765_v31, %v2764_v41  ;;  %v2769_v56 = vrot.slane %v2764_v41, 4  ;;  %v2694_v7 = vshrl.u32 %v9739_v36, 16  ;;  %v2367_v10 = vcombine.low %v2359_v19, %v2366_v47 }
 0x2a4   : > { %v2488_v60 = vcombine.low %v1957_v28, %v1959_v30  ;;  %v2697_v62 = vshll.u32 %v9739_v36, 16 }
 0x2a5   : > { %v2768_v6 = vsel %vm11958_vm10, %v2760_v8, %v2767_v0  ;;  %v3010_v57 = vsel %vm11129_vm4, %v2769_v56, %v3009_v29  ;;  %v2696_v61 = vrot.slane %v2694_v7, 7  ;;  %v9755_v18 = vpack.c.bf16 %v2367_v10, %v2367_v10 }
 0x2a6   : > { %3008 = vst.msk [vmem:[#allocation3 + $0x70] sm:$0xf] %vm410_vm5, %v2768_v6  ;;  %3011 = vst [vmem:[#allocation3 + $0x74] sm:$0x1] %v3010_v57  ;;  %v2502_v59 = vrot.slane %v2488_v60, %v12210_v39  ;;  %v2828_v39 = vrot.slane %v12888_v26, 4 }
 0x2a7   : > { %v2699_v23 = vor.u32 %v2697_v62, %v2696_v61  ;;  %v2701_v33 = vrot.slane %v2696_v61, 4  ;;  %v2830_v51 = vshrl.u32 %v9755_v18, 16  ;;  %v2833_v45 = vshll.u32 %v9755_v18, 16 }
 0x2a8   : > { %v2503_v34 = vcombine.low %v2495_v37, %v2502_v59 }
 0x2a9   : > { %v2700_v13 = vsel %vm11958_vm10, %v2692_v24, %v2699_v23  ;;  %v2982_v32 = vsel %vm11129_vm4, %v2701_v33, %v2981_v22  ;;  %v2832_v21 = vrot.slane %v2830_v51, 7 }
 0x2aa   : > { %2980 = vst.msk [vmem:[#allocation3 + $0x40] sm:$0xf] %vm410_vm5, %v2700_v13  ;;  %2983 = vst [vmem:[#allocation3 + $0x44] sm:$0x1] %v2982_v32  ;;  %v9763_v15 = vpack.c.bf16 %v2503_v34, %v2503_v34 }
 0x2ab   : > { %v2835_v55 = vor.u32 %v2833_v45, %v2832_v21  ;;  %v2837_v20 = vrot.slane %v2832_v21, 4 }
 0x2ac   : > { %v2898_v2 = vshrl.u32 %v9763_v15, 16  ;;  %v2901_v53 = vshll.u32 %v9763_v15, 16 }
 0x2ad   : > { %v2836_v4 = vsel %vm11958_vm10, %v2828_v39, %v2835_v55  ;;  %v3038_v58 = vsel %vm11129_vm4, %v2837_v20, %v3037_v16 }
 0x2ae   : > { %v2900_v38 = vrot.slane %v2898_v2, 7  ;;  %3036 = vst.msk [vmem:[#allocation3 + $0xa0] sm:$0xf] %vm410_vm5, %v2836_v4  ;;  %3039 = vst [vmem:[#allocation3 + $0xa4] sm:$0x1] %v3038_v58 }
 0x2b0   : > { %v2903_v49 = vor.u32 %v2901_v53, %v2900_v38  ;;  %v2905_v3 = vrot.slane %v2900_v38, 4 }
 0x2b2   : > { %v2904_v26 = vsel %vm11958_vm10, %v2896_v46, %v2903_v49  ;;  %v3066_v44 = vsel %vm11129_vm4, %v2905_v3, %v3065_v52 }
 0x2b3   : > { %3064 = vst.msk [vmem:[#allocation3 + $0xd0] sm:$0xf] %vm410_vm5, %v2904_v26  ;;  %3067 = vst [vmem:[#allocation3 + $0xd4] sm:$0x1] %v3066_v44 }
 0x2b4 PF: > { %v9315_v42 = vld [vmem:[%s15375_s4 + $0x8] sm:$0xf]  ;;  %s9764_s26 = smul.u32 48, %s10782_s13  ;;  %vm4414_vm12 = vcmask 1042432   ;;  %vm4415_vm13 = vcmask 1046532   ;;  %vm3628_vm14 = vcmask 1041408  }
 0x2b5   : > { %v9346_v5 = vcombine.low %v9315_v42, %v9315_v42  ;;  %vm12949_vm15 = vmor %vm4414_vm12, %vm4415_vm13  ;;  %v9393_v43 = vld [vmem:[%s15375_s4 + $0xc] sm:$0xf]  ;;  %v12967_v14 = vld [vmem:[%s15375_s4 + $0x10] sm:$0xf]  ;;  %vm3609_vm0 = vcmask 31744   ;;  %vm7625_vm4 = vcmask 27648  }
 0x2b6   : > { %s12940_s27 = scalar_lea.vmem [#allocation3], %s9764_s26  ;;  %v4868_v36 = vsel %vm3628_vm14, %v9393_v43, 0  ;;  %v12985_v47 = vld [vmem:[%s15375_s4] sm:$0xf]  ;;  %v12992_v30 = vsel %vm3628_vm14, %v12967_v14, 0  ;;  %v9412_v0 = vcombine.low %v9393_v43, %v9393_v43  ;;  %s13005_s23 = scalar_lea.vmem [#allocation2], %s9764_s26  ;;  %v9438_v13 = vcombine.low %v12967_v14, %v12967_v14 }
 0x2b7   : > { %v12936_v54 = vrot.slane %v9346_v5, 2  ;;  %v12997_v8 = vsel %vm3628_vm14, %v12985_v47, 0  ;;  %v13008_v10 = vld [vmem:[%s13005_s23 + $0xc] sm:$0xf]  ;;  %v13011_v60 = vld [vmem:[%s13005_s23 + $0x10] sm:$0xf] }
 0x2b8   : > { %v9394_v33 = vcombine.low %v13008_v10, %v13011_v60  ;;  %v13023_v51 = vld [vmem:[%s13005_s23 + $0x18] sm:$0xf]  ;;  %v13026_v34 = vld [vmem:[%s13005_s23 + $0x1c] sm:$0xf]  ;;  %v4996_v39 = vrot.slane %v9412_v0, 2  ;;  %v5114_v44 = vshrl.u32 %v13008_v10, 16 }
 0x2b9   : > { %15794 = vst [vmem:[#allocation78_spill] sm:$0xff] %v12936_v54  ;;  %10606 = vmatprep.subr.msk.bf16.mxu0 %vm3628_vm14, %v12936_v54  ;;  %v12961_v1 = vsel %vm3628_vm14, %v12936_v54, 0  ;;  %v5138_v21 = vshrl.u32 %v13023_v51, 16  ;;  %v5141_v45 = vshll.u32 %v13023_v51, 16  ;;  %v5147_v15 = vshll.u32 %v13026_v34, 16 }
 0x2ba   : > { %v12943_v25 = vld [vmem:[%s12940_s27] sm:$0xf]  ;;  %v12946_v11 = vld [vmem:[%s12940_s27 + $0x4] sm:$0xf]  ;;  %v3558_v17 = vld [vmem:[%s12940_s27 + $0x8] sm:$0x1]  ;;  %10042 = vmatpush3.bf16.msra.mxu0 %v12961_v1 }
 0x2bb   : > { %15795 = vst [vmem:[#allocation79_spill] sm:$0xff] %v12943_v25  ;;  %15796 = vst [vmem:[#allocation80_spill] sm:$0xff] %v12946_v11  ;;  %v9334_v40 = vrot.slane %v12943_v25, 9  ;;  %v4599_v9 = vrot.slane %v12946_v11, 5  ;;  %v4602_v35 = vrot.slane %v3558_v17, 5  ;;  %v9264_v50 = vcombine.low %v12943_v25, %v12946_v11  ;;  %10608 = vmatprep.subr.msk.bf16.mxu0 %vm3628_vm14, %v9393_v43 }
 0x2bc   : > { %15799 = vst [vmem:[#allocation81_spill] sm:$0xff] %v12961_v1  ;;  %v12971_v27 = vld [vmem:[%s12940_s27 + $0xc] sm:$0xf]  ;;  %v12974_v12 = vld [vmem:[%s12940_s27 + $0x10] sm:$0xf]  ;;  %v4146_v6 = vshll.u32 %v3558_v17, 16 }
 0x2bd   : > { %v4600_v41 = vsel %vm12949_vm15, %v9334_v40, %v4599_v9  ;;  %v4601_v31 = vrot.slane %v4599_v9, 4  ;;  %v3561_v29 = vld [vmem:[%s12940_s27 + $0x14] sm:$0x1]  ;;  %9973 = vmatprep.mubr.msk.bf16.mxu1 %vm3609_vm0, %v9264_v50  ;;  %v9335_v56 = vrot.slane %v12971_v27, 9  ;;  %v4606_v7 = vrot.slane %v12974_v12, 5 }
 0x2be   : > { %v4151_v61 = vshrl.u32 %v12971_v27, 16  ;;  %v4154_v62 = vshll.u32 %v12971_v27, 16  ;;  %v4160_v37 = vshll.u32 %v12974_v12, 16  ;;  %v4609_v59 = vrot.slane %v3561_v29, 5  ;;  %v13054_v3 = vld [vmem:[%s13005_s23 + $0x24] sm:$0xf] }
 0x2bf   : > { %v4603_v28 = vsel %vm12949_vm15, %v4601_v31, %v4602_v35  ;;  %v4607_v22 = vsel %vm12949_vm15, %v9335_v56, %v4606_v7  ;;  %v4608_v18 = vrot.slane %v4606_v7, 4  ;;  %v4164_v24 = vshrl.u32 %v12974_v12, 16  ;;  %v13065_v17 = vld [vmem:[%s13005_s23 + $0x28] sm:$0xf]  ;;  %v13073_v35 = vld [vmem:[%s13005_s23 + $0x30] sm:$0xf] }
 0x2c0   : > { %v9340_v57 = vcombine.low %v4600_v41, %v4603_v28  ;;  %v4170_v23 = vshll.u32 %v3561_v29, 16  ;;  %v5151_v20 = vshrl.u32 %v13026_v34, 16  ;;  %v13037_v2 = vrot.slane %v4146_v6, 5  ;;  %15806 = vst [vmem:[#allocation88_spill] sm:$0xff] %v13073_v35  ;;  %v13076_v50 = vld [vmem:[%s13005_s23 + $0x34] sm:$0xf] }
 0x2c1   : > { %v4610_v32 = vsel %vm12949_vm15, %v4608_v18, %v4609_v59  ;;  %v13039_v4 = vrot.slane %v4151_v61, 4  ;;  %v13041_v58 = vrot.slane %v4154_v62, 5  ;;  %v5686_v38 = vrot.slane %v13026_v34, 5  ;;  %15807 = vst [vmem:[#allocation89_spill] sm:$0xff] %v13076_v50  ;;  %v13088_v0 = vld [vmem:[%s13005_s23 + $0x3c] sm:$0xf] }
 0x2c2   : > { %10043 = vmatprep.mubr.msk.bf16.mxu0 %vm3609_vm0, %v9340_v57  ;;  %v9341_v55 = vcombine.low %v4607_v22, %v4610_v32  ;;  %15800 = vst [vmem:[#allocation82_spill] sm:$0xff] %v13037_v2  ;;  %v13044_v53 = vrot.slane %v4160_v37, 5  ;;  %v13046_v52 = vrot.slane %v4164_v24, 4  ;;  %v13049_v46 = vrot.slane %v5138_v21, 4  ;;  %15808 = vst [vmem:[#allocation90_spill] sm:$0xff] %v13088_v0 }
 0x2c3   : > { %15801 = vst [vmem:[#allocation83_spill] sm:$0xff] %v13039_v4  ;;  %15802 = vst [vmem:[#allocation84_spill] sm:$0xff] %v13041_v58  ;;  %v13051_v49 = vrot.slane %v5141_v45, 5  ;;  %v13056_v26 = vrot.slane %v4170_v23, 5  ;;  %v13060_v42 = vrot.slane %v5147_v15, 5  ;;  %v13062_v5 = vrot.slane %v5151_v20, 4 }
 0x2c4   : > { %15803 = vst [vmem:[#allocation85_spill] sm:$0xff] %v13044_v53  ;;  %15804 = vst [vmem:[#allocation86_spill] sm:$0xff] %v13046_v52  ;;  %10044 = vmatmul.mubr.msk.bf16.vlgmr.msra.gmra.mrb[0].mxu0 %vm3609_vm0, %v9341_v55  ;;  %v5117_v40 = vshll.u32 %v13008_v10, 16  ;;  %v5127_v43 = vshrl.u32 %v13011_v60, 16  ;;  %v9395_v9 = vcombine.low %v13023_v51, %v13026_v34  ;;  %v9270_v41 = vcombine.low %v12985_v47, %v12985_v47  ;;  %v13091_v56 = vld [vmem:[%s13005_s23 + $0x40] sm:$0xf] }
 0x2c5   : > { %15805 = vst [vmem:[#allocation87_spill] sm:$0xff] %v13056_v26  ;;  %10056 = vmatpush3.bf16.msra.mxu0 %v4868_v36  ;;  %10057 = vmatprep.mubr.msk.bf16.mxu0 %vm3609_vm0, %v9394_v33  ;;  %v9447_v31 = vrot.slane %v13023_v51, 9  ;;  %v13083_v36 = vrot.slane %v5686_v38, 4  ;;  %v5016_v29 = vsel %vm3628_vm14, %v4996_v39, 0  ;;  %15809 = vst [vmem:[#allocation91_spill] sm:$0xff] %v13091_v56  ;;  %v5144_v7 = vor.u32 %v13051_v49, %v13049_v46 }
 0x2c6   : > { %10609 = vmatprep.subr.msk.bf16.mxu0 %vm3628_vm14, %v4996_v39  ;;  %v9396_v6 = vcombine.low %v13054_v3, %v13065_v17  ;;  %v13100_v62 = vld [vmem:[%s13005_s23 + $0x48] sm:$0xf]  ;;  %v13103_v37 = vld [vmem:[%s13005_s23 + $0x4c] sm:$0xf]  ;;  %v9397_v18 = vcombine.low %v13073_v35, %v13076_v50  ;;  %v13115_v33 = vld [vmem:[%s12940_s27 + $0x10] sm:$0xf]  ;;  %v9265_v55 = vcombine.low %v12971_v27, %v12974_v12 }
 0x2c7   : > { %15810 = vst [vmem:[#allocation92_spill] sm:$0xff] %v13100_v62  ;;  %15811 = vst [vmem:[#allocation93_spill] sm:$0xff] %v13103_v37  ;;  %v13112_v23 = vld [vmem:[%s12940_s27 + $0xc] sm:$0xf]  ;;  %v13122_v15 = vld [vmem:[%s12940_s27 + $0x18] sm:$0xf] }
 0x2c8   : > { %v13129_v19 = vld [vmem:[%s12940_s27 + $0x1c] sm:$0xf]  ;;  %v13133_v32 = vrot.slane %v9438_v13, 2  ;;  %v13136_v45 = vld [vmem:[%s12940_s27 + $0x24] sm:$0xf]  ;;  %v3608_v51 = vrot.slane %v9270_v41, 2 }
 0x2c9   : > { %v13142_v24 = vld [vmem:[%s12940_s27 + $0x28] sm:$0xf]  ;;  %v13148_v21 = vld [vmem:[%s12940_s27 + $0x30] sm:$0xf]  ;;  %v13155_v20 = vld [vmem:[%s12940_s27 + $0x34] sm:$0xf] }
 0x2ca   : > { %10601 = vmatprep.subr.msk.bf16.mxu1 %vm3628_vm14, %v3608_v51  ;;  %v3630_v41 = vsel %vm3628_vm14, %v3608_v51, 0  ;;  %v5116_v63 = vrot.slane %v5114_v44, 4  ;;  %v5119_v13 = vrot.slane %v5117_v40, 5  ;;  %v9398_v51 = vcombine.low %v13088_v0, %v13091_v56  ;;  %v13164_v27 = vld [vmem:[%s12940_s27 + $0x18] sm:$0xf] }
 0x2cb   : > { %9972 = vmatpush3.bf16.msra.mxu1 %v3630_v41  ;;  %15812 = vst [vmem:[#allocation94_spill] sm:$0xff] %v13164_v27  ;;  %v13167_v12 = vld [vmem:[%s12940_s27 + $0x1c] sm:$0xf]  ;;  %v5123_v39 = vshll.u32 %v13011_v60, 16  ;;  %v13176_v44 = vsel %vm12949_vm15, %v9447_v31, %v5686_v38  ;;  %v13190_v34 = vld [vmem:[%s12940_s27 + $0x48] sm:$0xf] }
 0x2cc   : > { %15813 = vst [vmem:[#allocation95_spill] sm:$0xff] %v13167_v12  ;;  %10602 = vmatprep.subr.msk.bf16.mxu1 %vm3628_vm14, %v12985_v47  ;;  %v13184_v41 = vld [vmem:[%s12940_s27 + $0x3c] sm:$0xf]  ;;  %v13187_v47 = vld [vmem:[%s12940_s27 + $0x40] sm:$0xf]  ;;  %v9266_v38 = vcombine.low %v13164_v27, %v13167_v12  ;;  %v5129_v40 = vrot.slane %v5127_v43, 4 }
 0x2cd   : > { %v13201_v59 = vld [vmem:[%s12940_s27 + $0x4c] sm:$0xf]  ;;  %vm3847_vm1 = vsmask.f32 3328  ;;  %v13220_v31 = vrot.slane %v5123_v39, 5  ;;  %v15828_v12 = vshrl.u32 %v13073_v35, 16 }
 0x2ce   : > { %9974 = vmatmul.mubr.msk.bf16.vlgmr.msra.gmra.mrb[0].mxu1 %vm3609_vm0, %v9265_v55  ;;  %v13213_v55 = vld [vmem:[%s12940_s27 + $0x28] sm:$0xf]  ;;  %vm3848_vm2 = vsmask.f32 7440  ;;  %v13237_v43 = vld [vmem:[%s12940_s27 + $0x30] sm:$0xf] }
 0x2cf   : > { %9977 = vmatprep.mubr.msk.bf16.mxu1 %vm3609_vm0, %v9266_v38  ;;  %15815 = vst [vmem:[#allocation97_spill] sm:$0xff] %v13213_v55  ;;  %9986 = vmatpush3.bf16.msra.mxu1 %v12997_v8  ;;  %v5130_v39 = vor.u32 %v5129_v40, %v13220_v31  ;;  %15816 = vst [vmem:[#allocation98_spill] sm:$0xff] %v13237_v43  ;;  %v13240_v57 = vld [vmem:[%s12940_s27 + $0x34] sm:$0xf]  ;;  %v5145_v8 = vrot.slane %v5144_v7, 4  ;;  %v15824_v7 = vshrl.u32 %v13054_v3, 16 }
 0x2d0   : > { %10058 = vmatmul.mubr.msk.bf16.vlgmr.msra.gmra.mrb[0].mxu0 %vm3609_vm0, %v9395_v9  ;;  %15817 = vst [vmem:[#allocation99_spill] sm:$0xff] %v13240_v57  ;;  %v9268_v28 = vcombine.low %v13237_v43, %v13240_v57  ;;  %vm13258_vm3 = vmor %vm3847_vm1, %vm3848_vm2  ;;  %v15820_v9 = vor.u32 %v13062_v5, %v13060_v42  ;;  %v13271_v22 = vld [vmem:[%s12940_s27 + $0x3c] sm:$0xf]  ;;  %v13274_v40 = vld [vmem:[%s12940_s27 + $0x40] sm:$0xf]  ;;  %v5195_v2 = vshll.u32 %v13076_v50, 16 }
 0x2d1   : > { %10070 = vmatpush3.bf16.msra.mxu0 %v5016_v29  ;;  %10061 = vmatprep.mubr.msk.bf16.mxu0 %vm3609_vm0, %v9396_v6  ;;  %v13216_v29 = vld [vmem:[%s13005_s23 + $0x14] sm:$0x1]  ;;  %v5120_v6 = vor.u32 %v5119_v13, %v5116_v63  ;;  %v13229_v63 = vld [vmem:[%s13005_s23 + $0x20] sm:$0x1]  ;;  %15821 = vst [vmem:[#allocation100_spill] sm:$0xff] %v13271_v22  ;;  %15822 = vst [vmem:[#allocation101_spill] sm:$0xff] %v13274_v40 }
 0x2d2   : > { %10610 = vmatprep.subr.msk.bf16.mxu0 %vm3628_vm14, %v12967_v14  ;;  %v13210_v14 = vld [vmem:[%s12940_s27 + $0x24] sm:$0xf]  ;;  %v5133_v61 = vshll.u32 %v13216_v29, 16  ;;  %v5157_v16 = vshll.u32 %v13229_v63, 16  ;;  %v13278_v49 = vld [vmem:[%s13005_s23 + $0x2c] sm:$0x1] }
 0x2d3   : > { %15814 = vst [vmem:[#allocation96_spill] sm:$0xff] %v13210_v14  ;;  %v9267_v13 = vcombine.low %v13210_v14, %v13213_v55  ;;  %v5121_v38 = vrot.slane %v5120_v6, 4  ;;  %v5155_v6 = vrot.slane %v15820_v9, 4  ;;  %15823 = vst [vmem:[#allocation102_spill] sm:$0xff] %v13278_v49  ;;  %v5164_v54 = vrot.slane %v15824_v7, 4 }
 0x2d4   : > { %v5159_v1 = vrot.slane %v5157_v16, 5  ;;  %v5150_v9 = vsel %vm13258_vm3, %v5145_v8, %v13060_v42  ;;  %v5171_v16 = vshll.u32 %v13065_v17, 16  ;;  %v13295_v14 = vld [vmem:[%s13005_s23 + $0x38] sm:$0x1]  ;;  %v9269_v7 = vcombine.low %v13271_v22, %v13274_v40  ;;  %v13304_v42 = vld [vmem:[%s13005_s23] sm:$0xf] }
 0x2d5   : > { %v5126_v5 = vsel %vm13258_vm3, %v5121_v38, %v13220_v31  ;;  %15827 = vst [vmem:[#allocation103_spill] sm:$0xff] %v13295_v14  ;;  %v5188_v31 = vrot.slane %v15828_v12, 4  ;;  %v15829_v38 = vshll.u32 %v13073_v35, 16  ;;  %15830 = vst [vmem:[#allocation104_spill] sm:$0xff] %v13304_v42  ;;  %v15832_v26 = vshrl.u32 %v13076_v50, 16 }
 0x2d6   : > { %9978 = vmatmul.mubr.msk.bf16.gmra.mrb[4].mxu1 %vm3609_vm0, %v9267_v13  ;;  %v15826_v13 = vshrl.u32 %v13065_v17, 16  ;;  %v13309_v8 = vrot.slane %v5171_v16, 5  ;;  %v5160_v12 = vsel %vm13258_vm3, %v5155_v6, %v5159_v1  ;;  %v13323_v52 = vrot.slane %v5195_v2, 5  ;;  %v13351_v6 = vld [vmem:[%s13005_s23 + $0x10] sm:$0xf] }
 0x2d7   : > { %9981 = vmatprep.mubr.msk.bf16.mxu1 %vm3609_vm0, %v9268_v28  ;;  %v5191_v27 = vrot.slane %v15829_v38, 5  ;;  %v13307_v28 = vld [vmem:[%s13005_s23 + $0x4] sm:$0xf]  ;;  %v5201_v40 = vrot.slane %v15832_v26, 4  ;;  %v5205_v38 = vshll.u32 %v13295_v14, 16  ;;  %v13333_v1 = vsel %vm3628_vm14, %v13133_v32, 0 }
 0x2d8   : > { %10062 = vmatmul.mubr.msk.bf16.gmra.mrb[4].mxu0 %vm3609_vm0, %v9397_v18  ;;  %v5135_v18 = vrot.slane %v5133_v61, 5  ;;  %v15825_v61 = vshll.u32 %v13054_v3, 16  ;;  %15831 = vst [vmem:[#allocation105_spill] sm:$0xff] %v13307_v28  ;;  %v9277_v26 = vcombine.low %v13304_v42, %v13307_v28  ;;  %v13348_v14 = vld [vmem:[%s13005_s23 + $0xc] sm:$0xf]  ;;  %15836 = vst [vmem:[#allocation107_spill] sm:$0xff] %v13351_v6  ;;  %v15863_v50 = vcombine.low %v13190_v34, %v13201_v59 }
 0x2d9   : > { %10065 = vmatprep.mubr.msk.bf16.mxu0 %vm3609_vm0, %v9398_v51  ;;  %v5131_v51 = vrot.slane %v5130_v39, 4  ;;  %v5177_v39 = vrot.slane %v15826_v13, 4  ;;  %v5181_v13 = vshll.u32 %v13278_v49, 16  ;;  %v5192_v22 = vor.u32 %v5191_v27, %v5188_v31  ;;  %15835 = vst [vmem:[#allocation106_spill] sm:$0xff] %v13348_v14  ;;  %v13369_v43 = vld [vmem:[%s13005_s23 + $0x50] sm:$0x1] }
 0x2da   : > { %v5167_v55 = vrot.slane %v15825_v61, 5  ;;  %v15834_v27 = vcombine.low %v13112_v23, %v13115_v33  ;;  %v5219_v57 = vshll.u32 %v13091_v56, 16  ;;  %15840 = vst [vmem:[#allocation109_spill] sm:$0xff] %v13369_v43  ;;  %v13385_v4 = vld [vmem:[%s13005_s23 + $0x1c] sm:$0xf]  ;;  %v15862_v35 = vshll.u32 %v13148_v21, 16 }
 0x2db   : > { %v5178_v16 = vor.u32 %v5177_v39, %v13309_v8  ;;  %v5183_v31 = vrot.slane %v5181_v13, 5  ;;  %v15838_v13 = vshrl.u32 %v13088_v0, 16  ;;  %v5193_v2 = vrot.slane %v5192_v22, 4  ;;  %v13402_v22 = vld [vmem:[%s15375_s4 + $0x4] sm:$0xf] }
 0x2dc   : > { %v5168_v61 = vor.u32 %v5167_v55, %v5164_v54  ;;  %v5136_v54 = vsel %vm13258_vm3, %v5131_v51, %v5135_v18  ;;  %v15833_v18 = vcombine.low %v13100_v62, %v13103_v37  ;;  %10603 = vmatprep.subr.msk.bf16.mxu1 %vm3628_vm14, %v13402_v22  ;;  %v5467_v25 = vrot.slane %v15862_v35, 5 }
 0x2dd   : > { %v13342_v39 = vcombine.low %v5126_v5, %v5136_v54  ;;  %v5207_v5 = vrot.slane %v5205_v38, 5  ;;  %v13360_v54 = vld [vmem:[%s13005_s23 + $0x44] sm:$0x1]  ;;  %v15841_v38 = vshrl.u32 %v13091_v56, 16  ;;  %v15866_v35 = vshrl.u32 %v13304_v42, 16 }
 0x2de   : > { %v13319_v55 = vrot.slane %v5168_v61, 4  ;;  %v13344_v61 = vcombine.low %v5150_v9, %v5160_v12  ;;  %9982 = vmatmul.mubr.msk.bf16.gmra.mrb[8].mxu1 %vm3609_vm0, %v9269_v7  ;;  %15837 = vst [vmem:[#allocation108_spill] sm:$0xff] %v13360_v54  ;;  %v5179_v12 = vrot.slane %v5178_v16, 4  ;;  %v15839_v7 = vshll.u32 %v13088_v0, 16  ;;  %v13377_v16 = vld [vmem:[%s13005_s23 + $0x18] sm:$0xf] }
 0x2df   : > { %9987 = vmatprep.mubr.msk.bf16.mxu1 %vm3609_vm0, %v9277_v26  ;;  %v5225_v9 = vrot.slane %v15841_v38, 4  ;;  %v13380_v0 = vrot.slane %v5219_v57, 5  ;;  %v5229_v38 = vshll.u32 %v13360_v54, 16  ;;  %v5198_v57 = vsel %vm13258_vm3, %v5193_v2, %v13323_v52 }
 0x2e0   : > { %10066 = vmatmul.mubr.msk.bf16.gmra.mrb[8].mxu0 %vm3609_vm0, %v15833_v18  ;;  %v5202_v18 = vor.u32 %v5201_v40, %v13323_v52  ;;  %v5212_v40 = vrot.slane %v15838_v13, 4  ;;  %v5215_v51 = vrot.slane %v15839_v7, 5  ;;  %v15842_v13 = vshrl.u32 %v13100_v62, 16 }
 0x2e1   : > { %10071 = vmatprep.mubr.msk.bf16.mxu0 %vm3609_vm0, %v15834_v27  ;;  %v5174_v27 = vsel %vm13258_vm3, %v13319_v55, %v13309_v8  ;;  %v15843_v7 = vshll.u32 %v13100_v62, 16  ;;  %v5243_v55 = vshll.u32 %v13103_v37, 16  ;;  %v15845_v62 = vcombine.low %v13122_v15, %v13129_v19 }
 0x2e2   : > { %v5203_v8 = vrot.slane %v5202_v18, 4  ;;  %v5236_v53 = vrot.slane %v15842_v13, 4  ;;  %v5216_v26 = vor.u32 %v5215_v51, %v5212_v40  ;;  %v9278_v18 = vcombine.low %v13348_v14, %v13351_v6 }
 0x2e3   : > { %v5239_v58 = vrot.slane %v15843_v7, 5  ;;  %v15844_v13 = vshrl.u32 %v13103_v37, 16  ;;  %v5184_v51 = vsel %vm13258_vm3, %v5179_v12, %v5183_v31  ;;  %v5226_v40 = vor.u32 %v5225_v9, %v13380_v0  ;;  %v13469_v37 = vld [vmem:[%s13005_s23 + $0x34] sm:$0xf] }
 0x2e4   : > { %v5208_v31 = vsel %vm13258_vm3, %v5203_v8, %v5207_v5  ;;  %v5245_v12 = vrot.slane %v5243_v55, 5  ;;  %v5253_v52 = vshll.u32 %v13369_v43, 16  ;;  %v5217_v9 = vrot.slane %v5216_v26, 4  ;;  %v13429_v43 = vld [vmem:[%s13005_s23 + $0x24] sm:$0xf] }
 0x2e5   : > { %v5249_v56 = vrot.slane %v15844_v13, 4  ;;  %v5240_v7 = vor.u32 %v5239_v58, %v5236_v53  ;;  %v9279_v58 = vcombine.low %v13377_v16, %v13385_v4  ;;  %v15846_v53 = vcombine.low %v13136_v45, %v13142_v24  ;;  %v13466_v5 = vld [vmem:[%s13005_s23 + $0x30] sm:$0xf] }
 0x2e6   : > { %v13425_v8 = vcombine.low %v5174_v27, %v5184_v51  ;;  %9988 = vmatmul.mubr.msk.bf16.vlgmr.msra.gmra.mrb[0].mxu1 %vm3609_vm0, %v9278_v18  ;;  %v5231_v55 = vrot.slane %v5229_v38, 5  ;;  %v5255_v18 = vrot.slane %v5253_v52, 5  ;;  %v13440_v51 = vld [vmem:[%s12940_s27 + $0x14] sm:$0x1]  ;;  %v15850_v52 = vshrl.u32 %v13115_v33, 16 }
 0x2e7   : > { %v5250_v13 = vor.u32 %v5249_v56, %v5245_v12  ;;  %v5241_v2 = vrot.slane %v5240_v7, 4  ;;  %9991 = vmatprep.mubr.msk.bf16.mxu1 %vm3609_vm0, %v9279_v58  ;;  %15847 = vst [vmem:[#allocation110_spill] sm:$0xff] %v13440_v51  ;;  %v15848_v56 = vshrl.u32 %v13112_v23, 16  ;;  %v5222_v7 = vsel %vm13258_vm3, %v5217_v9, %v13380_v0 }
 0x2e8   : > { %10072 = vmatmul.mubr.msk.bf16.vlgmr.msra.gmra.mrb[0].mxu0 %vm3609_vm0, %v15845_v62  ;;  %v13434_v62 = vcombine.low %v5198_v57, %v5208_v31  ;;  %v5399_v58 = vshll.u32 %v13115_v33, 16  ;;  %v15852_v9 = vshll.u32 %v13122_v15, 16  ;;  %v5409_v54 = vshll.u32 %v13440_v51, 16 }
 0x2e9   : > { %10084 = vmatpush3.bf16.msra.mxu0 %v12992_v30  ;;  %10075 = vmatprep.mubr.msk.bf16.mxu0 %vm3609_vm0, %v15846_v53  ;;  %v5227_v30 = vrot.slane %v5226_v40, 4  ;;  %v13432_v53 = vld [vmem:[%s13005_s23 + $0x28] sm:$0xf]  ;;  %v5251_v27 = vrot.slane %v5250_v13, 4  ;;  %v5392_v38 = vrot.slane %v15848_v56, 4  ;;  %v15849_v40 = vshll.u32 %v13112_v23, 16 }
 0x2ea   : > { %10611 = vmatprep.subr.msk.bf16.mxu0 %vm3628_vm14, %v13133_v32  ;;  %v9280_v31 = vcombine.low %v13429_v43, %v13432_v53  ;;  %v5405_v13 = vrot.slane %v15850_v52, 4  ;;  %v13457_v56 = vld [vmem:[%s15375_s4 + $0x14] sm:$0xf]  ;;  %v15851_v32 = vshrl.u32 %v13122_v15, 16  ;;  %v5419_v26 = vrot.slane %v15852_v9, 5 }
 0x2eb   : > { %v5395_v57 = vrot.slane %v15849_v40, 5  ;;  %v5232_v23 = vsel %vm13258_vm3, %v5227_v30, %v5231_v55  ;;  %v5246_v33 = vsel %vm13258_vm3, %v5241_v2, %v5245_v12  ;;  %v13473_v52 = vrot.slane %v5399_v58, 5  ;;  %v13479_v55 = vld [vmem:[%s12940_s27 + $0x20] sm:$0x1]  ;;  %v13543_v9 = vld [vmem:[%s12940_s27 + $0x2c] sm:$0x1] }
 0x2ec   : > { %v5416_v0 = vrot.slane %v15851_v32, 4  ;;  %v9476_v30 = vcombine.low %v13457_v56, %v13457_v56  ;;  %15853 = vst [vmem:[#allocation111_spill] sm:$0xff] %v13479_v55  ;;  %v15854_v15 = vcombine.low %v13148_v21, %v13155_v20  ;;  %v5256_v32 = vsel %vm13258_vm3, %v5251_v27, %v5255_v18  ;;  %15858 = vst [vmem:[#allocation112_spill] sm:$0xff] %v13543_v9 }
 0x2ed   : > { %v5396_v40 = vor.u32 %v5395_v57, %v5392_v38  ;;  %v5423_v12 = vshll.u32 %v13129_v19, 16  ;;  %v15855_v2 = vshrl.u32 %v13129_v19, 16  ;;  %v15856_v58 = vcombine.low %v13184_v41, %v13187_v47 }
 0x2ee   : > { %v5420_v51 = vor.u32 %v5419_v26, %v5416_v0  ;;  %v9281_v27 = vcombine.low %v13466_v5, %v13469_v37  ;;  %9992 = vmatmul.mubr.msk.bf16.gmra.mrb[4].mxu1 %vm3609_vm0, %v9280_v31  ;;  %v13508_v11 = vcombine.low %v5246_v33, %v5256_v32  ;;  %v13515_v31 = vld [vmem:[%s13005_s23 + $0x3c] sm:$0xf]  ;;  %v13518_v0 = vld [vmem:[%s13005_s23 + $0x40] sm:$0xf]  ;;  %v13529_v33 = vsel %vm3628_vm14, %v13457_v56, 0 }
 0x2ef   : > { %v13487_v38 = vrot.slane %v5396_v40, 4  ;;  %v5429_v57 = vrot.slane %v15855_v2, 4  ;;  %v13503_v40 = vrot.slane %v5423_v12, 5  ;;  %v5433_v2 = vshll.u32 %v13479_v55, 16 }
 0x2f0   : > { %10076 = vmatmul.mubr.msk.bf16.gmra.mrb[4].mxu0 %vm3609_vm0, %v15854_v15  ;;  %v5406_v15 = vor.u32 %v5405_v13, %v13473_v52  ;;  %v13511_v13 = vrot.slane %v5409_v54, 5  ;;  %9995 = vmatprep.mubr.msk.bf16.mxu1 %vm3609_vm0, %v9281_v27  ;;  %v13533_v32 = vrot.slane %v5420_v51, 4  ;;  %v15857_v26 = vshrl.u32 %v13136_v45, 16  ;;  %v13590_v51 = vld [vmem:[%s13005_s23 + $0x8] sm:$0x1] }
 0x2f1   : > { %10079 = vmatprep.mubr.msk.bf16.mxu0 %vm3609_vm0, %v15856_v58  ;;  %v13506_v58 = vcombine.low %v5222_v7, %v5232_v23  ;;  %v13524_v7 = vrot.slane %v9476_v30, 2  ;;  %v5430_v23 = vor.u32 %v5429_v57, %v13503_v40  ;;  %v13538_v19 = vrot.slane %v5433_v2, 5  ;;  %15865 = vst [vmem:[#allocation114_spill] sm:$0xff] %v13590_v51 }
 0x2f2   : > { %v13531_v54 = vrot.slane %v5406_v15, 4  ;;  %v5440_v18 = vrot.slane %v15857_v26, 4  ;;  %v9282_v30 = vcombine.low %v13515_v31, %v13518_v0  ;;  %v15859_v57 = vshll.u32 %v13136_v45, 16 }
 0x2f3   : > { %v5447_v15 = vshll.u32 %v13142_v24, 16  ;;  %v15860_v27 = vshrl.u32 %v13142_v24, 16  ;;  %v15861_v26 = vshrl.u32 %v13148_v21, 16  ;;  %v13559_v45 = vrot.slane %v5430_v23, 4 }
 0x2f4   : > { %v5443_v12 = vrot.slane %v15859_v57, 5  ;;  %v5471_v24 = vshll.u32 %v13155_v20, 16  ;;  %v5457_v23 = vshll.u32 %v13543_v9, 16  ;;  %v4031_v21 = vsel %vm3628_vm14, %v13402_v22, 0 }
 0x2f5   : > { %v5453_v55 = vrot.slane %v15860_v27, 4  ;;  %v5464_v2 = vrot.slane %v15861_v26, 4  ;;  %v13561_v49 = vrot.slane %v5447_v15, 5  ;;  %10000 = vmatpush3.bf16.msra.mxu1 %v4031_v21  ;;  %v3860_v9 = vshll.u32 %v13307_v28, 16 }
 0x2f6   : > { %v5444_v57 = vor.u32 %v5443_v12, %v5440_v18  ;;  %v13574_v18 = vld [vmem:[%s12940_s27 + $0x38] sm:$0x1]  ;;  %v5412_v12 = vsel %vm13258_vm3, %v13531_v54, %v13511_v13  ;;  %9996 = vmatmul.mubr.msk.bf16.gmra.mrb[8].mxu1 %vm3609_vm0, %v9282_v30  ;;  %v3853_v13 = vrot.slane %v15866_v35, 4  ;;  %v5436_v54 = vsel %vm13258_vm3, %v13559_v45, %v13538_v19 }
 0x2f7   : > { %15864 = vst [vmem:[#allocation113_spill] sm:$0xff] %v13574_v18  ;;  %v5468_v15 = vor.u32 %v5467_v25, %v5464_v2  ;;  %v5454_v26 = vor.u32 %v5453_v55, %v13561_v49  ;;  %v13598_v25 = vrot.slane %v5471_v24, 5  ;;  %v15867_v55 = vshrl.u32 %v13155_v20, 16 }
 0x2f8   : > { %10080 = vmatmul.mubr.msk.bf16.gmra.mrb[8].mxu0 %vm3609_vm0, %v15863_v50  ;;  %v13582_v27 = vrot.slane %v5444_v57, 4  ;;  %v9308_v50 = vcombine.low %v13402_v22, %v13402_v22  ;;  %v5481_v2 = vshll.u32 %v13574_v18, 16  ;;  %v5459_v22 = vrot.slane %v5457_v23, 5  ;;  %v13618_v18 = vld [vmem:[%s13005_s23 + $0x14] sm:$0x1] }
 0x2f9   : > { %10085 = vmatprep.mubr.msk.bf16.mxu0 %vm3609_vm0, %v13342_v39  ;;  %v5477_v30 = vrot.slane %v15867_v55, 4  ;;  %v15868_v39 = vshll.u32 %v13304_v42, 16  ;;  %v13612_v45 = vrot.slane %v5468_v15, 4  ;;  %v15869_v20 = vshrl.u32 %v13307_v28, 16 }
 0x2fa   : > { %v13603_v57 = vrot.slane %v9308_v50, 2  ;;  %v5450_v19 = vsel %vm13258_vm3, %v13582_v27, %v13561_v49  ;;  %v3870_v21 = vshll.u32 %v13590_v51, 16  ;;  %v5455_v23 = vrot.slane %v5454_v26, 4 }
 0x2fb   : > { %v3856_v35 = vrot.slane %v15868_v39, 5  ;;  %v3866_v24 = vrot.slane %v15869_v20, 4  ;;  %v3862_v55 = vrot.slane %v3860_v9, 5  ;;  %v15870_v39 = vshrl.u32 %v13348_v14, 16 }
 0x2fc   : > { %10604 = vmatprep.subr.msk.bf16.mxu1 %vm3628_vm14, %v13603_v57  ;;  %v5478_v49 = vor.u32 %v5477_v30, %v13598_v25  ;;  %v13627_v27 = vrot.slane %v5481_v2, 5  ;;  %v15871_v15 = vshll.u32 %v13348_v14, 16  ;;  %v3884_v9 = vshll.u32 %v13351_v6, 16 }
 0x2fd   : > { %v3857_v50 = vor.u32 %v3856_v35, %v3853_v13  ;;  %v3877_v42 = vrot.slane %v15870_v39, 4  ;;  %v3867_v35 = vor.u32 %v3866_v24, %v3862_v55  ;;  %v3872_v20 = vrot.slane %v3870_v21, 5 }
 0x2fe   : > { %v3880_v26 = vrot.slane %v15871_v15, 5  ;;  %v3886_v2 = vrot.slane %v3884_v9, 5  ;;  %v3894_v15 = vshll.u32 %v13618_v18, 16  ;;  %v15873_v14 = vshrl.u32 %v13184_v41, 16 }
 0x2ff   : > { %v3858_v13 = vrot.slane %v3857_v50, 4  ;;  %v3868_v50 = vrot.slane %v3867_v35, 4  ;;  %v15874_v24 = vshll.u32 %v13184_v41, 16  ;;  %v5479_v9 = vrot.slane %v5478_v49, 4  ;;  %v13695_v49 = vld [vmem:[%s13005_s23 + $0x20] sm:$0x1] }
 0x300   : > { %10086 = vmatmul.mubr.msk.bf16.vlgmr.msra.gmra.mrb[0].mxu0 %vm3609_vm0, %v13344_v61  ;;  %v15872_v61 = vshrl.u32 %v13351_v6, 16  ;;  %v3881_v30 = vor.u32 %v3880_v26, %v3877_v42  ;;  %v5495_v6 = vshll.u32 %v13187_v47, 16  ;;  %v3896_v28 = vrot.slane %v3894_v15, 5 }
 0x301   : > { %10098 = vmatpush3.bf16.msra.mxu0 %v13333_v1  ;;  %10089 = vmatprep.mubr.msk.bf16.mxu0 %vm3609_vm0, %v13425_v8  ;;  %v5488_v1 = vrot.slane %v15873_v14, 4  ;;  %v3863_v8 = vsel %vm13258_vm3, %v3858_v13, %v3862_v55  ;;  %v5491_v21 = vrot.slane %v15874_v24, 5  ;;  %v15875_v42 = vshrl.u32 %v13187_v47, 16 }
 0x302   : > { %v3890_v39 = vrot.slane %v15872_v61, 4  ;;  %10612 = vmatprep.subr.msk.bf16.mxu0 %vm3628_vm14, %v13457_v56  ;;  %v3882_v61 = vrot.slane %v3881_v30, 4  ;;  %v13648_v56 = vld [vmem:[%s12940_s27 + $0x44] sm:$0x1]  ;;  %v5460_v14 = vsel %vm13258_vm3, %v5455_v23, %v5459_v22  ;;  %v3873_v55 = vsel %vm13258_vm3, %v3868_v50, %v3872_v20  ;;  %v13698_v20 = vld [vmem:[%s12940_s27 + $0x50] sm:$0x1] }
 0x303   : > { %v5501_v26 = vrot.slane %v15875_v42, 4  ;;  %v13656_v13 = vrot.slane %v5495_v6, 5  ;;  %v9290_v41 = vcombine.low %v3863_v8, %v3873_v55  ;;  %v5492_v30 = vor.u32 %v5491_v21, %v5488_v1 }
 0x304   : > { %v3891_v51 = vor.u32 %v3890_v39, %v3886_v2  ;;  %v3887_v35 = vsel %vm13258_vm3, %v3882_v61, %v3886_v2  ;;  %v15876_v47 = vsel %vm13258_vm3, %v13487_v38, %v13473_v52  ;;  %v15877_v22 = vsel %vm13258_vm3, %v13533_v32, %v13503_v40 }
 0x305   : > { %v9432_v15 = vcombine.low %v15876_v47, %v5412_v12  ;;  %v13670_v6 = vcombine.low %v15877_v22, %v5436_v54  ;;  %v3984_v23 = vshrl.u32 %v13518_v0, 16  ;;  %v5474_v52 = vsel %vm13258_vm3, %v13612_v45, %v13598_v25  ;;  %10001 = vmatprep.mubr.msk.bf16.mxu1 %vm3609_vm0, %v9290_v41  ;;  %v13716_v41 = vld [vmem:[%s13005_s23 + $0x2c] sm:$0x1] }
 0x306   : > { %v3892_v39 = vrot.slane %v3891_v51, 4  ;;  %v5505_v51 = vshll.u32 %v13648_v56, 16  ;;  %v5502_v40 = vor.u32 %v5501_v26, %v13656_v13  ;;  %v5519_v32 = vshll.u32 %v13201_v59, 16 }
 0x307   : > { %v13687_v12 = vcombine.low %v5450_v19, %v5460_v14  ;;  %v15878_v25 = vshrl.u32 %v13190_v34, 16  ;;  %v15879_v2 = vshll.u32 %v13190_v34, 16  ;;  %v15881_v8 = vshll.u32 %v13377_v16, 16 }
 0x308   : > { %10090 = vmatmul.mubr.msk.bf16.gmra.mrb[4].mxu0 %vm3609_vm0, %v13434_v62  ;;  %v3897_v38 = vsel %vm13258_vm3, %v3892_v39, %v3896_v28  ;;  %v5484_v62 = vsel %vm13258_vm3, %v5479_v9, %v13627_v27  ;;  %v5493_v28 = vrot.slane %v5492_v30, 4  ;;  %v5507_v27 = vrot.slane %v5505_v51, 5 }
 0x309   : > { %10093 = vmatprep.mubr.msk.bf16.mxu0 %vm3609_vm0, %v13506_v58  ;;  %v9291_v54 = vcombine.low %v3887_v35, %v3897_v38  ;;  %v5512_v45 = vrot.slane %v15878_v25, 4  ;;  %v5515_v1 = vrot.slane %v15879_v2, 5  ;;  %v15880_v58 = vshrl.u32 %v13377_v16, 16 }
 0x30a   : > { %v3904_v50 = vrot.slane %v15881_v8, 5  ;;  %v15882_v24 = vshrl.u32 %v13201_v59, 16  ;;  %v3908_v61 = vshll.u32 %v13385_v4, 16  ;;  %v15883_v42 = vshrl.u32 %v13385_v4, 16 }
 0x30b   : > { %v3901_v19 = vrot.slane %v15880_v58, 4  ;;  %10002 = vmatmul.mubr.msk.bf16.vlgmr.msra.gmra.mrb[0].mxu1 %vm3609_vm0, %v9291_v54  ;;  %v5503_v14 = vrot.slane %v5502_v40, 4  ;;  %v13712_v34 = vrot.slane %v5519_v32, 5  ;;  %v3918_v55 = vshll.u32 %v13695_v49, 16 }
 0x30c   : > { %v5525_v21 = vrot.slane %v15882_v24, 4  ;;  %v3914_v26 = vrot.slane %v15883_v42, 4  ;;  %v5529_v35 = vshll.u32 %v13698_v20, 16  ;;  %v3910_v39 = vrot.slane %v3908_v61, 5 }
 0x30d   : > { %v3905_v9 = vor.u32 %v3904_v50, %v3901_v19  ;;  %v15884_v30 = vshrl.u32 %v13429_v43, 16  ;;  %v15885_v47 = vshll.u32 %v13429_v43, 16  ;;  %v5516_v51 = vor.u32 %v5515_v1, %v5512_v45 }
 0x30e   : > { %v3920_v54 = vrot.slane %v3918_v55, 5  ;;  %v3932_v40 = vshll.u32 %v13432_v53, 16  ;;  %v3915_v32 = vor.u32 %v3914_v26, %v3910_v39  ;;  %v15886_v2 = vshrl.u32 %v13432_v53, 16 }
 0x30f   : > { %v3925_v59 = vrot.slane %v15884_v30, 4  ;;  %v3928_v22 = vrot.slane %v15885_v47, 5  ;;  %v3906_v38 = vrot.slane %v3905_v9, 4  ;;  %v3942_v19 = vshll.u32 %v13716_v41, 16 }
 0x310   : > { %v3938_v58 = vrot.slane %v15886_v2, 4  ;;  %10094 = vmatmul.mubr.msk.bf16.gmra.mrb[8].mxu0 %vm3609_vm0, %v13508_v11  ;;  %v5498_v8 = vsel %vm13258_vm3, %v5493_v28, %v13656_v13  ;;  %v5508_v45 = vsel %vm13258_vm3, %v5503_v14, %v5507_v27  ;;  %v5526_v1 = vor.u32 %v5525_v21, %v13712_v34 }
 0x311   : > { %v3929_v25 = vor.u32 %v3928_v22, %v3925_v59  ;;  %v3934_v50 = vrot.slane %v3932_v40, 5  ;;  %10099 = vmatprep.mubr.msk.bf16.mxu0 %vm3609_vm0, %v9432_v15  ;;  %v13736_v24 = vcombine.low %v5474_v52, %v5484_v62  ;;  %v3911_v61 = vsel %vm13258_vm3, %v3906_v38, %v3910_v39  ;;  %v13750_v52 = vld [vmem:[%s13005_s23 + $0x38] sm:$0x1] }
 0x312   : > { %v3916_v42 = vrot.slane %v3915_v32, 4  ;;  %v13740_v26 = vrot.slane %v5529_v35, 5  ;;  %v3944_v13 = vrot.slane %v3942_v19, 5  ;;  %v5689_v28 = vrot.slane %v13229_v63, 5 }
 0x313   : > { %v3930_v11 = vrot.slane %v3929_v25, 4  ;;  %v3939_v9 = vor.u32 %v3938_v58, %v3934_v50  ;;  %v13743_v55 = vcombine.low %v5498_v8, %v5508_v45  ;;  %v13745_v27 = vrot.slane %v5516_v51, 4  ;;  %v13776_v25 = vld [vmem:[%s13005_s23 + $0x44] sm:$0x1] }
 0x314   : > { %v3921_v15 = vsel %vm13258_vm3, %v3916_v42, %v3920_v54  ;;  %v15887_v62 = vshrl.u32 %v13466_v5, 16  ;;  %v13754_v14 = vrot.slane %v5526_v1, 4  ;;  %v13761_v30 = vsel %vm12949_vm15, %v13083_v36, %v5689_v28 }
 0x315   : > { %v9292_v35 = vcombine.low %v3911_v61, %v3921_v15  ;;  %v3935_v39 = vsel %vm13258_vm3, %v3930_v11, %v3934_v50  ;;  %v3940_v63 = vrot.slane %v3939_v9, 4  ;;  %v15888_v59 = vshll.u32 %v13466_v5, 16 }
 0x316   : > { %v3949_v21 = vrot.slane %v15887_v62, 4  ;;  %v3956_v22 = vshll.u32 %v13469_v37, 16  ;;  %v15889_v51 = vshrl.u32 %v13469_v37, 16  ;;  %v9446_v40 = vrot.slane %v13008_v10, 9 }
 0x317   : > { %v3952_v47 = vrot.slane %v15888_v59, 5  ;;  %10005 = vmatprep.mubr.msk.bf16.mxu1 %vm3609_vm0, %v9292_v35  ;;  %v3945_v54 = vsel %vm13258_vm3, %v3940_v63, %v3944_v13  ;;  %v9453_v32 = vcombine.low %v13176_v44, %v13761_v30  ;;  %v3966_v36 = vshll.u32 %v13750_v52, 16 }
 0x318   : > { %v3962_v38 = vrot.slane %v15889_v51, 4  ;;  %v9293_v2 = vcombine.low %v3935_v39, %v3945_v54  ;;  %v5679_v58 = vrot.slane %v13011_v60, 5  ;;  %v3958_v8 = vrot.slane %v3956_v22, 5  ;;  %10100 = vmatmul.mubr.msk.bf16.vlgmr.msra.gmra.mrb[0].mxu0 %vm3609_vm0, %v13670_v6 }
 0x319   : > { %v3953_v19 = vor.u32 %v3952_v47, %v3949_v21  ;;  %v3968_v45 = vrot.slane %v3966_v36, 5  ;;  %v15890_v1 = vshrl.u32 %v13515_v31, 16  ;;  %v15891_v10 = vshll.u32 %v13515_v31, 16  ;;  %10112 = vmatpush3.bf16.msra.mxu0 %v13529_v33  ;;  %10103 = vmatprep.mubr.msk.bf16.mxu0 %vm3609_vm0, %v13687_v12  ;;  %v15892_v47 = vld [vmem:[#allocation102_spill] sm:$0xff] }
 0x31a   : > { %v3980_v42 = vshll.u32 %v13518_v0, 16  ;;  %v3963_v11 = vor.u32 %v3962_v38, %v3958_v8  ;;  %v3986_v9 = vrot.slane %v3984_v23, 4  ;;  %v3990_v6 = vshll.u32 %v13776_v25, 16  ;;  %10006 = vmatmul.mubr.msk.bf16.gmra.mrb[4].mxu1 %vm3609_vm0, %v9293_v2  ;;  %10613 = vmatprep.subr.msk.bf16.mxu0 %vm3628_vm14, %v13524_v7 }
 0x31b   : > { %v3973_v50 = vrot.slane %v15890_v1, 4  ;;  %v3976_v61 = vrot.slane %v15891_v10, 5  ;;  %v3954_v60 = vrot.slane %v3953_v19, 4  ;;  %v5682_v13 = vrot.slane %v13216_v29, 5 }
 0x31c   : > { %v3982_v15 = vrot.slane %v3980_v42, 5  ;;  %v5693_v33 = vrot.slane %v13065_v17, 5  ;;  %v5681_v62 = vrot.slane %v5679_v58, 4  ;;  %v3964_v21 = vrot.slane %v3963_v11, 4 }
 0x31d   : > { %v3977_v28 = vor.u32 %v3976_v61, %v3973_v50  ;;  %v3959_v12 = vsel %vm13258_vm3, %v3954_v60, %v3958_v8  ;;  %v9448_v23 = vrot.slane %v13054_v3, 9  ;;  %v5522_v35 = vsel %vm13258_vm3, %v13745_v27, %v13712_v34  ;;  %v10726_v50 = vld [vmem:[%s12940_s27 + $0x4] sm:$0xf]  ;;  %v15897_v61 = vld [vmem:[#allocation88_spill] sm:$0xff] }
 0x31e   : > { %v3987_v39 = vor.u32 %v3986_v9, %v3982_v15  ;;  %v3992_v63 = vrot.slane %v3990_v6, 5  ;;  %v5532_v17 = vsel %vm13258_vm3, %v13754_v14, %v13740_v26  ;;  %v5680_v59 = vsel %vm12949_vm15, %v9446_v40, %v5679_v58  ;;  %v15893_v14 = vld [vmem:[#allocation89_spill] sm:$0xff]  ;;  %v15894_v58 = vld [vmem:[#allocation79_spill] sm:$0xff]  ;;  %v15901_v6 = vld [vmem:[#allocation84_spill] sm:$0xff] }
 0x31f   : > { %v3978_v29 = vrot.slane %v3977_v28, 4  ;;  %v3969_v3 = vsel %vm13258_vm3, %v3964_v21, %v3968_v45  ;;  %v5696_v22 = vrot.slane %v15892_v47, 5  ;;  %v5695_v38 = vrot.slane %v5693_v33, 4  ;;  %v15900_v9 = vld [vmem:[#allocation83_spill] sm:$0xff] }
 0x320   : > { %v9294_v51 = vcombine.low %v3959_v12, %v3969_v3  ;;  %v3988_v27 = vrot.slane %v3987_v39, 4  ;;  %v5683_v54 = vsel %vm12949_vm15, %v5681_v62, %v5682_v13  ;;  %v13819_v26 = vsel %vm12949_vm15, %v9448_v23, %v5693_v33  ;;  %10104 = vmatmul.mubr.msk.bf16.gmra.mrb[4].mxu0 %vm3609_vm0, %v13736_v24  ;;  %v15898_v24 = vld [vmem:[#allocation80_spill] sm:$0xff]  ;;  %v15902_v62 = vld [vmem:[#allocation85_spill] sm:$0xff]  ;;  %v15903_v12 = vld [vmem:[#allocation86_spill] sm:$0xff] }
 0x321   : > { %v3983_v34 = vsel %vm13258_vm3, %v3978_v29, %v3982_v15  ;;  %v5700_v40 = vrot.slane %v15893_v14, 5  ;;  %v4311_v36 = vsel %vm3628_vm14, %v13603_v57, 0  ;;  %v15895_v19 = vshrl.u32 %v15894_v58, 16  ;;  %10107 = vmatprep.mubr.msk.bf16.mxu0 %vm3609_vm0, %v13743_v55  ;;  %v13850_v55 = vld [vmem:[%s15375_s4 + $0x8] sm:$0xf]  ;;  %v15904_v39 = vld [vmem:[#allocation103_spill] sm:$0xff] }
 0x322   : > { %10009 = vmatprep.mubr.msk.bf16.mxu1 %vm3609_vm0, %v9294_v51  ;;  %v3993_v2 = vsel %vm13258_vm3, %v3988_v27, %v3992_v63  ;;  %v15896_v45 = vshll.u32 %v15894_v58, 16  ;;  %v4136_v10 = vshll.u32 %v10726_v50, 16  ;;  %v9449_v42 = vrot.slane %v15897_v61, 9  ;;  %10014 = vmatpush3.bf16.msra.mxu1 %v4311_v36  ;;  %v15905_v36 = vld [vmem:[#allocation87_spill] sm:$0xff]  ;;  %v15907_v58 = vld [vmem:[#allocation90_spill] sm:$0xff] }
 0x323   : > { %v4129_v8 = vrot.slane %v15895_v19, 4  ;;  %v9295_v57 = vcombine.low %v3983_v34, %v3993_v2  ;;  %v15899_v60 = vshrl.u32 %v15898_v24, 16  ;;  %v4157_v13 = vor.u32 %v15901_v6, %v15900_v9  ;;  %10605 = vmatprep.subr.msk.bf16.mxu1 %vm3628_vm14, %v13850_v55  ;;  %v15909_v50 = vld [vmem:[#allocation82_spill] sm:$0xff] }
 0x324   : > { %v4132_v1 = vrot.slane %v15896_v45, 5  ;;  %v13843_v28 = vsel %vm12949_vm15, %v5695_v38, %v5696_v22  ;;  %v4138_v33 = vrot.slane %v4136_v10, 5  ;;  %v4167_v21 = vor.u32 %v15903_v12, %v15902_v62 }
 0x325   : > { %v4142_v11 = vrot.slane %v15899_v60, 4  ;;  %v9437_v23 = vcombine.low %v5522_v35, %v5532_v17  ;;  %10010 = vmatmul.mubr.msk.bf16.gmra.mrb[8].mxu1 %vm3609_vm0, %v9295_v57  ;;  %v5702_v29 = vrot.slane %v5700_v40, 4  ;;  %v5703_v63 = vrot.slane %v15904_v39, 5  ;;  %v15910_v57 = vld [vmem:[#allocation93_spill] sm:$0xff] }
 0x326   : > { %v4133_v15 = vor.u32 %v4132_v1, %v4129_v8  ;;  %v4158_v3 = vrot.slane %v4157_v13, 4  ;;  %v5940_v47 = vsel %vm3628_vm14, %v13524_v7, 0  ;;  %v4168_v34 = vrot.slane %v4167_v21, 4  ;;  %v15908_v8 = vld [vmem:[#allocation108_spill] sm:$0xff]  ;;  %v13880_v1 = vld [vmem:[%s12940_s27 + $0x20] sm:$0x1] }
 0x327   : > { %v4143_v51 = vor.u32 %v4142_v11, %v4138_v33  ;;  %v9452_v27 = vcombine.low %v5680_v59, %v5683_v54  ;;  %v9454_v38 = vcombine.low %v13819_v26, %v13843_v28  ;;  %v13862_v35 = vsel %vm12949_vm15, %v9449_v42, %v5700_v40  ;;  %v15906_v59 = vld [vmem:[#allocation91_spill] sm:$0xff]  ;;  %v15911_v42 = vld [vmem:[#allocation94_spill] sm:$0xff]  ;;  %v15914_v13 = vld [vmem:[#allocation92_spill] sm:$0xff] }
 0x328   : > { %v4134_v22 = vrot.slane %v4133_v15, 4  ;;  %v4163_v17 = vsel %vm13258_vm3, %v4158_v3, %v15902_v62  ;;  %v4173_v2 = vsel %vm13258_vm3, %v4168_v34, %v15905_v36  ;;  %v5707_v54 = vrot.slane %v15906_v59, 5  ;;  %10108 = vmatmul.mubr.msk.bf16.gmra.mrb[8].mxu0 %vm3609_vm0, %v9437_v23  ;;  %v15915_v15 = vld [vmem:[#allocation95_spill] sm:$0xff]  ;;  %v13897_v21 = vld [vmem:[%s12940_s27 + $0x2c] sm:$0x1]  ;;  %v15922_v59 = vld [vmem:[#allocation109_spill] sm:$0xff] }
 0x329   : > { %v4144_v7 = vrot.slane %v4143_v51, 4  ;;  %v13875_v26 = vsel %vm12949_vm15, %v5702_v29, %v5703_v63  ;;  %v9303_v40 = vcombine.low %v4163_v17, %v4173_v2  ;;  %v9450_v19 = vrot.slane %v15907_v58, 9  ;;  %10113 = vmatprep.mubr.msk.bf16.mxu0 %vm3609_vm0, %v9452_v27  ;;  %v15917_v63 = vld [vmem:[#allocation96_spill] sm:$0xff]  ;;  %v15920_v17 = vld [vmem:[#allocation97_spill] sm:$0xff] }
 0x32a   : > { %v4139_v14 = vsel %vm13258_vm3, %v4134_v22, %v4138_v33  ;;  %v5710_v45 = vrot.slane %v15908_v8, 5  ;;  %v5714_v61 = vrot.slane %v15910_v57, 5  ;;  %v15912_v24 = vshrl.u32 %v15911_v42, 16 }
 0x32b   : > { %v4149_v10 = vsel %vm13258_vm3, %v4144_v7, %v15909_v50  ;;  %v15913_v11 = vshll.u32 %v15911_v42, 16  ;;  %v9451_v28 = vrot.slane %v15914_v13, 9  ;;  %v4184_v33 = vshll.u32 %v15915_v15, 16 }
 0x32c   : > { %v4177_v60 = vrot.slane %v15912_v24, 4  ;;  %v9302_v6 = vcombine.low %v4139_v14, %v4149_v10  ;;  %v15916_v62 = vshrl.u32 %v15915_v15, 16  ;;  %v5709_v23 = vrot.slane %v5707_v54, 4 }
 0x32d   : > { %v4180_v9 = vrot.slane %v15913_v11, 5  ;;  %v4194_v39 = vshll.u32 %v13880_v1, 16  ;;  %v15918_v3 = vshrl.u32 %v15917_v63, 16  ;;  %v4186_v51 = vrot.slane %v4184_v33, 5  ;;  %v10728_v33 = vld [vmem:[%s12940_s27 + $0x10] sm:$0xf] }
 0x32e   : > { %v4190_v12 = vrot.slane %v15916_v62, 4  ;;  %10015 = vmatprep.mubr.msk.bf16.mxu1 %vm3609_vm0, %v9302_v6  ;;  %v15919_v34 = vshll.u32 %v15917_v63, 16  ;;  %v4208_v14 = vshll.u32 %v15920_v17, 16  ;;  %v15921_v7 = vshrl.u32 %v15920_v17, 16  ;;  %v15925_v17 = vld [vmem:[#allocation110_spill] sm:$0xff] }
 0x32f   : > { %v4181_v29 = vor.u32 %v4180_v9, %v4177_v60  ;;  %v4201_v22 = vrot.slane %v15918_v3, 4  ;;  %10016 = vmatmul.mubr.msk.bf16.vlgmr.msra.gmra.mrb[0].mxu1 %vm3609_vm0, %v9303_v40  ;;  %v5716_v2 = vrot.slane %v5714_v61, 4  ;;  %v5717_v58 = vrot.slane %v15922_v59, 5 }
 0x330   : > { %v4204_v27 = vrot.slane %v15919_v34, 5  ;;  %v4214_v36 = vrot.slane %v15921_v7, 4  ;;  %v4218_v50 = vshll.u32 %v13897_v21, 16  ;;  %v4191_v10 = vor.u32 %v4190_v12, %v4186_v51  ;;  %v13921_v12 = vld [vmem:[%s15375_s4 + $0x18] sm:$0xf]  ;;  %10114 = vmatmul.mubr.msk.bf16.vlgmr.msra.gmra.mrb[0].mxu0 %vm3609_vm0, %v9453_v32 }
 0x331   : > { %v4182_v8 = vrot.slane %v4181_v29, 4  ;;  %v4196_v57 = vrot.slane %v4194_v39, 5  ;;  %v4210_v24 = vrot.slane %v4208_v14, 5  ;;  %v5708_v60 = vsel %vm12949_vm15, %v9450_v19, %v5707_v54  ;;  %v15923_v29 = vld [vmem:[#allocation100_spill] sm:$0xff]  ;;  %v15924_v39 = vld [vmem:[#allocation101_spill] sm:$0xff]  ;;  %10126 = vmatpush3.bf16.msra.mxu0 %v5940_v47  ;;  %10117 = vmatprep.mubr.msk.bf16.mxu0 %vm3609_vm0, %v9454_v38  ;;  %v15926_v14 = vld [vmem:[#allocation98_spill] sm:$0xff] }
 0x332   : > { %v4205_v42 = vor.u32 %v4204_v27, %v4201_v22  ;;  %v5711_v11 = vsel %vm12949_vm15, %v5709_v23, %v5710_v45  ;;  %v4220_v9 = vrot.slane %v4218_v50, 5  ;;  %v4192_v6 = vrot.slane %v4191_v10, 4  ;;  %v10729_v22 = vld [vmem:[%s12940_s27 + $0xc] sm:$0xf]  ;;  %10614 = vmatprep.subr.msk.bf16.mxu0 %vm3628_vm14, %v13921_v12  ;;  %v13949_v47 = vld [vmem:[%s12940_s27 + $0x38] sm:$0x1] }
 0x333   : > { %v4187_v40 = vsel %vm13258_vm3, %v4182_v8, %v4186_v51  ;;  %v4215_v15 = vor.u32 %v4214_v36, %v4210_v24  ;;  %v5859_v62 = vrot.slane %v10728_v33, 5  ;;  %v4247_v54 = vshrl.u32 %v15923_v29, 16  ;;  %v13963_v50 = vld [vmem:[%s12940_s27 + $0x44] sm:$0x1]  ;;  %v10730_v10 = vld [vmem:[%s12940_s27 + $0x1c] sm:$0xf] }
 0x334   : > { %v4206_v13 = vrot.slane %v4205_v42, 4  ;;  %v4250_v19 = vshll.u32 %v15923_v29, 16  ;;  %v13931_v45 = vsel %vm12949_vm15, %v9451_v28, %v5714_v61  ;;  %v13935_v23 = vsel %vm12949_vm15, %v5716_v2, %v5717_v58  ;;  %v15929_v58 = vld [vmem:[#allocation99_spill] sm:$0xff] }
 0x335   : > { %v4260_v63 = vshrl.u32 %v15924_v39, 16  ;;  %v4197_v3 = vsel %vm13258_vm3, %v4192_v6, %v4196_v57  ;;  %v4216_v30 = vrot.slane %v4215_v15, 4  ;;  %v9455_v32 = vcombine.low %v13862_v35, %v13875_v26 }
 0x336   : > { %v4211_v44 = vsel %vm13258_vm3, %v4206_v13, %v4210_v24  ;;  %v9456_v61 = vcombine.low %v5708_v60, %v5711_v11  ;;  %v9304_v28 = vcombine.low %v4187_v40, %v4197_v3  ;;  %v9464_v51 = vrot.slane %v10729_v22, 9 }
 0x337   : > { %v9457_v38 = vcombine.low %v13931_v45, %v13935_v23  ;;  %v4221_v34 = vsel %vm13258_vm3, %v4216_v30, %v4220_v9  ;;  %v5861_v27 = vrot.slane %v5859_v62, 4  ;;  %v5862_v35 = vrot.slane %v15925_v17, 5  ;;  %v15931_v17 = vld [vmem:[#allocation111_spill] sm:$0xff] }
 0x338   : > { %10019 = vmatprep.mubr.msk.bf16.mxu1 %vm3609_vm0, %v9304_v28  ;;  %v9305_v26 = vcombine.low %v4211_v44, %v4221_v34  ;;  %v15927_v7 = vshrl.u32 %v15926_v14, 16  ;;  %v15928_v2 = vshll.u32 %v15926_v14, 16  ;;  %v4232_v8 = vshll.u32 %v15929_v58, 16  ;;  %10118 = vmatmul.mubr.msk.bf16.gmra.mrb[4].mxu0 %vm3609_vm0, %v9455_v32  ;;  %v10732_v34 = vld [vmem:[%s12940_s27 + $0x28] sm:$0xf] }
 0x339   : > { %v5866_v57 = vrot.slane %v10730_v10, 5  ;;  %v15930_v42 = vshrl.u32 %v15929_v58, 16  ;;  %v4242_v60 = vshll.u32 %v13949_v47, 16  ;;  %v4249_v11 = vrot.slane %v4247_v54, 4  ;;  %10121 = vmatprep.mubr.msk.bf16.mxu0 %vm3609_vm0, %v9456_v61  ;;  %v15932_v58 = vld [vmem:[#allocation112_spill] sm:$0xff] }
 0x33a   : > { %v4225_v36 = vrot.slane %v15927_v7, 4  ;;  %v4228_v59 = vrot.slane %v15928_v2, 5  ;;  %10020 = vmatmul.mubr.msk.bf16.gmra.mrb[4].mxu1 %vm3609_vm0, %v9305_v26  ;;  %v5860_v40 = vsel %vm12949_vm15, %v9464_v51, %v5859_v62  ;;  %v4234_v6 = vrot.slane %v4232_v8, 5  ;;  %v10731_v62 = vld [vmem:[%s12940_s27 + $0x18] sm:$0xf] }
 0x33b   : > { %v4238_v24 = vrot.slane %v15930_v42, 4  ;;  %v4252_v13 = vrot.slane %v4250_v19, 5  ;;  %v5863_v15 = vsel %vm12949_vm15, %v5861_v27, %v5862_v35  ;;  %v4256_v33 = vshll.u32 %v15924_v39, 16  ;;  %v10733_v2 = vld [vmem:[%s12940_s27 + $0x24] sm:$0xf] }
 0x33c   : > { %v4229_v9 = vor.u32 %v4228_v59, %v4225_v36  ;;  %v4262_v29 = vrot.slane %v4260_v63, 4  ;;  %v4266_v3 = vshll.u32 %v13963_v50, 16  ;;  %v4244_v30 = vrot.slane %v4242_v60, 5 }
 0x33d   : > { %v4239_v44 = vor.u32 %v4238_v24, %v4234_v6  ;;  %v4253_v28 = vor.u32 %v4252_v13, %v4249_v11  ;;  %v9465_v22 = vrot.slane %v10731_v62, 9  ;;  %v5868_v19 = vrot.slane %v5866_v57, 4 }
 0x33e   : > { %v4230_v54 = vrot.slane %v4229_v9, 4  ;;  %v4258_v51 = vrot.slane %v4256_v33, 5  ;;  %v5873_v27 = vrot.slane %v10732_v34, 5  ;;  %v5869_v39 = vrot.slane %v15931_v17, 5 }
 0x33f   : > { %v4240_v35 = vrot.slane %v4239_v44, 4  ;;  %v4254_v32 = vrot.slane %v4253_v28, 4  ;;  %v9470_v26 = vcombine.low %v5860_v40, %v5863_v15  ;;  %v9542_v14 = vcombine.low %v13921_v12, %v13921_v12  ;;  %v15934_v15 = vld [vmem:[#allocation105_spill] sm:$0xff]  ;;  %v15937_v44 = vld [vmem:[#allocation106_spill] sm:$0xff] }
 0x340   : > { %v4235_v63 = vsel %vm13258_vm3, %v4230_v54, %v4234_v6  ;;  %v4263_v7 = vor.u32 %v4262_v29, %v4258_v51  ;;  %v4268_v61 = vrot.slane %v4266_v3, 5  ;;  %v9466_v59 = vrot.slane %v10733_v2, 9  ;;  %v15933_v6 = vld [vmem:[#allocation104_spill] sm:$0xff]  ;;  %v15935_v29 = vld [vmem:[#allocation78_spill] sm:$0xff]  ;;  %10122 = vmatmul.mubr.msk.bf16.gmra.mrb[8].mxu0 %vm3609_vm0, %v9457_v38 }
 0x341   : > { %v4245_v36 = vsel %vm13258_vm3, %v4240_v35, %v4244_v30  ;;  %v5876_v8 = vrot.slane %v15932_v58, 5  ;;  %v4496_v10 = vsel %vm3628_vm14, %v13850_v55, 0  ;;  %v4259_v24 = vsel %vm13258_vm3, %v4254_v32, %v4258_v51  ;;  %v15936_v3 = vld [vmem:[#allocation114_spill] sm:$0xff]  ;;  %10127 = vmatprep.mubr.msk.bf16.mxu0 %vm3609_vm0, %v9470_v26  ;;  %v10735_v32 = vld [vmem:[%s12940_s27 + $0x40] sm:$0xf] }
 0x342   : > { %v9306_v42 = vcombine.low %v4235_v63, %v4245_v36  ;;  %v4264_v60 = vrot.slane %v4263_v7, 4  ;;  %v5875_v11 = vrot.slane %v5873_v27, 4  ;;  %10028 = vmatpush3.bf16.msra.mxu1 %v4496_v10  ;;  %v5867_v40 = vsel %vm12949_vm15, %v9465_v22, %v5866_v57  ;;  %v15938_v57 = vld [vmem:[#allocation107_spill] sm:$0xff] }
 0x343   : > { %v5870_v9 = vsel %vm12949_vm15, %v5868_v19, %v5869_v39  ;;  %v9316_v13 = vrot.slane %v15933_v6, 9  ;;  %v4419_v33 = vrot.slane %v15934_v15, 5  ;;  %10607 = vmatprep.subr.msk.bf16.mxu1 %vm3628_vm14, %v15935_v29  ;;  %v4422_v54 = vrot.slane %v15936_v3, 5  ;;  %v10734_v22 = vld [vmem:[%s12940_s27 + $0x34] sm:$0xf] }
 0x344   : > { %10023 = vmatprep.mubr.msk.bf16.mxu1 %vm3609_vm0, %v9306_v42  ;;  %v4269_v55 = vsel %vm13258_vm3, %v4264_v60, %v4268_v61  ;;  %v9317_v30 = vrot.slane %v15937_v44, 9  ;;  %v4426_v28 = vrot.slane %v15938_v57, 5  ;;  %v5880_v19 = vrot.slane %v10734_v22, 5  ;;  %v10736_v36 = vld [vmem:[%s12940_s27 + $0x30] sm:$0xf]  ;;  %v15940_v57 = vld [vmem:[#allocation81_spill] sm:$0xff] }
 0x345   : > { %v9307_v62 = vcombine.low %v4259_v24, %v4269_v55  ;;  %v4420_v51 = vsel %vm12949_vm15, %v9316_v13, %v4419_v33  ;;  %v4421_v34 = vrot.slane %v4419_v33, 4  ;;  %v5874_v17 = vsel %vm12949_vm15, %v9466_v59, %v5873_v27 }
 0x346   : > { %v5877_v39 = vsel %vm12949_vm15, %v5875_v11, %v5876_v8  ;;  %v4428_v45 = vrot.slane %v4426_v28, 4  ;;  %v4429_v23 = vrot.slane %v13618_v18, 5  ;;  %v14020_v38 = vrot.slane %v9542_v14, 2  ;;  %v10737_v8 = vld [vmem:[%s12940_s27 + $0x3c] sm:$0xf] }
 0x347   : > { %v6128_v63 = vsel %vm3628_vm14, %v13921_v12, 0  ;;  %10024 = vmatmul.mubr.msk.bf16.gmra.mrb[8].mxu1 %vm3609_vm0, %v9307_v62  ;;  %v4423_v35 = vsel %vm12949_vm15, %v4421_v34, %v4422_v54  ;;  %v5887_v26 = vrot.slane %v10735_v32, 5  ;;  %v9471_v27 = vcombine.low %v5867_v40, %v5870_v9  ;;  %v15939_v12 = vld [vmem:[#allocation113_spill] sm:$0xff] }
 0x348   : > { %v9322_v7 = vcombine.low %v4420_v51, %v4423_v35  ;;  %v4427_v61 = vsel %vm12949_vm15, %v9317_v30, %v4426_v28  ;;  %v4430_v18 = vsel %vm12949_vm15, %v4428_v45, %v4429_v23  ;;  %v9472_v14 = vcombine.low %v5874_v17, %v5877_v39  ;;  %v10739_v28 = vld [vmem:[%s12940_s27 + $0x48] sm:$0xf] }
 0x349   : > { %v9467_v2 = vrot.slane %v10736_v36, 9  ;;  %v5882_v59 = vrot.slane %v5880_v19, 4  ;;  %v5883_v58 = vrot.slane %v15939_v12, 5  ;;  %v9468_v10 = vrot.slane %v10737_v8, 9  ;;  %10128 = vmatmul.mubr.msk.bf16.vlgmr.msra.gmra.mrb[0].mxu0 %vm3609_vm0, %v9471_v27  ;;  %v10740_v27 = vld [vmem:[%s12940_s27 + $0x18] sm:$0xf] }
 0x34a   : > { %10029 = vmatprep.mubr.msk.bf16.mxu1 %vm3609_vm0, %v9322_v7  ;;  %v5890_v42 = vrot.slane %v13648_v56, 5  ;;  %v9318_v24 = vrot.slane %v13377_v16, 9  ;;  %v4433_v60 = vrot.slane %v13385_v4, 5  ;;  %v9323_v11 = vcombine.low %v4427_v61, %v4430_v18  ;;  %10140 = vmatpush3.bf16.msra.mxu0 %v6128_v63  ;;  %v10741_v7 = vld [vmem:[%s12940_s27 + $0x1c] sm:$0xf] }
 0x34b   : > { %v5889_v40 = vrot.slane %v5887_v26, 4  ;;  %v4436_v9 = vrot.slane %v13695_v49, 5  ;;  %v4440_v6 = vrot.slane %v13432_v53, 5  ;;  %v9319_v33 = vrot.slane %v13429_v43, 9  ;;  %10131 = vmatprep.mubr.msk.bf16.mxu0 %vm3609_vm0, %v9472_v14  ;;  %v10738_v53 = vld [vmem:[%s12940_s27 + $0x4c] sm:$0xf]  ;;  %10615 = vmatprep.subr.msk.bf16.mxu0 %vm3628_vm14, %v14020_v38 }
 0x34c   : > { %v4434_v13 = vsel %vm12949_vm15, %v9318_v24, %v4433_v60  ;;  %v4435_v15 = vrot.slane %v4433_v60, 4  ;;  %v5881_v16 = vsel %vm12949_vm15, %v9467_v2, %v5880_v19  ;;  %v5884_v4 = vsel %vm12949_vm15, %v5882_v59, %v5883_v58  ;;  %v14092_v18 = vld [vmem:[%s13005_s23 + $0x1c] sm:$0xf]  ;;  %v10742_v36 = vld [vmem:[%s12940_s27 + $0x28] sm:$0xf] }
 0x34d   : > { %v4442_v56 = vrot.slane %v4440_v6, 4  ;;  %v4443_v49 = vrot.slane %v13716_v41, 5  ;;  %v5894_v29 = vrot.slane %v10738_v53, 5  ;;  %v5888_v55 = vsel %vm12949_vm15, %v9468_v10, %v5887_v26  ;;  %v10743_v60 = vld [vmem:[%s12940_s27 + $0x34] sm:$0xf] }
 0x34e   : > { %v4437_v43 = vsel %vm12949_vm15, %v4435_v15, %v4436_v9  ;;  %v5891_v3 = vsel %vm12949_vm15, %v5889_v40, %v5890_v42  ;;  %v9473_v41 = vcombine.low %v5881_v16, %v5884_v4  ;;  %v4441_v44 = vsel %vm12949_vm15, %v9319_v33, %v4440_v6  ;;  %v10744_v40 = vld [vmem:[%s12940_s27 + $0x24] sm:$0xf]  ;;  %v10745_v33 = vld [vmem:[%s12940_s27 + $0x30] sm:$0xf]  ;;  %v14118_v53 = vld [vmem:[%s13005_s23 + $0x28] sm:$0xf] }
 0x34f   : > { %10030 = vmatmul.mubr.msk.bf16.vlgmr.msra.gmra.mrb[0].mxu1 %vm3609_vm0, %v9323_v11  ;;  %v9324_v54 = vcombine.low %v4434_v13, %v4437_v43  ;;  %v4444_v30 = vsel %vm12949_vm15, %v4442_v56, %v4443_v49  ;;  %v9469_v62 = vrot.slane %v10739_v28, 9  ;;  %v9320_v22 = vrot.slane %v13466_v5, 9  ;;  %v14115_v49 = vld [vmem:[%s13005_s23 + $0x24] sm:$0xf] }
 0x350   : > { %10330 = vmatpush3.bf16.msra.mxu1 %v15940_v57  ;;  %v4447_v19 = vrot.slane %v13469_v37, 5  ;;  %v4450_v51 = vrot.slane %v13750_v52, 5  ;;  %v9474_v34 = vcombine.low %v5888_v55, %v5891_v3  ;;  %v5896_v17 = vrot.slane %v5894_v29, 4  ;;  %v10746_v55 = vld [vmem:[%s12940_s27 + $0x40] sm:$0xf] }
 0x351   : > { %10033 = vmatprep.mubr.msk.bf16.mxu1 %vm3609_vm0, %v9324_v54  ;;  %v5897_v39 = vrot.slane %v13698_v20, 5  ;;  %v4454_v45 = vrot.slane %v13518_v0, 5  ;;  %v9325_v23 = vcombine.low %v4441_v44, %v4444_v30  ;;  %v9321_v5 = vrot.slane %v13515_v31, 9  ;;  %10132 = vmatmul.mubr.msk.bf16.gmra.mrb[4].mxu0 %vm3609_vm0, %v9473_v41 }
 0x352   : > { %v4448_v63 = vsel %vm12949_vm15, %v9320_v22, %v4447_v19  ;;  %v4449_v35 = vrot.slane %v4447_v19, 4  ;;  %v4457_v52 = vrot.slane %v13776_v25, 5  ;;  %v5895_v20 = vsel %vm12949_vm15, %v9469_v62, %v5894_v29  ;;  %10135 = vmatprep.mubr.msk.bf16.mxu0 %vm3609_vm0, %v9474_v34  ;;  %v14089_v25 = vld [vmem:[%s13005_s23 + $0x18] sm:$0xf]  ;;  %v14122_v29 = vld [vmem:[%s13005_s23 + $0x30] sm:$0xf] }
 0x353   : > { %v4456_v37 = vrot.slane %v4454_v45, 4  ;;  %v5898_v32 = vsel %vm12949_vm15, %v5896_v17, %v5897_v39  ;;  %v9336_v31 = vrot.slane %v10740_v27, 9  ;;  %v4613_v61 = vrot.slane %v10741_v7, 5  ;;  %15941 = vst [vmem:[#allocation102_spill] sm:$0xff] %v14122_v29  ;;  %v10747_v22 = vld [vmem:[%s12940_s27 + $0x3c] sm:$0xf] }
 0x354   : > { %v4451_v0 = vsel %vm12949_vm15, %v4449_v35, %v4450_v51  ;;  %v4616_v14 = vrot.slane %v13880_v1, 5  ;;  %v4620_v2 = vrot.slane %v10742_v36, 5  ;;  %v4455_v59 = vsel %vm12949_vm15, %v9321_v5, %v4454_v45  ;;  %v9549_v17 = vld [vmem:[%s15375_s4 + $0x1c] sm:$0xf]  ;;  %v14158_v45 = vld [vmem:[%s13005_s23 + $0x48] sm:$0xf] }
 0x355   : > { %v9326_v26 = vcombine.low %v4448_v63, %v4451_v0  ;;  %v4458_v12 = vsel %vm12949_vm15, %v4456_v37, %v4457_v52  ;;  %v4615_v58 = vrot.slane %v4613_v61, 4  ;;  %v9475_v8 = vcombine.low %v5895_v20, %v5898_v32  ;;  %v14151_v39 = vld [vmem:[%s13005_s23 + $0x3c] sm:$0xf]  ;;  %v14167_v35 = vld [vmem:[%s13005_s23 + $0x54] sm:$0xf] }
 0x356   : > { %v4614_v10 = vsel %vm12949_vm15, %v9336_v31, %v4613_v61  ;;  %v9524_v42 = vcombine.low %v14089_v25, %v14092_v18  ;;  %v9327_v24 = vcombine.low %v4455_v59, %v4458_v12  ;;  %v4627_v11 = vrot.slane %v10743_v60, 5  ;;  %15942 = vst [vmem:[#allocation89_spill] sm:$0xff] %v14151_v39  ;;  %v14170_v5 = vld [vmem:[%s13005_s23 + $0x58] sm:$0xf]  ;;  %v14186_v31 = vld [vmem:[%s12940_s27 + $0x1c] sm:$0xf] }
 0x357   : > { %10034 = vmatmul.mubr.msk.bf16.gmra.mrb[4].mxu1 %vm3609_vm0, %v9325_v23  ;;  %v4617_v1 = vsel %vm12949_vm15, %v4615_v58, %v4616_v14  ;;  %v9337_v9 = vrot.slane %v10744_v40, 9  ;;  %v4622_v6 = vrot.slane %v4620_v2, 4  ;;  %v4623_v13 = vrot.slane %v13897_v21, 5  ;;  %v14125_v21 = vld [vmem:[%s13005_s23 + $0x34] sm:$0xf] }
 0x358   : > { %10037 = vmatprep.mubr.msk.bf16.mxu1 %vm3609_vm0, %v9326_v26  ;;  %v9342_v15 = vcombine.low %v4614_v10, %v4617_v1  ;;  %v9338_v16 = vrot.slane %v10745_v33, 9  ;;  %v4629_v4 = vrot.slane %v4627_v11, 4  ;;  %v4630_v56 = vrot.slane %v13949_v47, 5  ;;  %v14183_v27 = vld [vmem:[%s12940_s27 + $0x18] sm:$0xf] }
 0x359   : > { %10136 = vmatmul.mubr.msk.bf16.gmra.mrb[8].mxu0 %vm3609_vm0, %v9475_v8  ;;  %v4621_v43 = vsel %vm12949_vm15, %v9337_v9, %v4620_v2  ;;  %v4624_v47 = vsel %vm12949_vm15, %v4622_v6, %v4623_v13  ;;  %v4634_v3 = vrot.slane %v10746_v55, 5  ;;  %v9525_v54 = vcombine.low %v14115_v49, %v14118_v53  ;;  %v14194_v2 = vld [vmem:[%s12940_s27 + $0x24] sm:$0xf]  ;;  %v14197_v59 = vld [vmem:[%s12940_s27 + $0x28] sm:$0xf] }
 0x35a   : > { %10141 = vmatprep.mubr.msk.bf16.mxu0 %vm3609_vm0, %v9524_v42  ;;  %v4628_v41 = vsel %vm12949_vm15, %v9338_v16, %v4627_v11  ;;  %v4631_v44 = vsel %vm12949_vm15, %v4629_v4, %v4630_v56  ;;  %v9526_v30 = vcombine.low %v14122_v29, %v14125_v21  ;;  %v6276_v57 = vsel %vm3628_vm14, %v14020_v38, 0  ;;  %v14154_v38 = vld [vmem:[%s13005_s23 + $0x40] sm:$0xf]  ;;  %v14203_v42 = vld [vmem:[%s12940_s27 + $0x30] sm:$0xf] }
 0x35b   : > { %v9343_v28 = vcombine.low %v4621_v43, %v4624_v47  ;;  %v9344_v62 = vcombine.low %v4628_v41, %v4631_v44  ;;  %v9339_v19 = vrot.slane %v10747_v22, 9  ;;  %v4636_v51 = vrot.slane %v4634_v3, 4  ;;  %15943 = vst [vmem:[#allocation79_spill] sm:$0xff] %v14154_v38  ;;  %v14209_v40 = vld [vmem:[%s12940_s27 + $0x34] sm:$0xf] }
 0x35c   : > { %v4637_v34 = vrot.slane %v13963_v50, 5  ;;  %v14161_v50 = vld [vmem:[%s13005_s23 + $0x4c] sm:$0xf]  ;;  %v6374_v23 = vshrl.u32 %v14089_v25, 16  ;;  %v6377_v63 = vshll.u32 %v14089_v25, 16  ;;  %v6387_v20 = vshrl.u32 %v14092_v18, 16 }
 0x35d   : > { %v4635_v37 = vsel %vm12949_vm15, %v9339_v19, %v4634_v3  ;;  %v6398_v0 = vshrl.u32 %v14115_v49, 16  ;;  %v6401_v32 = vshll.u32 %v14115_v49, 16  ;;  %v9527_v26 = vcombine.low %v14151_v39, %v14154_v38  ;;  %v14218_v33 = vld [vmem:[%s12940_s27 + $0x3c] sm:$0xf]  ;;  %v14227_v47 = vld [vmem:[%s12940_s27 + $0x40] sm:$0xf] }
 0x35e   : > { %v4638_v52 = vsel %vm12949_vm15, %v4636_v51, %v4637_v34  ;;  %v6411_v7 = vshrl.u32 %v14118_v53, 16  ;;  %v6422_v61 = vshrl.u32 %v14122_v29, 16  ;;  %v6425_v14 = vshll.u32 %v14122_v29, 16  ;;  %v14236_v44 = vld [vmem:[%s12940_s27 + $0x48] sm:$0xf] }
 0x35f   : > { %10038 = vmatmul.mubr.msk.bf16.gmra.mrb[8].mxu1 %vm3609_vm0, %v9327_v24  ;;  %v9528_v36 = vcombine.low %v14158_v45, %v14161_v50  ;;  %v6435_v12 = vshrl.u32 %v14125_v21, 16  ;;  %v6446_v58 = vshrl.u32 %v14151_v39, 16  ;;  %v6449_v8 = vshll.u32 %v14151_v39, 16  ;;  %v14247_v22 = vld [vmem:[%s12940_s27 + $0x4c] sm:$0xf] }
 0x360   : > { %10047 = vmatprep.mubr.msk.bf16.mxu1 %vm3609_vm0, %v9342_v15  ;;  %v9345_v10 = vcombine.low %v4635_v37, %v4638_v52  ;;  %v6459_v1 = vshrl.u32 %v14154_v38, 16  ;;  %v6470_v24 = vshrl.u32 %v14158_v45, 16  ;;  %v6473_v60 = vshll.u32 %v14158_v45, 16  ;;  %v14255_v52 = vld [vmem:[%s12940_s27 + $0x54] sm:$0xf] }
 0x361   : > { %10142 = vmatmul.mubr.msk.bf16.vlgmr.msra.gmra.mrb[0].mxu0 %vm3609_vm0, %v9525_v54  ;;  %v9568_v11 = vcombine.low %v9549_v17, %v9549_v17  ;;  %v6483_v9 = vshrl.u32 %v14161_v50, 16  ;;  %v9529_v6 = vcombine.low %v14167_v35, %v14170_v5  ;;  %v9536_v4 = vcombine.low %v14183_v27, %v14186_v31  ;;  %v14267_v51 = vld [vmem:[%s13005_s23 + $0x20] sm:$0x1]  ;;  %v14289_v19 = vld [vmem:[%s13005_s23 + $0x2c] sm:$0x1] }
 0x362   : > { %10154 = vmatpush3.bf16.msra.mxu0 %v6276_v57  ;;  %10145 = vmatprep.mubr.msk.bf16.mxu0 %vm3609_vm0, %v9526_v30  ;;  %v9537_v3 = vcombine.low %v14194_v2, %v14197_v59  ;;  %v6407_v41 = vshll.u32 %v14118_v53, 16  ;;  %v6400_v34 = vrot.slane %v6398_v0, 4  ;;  %v6403_v55 = vrot.slane %v6401_v32, 5  ;;  %v14307_v57 = vld [vmem:[%s13005_s23 + $0x38] sm:$0x1] }
 0x363   : > { %10616 = vmatprep.subr.msk.bf16.mxu0 %vm3628_vm14, %v9549_v17  ;;  %v14238_v30 = vrot.slane %v9568_v11, 2  ;;  %v6383_v11 = vshll.u32 %v14092_v18, 16  ;;  %v6413_v0 = vrot.slane %v6411_v7, 4  ;;  %v6455_v32 = vshll.u32 %v14154_v38, 16  ;;  %15944 = vst [vmem:[#allocation88_spill] sm:$0xff] %v14307_v57 }
 0x364   : > { %v14292_v43 = vrot.slane %v6407_v41, 5  ;;  %v6417_v41 = vshll.u32 %v14289_v19, 16  ;;  %v6448_v7 = vrot.slane %v6446_v58, 4  ;;  %v6451_v56 = vrot.slane %v6449_v8, 5 }
 0x365   : > { %v6461_v58 = vrot.slane %v6459_v1, 4  ;;  %v6479_v8 = vshll.u32 %v14161_v50, 16  ;;  %v15954_v38 = vshrl.u32 %v14194_v2, 16  ;;  %vm7626_vm5 = vsmask.f32 7938 }
 0x366   : > { %v6452_v15 = vor.u32 %v6451_v56, %v6448_v7  ;;  %v6503_v56 = vshll.u32 %v14170_v5, 16  ;;  %vm7502_vm6 = vsmask.f32 256  ;;  %vm7503_vm7 = vsmask.f32 4368  ;;  %vm14853_vm9 = vmand %vm7625_vm4, %vm7626_vm5 }
 0x367   : > { %10048 = vmatmul.mubr.msk.bf16.vlgmr.msra.gmra.mrb[4].mxu1 %vm3609_vm0, %v9343_v28  ;;  %v14242_v28 = vsel %vm3628_vm14, %v9549_v17, 0  ;;  %v6393_v17 = vshll.u32 %v14267_v51, 16  ;;  %vm7633_vm8 = vcmask 24576   ;;  %vm14859_vm10 = vmor %vm7502_vm6, %vm7503_vm7 }
 0x368   : > { %10051 = vmatprep.mubr.msk.bf16.mxu1 %vm3609_vm0, %v9344_v62  ;;  %v9538_v62 = vcombine.low %v14203_v42, %v14209_v40  ;;  %vm14868_vm11 = vmand %vm7633_vm8, %vm7502_vm6 }
 0x369   : > { %10146 = vmatmul.mubr.msk.bf16.gmra.mrb[4].mxu0 %vm3609_vm0, %v9527_v26  ;;  %v14259_v26 = vld [vmem:[%s12940_s27 + $0x58] sm:$0xf] }
 0x36a   : > { %10149 = vmatprep.mubr.msk.bf16.mxu0 %vm3609_vm0, %v9528_v36  ;;  %v6376_v36 = vrot.slane %v6374_v23, 4  ;;  %v14283_v23 = vrot.slane %v6383_v11, 5  ;;  %v6404_v11 = vor.u32 %v6403_v55, %v6400_v34  ;;  %v14324_v55 = vsel %vm3628_vm14, %v14238_v30, 0 }
 0x36b   : > { %v14326_v34 = vrot.slane %v6455_v32, 5  ;;  %v6419_v32 = vrot.slane %v6417_v41, 5  ;;  %v6453_v41 = vrot.slane %v6452_v15, 4  ;;  %v14378_v15 = vld [vmem:[%s13005_s23 + $0x5c] sm:$0x1] }
 0x36c   : > { %v6405_v16 = vrot.slane %v6404_v11, 4  ;;  %v14361_v11 = vld [vmem:[%s13005_s23 + $0x50] sm:$0x1] }
 0x36f   : > { %10052 = vmatmul.mubr.msk.bf16.gmra.mrb[8].mxu1 %vm3609_vm0, %v9345_v10  ;;  %v6379_v10 = vrot.slane %v6377_v63, 5  ;;  %v6431_v63 = vshll.u32 %v14125_v21, 16 }
 0x371   : > { %10150 = vmatmul.mubr.msk.bf16.gmra.mrb[8].mxu0 %vm3609_vm0, %v9529_v6  ;;  %v6380_v54 = vor.u32 %v6379_v10, %v6376_v36  ;;  %v6389_v6 = vrot.slane %v6387_v20, 4  ;;  %v6427_v20 = vrot.slane %v6425_v14, 5  ;;  %v14301_v36 = vrot.slane %v6431_v63, 5 }
 0x372   : > { %10155 = vmatprep.mubr.msk.bf16.mxu0 %vm3609_vm0, %v9536_v4  ;;  %v6424_v4 = vrot.slane %v6422_v61, 4  ;;  %v6437_v10 = vrot.slane %v6435_v12, 4  ;;  %v14317_v63 = vrot.slane %v6393_v17, 5  ;;  %v14320_v12 = vld [vmem:[%s13005_s23 + $0x44] sm:$0x1]  ;;  %v6441_v17 = vshll.u32 %v14307_v57, 16 }
 0x373   : > { %v14314_v37 = vrot.slane %v6380_v54, 4  ;;  %v6390_v14 = vor.u32 %v6389_v6, %v14283_v23  ;;  %15945 = vst [vmem:[#allocation80_spill] sm:$0xff] %v14320_v12  ;;  %v6414_v54 = vor.u32 %v6413_v0, %v14292_v43  ;;  %v6465_v13 = vshll.u32 %v14320_v12, 16 }
 0x374   : > { %v6428_v61 = vor.u32 %v6427_v20, %v6424_v4  ;;  %v6438_v6 = vor.u32 %v6437_v10, %v14301_v36  ;;  %v6475_v4 = vrot.slane %v6473_v60, 5  ;;  %v6485_v20 = vrot.slane %v6483_v9, 4 }
 0x375   : > { %v6386_v1 = vsel %vm13258_vm3, %v14314_v37, %v14283_v23  ;;  %v6391_v0 = vrot.slane %v6390_v14, 4  ;;  %v6415_v37 = vrot.slane %v6414_v54, 4  ;;  %v6467_v7 = vrot.slane %v6465_v13, 5 }
 0x376   : > { %v6429_v23 = vrot.slane %v6428_v61, 4  ;;  %v6439_v10 = vrot.slane %v6438_v6, 4  ;;  %v6659_v60 = vshll.u32 %v14186_v31, 16  ;;  %v15946_v14 = vshrl.u32 %v14167_v35, 16 }
 0x377   : > { %v15947_v9 = vshll.u32 %v14167_v35, 16  ;;  %v15948_v54 = vshrl.u32 %v14170_v5, 16  ;;  %v6489_v13 = vshll.u32 %v14361_v11, 16  ;;  %v15955_v57 = vshll.u32 %v14194_v2, 16 }
 0x379   : > { %10156 = vmatmul.mubr.msk.bf16.vlgmr.msra.gmra.mrb[0].mxu0 %vm3609_vm0, %v9537_v3  ;;  %v6472_v3 = vrot.slane %v6470_v24, 4  ;;  %v6443_v24 = vrot.slane %v6441_v17, 5  ;;  %v6499_v61 = vrot.slane %v15947_v9, 5  ;;  %v6509_v6 = vrot.slane %v15948_v54, 4 }
 0x37a   : > { %10168 = vmatpush3.bf16.msra.mxu0 %v14242_v28  ;;  %10159 = vmatprep.mubr.msk.bf16.mxu0 %vm3609_vm0, %v9538_v62  ;;  %v6462_v28 = vor.u32 %v6461_v58, %v14326_v34  ;;  %v14356_v62 = vrot.slane %v6479_v8, 5  ;;  %v6496_v58 = vrot.slane %v15946_v14, 4  ;;  %v14371_v8 = vrot.slane %v6503_v56, 5 }
 0x37b   : > { %10617 = vmatprep.subr.msk.bf16.mxu0 %vm3628_vm14, %v14238_v30  ;;  %v6410_v30 = vsel %vm13258_vm3, %v6405_v16, %v14292_v43  ;;  %v6476_v12 = vor.u32 %v6475_v4, %v6472_v3  ;;  %v6396_v43 = vsel %vm13258_vm3, %v6391_v0, %v14317_v63  ;;  %v6420_v14 = vsel %vm13258_vm3, %v6415_v37, %v6419_v32  ;;  %v14395_v4 = vld [vmem:[%s12940_s27 + $0x20] sm:$0x1] }
 0x37c   : > { %v6463_v17 = vrot.slane %v6462_v28, 4  ;;  %v6486_v16 = vor.u32 %v6485_v20, %v14356_v62  ;;  %v6434_v56 = vsel %vm13258_vm3, %v6429_v23, %v14301_v36  ;;  %v6444_v3 = vsel %vm13258_vm3, %v6439_v10, %v6443_v24 }
 0x37d   : > { %v15949_v28 = vcombine.low %v14218_v33, %v14227_v47  ;;  %v15950_v20 = vshrl.u32 %v14183_v27, 16  ;;  %v15951_v0 = vshll.u32 %v14183_v27, 16  ;;  %v14401_v37 = vrot.slane %v6659_v60, 5 }
 0x37e   : > { %v15952_v36 = vshrl.u32 %v14186_v31, 16  ;;  %v15953_v10 = vcombine.low %v14236_v44, %v14247_v22  ;;  %v6458_v24 = vsel %vm13258_vm3, %v6453_v41, %v14326_v34  ;;  %v6500_v9 = vor.u32 %v6499_v61, %v6496_v58 }
 0x37f   : > { %v6652_v63 = vrot.slane %v15950_v20, 4  ;;  %v6655_v32 = vrot.slane %v15951_v0, 5  ;;  %v6510_v54 = vor.u32 %v6509_v6, %v14371_v8  ;;  %v6468_v60 = vsel %vm13258_vm3, %v6463_v17, %v6467_v7 }
 0x380   : > { %v6665_v23 = vrot.slane %v15952_v36, 4  ;;  %v6477_v20 = vrot.slane %v6476_v12, 4  ;;  %v6487_v0 = vrot.slane %v6486_v16, 4  ;;  %v6491_v36 = vrot.slane %v6489_v13, 5 }
 0x381   : > { %10160 = vmatmul.mubr.msk.bf16.gmra.mrb[4].mxu0 %vm3609_vm0, %v15949_v28  ;;  %v6513_v28 = vshll.u32 %v14378_v15, 16  ;;  %v6669_v39 = vshll.u32 %v14395_v4, 16  ;;  %v6679_v34 = vrot.slane %v15955_v57, 5  ;;  %v6683_v41 = vshll.u32 %v14197_v59, 16 }
 0x382   : > { %10163 = vmatprep.mubr.msk.bf16.mxu0 %vm3609_vm0, %v15953_v10  ;;  %v6676_v10 = vrot.slane %v15954_v38, 4  ;;  %v9550_v58 = vcombine.low %v6386_v1, %v6396_v43  ;;  %v9551_v61 = vcombine.low %v6410_v30, %v6420_v14  ;;  %v6656_v6 = vor.u32 %v6655_v32, %v6652_v63  ;;  %v14432_v43 = vld [vmem:[%s12940_s27 + $0x2c] sm:$0x1] }
 0x383   : > { %v6666_v29 = vor.u32 %v6665_v23, %v14401_v37  ;;  %v9552_v7 = vcombine.low %v6434_v56, %v6444_v3  ;;  %v6501_v12 = vrot.slane %v6500_v9, 4  ;;  %v6511_v17 = vrot.slane %v6510_v54, 4 }
 0x384   : > { %v6515_v16 = vrot.slane %v6513_v28, 5  ;;  %v14423_v13 = vcombine.low %v6458_v24, %v6468_v60  ;;  %v6482_v38 = vsel %vm13258_vm3, %v6477_v20, %v14356_v62  ;;  %v6492_v57 = vsel %vm13258_vm3, %v6487_v0, %v6491_v36  ;;  %v14453_v20 = vld [vmem:[%s12940_s27 + $0x38] sm:$0x1] }
 0x385   : > { %v6707_v1 = vshll.u32 %v14209_v40, 16  ;;  %v6671_v30 = vrot.slane %v6669_v39, 5  ;;  %v6680_v14 = vor.u32 %v6679_v34, %v6676_v10  ;;  %v14434_v56 = vrot.slane %v6683_v41, 5 }
 0x386   : > { %v15956_v3 = vshrl.u32 %v14197_v59, 16  ;;  %v15957_v32 = vcombine.low %v14255_v52, %v14259_v26  ;;  %v6657_v62 = vrot.slane %v6656_v6, 4  ;;  %v6667_v23 = vrot.slane %v6666_v29, 4 }
 0x387   : > { %v15958_v24 = vshrl.u32 %v14203_v42, 16  ;;  %v15959_v39 = vshll.u32 %v14203_v42, 16  ;;  %v6506_v28 = vsel %vm13258_vm3, %v6501_v12, %v14371_v8  ;;  %v6516_v60 = vsel %vm13258_vm3, %v6511_v17, %v6515_v16 }
 0x388   : > { %v6689_v63 = vrot.slane %v15956_v3, 4  ;;  %v9576_v0 = vrot.slane %v14089_v25, 9  ;;  %v6939_v29 = vrot.slane %v14092_v18, 5  ;;  %v6693_v36 = vshll.u32 %v14432_v43, 16 }
 0x389   : > { %10164 = vmatmul.mubr.msk.bf16.gmra.mrb[8].mxu0 %vm3609_vm0, %v15957_v32  ;;  %v6700_v9 = vrot.slane %v15958_v24, 4  ;;  %v6703_v54 = vrot.slane %v15959_v39, 5  ;;  %v14458_v10 = vrot.slane %v6707_v1, 5  ;;  %v15960_v34 = vshrl.u32 %v14209_v40, 16 }
 0x38a   : > { %10169 = vmatprep.mubr.msk.bf16.mxu0 %vm3609_vm0, %v9550_v58  ;;  %v6942_v58 = vrot.slane %v14267_v51, 5  ;;  %v14463_v6 = vrot.slane %v6680_v14, 4  ;;  %v6690_v8 = vor.u32 %v6689_v63, %v14434_v56  ;;  %v14468_v12 = vsel %vm12949_vm15, %v9576_v0, %v6939_v29  ;;  %v14478_v51 = vld [vmem:[%s15375_s4 + $0x20] sm:$0xf] }
 0x38b   : > { %v6713_v41 = vrot.slane %v15960_v34, 4  ;;  %v6941_v25 = vrot.slane %v6939_v29, 4  ;;  %v6662_v18 = vsel %vm13258_vm3, %v6657_v62, %v14401_v37  ;;  %v6672_v17 = vsel %vm13258_vm3, %v6667_v23, %v6671_v30 }
 0x38c   : > { %v6704_v16 = vor.u32 %v6703_v54, %v6700_v9  ;;  %v6717_v1 = vshll.u32 %v14453_v20, 16  ;;  %v9554_v14 = vcombine.low %v6482_v38, %v6492_v57  ;;  %v14481_v3 = vcombine.low %v6506_v28, %v6516_v60 }
 0x38d   : > { %v9606_v63 = vcombine.low %v14478_v51, %v14478_v51  ;;  %v14487_v37 = vsel %vm12949_vm15, %v6941_v25, %v6942_v58  ;;  %v14489_v32 = vrot.slane %v6693_v36, 5  ;;  %v6714_v30 = vor.u32 %v6713_v41, %v14458_v10 }
 0x38e   : > { %v6731_v62 = vshll.u32 %v14227_v47, 16  ;;  %v9582_v23 = vcombine.low %v14468_v12, %v14487_v37  ;;  %v14495_v24 = vcombine.low %v6662_v18, %v6672_v17  ;;  %v6686_v38 = vsel %vm13258_vm3, %v14463_v6, %v14434_v56 }
 0x38f   : > { %v14501_v57 = vrot.slane %v6690_v8, 4  ;;  %v15961_v9 = vshrl.u32 %v14218_v33, 16  ;;  %v14508_v54 = vrot.slane %v6704_v16, 4  ;;  %v14510_v28 = vrot.slane %v6717_v1, 5 }
 0x390   : > { %v15962_v60 = vshll.u32 %v14218_v33, 16  ;;  %v15963_v29 = vshrl.u32 %v14227_v47, 16  ;;  %v6755_v34 = vshll.u32 %v14247_v22, 16  ;;  %v6967_v41 = vrot.slane %v14161_v50, 5 }
 0x391   : > { %v14505_v39 = vrot.slane %v15961_v9, 4  ;;  %10170 = vmatmul.mubr.msk.bf16.vlgmr.msra.gmra.mrb[0].mxu0 %vm3609_vm0, %v9551_v61  ;;  %v9580_v61 = vrot.slane %v14158_v45, 9  ;;  %v6970_v58 = vrot.slane %v14361_v11, 5  ;;  %v14528_v8 = vrot.slane %v6714_v30, 4 }
 0x392   : > { %v14514_v0 = vrot.slane %v15962_v60, 5  ;;  %v14518_v36 = vrot.slane %v15963_v29, 4  ;;  %10182 = vmatpush3.bf16.msra.mxu0 %v14324_v55  ;;  %10173 = vmatprep.mubr.msk.bf16.mxu0 %vm3609_vm0, %v9552_v7  ;;  %v14530_v25 = vrot.slane %v6731_v62, 5  ;;  %v15964_v18 = vshrl.u32 %v14236_v44, 16 }
 0x393   : > { %10618 = vmatprep.subr.msk.bf16.mxu0 %vm3628_vm14, %v14478_v51  ;;  %v9581_v7 = vrot.slane %v14167_v35, 9  ;;  %v15965_v17 = vshll.u32 %v14236_v44, 16  ;;  %v14543_v50 = vsel %vm12949_vm15, %v9580_v61, %v6967_v41  ;;  %v6969_v11 = vrot.slane %v6967_v41, 4 }
 0x394   : > { %v14534_v55 = vrot.slane %v15964_v18, 4  ;;  %v6974_v16 = vrot.slane %v14170_v5, 5  ;;  %v15966_v1 = vshrl.u32 %v14247_v22, 16  ;;  %v6977_v62 = vrot.slane %v14378_v15, 5 }
 0x395   : > { %v14539_v45 = vrot.slane %v15965_v17, 5  ;;  %v9594_v9 = vrot.slane %v14183_v27, 9  ;;  %v7119_v35 = vrot.slane %v14186_v31, 5  ;;  %v14553_v60 = vrot.slane %v6755_v34, 5 }
 0x396   : > { %v14548_v30 = vrot.slane %v15966_v1, 4  ;;  %v14557_v29 = vsel %vm12949_vm15, %v6969_v11, %v6970_v58  ;;  %v14561_v61 = vsel %vm12949_vm15, %v9581_v7, %v6974_v16  ;;  %v6976_v5 = vrot.slane %v6974_v16, 4  ;;  %v9516_v1 = vld [vmem:[%s12940_s27 + $0x44] sm:$0x1] }
 0x397   : > { %v9586_v41 = vcombine.low %v14543_v50, %v14557_v29  ;;  %v14567_v15 = vsel %vm12949_vm15, %v9594_v9, %v7119_v35  ;;  %v7121_v27 = vrot.slane %v7119_v35, 4  ;;  %v7122_v31 = vrot.slane %v14395_v4, 5 }
 0x398   : > { %v14572_v34 = vsel %vm12949_vm15, %v6976_v5, %v6977_v62  ;;  %v9595_v58 = vrot.slane %v14194_v2, 9  ;;  %v7126_v18 = vrot.slane %v14197_v59, 5  ;;  %v7129_v7 = vrot.slane %v14432_v43, 5 }
 0x399   : > { %10174 = vmatmul.mubr.msk.bf16.gmra.mrb[4].mxu0 %vm3609_vm0, %v14423_v13  ;;  %v9587_v17 = vcombine.low %v14561_v61, %v14572_v34  ;;  %v14583_v11 = vsel %vm12949_vm15, %v7121_v27, %v7122_v31  ;;  %v9596_v4 = vrot.slane %v14203_v42, 9  ;;  %v7133_v16 = vrot.slane %v14209_v40, 5 }
 0x39a   : > { %10177 = vmatprep.mubr.msk.bf16.mxu0 %vm3609_vm0, %v9554_v14  ;;  %v9600_v2 = vcombine.low %v14567_v15, %v14583_v11  ;;  %v14592_v59 = vsel %vm12949_vm15, %v9595_v58, %v7126_v18  ;;  %v7128_v13 = vrot.slane %v7126_v18, 4  ;;  %v7136_v43 = vrot.slane %v14453_v20, 5  ;;  %v9519_v20 = vld [vmem:[%s12940_s27 + $0x50] sm:$0x1]  ;;  %v9522_v18 = vld [vmem:[%s12940_s27 + $0x5c] sm:$0x1] }
 0x39b   : > { %v14598_v42 = vsel %vm12949_vm15, %v9596_v4, %v7133_v16  ;;  %v7135_v62 = vrot.slane %v7133_v16, 4  ;;  %v9597_v40 = vrot.slane %v14218_v33, 9  ;;  %v7140_v14 = vrot.slane %v14227_v47, 5 }
 0x39c   : > { %v14604_v9 = vsel %vm12949_vm15, %v7128_v13, %v7129_v7  ;;  %v7143_v35 = vrot.slane %v9516_v1, 5  ;;  %v9598_v5 = vrot.slane %v14236_v44, 9  ;;  %v7147_v27 = vrot.slane %v14247_v22, 5 }
 0x39d   : > { %v9601_v31 = vcombine.low %v14592_v59, %v14604_v9  ;;  %v14613_v58 = vsel %vm12949_vm15, %v7135_v62, %v7136_v43  ;;  %v14617_v33 = vsel %vm12949_vm15, %v9597_v40, %v7140_v14  ;;  %v7142_v47 = vrot.slane %v7140_v14, 4 }
 0x39e   : > { %v9602_v7 = vcombine.low %v14598_v42, %v14613_v58  ;;  %v14624_v44 = vsel %vm12949_vm15, %v9598_v5, %v7147_v27  ;;  %v7149_v22 = vrot.slane %v7147_v27, 4  ;;  %v7150_v4 = vrot.slane %v9519_v20, 5 }
 0x39f   : > { %v14628_v16 = vsel %vm12949_vm15, %v7142_v47, %v7143_v35  ;;  %v9599_v13 = vrot.slane %v14255_v52, 9  ;;  %v7154_v43 = vrot.slane %v14259_v26, 5  ;;  %v7157_v62 = vrot.slane %v9522_v18, 5 }
 0x3a0   : > { %v6696_v40 = vsel %vm13258_vm3, %v14501_v57, %v14489_v32  ;;  %v6741_v14 = vshll.u32 %v9516_v1, 16  ;;  %v9603_v5 = vcombine.low %v14617_v33, %v14628_v16  ;;  %v14640_v27 = vsel %vm12949_vm15, %v7149_v22, %v7150_v4 }
 0x3a1   : > { %10178 = vmatmul.mubr.msk.bf16.gmra.mrb[8].mxu0 %vm3609_vm0, %v14481_v3  ;;  %v6728_v35 = vor.u32 %v14514_v0, %v14505_v39  ;;  %v14650_v32 = vsel %vm12949_vm15, %v9599_v13, %v7154_v43  ;;  %v7156_v57 = vrot.slane %v7154_v43, 4  ;;  %v6710_v1 = vsel %vm13258_vm3, %v14508_v54, %v14458_v10 }
 0x3a2   : > { %10183 = vmatprep.mubr.msk.bf16.mxu0 %vm3609_vm0, %v14495_v24  ;;  %v6720_v3 = vsel %vm13258_vm3, %v14528_v8, %v14510_v28  ;;  %v6738_v39 = vor.u32 %v14518_v36, %v14530_v25  ;;  %v6779_v0 = vshll.u32 %v14259_v26, 16  ;;  %v6752_v22 = vor.u32 %v14539_v45, %v14534_v55 }
 0x3a3   : > { %v6762_v24 = vor.u32 %v14548_v30, %v14553_v60  ;;  %v6765_v4 = vshll.u32 %v9519_v20, 16  ;;  %v14671_v10 = vsel %vm12949_vm15, %v7156_v57, %v7157_v62  ;;  %v7180_v54 = vrot.slane %v9606_v63, 2 }
 0x3a4   : > { %v9563_v28 = vcombine.low %v6686_v38, %v6696_v40  ;;  %v9605_v36 = vcombine.low %v14650_v32, %v14671_v10  ;;  %v9564_v8 = vcombine.low %v6710_v1, %v6720_v3  ;;  %v6729_v55 = vrot.slane %v6728_v35, 4 }
 0x3a5   : > { %v6743_v45 = vrot.slane %v6741_v14, 5  ;;  %v15967_v30 = vshrl.u32 %v14255_v52, 16  ;;  %v6739_v13 = vrot.slane %v6738_v39, 4  ;;  %v15968_v43 = vshll.u32 %v14255_v52, 16 }
 0x3a6   : > { %v6781_v63 = vrot.slane %v6779_v0, 5  ;;  %v15969_v57 = vshrl.u32 %v14259_v26, 16  ;;  %v7016_v56 = vsel %vm3628_vm14, %v14478_v51, 0  ;;  %v6753_v6 = vrot.slane %v6752_v22, 4 }
 0x3a7   : > { %v6772_v20 = vrot.slane %v15967_v30, 4  ;;  %v6775_v62 = vrot.slane %v15968_v43, 5  ;;  %v6763_v38 = vrot.slane %v6762_v24, 4  ;;  %v6767_v40 = vrot.slane %v6765_v4, 5  ;;  %v15970_v30 = vld [vmem:[#allocation102_spill] sm:$0xff]  ;;  %v15971_v43 = vld [vmem:[#allocation88_spill] sm:$0xff] }
 0x3a8   : > { %v6785_v47 = vrot.slane %v15969_v57, 4  ;;  %v6734_v14 = vsel %vm13258_vm3, %v6729_v55, %v14530_v25  ;;  %v6744_v52 = vsel %vm13258_vm3, %v6739_v13, %v6743_v45  ;;  %v6789_v1 = vshll.u32 %v9522_v18, 16 }
 0x3a9   : > { %10184 = vmatmul.mubr.msk.bf16.vlgmr.msra.gmra.mrb[0].mxu0 %vm3609_vm0, %v9563_v28  ;;  %v6776_v26 = vor.u32 %v6775_v62, %v6772_v20  ;;  %v6758_v51 = vsel %vm13258_vm3, %v6753_v6, %v14553_v60  ;;  %v6768_v3 = vsel %vm13258_vm3, %v6763_v38, %v6767_v40  ;;  %v9565_v39 = vcombine.low %v6734_v14, %v6744_v52  ;;  %v15973_v38 = vld [vmem:[#allocation89_spill] sm:$0xff] }
 0x3aa   : > { %10196 = vmatpush3.bf16.msra.mxu0 %v7016_v56  ;;  %10187 = vmatprep.mubr.msk.bf16.mxu0 %vm3609_vm0, %v9564_v8  ;;  %v6786_v35 = vor.u32 %v6785_v47, %v6781_v63  ;;  %v9566_v25 = vcombine.low %v6758_v51, %v6768_v3  ;;  %v6791_v24 = vrot.slane %v6789_v1, 5  ;;  %v6946_v47 = vrot.slane %v14118_v53, 5  ;;  %v7332_v52 = vld [vmem:[%s15377_s6] sm:$0x3] }
 0x3ab   : > { %10619 = vmatprep.subr.msk.bf16.mxu0 %vm3628_vm14, %v7180_v54  ;;  %v6777_v0 = vrot.slane %v6776_v26, 4  ;;  %v6953_v4 = vrot.slane %v14125_v21, 5  ;;  %v9577_v8 = vrot.slane %v14115_v49, 9  ;;  %v6949_v45 = vrot.slane %v14289_v19, 5  ;;  %v15972_v21 = vld [vmem:[#allocation79_spill] sm:$0xff]  ;;  %10620 = vmatprep.subr.msk.bf16.mxu1 %vm3628_vm14, %v7332_v52 }
 0x3ac   : > { %v6787_v22 = vrot.slane %v6786_v35, 4  ;;  %v6948_v55 = vrot.slane %v6946_v47, 4  ;;  %v9578_v20 = vrot.slane %v15970_v30, 9  ;;  %v6956_v62 = vrot.slane %v15971_v43, 5 }
 0x3ad   : > { %v6782_v18 = vsel %vm13258_vm3, %v6777_v0, %v6781_v63  ;;  %v6955_v13 = vrot.slane %v6953_v4, 4  ;;  %v6947_v53 = vsel %vm12949_vm15, %v9577_v8, %v6946_v47  ;;  %v6960_v19 = vrot.slane %v15972_v21, 5 }
 0x3ae   : > { %v6792_v60 = vsel %vm13258_vm3, %v6787_v22, %v6791_v24  ;;  %v6950_v49 = vsel %vm12949_vm15, %v6948_v55, %v6949_v45  ;;  %v6954_v63 = vsel %vm12949_vm15, %v9578_v20, %v6953_v4  ;;  %v9579_v12 = vrot.slane %v15973_v38, 9 }
 0x3af   : > { %v9567_v28 = vcombine.low %v6782_v18, %v6792_v60  ;;  %v6957_v57 = vsel %vm12949_vm15, %v6955_v13, %v6956_v62  ;;  %v9583_v56 = vcombine.low %v6947_v53, %v6950_v49  ;;  %v6962_v37 = vrot.slane %v6960_v19, 4 }
 0x3b0   : > { %v9584_v6 = vcombine.low %v6954_v63, %v6957_v57  ;;  %v7200_v14 = vsel %vm3628_vm14, %v7180_v54, 0  ;;  %v6961_v26 = vsel %vm12949_vm15, %v9579_v12, %v6960_v19  ;;  %v7359_v1 = vsel %vm3628_vm14, %v7332_v52, 0 }
 0x3b1   : > { %10188 = vmatmul.mubr.msk.bf16.gmra.mrb[4].mxu0 %vm3609_vm0, %v9565_v39  ;;  %10224 = vmatpush3.bf16.msra.mxu1 %v7359_v1  ;;  %v15975_v50 = vcombine.low %v14624_v44, %v14640_v27 }
 0x3b2   : > { %10191 = vmatprep.mubr.msk.bf16.mxu0 %vm3609_vm0, %v9566_v25 }
 0x3b9   : > { %10192 = vmatmul.mubr.msk.bf16.gmra.mrb[8].mxu0 %vm3609_vm0, %v9567_v28 }
 0x3ba   : > { %10197 = vmatprep.mubr.msk.bf16.mxu0 %vm3609_vm0, %v9582_v23  ;;  %v15974_v23 = vld [vmem:[#allocation80_spill] sm:$0xff] }
 0x3bb   : > { %v6963_v40 = vrot.slane %v15974_v23, 5 }
 0x3bd   : > { %v6964_v35 = vsel %vm12949_vm15, %v6962_v37, %v6963_v40 }
 0x3be   : > { %v9585_v54 = vcombine.low %v6961_v26, %v6964_v35 }
 0x3c1   : > { %10198 = vmatmul.mubr.msk.bf16.vlgmr.msra.gmra.mrb[0].mxu0 %vm3609_vm0, %v9583_v56 }
 0x3c2   : > { %10210 = vmatpush3.bf16.msra.mxu0 %v7200_v14  ;;  %10201 = vmatprep.mubr.msk.bf16.mxu0 %vm3609_vm0, %v9584_v6 }
 0x3c9   : > { %10202 = vmatmul.mubr.msk.bf16.gmra.mrb[4].mxu0 %vm3609_vm0, %v9585_v54 }
 0x3ca   : > { %10205 = vmatprep.mubr.msk.bf16.mxu0 %vm3609_vm0, %v9586_v41 }
 0x3d1   : > { %10206 = vmatmul.mubr.msk.bf16.gmra.mrb[8].mxu0 %vm3609_vm0, %v9587_v17 }
 0x3d2   : > { %10211 = vmatprep.mubr.msk.bf16.mxu0 %vm3609_vm0, %v9600_v2 }
 0x3d9   : > { %10212 = vmatmul.mubr.msk.bf16.vlgmr.msra.gmra.mrb[0].mxu0 %vm3609_vm0, %v9601_v31 }
 0x3da   : > { %10215 = vmatprep.mubr.msk.bf16.mxu0 %vm3609_vm0, %v9602_v7  ;;  %v9613_v7 = vld [vmem:[%s15376_s5] ss:$0 sm:$0xff] }
 0x3e1   : > { %10216 = vmatmul.mubr.msk.bf16.gmra.mrb[4].mxu0 %vm3609_vm0, %v9603_v5 }
 0x3e2   : > { %10219 = vmatprep.mubr.msk.bf16.mxu0 %vm3609_vm0, %v15975_v50 }
 0x3e9   : > { %10220 = vmatmul.mubr.msk.bf16.gmra.mrb[8].mxu0 %vm3609_vm0, %v9605_v36 }
 0x422   : > { %v10031_v29 = vpop.f32.mrb[0].mxu1 }
 0x423   : > { %v4532_v61 = vpop.f32.mrb[1].mxu1 }
 0x424   : > { %v10032_v41 = vpop.f32.mrb[2].mxu1 }
 0x425   : > { %v4535_v15 = vpop.f32.mrb[3].mxu1 }
 0x43a   : > { %v10049_v34 = vpop.f32.mrb[4].mxu1 }
 0x43b   : > { %v4732_v17 = vpop.f32.mrb[5].mxu1 }
 0x43c   : > { %v10050_v11 = vpop.f32.mrb[6].mxu1 }
 0x43d   : > { %v4735_v2 = vpop.f32.mrb[7].mxu1 }
 0x442   : > { %v10053_v59 = vpop.f32.mrb[8].mxu1 }
 0x443   : > { %v4748_v42 = vpop.f32.mrb[9].mxu1 }
 0x444   : > { %v10054_v9 = vpop.f32.mrb[10].mxu1 }
 0x445   : > { %v4751_v31 = vpop.f32.mrb[11].mxu1 }
 0x4ac   : > { %v10213_v58 = vpop.f32.mrb[0].mxu0 }
 0x4ad   : > { %v10331_v33 = vadd.f32 %v10213_v58, %v10031_v29  ;;  %v7236_v44 = vpop.f32.mrb[1].mxu0 }
 0x4ae   : > { %v10332_v16 = vadd.f32 %v7236_v44, %v4532_v61  ;;  %v10214_v5 = vpop.f32.mrb[2].mxu0 }
 0x4af   : > { %v10333_v27 = vadd.f32 %v10214_v5, %v10032_v41  ;;  %v7239_v32 = vpop.f32.mrb[3].mxu0  ;;  %v7304_v51 = vadd.f32 %v10331_v33, %v9613_v7 }
 0x4b0   : > { %v14780_v10 = vadd.f32 %v10332_v16, %v9613_v7  ;;  %v10334_v36 = vadd.f32 %v7239_v32, %v4535_v15 }
 0x4b1   : > { %v7305_v3 = vadd.f32 %v10333_v27, %v9613_v7  ;;  %v14788_v18 = vmax.f32 %v7304_v51, 0.0 }
 0x4b2   : > { %v14782_v39 = vadd.f32 %v10334_v36, %v9613_v7  ;;  %v7314_v0 = vmax.f32 %v14780_v10, 0.0 }
 0x4b3   : > { %v14784_v25 = vmax.f32 %v7305_v3, 0.0 }
 0x4b4   : > { %v7315_v22 = vmax.f32 %v14782_v39, 0.0  ;;  %v10217_v24 = vpop.f32.mrb[4].mxu0 }
 0x4b5   : > { %v10335_v60 = vadd.f32 %v10217_v24, %v10049_v34  ;;  %v7252_v47 = vpop.f32.mrb[5].mxu0  ;;  %v7327_v55 = vpack.c.bf16 %v14784_v25, %v14788_v18 }
 0x4b6   : > { %v7326_v4 = vpack.c.bf16 %v7315_v22, %v7314_v0  ;;  %v10336_v28 = vadd.f32 %v7252_v47, %v4732_v17  ;;  %v10218_v8 = vpop.f32.mrb[6].mxu0  ;;  %v14831_v17 = vld [vmem:[%s15378_s7] ss:$0 sm:$0xff] }
 0x4b7   : > { %v10337_v45 = vadd.f32 %v10218_v8, %v10050_v11  ;;  %v7255_v30 = vpop.f32.mrb[7].mxu0  ;;  %v7308_v43 = vadd.f32 %v10335_v60, %v9613_v7 }
 0x4b8   : > { %v7306_v20 = vadd.f32 %v10336_v28, %v9613_v7  ;;  %v10338_v13 = vadd.f32 %v7255_v30, %v4735_v2  ;;  %10225 = vmatprep.mubr.msk.bf16.mxu1 %vm3609_vm0, %v7326_v4 }
 0x4b9   : > { %v7309_v62 = vadd.f32 %v10337_v45, %v9613_v7  ;;  %10226 = vmatmul.mubr.msk.bf16.vlgmr.msra.gmra.mrb[12].mxu1 %vm3609_vm0, %v7327_v55  ;;  %v14802_v57 = vmax.f32 %v7308_v43, 0.0 }
 0x4ba   : > { %v7307_v53 = vadd.f32 %v10338_v13, %v9613_v7  ;;  %v14798_v21 = vmax.f32 %v7306_v20, 0.0 }
 0x4bb   : > { %v14796_v49 = vmax.f32 %v7309_v62, 0.0 }
 0x4bc   : > { %v14800_v19 = vmax.f32 %v7307_v53, 0.0  ;;  %v10221_v63 = vpop.f32.mrb[8].mxu0 }
 0x4bd   : > { %v10339_v56 = vadd.f32 %v10221_v63, %v10053_v59  ;;  %v7268_v6 = vpop.f32.mrb[9].mxu0  ;;  %v7329_v23 = vpack.c.bf16 %v14796_v49, %v14802_v57  ;;  %v7638_v63 = vld [vmem:[#allocation4 + $0xc] sm:$0xf] }
 0x4be   : > { %v7328_v38 = vpack.c.bf16 %v14800_v19, %v14798_v21  ;;  %v10340_v12 = vadd.f32 %v7268_v6, %v4748_v42  ;;  %v10222_v37 = vpop.f32.mrb[10].mxu0 }
 0x4bf   : > { %v10341_v40 = vadd.f32 %v10222_v37, %v10054_v9  ;;  %v7271_v14 = vpop.f32.mrb[11].mxu0  ;;  %v14809_v35 = vadd.f32 %v10339_v56, %v9613_v7 }
 0x4c0   : > { %v7310_v52 = vadd.f32 %v10340_v12, %v9613_v7  ;;  %v10342_v26 = vadd.f32 %v7271_v14, %v4751_v31  ;;  %10229 = vmatprep.mubr.msk.bf16.mxu1 %vm3609_vm0, %v7328_v38 }
 0x4c1   : > { %v14811_v1 = vadd.f32 %v10341_v40, %v9613_v7  ;;  %10230 = vmatmul.mubr.msk.bf16.gmra.mrb[16].mxu1 %vm3609_vm0, %v7329_v23  ;;  %v7324_v41 = vmax.f32 %v14809_v35, 0.0  ;;  %v7628_v40 = vld [vmem:[#allocation4] sm:$0xf] }
 0x4c2   : > { %v7311_v54 = vadd.f32 %v10342_v26, %v9613_v7  ;;  %v14815_v29 = vmax.f32 %v7310_v52, 0.0 }
 0x4c3   : > { %v7325_v50 = vmax.f32 %v14811_v1, 0.0 }
 0x4c4   : > { %v14817_v61 = vmax.f32 %v7311_v54, 0.0 }
 0x4c5   : > { %v7331_v34 = vpack.c.bf16 %v7325_v50, %v7324_v41 }
 0x4c6   : > { %v7330_v15 = vpack.c.bf16 %v14817_v61, %v14815_v29 }
 0x4c8   : > { %10233 = vmatprep.mubr.msk.bf16.mxu1 %vm3609_vm0, %v7330_v15 }
 0x4c9   : > { %10234 = vmatmul.mubr.msk.bf16.gmra.mrb[20].mxu1 %vm3609_vm0, %v7331_v34 }
 0x58c   : > { %v10227_v11 = vpop.f32.mrb[12].mxu1 }
 0x58d   : > { %v7404_v2 = vadd.f32 %v10227_v11, %v14831_v17  ;;  %v7395_v59 = vpop.f32.mrb[13].mxu1  ;;  %v7642_v11 = vld [vmem:[#allocation4 + $0x14] sm:$0x1] }
 0x58e   : > { %v7396_v42 = vadd.f32 %v14831_v17, %v7395_v59  ;;  %v10228_v9 = vpop.f32.mrb[14].mxu1 }
 0x58f   : > { %v7444_v31 = vmax.f32 %v7404_v2, 0.0  ;;  %v7407_v58 = vadd.f32 %v10228_v9, %v14831_v17  ;;  %v7398_v33 = vpop.f32.mrb[15].mxu1 }
 0x590   : > { %v7442_v7 = vmax.f32 %v7396_v42, 0.0  ;;  %v7399_v44 = vadd.f32 %v14831_v17, %v7398_v33 }
 0x591   : > { %v14838_v16 = vadd.f32 %v7444_v31, %v14788_v18  ;;  %v7445_v5 = vmax.f32 %v7407_v58, 0.0  ;;  %v7635_v58 = vld [vmem:[#allocation4 + $0x8] sm:$0x1] }
 0x592   : > { %v7454_v27 = vadd.f32 %v7442_v7, %v7314_v0  ;;  %v7443_v32 = vmax.f32 %v7399_v44, 0.0 }
 0x593   : > { %v9768_v10 = vpack.c.bf16 %v14838_v16, %v14838_v16  ;;  %v14843_v36 = vadd.f32 %v7445_v5, %v14784_v25 }
 0x594   : > { %v9766_v51 = vpack.c.bf16 %v7454_v27, %v7454_v27  ;;  %v7455_v3 = vadd.f32 %v7443_v32, %v7315_v22  ;;  %v10231_v24 = vpop.f32.mrb[16].mxu1 }
 0x595   : > { %v7523_v60 = vshrl.u32 %v9768_v10, 16  ;;  %v7526_v47 = vshll.u32 %v9768_v10, 16  ;;  %v9769_v0 = vpack.c.bf16 %v14843_v36, %v14843_v36  ;;  %v7420_v4 = vadd.f32 %v10231_v24, %v14831_v17  ;;  %v7411_v28 = vpop.f32.mrb[17].mxu1 }
 0x596   : > { %v7506_v8 = vshrl.u32 %v9766_v51, 16  ;;  %v7509_v55 = vshll.u32 %v9766_v51, 16  ;;  %v9767_v45 = vpack.c.bf16 %v7455_v3, %v7455_v3  ;;  %v7412_v30 = vadd.f32 %v14831_v17, %v7411_v28  ;;  %v10232_v20 = vpop.f32.mrb[18].mxu1 }
 0x597   : > { %v7525_v13 = vrot.slane %v7523_v60, 7  ;;  %v7531_v43 = vshrl.u32 %v9769_v0, 16  ;;  %v7534_v62 = vshll.u32 %v9769_v0, 16  ;;  %v7448_v39 = vmax.f32 %v7420_v4, 0.0  ;;  %v7414_v22 = vpop.f32.mrb[19].mxu1 }
 0x598   : > { %v7508_v56 = vrot.slane %v7506_v8, 7  ;;  %v7514_v6 = vshrl.u32 %v9767_v45, 16  ;;  %v7517_v38 = vshll.u32 %v9767_v45, 16  ;;  %v7446_v12 = vmax.f32 %v7412_v30, 0.0 }
 0x599   : > { %v7528_v37 = vor.u32 %v7526_v47, %v7525_v13  ;;  %v7529_v23 = vrot.slane %v7525_v13, 4  ;;  %v7533_v52 = vrot.slane %v7531_v43, 7  ;;  %v14864_v26 = vadd.f32 %v7448_v39, %v14802_v57 }
 0x59a   : > { %v7511_v54 = vor.u32 %v7509_v55, %v7508_v56  ;;  %v7512_v15 = vrot.slane %v7508_v56, 4  ;;  %v7516_v2 = vrot.slane %v7514_v6, 7  ;;  %v14873_v59 = vadd.f32 %v7446_v12, %v14798_v21  ;;  %v7645_v12 = vld [vmem:[#allocation4 + $0x18] sm:$0xf] }
 0x59b   : > { %v7639_v42 = vsel %vm14853_vm9, %v7528_v37, %v7638_v63  ;;  %v7536_v9 = vor.u32 %v7534_v62, %v7533_v52  ;;  %v7538_v31 = vrot.slane %v7533_v52, 4  ;;  %v9772_v33 = vpack.c.bf16 %v14864_v26, %v14864_v26  ;;  %v7652_v62 = vld [vmem:[#allocation4 + $0x24] sm:$0xf] }
 0x59c   : > { %7640 = vst [vmem:[#allocation4 + $0xc] sm:$0xf] %v7639_v42  ;;  %v7629_v7 = vsel %vm14853_vm9, %v7511_v54, %v7628_v40  ;;  %v7519_v44 = vor.u32 %v7517_v38, %v7516_v2  ;;  %v7521_v5 = vrot.slane %v7516_v2, 4  ;;  %v9770_v27 = vpack.c.bf16 %v14873_v59, %v14873_v59  ;;  %v10235_v32 = vpop.f32.mrb[20].mxu1 }
 0x59d   : > { %7630 = vst [vmem:[#allocation4] sm:$0xf] %v7629_v7  ;;  %v7537_v10 = vsel %vm14859_vm10, %v7529_v23, %v7536_v9  ;;  %v7643_v51 = vsel %vm14868_vm11, %v7538_v31, %v7642_v11  ;;  %v7557_v3 = vshrl.u32 %v9772_v33, 16  ;;  %v7560_v24 = vshll.u32 %v9772_v33, 16  ;;  %v7427_v60 = vpop.f32.mrb[21].mxu1 }
 0x59e   : > { %7641 = vst.msk [vmem:[#allocation4 + $0x10] sm:$0xf] %vm7625_vm4, %v7537_v10  ;;  %7644 = vst [vmem:[#allocation4 + $0x14] sm:$0x1] %v7643_v51  ;;  %v7520_v47 = vsel %vm14859_vm10, %v7512_v15, %v7519_v44  ;;  %v7636_v0 = vsel %vm14868_vm11, %v7521_v5, %v7635_v58  ;;  %v7540_v4 = vshrl.u32 %v9770_v27, 16  ;;  %v7543_v28 = vshll.u32 %v9770_v27, 16 }
 0x59f   : > { %v10236_v8 = vpop.f32.mrb[22].mxu1  ;;  %7632 = vst.msk [vmem:[#allocation4 + $0x4] sm:$0xf] %vm7625_vm4, %v7520_v47  ;;  %7637 = vst [vmem:[#allocation4 + $0x8] sm:$0x1] %v7636_v0  ;;  %v7559_v55 = vrot.slane %v7557_v3, 7  ;;  %v7423_v45 = vadd.f32 %v10232_v20, %v14831_v17  ;;  %v7415_v30 = vadd.f32 %v14831_v17, %v7414_v22  ;;  %v7436_v13 = vadd.f32 %v10235_v32, %v14831_v17 }
 0x5a0   : > { %v7430_v43 = vpop.f32.mrb[23].mxu1  ;;  %v7542_v39 = vrot.slane %v7540_v4, 7  ;;  %v7428_v63 = vadd.f32 %v14831_v17, %v7427_v60  ;;  %v7439_v56 = vadd.f32 %v10236_v8, %v14831_v17  ;;  %v7649_v8 = vld [vmem:[#allocation4 + $0x20] sm:$0x1] }
 0x5a1   : > { %v7431_v6 = vadd.f32 %v14831_v17, %v7430_v43  ;;  %v7562_v38 = vor.u32 %v7560_v24, %v7559_v55  ;;  %v7449_v37 = vmax.f32 %v7423_v45, 0.0  ;;  %v7447_v23 = vmax.f32 %v7415_v30, 0.0 }
 0x5a2   : > { %v7545_v40 = vor.u32 %v7543_v28, %v7542_v39  ;;  %v7452_v52 = vmax.f32 %v7436_v13, 0.0  ;;  %v7450_v20 = vmax.f32 %v7428_v63, 0.0  ;;  %v7453_v11 = vmax.f32 %v7439_v56, 0.0  ;;  %v7656_v28 = vld [vmem:[#allocation4 + $0x2c] sm:$0x1] }
 0x5a3   : > { %v7653_v22 = vsel %vm14853_vm9, %v7562_v38, %v7652_v62  ;;  %v14902_v54 = vadd.f32 %v7449_v37, %v14796_v49  ;;  %v14905_v15 = vadd.f32 %v7447_v23, %v14800_v19  ;;  %v7451_v9 = vmax.f32 %v7431_v6, 0.0  ;;  %v7659_v63 = vld [vmem:[#allocation4 + $0x30] sm:$0xf] }
 0x5a4   : > { %7654 = vst [vmem:[#allocation4 + $0x24] sm:$0xf] %v7653_v22  ;;  %v7646_v17 = vsel %vm14853_vm9, %v7545_v40, %v7645_v12  ;;  %v7464_v2 = vadd.f32 %v7452_v52, %v7324_v41  ;;  %v14912_v42 = vadd.f32 %v7450_v20, %v14815_v29  ;;  %v7465_v44 = vadd.f32 %v7453_v11, %v7325_v50 }
 0x5a5   : > { %7647 = vst [vmem:[#allocation4 + $0x18] sm:$0xf] %v7646_v17  ;;  %v9773_v31 = vpack.c.bf16 %v14902_v54, %v14902_v54  ;;  %v9771_v58 = vpack.c.bf16 %v14905_v15, %v14905_v15  ;;  %v14923_v35 = vadd.f32 %v7451_v9, %v14817_v61  ;;  %v7563_v41 = vrot.slane %v7559_v55, 4 }
 0x5a6   : > { %v9776_v33 = vpack.c.bf16 %v7464_v2, %v7464_v2  ;;  %v9774_v7 = vpack.c.bf16 %v14912_v42, %v14912_v42  ;;  %v7546_v5 = vrot.slane %v7542_v39, 4  ;;  %v9777_v50 = vpack.c.bf16 %v7465_v44, %v7465_v44  ;;  %v7666_v39 = vld [vmem:[#allocation4 + $0x3c] sm:$0xf]  ;;  %v7670_v2 = vld [vmem:[#allocation4 + $0x44] sm:$0x1] }
 0x5a7   : > { %v7565_v27 = vshrl.u32 %v9773_v31, 16  ;;  %v7548_v32 = vshrl.u32 %v9771_v58, 16  ;;  %v7568_v10 = vshll.u32 %v9773_v31, 16  ;;  %v7551_v51 = vshll.u32 %v9771_v58, 16  ;;  %v7663_v44 = vld [vmem:[#allocation4 + $0x38] sm:$0x1] }
 0x5a8   : > { %v7591_v3 = vshrl.u32 %v9776_v33, 16  ;;  %v7574_v24 = vshrl.u32 %v9774_v7, 16  ;;  %v7594_v0 = vshll.u32 %v9776_v33, 16  ;;  %v7577_v4 = vshll.u32 %v9774_v7, 16 }
 0x5a9   : > { %v7567_v60 = vrot.slane %v7565_v27, 7  ;;  %v7550_v47 = vrot.slane %v7548_v32, 7  ;;  %v9775_v30 = vpack.c.bf16 %v14923_v35, %v14923_v35  ;;  %v7599_v20 = vshrl.u32 %v9777_v50, 16 }
 0x5aa   : > { %v7593_v45 = vrot.slane %v7591_v3, 7  ;;  %v7576_v1 = vrot.slane %v7574_v24, 7  ;;  %v7602_v17 = vshll.u32 %v9777_v50, 16  ;;  %v10805_v3 = vmov (!%p9218_p7), 0  }
 0x5ab   : > { %v7570_v55 = vor.u32 %v7568_v10, %v7567_v60  ;;  %v7572_v13 = vrot.slane %v7567_v60, 4  ;;  %v7553_v43 = vor.u32 %v7551_v51, %v7550_v47  ;;  %v7555_v62 = vrot.slane %v7550_v47, 4  ;;  %7676 = vst.msk [vmem:[#allocation4] sm:$0xf] (!%p9218_p7), %vm7625_vm4, %v10805_v3  ;;  %7677 = vst.msk [vmem:[#allocation4 + $0x4] sm:$0xf] (!%p9218_p7), %vm7625_vm4, %v10805_v3 }
 0x5ac   : > { %v7596_v56 = vor.u32 %v7594_v0, %v7593_v45  ;;  %v7579_v6 = vor.u32 %v7577_v4, %v7576_v1  ;;  %v7582_v22 = vshrl.u32 %v9775_v30, 16  ;;  %v7601_v11 = vrot.slane %v7599_v20, 7  ;;  %7679 = vst.msk [vmem:[#allocation4 + $0x8] sm:$0x1] (!%p9218_p7), %vm7633_vm8, %v10805_v3 }
 0x5ad   : > { %v7571_v38 = vsel %vm14859_vm10, %v7563_v41, %v7570_v55  ;;  %v7657_v12 = vsel %vm14868_vm11, %v7572_v13, %v7656_v28  ;;  %v7554_v37 = vsel %vm14859_vm10, %v7546_v5, %v7553_v43  ;;  %v7650_v23 = vsel %vm14868_vm11, %v7555_v62, %v7649_v8  ;;  %7675 = sbr.rel (%p9218_p7) target bundleno = 1460 (0x5b4), region = 68 }
 0x5ae   : > { %7655 = vst.msk [vmem:[#allocation4 + $0x28] sm:$0xf] %vm7625_vm4, %v7571_v38  ;;  %7658 = vst [vmem:[#allocation4 + $0x2c] sm:$0x1] %v7657_v12  ;;  %v7667_v40 = vsel %vm14853_vm9, %v7596_v56, %v7666_v39  ;;  %v7660_v52 = vsel %vm14853_vm9, %v7579_v6, %v7659_v63  ;;  %v7584_v9 = vrot.slane %v7582_v22, 7  ;;  %v7585_v31 = vshll.u32 %v9775_v30, 16 }
 0x5af   : > { %7648 = vst.msk [vmem:[#allocation4 + $0x1c] sm:$0xf] %vm7625_vm4, %v7554_v37  ;;  %7651 = vst [vmem:[#allocation4 + $0x20] sm:$0x1] %v7650_v23  ;;  %v7597_v58 = vrot.slane %v7593_v45, 4  ;;  %v7604_v33 = vor.u32 %v7602_v17, %v7601_v11  ;;  %v7606_v7 = vrot.slane %v7601_v11, 4 }
 0x5b0   : > { %7668 = vst [vmem:[#allocation4 + $0x3c] sm:$0xf] %v7667_v40  ;;  %7661 = vst [vmem:[#allocation4 + $0x30] sm:$0xf] %v7660_v52  ;;  %v7580_v41 = vrot.slane %v7576_v1, 4  ;;  %v7587_v5 = vor.u32 %v7585_v31, %v7584_v9  ;;  %v7589_v27 = vrot.slane %v7584_v9, 4 }
 0x5b1   : > { %v7605_v53 = vsel %vm14859_vm10, %v7597_v58, %v7604_v33  ;;  %v7671_v32 = vsel %vm14868_vm11, %v7606_v7, %v7670_v2 }
 0x5b2   : > { %7669 = vst.msk [vmem:[#allocation4 + $0x40] sm:$0xf] %vm7625_vm4, %v7605_v53  ;;  %7672 = vst [vmem:[#allocation4 + $0x44] sm:$0x1] %v7671_v32  ;;  %v7588_v10 = vsel %vm14859_vm10, %v7580_v41, %v7587_v5  ;;  %v7664_v51 = vsel %vm14868_vm11, %v7589_v27, %v7663_v44 }
 0x5b3   : > { %7662 = vst.msk [vmem:[#allocation4 + $0x34] sm:$0xf] %vm7625_vm4, %v7588_v10  ;;  %7665 = vst [vmem:[#allocation4 + $0x38] sm:$0x1] %v7664_v51 }
 0x5b4 PF: > { %p9634_p8 = scmp.ne.s32.totalorder %s10782_s13, 3 }
 0x5b5   : > { %v10806_v14 = vmov (!%p9634_p8), 0  }
 0x5b6   : > { %7683 = sbr.rel (%p9634_p8) target bundleno = 1469 (0x5bd), region = 72  ;;  %7685 = vst.msk [vmem:[#allocation4 + $0x3c] sm:$0xf] (!%p9634_p8), %vm7625_vm4, %v10806_v14  ;;  %7686 = vst.msk [vmem:[#allocation4 + $0x40] sm:$0xf] (!%p9634_p8), %vm7625_vm4, %v10806_v14 }
 0x5b7   : > { %7688 = vst.msk [vmem:[#allocation4 + $0x44] sm:$0x1] (!%p9634_p8), %vm7633_vm8, %v10806_v14 }
 0x5bd PF: > { %v9635_v34 = vld [vmem:[%s15379_s8 + $0x2] sm:$0x3]  ;;  %v14965_v60 = vld [vmem:[#allocation4 + $0x4] sm:$0xf]  ;;  %v14969_v0 = vld [vmem:[#allocation4 + $0x8] sm:$0x1] }
 0x5be   : > { %v14963_v24 = vld [vmem:[#allocation4] sm:$0xf]  ;;  %10621 = vmatprep.subr.msk.bf16.mxu1 %vm3628_vm14, %v9635_v34  ;;  %v7825_v47 = vsel %vm3628_vm14, %v9635_v34, 0  ;;  %v7712_v8 = vshll.u32 %v14965_v60, 16  ;;  %v7716_v45 = vshrl.u32 %v14965_v60, 16  ;;  %v7722_v1 = vshll.u32 %v14969_v0, 16 }
 0x5bf   : > { %v7703_v4 = vshrl.u32 %v14963_v24, 16  ;;  %v7706_v28 = vshll.u32 %v14963_v24, 16  ;;  %10238 = vmatpush3.bf16.msra.mxu1 %v7825_v47  ;;  %v7701_v50 = vld [vmem:[%s15379_s8] sm:$0x3]  ;;  %v14980_v43 = vld [vmem:[#allocation4 + $0xc] sm:$0xf] }
 0x5c0   : > { %v7714_v13 = vrot.slane %v7712_v8, 5  ;;  %10622 = vmatprep.subr.msk.bf16.mxu1 %vm3628_vm14, %v7701_v50  ;;  %v7718_v62 = vrot.slane %v7716_v45, 4  ;;  %v14982_v39 = vld [vmem:[#allocation4 + $0x10] sm:$0xf]  ;;  %v14984_v63 = vld [vmem:[#allocation4 + $0x14] sm:$0x1] }
 0x5c1   : > { %v7705_v30 = vrot.slane %v7703_v4, 4  ;;  %v7708_v55 = vrot.slane %v7706_v28, 5  ;;  %v7727_v6 = vshrl.u32 %v14980_v43, 16  ;;  %v7730_v38 = vshll.u32 %v14980_v43, 16  ;;  %v14991_v20 = vld [vmem:[#allocation4 + $0x18] sm:$0xf] }
 0x5c2   : > { %v7736_v12 = vshll.u32 %v14982_v39, 16  ;;  %v7719_v37 = vor.u32 %v7718_v62, %v7714_v13  ;;  %v7724_v23 = vrot.slane %v7722_v1, 5  ;;  %v7740_v40 = vshrl.u32 %v14982_v39, 16  ;;  %v14993_v9 = vld [vmem:[#allocation4 + $0x1c] sm:$0xf] }
 0x5c3   : > { %v7709_v56 = vor.u32 %v7708_v55, %v7705_v30  ;;  %v7746_v52 = vshll.u32 %v14984_v63, 16  ;;  %v7729_v11 = vrot.slane %v7727_v6, 4  ;;  %v7732_v17 = vrot.slane %v7730_v38, 5  ;;  %v15000_v53 = vld [vmem:[#allocation4 + $0x20] sm:$0x1] }
 0x5c4   : > { %v7738_v2 = vrot.slane %v7736_v12, 5  ;;  %v7720_v31 = vrot.slane %v7719_v37, 4  ;;  %v7742_v58 = vrot.slane %v7740_v40, 4  ;;  %v7751_v41 = vshrl.u32 %v14991_v20, 16  ;;  %v15004_v51 = vld [vmem:[#allocation4 + $0x24] sm:$0xf] }
 0x5c5   : > { %v7710_v22 = vrot.slane %v7709_v56, 4  ;;  %v7733_v7 = vor.u32 %v7732_v17, %v7729_v11  ;;  %v7748_v44 = vrot.slane %v7746_v52, 5  ;;  %v7754_v32 = vshll.u32 %v14991_v20, 16  ;;  %v15007_v4 = vld [vmem:[#allocation4 + $0x28] sm:$0xf] }
 0x5c6   : > { %v7725_v5 = vsel %vm13258_vm3, %v7720_v31, %v7724_v23  ;;  %v7743_v27 = vor.u32 %v7742_v58, %v7738_v2  ;;  %v7760_v10 = vshll.u32 %v14993_v9, 16  ;;  %v7925_v14 = vsel %vm3628_vm14, %v7701_v50, 0  ;;  %v15018_v38 = vld [vmem:[#allocation4 + $0x2c] sm:$0x1]  ;;  %v9656_v31 = vld [vmem:[%s15379_s8 + $0x4] sm:$0x3] }
 0x5c7   : > { %v7715_v33 = vsel %vm13258_vm3, %v7710_v22, %v7714_v13  ;;  %v7734_v34 = vrot.slane %v7733_v7, 4  ;;  %v7753_v47 = vrot.slane %v7751_v41, 4  ;;  %v7756_v8 = vrot.slane %v7754_v32, 5 }
 0x5c8   : > { %v9636_v3 = vcombine.low %v7715_v33, %v7725_v5  ;;  %v7744_v28 = vrot.slane %v7743_v27, 4  ;;  %v7762_v45 = vrot.slane %v7760_v10, 5  ;;  %v7764_v1 = vshrl.u32 %v14993_v9, 16 }
 0x5c9   : > { %v7739_v30 = vsel %vm13258_vm3, %v7734_v34, %v7738_v2  ;;  %v7770_v55 = vshll.u32 %v15000_v53, 16  ;;  %v7775_v13 = vshrl.u32 %v15004_v51, 16  ;;  %v7778_v50 = vshll.u32 %v15004_v51, 16 }
 0x5ca   : > { %10239 = vmatprep.mubr.msk.bf16.mxu1 %vm3609_vm0, %v9636_v3  ;;  %v7749_v62 = vsel %vm13258_vm3, %v7744_v28, %v7748_v44  ;;  %v7757_v56 = vor.u32 %v7756_v8, %v7753_v47  ;;  %v7766_v6 = vrot.slane %v7764_v1, 4  ;;  %v7784_v12 = vshll.u32 %v15007_v4, 16 }
 0x5cb   : > { %v9637_v37 = vcombine.low %v7739_v30, %v7749_v62  ;;  %v7772_v23 = vrot.slane %v7770_v55, 5  ;;  %v7777_v40 = vrot.slane %v7775_v13, 4  ;;  %v7780_v52 = vrot.slane %v7778_v50, 5 }
 0x5cc   : > { %v7758_v22 = vrot.slane %v7757_v56, 4  ;;  %v7767_v11 = vor.u32 %v7766_v6, %v7762_v45  ;;  %v7786_v17 = vrot.slane %v7784_v12, 5  ;;  %v7788_v2 = vshrl.u32 %v15007_v4, 16  ;;  %v9665_v56 = vld [vmem:[%s15379_s8 + $0x6] sm:$0x3] }
 0x5cd   : > { %10240 = vmatmul.mubr.msk.bf16.vlgmr.msra.gmra.mrb[24].mxu1 %vm3609_vm0, %v9637_v37  ;;  %v7781_v58 = vor.u32 %v7780_v52, %v7777_v40  ;;  %v7794_v33 = vshll.u32 %v15018_v38, 16  ;;  %v9644_v28 = vcombine.low %v14963_v24, %v14965_v60  ;;  %v9645_v1 = vcombine.low %v14980_v43, %v14982_v39 }
 0x5ce   : > { %10248 = vmatpush3.bf16.msra.mxu1 %v7925_v14  ;;  %v7763_v7 = vsel %vm13258_vm3, %v7758_v22, %v7762_v45  ;;  %v7768_v44 = vrot.slane %v7767_v11, 4  ;;  %v7790_v41 = vrot.slane %v7788_v2, 4  ;;  %v7998_v45 = vrot.slane %v14965_v60, 5 }
 0x5cf   : > { %v7782_v5 = vrot.slane %v7781_v58, 4  ;;  %10623 = vmatprep.subr.msk.bf16.mxu1 %vm3628_vm14, %v9656_v31  ;;  %v7796_v10 = vrot.slane %v7794_v33, 5  ;;  %v9646_v30 = vcombine.low %v14991_v20, %v14993_v9  ;;  %v8001_v55 = vrot.slane %v14969_v0, 5 }
 0x5d0   : > { %v7773_v27 = vsel %vm13258_vm3, %v7768_v44, %v7772_v23  ;;  %v7791_v32 = vor.u32 %v7790_v41, %v7786_v17  ;;  %v8051_v13 = vsel %vm3628_vm14, %v9656_v31, 0  ;;  %v9652_v50 = vrot.slane %v14963_v24, 9  ;;  %v15085_v41 = vld [vmem:[#allocation4 + $0xc] sm:$0xf] }
 0x5d1   : > { %v9638_v3 = vcombine.low %v7763_v7, %v7773_v27  ;;  %v7787_v34 = vsel %vm13258_vm3, %v7782_v5, %v7786_v17  ;;  %v8000_v62 = vrot.slane %v7998_v45, 4  ;;  %v8005_v60 = vrot.slane %v14982_v39, 5  ;;  %v15087_v5 = vld [vmem:[#allocation4 + $0x10] sm:$0xf] }
 0x5d2   : > { %v7792_v47 = vrot.slane %v7791_v32, 4  ;;  %v7999_v6 = vsel %vm12949_vm15, %v9652_v50, %v7998_v45  ;;  %v8012_v24 = vrot.slane %v14993_v9, 5  ;;  %v9647_v12 = vcombine.low %v15004_v51, %v15007_v4 }
 0x5d3   : > { %10243 = vmatprep.mubr.msk.bf16.mxu1 %vm3609_vm0, %v9638_v3  ;;  %v8002_v0 = vsel %vm12949_vm15, %v8000_v62, %v8001_v55  ;;  %v8007_v37 = vrot.slane %v8005_v60, 4  ;;  %v8008_v23 = vrot.slane %v14984_v63, 5  ;;  %v9653_v40 = vrot.slane %v14980_v43, 9 }
 0x5d4   : > { %v7797_v14 = vsel %vm13258_vm3, %v7792_v47, %v7796_v10  ;;  %v9657_v39 = vcombine.low %v7999_v6, %v8002_v0  ;;  %v9654_v52 = vrot.slane %v14991_v20, 9  ;;  %v8014_v22 = vrot.slane %v8012_v24, 4  ;;  %v15114_v0 = vld [vmem:[#allocation4 + $0x24] sm:$0xf] }
 0x5d5   : > { %v9639_v8 = vcombine.low %v7787_v34, %v7797_v14  ;;  %v8015_v11 = vrot.slane %v15000_v53, 5  ;;  %v8019_v17 = vrot.slane %v15007_v4, 5  ;;  %v8009_v9 = vsel %vm12949_vm15, %v8007_v37, %v8008_v23  ;;  %v15099_v34 = vld [vmem:[#allocation4 + $0x14] sm:$0x1] }
 0x5d6   : > { %v8006_v63 = vsel %vm12949_vm15, %v9653_v40, %v8005_v60  ;;  %v8013_v43 = vsel %vm12949_vm15, %v9654_v52, %v8012_v24  ;;  %v9655_v53 = vrot.slane %v15004_v51, 9  ;;  %v8022_v4 = vrot.slane %v15018_v38, 5  ;;  %v9674_v51 = vld [vmem:[%s15379_s8 + $0x8] sm:$0x3] }
 0x5d7   : > { %10244 = vmatmul.mubr.msk.bf16.gmra.mrb[28].mxu1 %vm3609_vm0, %v9639_v8  ;;  %v8016_v20 = vsel %vm12949_vm15, %v8014_v22, %v8015_v11  ;;  %v8021_v2 = vrot.slane %v8019_v17, 4  ;;  %v9658_v31 = vcombine.low %v8006_v63, %v8009_v9  ;;  %v8174_v33 = vsel %vm3628_vm14, %v9665_v56, 0  ;;  %v15116_v24 = vld [vmem:[#allocation4 + $0x28] sm:$0xf]  ;;  %v15124_v63 = vld [vmem:[#allocation4 + $0x20] sm:$0x1] }
 0x5d8   : > { %10249 = vmatprep.mubr.msk.bf16.mxu1 %vm3609_vm0, %v9644_v28  ;;  %v9659_v58 = vcombine.low %v8013_v43, %v8016_v20  ;;  %v8020_v7 = vsel %vm12949_vm15, %v9655_v53, %v8019_v17  ;;  %v8250_v38 = vshrl.u32 %v15085_v41, 16  ;;  %v8253_v27 = vshll.u32 %v15085_v41, 16 }
 0x5d9   : > { %v8023_v44 = vsel %vm12949_vm15, %v8021_v2, %v8022_v4  ;;  %v8259_v32 = vshll.u32 %v15087_v5, 16  ;;  %v8263_v10 = vshrl.u32 %v15087_v5, 16  ;;  %v9666_v45 = vcombine.low %v15085_v41, %v15087_v5 }
 0x5da   : > { %v9660_v3 = vcombine.low %v8020_v7, %v8023_v44  ;;  %v8252_v47 = vrot.slane %v8250_v38, 4  ;;  %v8255_v14 = vrot.slane %v8253_v27, 5  ;;  %v8269_v55 = vshll.u32 %v15099_v34, 16  ;;  %v9687_v7 = vld [vmem:[%s15379_s8 + $0xa] sm:$0x3] }
 0x5db   : > { %v8261_v28 = vrot.slane %v8259_v32, 5  ;;  %v8265_v8 = vrot.slane %v8263_v10, 4  ;;  %v8301_v37 = vshll.u32 %v15114_v0, 16  ;;  %v8307_v23 = vshll.u32 %v15116_v24, 16  ;;  %v15133_v38 = vld [vmem:[#allocation4 + $0x2c] sm:$0x1] }
 0x5dc   : > { %v8256_v62 = vor.u32 %v8255_v14, %v8252_v47  ;;  %v8271_v52 = vrot.slane %v8269_v55, 5  ;;  %v8372_v53 = vsel %vm3628_vm14, %v9674_v51, 0  ;;  %v9668_v2 = vcombine.low %v15114_v0, %v15116_v24  ;;  %v15136_v27 = vld [vmem:[#allocation4 + $0x30] sm:$0xf] }
 0x5dd   : > { %v8293_v44 = vshll.u32 %v15124_v63, 16  ;;  %v8322_v14 = vshrl.u32 %v15136_v27, 16 }
 0x5de   : > { %v8257_v17 = vrot.slane %v8256_v62, 4 }
 0x5df   : > { %10250 = vmatmul.mubr.msk.bf16.vlgmr.msra.gmra.mrb[24].mxu1 %vm3609_vm0, %v9645_v1  ;;  %v15103_v1 = vld [vmem:[#allocation4 + $0x18] sm:$0xf] }
 0x5e0   : > { %10258 = vmatpush3.bf16.msra.mxu1 %v8051_v13  ;;  %10253 = vmatprep.mubr.msk.bf16.mxu1 %vm3609_vm0, %v9646_v30  ;;  %v15105_v30 = vld [vmem:[#allocation4 + $0x1c] sm:$0xf]  ;;  %v8274_v13 = vshrl.u32 %v15103_v1, 16  ;;  %v8277_v50 = vshll.u32 %v15103_v1, 16  ;;  %v8262_v32 = vsel %vm13258_vm3, %v8257_v17, %v8261_v28  ;;  %v8138_v17 = vld [vmem:[#allocation4 + $0x38] sm:$0x1] }
 0x5e1   : > { %10624 = vmatprep.subr.msk.bf16.mxu1 %vm3628_vm14, %v9665_v56  ;;  %v8266_v56 = vor.u32 %v8265_v8, %v8261_v28  ;;  %v8283_v60 = vshll.u32 %v15105_v30, 16  ;;  %v8287_v6 = vshrl.u32 %v15105_v30, 16  ;;  %v9667_v40 = vcombine.low %v15103_v1, %v15105_v30 }
 0x5e2   : > { %v8276_v22 = vrot.slane %v8274_v13, 4  ;;  %v8279_v11 = vrot.slane %v8277_v50, 5  ;;  %v8325_v8 = vshll.u32 %v15136_v27, 16  ;;  %v8317_v50 = vshll.u32 %v15133_v38, 16 }
 0x5e3   : > { %v8267_v9 = vrot.slane %v8266_v56, 4  ;;  %v8285_v43 = vrot.slane %v8283_v60, 5  ;;  %v8289_v20 = vrot.slane %v8287_v6, 4 }
 0x5e5   : > { %v8272_v10 = vsel %vm13258_vm3, %v8267_v9, %v8271_v52  ;;  %v8290_v47 = vor.u32 %v8289_v20, %v8285_v43 }
 0x5e6   : > { %v9675_v56 = vcombine.low %v8262_v32, %v8272_v10 }
 0x5e7   : > { %10254 = vmatmul.mubr.msk.bf16.gmra.mrb[28].mxu1 %vm3609_vm0, %v9647_v12  ;;  %v8298_v12 = vshrl.u32 %v15114_v0, 16  ;;  %v8291_v6 = vrot.slane %v8290_v47, 4 }
 0x5e8   : > { %10259 = vmatprep.mubr.msk.bf16.mxu1 %vm3609_vm0, %v9657_v39  ;;  %v8311_v39 = vshrl.u32 %v15116_v24, 16 }
 0x5e9   : > { %v8300_v4 = vrot.slane %v8298_v12, 4  ;;  %v8295_v12 = vrot.slane %v8293_v44, 5  ;;  %v8453_v44 = vrot.slane %v15087_v5, 5 }
 0x5eb   : > { %v8296_v20 = vsel %vm13258_vm3, %v8291_v6, %v8295_v12  ;;  %v8463_v6 = vrot.slane %v15124_v63, 5  ;;  %v9685_v12 = vrot.slane %v15114_v0, 9 }
 0x5ef   : > { %10260 = vmatmul.mubr.msk.bf16.vlgmr.msra.gmra.mrb[24].mxu1 %vm3609_vm0, %v9658_v31  ;;  %v8303_v31 = vrot.slane %v8301_v37, 5  ;;  %v8324_v37 = vrot.slane %v8322_v14, 4  ;;  %v8506_v14 = vsel %vm3628_vm14, %v9687_v7, 0 }
 0x5f0   : > { %10268 = vmatpush3.bf16.msra.mxu1 %v8174_v33  ;;  %10263 = vmatprep.mubr.msk.bf16.mxu1 %vm3609_vm0, %v9659_v58  ;;  %v8309_v58 = vrot.slane %v8307_v23, 5  ;;  %v8313_v33 = vrot.slane %v8311_v39, 4  ;;  %v8327_v23 = vrot.slane %v8325_v8, 5  ;;  %v9683_v8 = vrot.slane %v15085_v41, 9 }
 0x5f1   : > { %10625 = vmatprep.subr.msk.bf16.mxu1 %vm3628_vm14, %v9674_v51  ;;  %v15138_v51 = vld [vmem:[#allocation4 + $0x34] sm:$0xf]  ;;  %v8304_v13 = vor.u32 %v8303_v31, %v8300_v4  ;;  %v8341_v4 = vshll.u32 %v8138_v17, 16  ;;  %v8460_v41 = vrot.slane %v15105_v30, 5 }
 0x5f2   : > { %v8335_v55 = vshrl.u32 %v15138_v51, 16  ;;  %v8314_v28 = vor.u32 %v8313_v33, %v8309_v58  ;;  %v9669_v62 = vcombine.low %v15136_v27, %v15138_v51 }
 0x5f3   : > { %v8305_v52 = vrot.slane %v8304_v13, 4  ;;  %v8343_v47 = vrot.slane %v8341_v4, 5 }
 0x5f5   : > { %v8310_v31 = vsel %vm13258_vm3, %v8305_v52, %v8309_v58  ;;  %v9696_v58 = vld [vmem:[%s15379_s8 + $0xc] sm:$0x3]  ;;  %v8477_v52 = vrot.slane %v8138_v17, 5 }
 0x5f7   : > { %10264 = vmatmul.mubr.msk.bf16.gmra.mrb[28].mxu1 %vm3609_vm0, %v9660_v3  ;;  %v8280_v3 = vor.u32 %v8279_v11, %v8276_v22  ;;  %v8315_v22 = vrot.slane %v8314_v28, 4  ;;  %v8319_v11 = vrot.slane %v8317_v50, 5  ;;  %v8467_v28 = vrot.slane %v15116_v24, 5 }
 0x5f8   : > { %10269 = vmatprep.mubr.msk.bf16.mxu1 %vm3609_vm0, %v9666_v45  ;;  %v8331_v45 = vshll.u32 %v15138_v51, 16 }
 0x5f9   : > { %v8281_v60 = vrot.slane %v8280_v3, 4  ;;  %v8320_v33 = vsel %vm13258_vm3, %v8315_v22, %v8319_v11  ;;  %v8469_v30 = vrot.slane %v8467_v28, 4  ;;  %v8468_v63 = vsel %vm12949_vm15, %v9685_v12, %v8467_v28  ;;  %v15200_v11 = vld [vmem:[#allocation4 + $0x18] sm:$0xf]  ;;  %v15235_v28 = vld [vmem:[#allocation4 + $0x34] sm:$0xf] }
 0x5fa   : > { %v8333_v39 = vrot.slane %v8331_v45, 5  ;;  %v9677_v10 = vcombine.low %v8310_v31, %v8320_v33  ;;  %v8455_v45 = vrot.slane %v8453_v44, 4  ;;  %v8629_v22 = vsel %vm3628_vm14, %v9696_v58, 0 }
 0x5fb   : > { %v8286_v9 = vsel %vm13258_vm3, %v8281_v60, %v8285_v43  ;;  %v8462_v60 = vrot.slane %v8460_v41, 4  ;;  %v8708_v17 = vshll.u32 %v15200_v11, 16 }
 0x5fc   : > { %v9676_v32 = vcombine.low %v8286_v9, %v8296_v20  ;;  %v15204_v20 = vld [vmem:[#allocation4 + $0x1c] sm:$0xf] }
 0x5fd   : > { %v8714_v4 = vshll.u32 %v15204_v20, 16  ;;  %v8718_v31 = vshrl.u32 %v15204_v20, 16 }
 0x5ff   : > { %10270 = vmatmul.mubr.msk.bf16.vlgmr.msra.gmra.mrb[24].mxu1 %vm3609_vm0, %v9667_v40  ;;  %v8337_v40 = vrot.slane %v8335_v55, 4  ;;  %v8456_v55 = vrot.slane %v15099_v34, 5  ;;  %v8454_v34 = vsel %vm12949_vm15, %v9683_v8, %v8453_v44  ;;  %v15218_v44 = vld [vmem:[#allocation4 + $0x20] sm:$0x1]  ;;  %v15224_v8 = vld [vmem:[#allocation4 + $0x28] sm:$0xf] }
 0x600   : > { %10278 = vmatpush3.bf16.msra.mxu1 %v8372_v53  ;;  %10273 = vmatprep.mubr.msk.bf16.mxu1 %vm3609_vm0, %v9668_v2  ;;  %v8328_v53 = vor.u32 %v8327_v23, %v8324_v37  ;;  %v8470_v37 = vrot.slane %v15133_v38, 5  ;;  %v8474_v23 = vrot.slane %v15138_v51, 5  ;;  %v9686_v38 = vrot.slane %v15136_v27, 9 }
 0x601   : > { %10626 = vmatprep.subr.msk.bf16.mxu1 %vm3628_vm14, %v9687_v7  ;;  %v8338_v2 = vor.u32 %v8337_v40, %v8333_v39  ;;  %v8457_v13 = vsel %vm12949_vm15, %v8455_v45, %v8456_v55  ;;  %v8724_v45 = vshll.u32 %v15218_v44, 16 }
 0x602   : > { %v8329_v3 = vrot.slane %v8328_v53, 4  ;;  %v8471_v0 = vsel %vm12949_vm15, %v8469_v30, %v8470_v37  ;;  %v8476_v40 = vrot.slane %v8474_v23, 4  ;;  %v8475_v9 = vsel %vm12949_vm15, %v9686_v38, %v8474_v23  ;;  %v9705_v53 = vld [vmem:[%s15379_s8 + $0xe] sm:$0x3] }
 0x603   : > { %v8339_v43 = vrot.slane %v8338_v2, 4  ;;  %v9690_v51 = vcombine.low %v8468_v63, %v8471_v0  ;;  %v8705_v2 = vshrl.u32 %v15200_v11, 16  ;;  %v8726_v12 = vrot.slane %v8724_v45, 5 }
 0x604   : > { %v8334_v5 = vsel %vm13258_vm3, %v8329_v3, %v8333_v39  ;;  %v8478_v27 = vsel %vm12949_vm15, %v8476_v40, %v8477_v52  ;;  %v8716_v3 = vrot.slane %v8714_v4, 5  ;;  %v8827_v38 = vsel %vm3628_vm14, %v9705_v53, 0 }
 0x605   : > { %v8344_v7 = vsel %vm13258_vm3, %v8339_v43, %v8343_v47  ;;  %v9691_v33 = vcombine.low %v8475_v9, %v8478_v27  ;;  %v8720_v43 = vrot.slane %v8718_v31, 4  ;;  %v9697_v47 = vcombine.low %v15200_v11, %v15204_v20  ;;  %v9718_v9 = vld [vmem:[%s15379_s8 + $0x10] sm:$0x3]  ;;  %v15252_v27 = vld [vmem:[#allocation4 + $0x38] sm:$0x1] }
 0x606   : > { %v9678_v50 = vcombine.low %v8334_v5, %v8344_v7 }
 0x607   : > { %10274 = vmatmul.mubr.msk.bf16.gmra.mrb[28].mxu1 %vm3609_vm0, %v9669_v62  ;;  %v9688_v62 = vcombine.low %v8454_v34, %v8457_v13  ;;  %v8721_v7 = vor.u32 %v8720_v43, %v8716_v3  ;;  %v8742_v34 = vshrl.u32 %v15224_v8, 16  ;;  %v15233_v13 = vld [vmem:[#allocation4 + $0x30] sm:$0xf] }
 0x608   : > { %10279 = vmatprep.mubr.msk.bf16.mxu1 %vm3609_vm0, %v9675_v56  ;;  %v9684_v56 = vrot.slane %v15103_v1, 9  ;;  %v8464_v1 = vsel %vm12949_vm15, %v8462_v60, %v8463_v6  ;;  %v8766_v60 = vshrl.u32 %v15235_v28, 16  ;;  %v9716_v46 = vrot.slane %v15233_v13, 9 }
 0x609   : > { %v8744_v0 = vrot.slane %v8742_v34, 4 }
 0x60a   : > { %v8461_v24 = vsel %vm12949_vm15, %v9684_v56, %v8460_v41  ;;  %v8738_v41 = vshll.u32 %v15224_v8, 16  ;;  %v8762_v56 = vshll.u32 %v15235_v28, 16 }
 0x60b   : > { %v9689_v39 = vcombine.low %v8461_v24, %v8464_v1  ;;  %v8722_v24 = vrot.slane %v8721_v7, 4  ;;  %v15243_v1 = vld [vmem:[#allocation4 + $0x2c] sm:$0x1] }
 0x60c   : > { %v8740_v63 = vrot.slane %v8738_v41, 5 }
 0x60d   : > { %v8727_v31 = vsel %vm13258_vm3, %v8722_v24, %v8726_v12 }
 0x60f   : > { %10280 = vmatmul.mubr.msk.bf16.vlgmr.msra.gmra.mrb[24].mxu1 %vm3609_vm0, %v9676_v32  ;;  %v8707_v32 = vrot.slane %v8705_v2, 4  ;;  %v8748_v2 = vshll.u32 %v15243_v1, 16 }
 0x610   : > { %10288 = vmatpush3.bf16.msra.mxu1 %v8506_v14  ;;  %10283 = vmatprep.mubr.msk.bf16.mxu1 %vm3609_vm0, %v9677_v10  ;;  %v8710_v10 = vrot.slane %v8708_v17, 5  ;;  %v15222_v14 = vld [vmem:[#allocation4 + $0x24] sm:$0xf]  ;;  %v15255_v17 = vld [vmem:[#allocation4 + $0x3c] sm:$0xf] }
 0x611   : > { %10627 = vmatprep.subr.msk.bf16.mxu1 %vm3628_vm14, %v9696_v58  ;;  %v8729_v55 = vshrl.u32 %v15222_v14, 16  ;;  %v8732_v58 = vshll.u32 %v15222_v14, 16  ;;  %v9698_v6 = vcombine.low %v15222_v14, %v15224_v8  ;;  %v8780_v43 = vshll.u32 %v15255_v17, 16 }
 0x612   : > { %v8711_v5 = vor.u32 %v8710_v10, %v8707_v32  ;;  %v8745_v32 = vor.u32 %v8744_v0, %v8740_v63  ;;  %v8777_v10 = vshrl.u32 %v15255_v17, 16 }
 0x613   : > { %v8731_v30 = vrot.slane %v8729_v55, 4  ;;  %v8734_v37 = vrot.slane %v8732_v58, 5  ;;  %v8772_v58 = vshll.u32 %v15252_v27, 16 }
 0x614   : > { %v8712_v23 = vrot.slane %v8711_v5, 4  ;;  %v8746_v34 = vrot.slane %v8745_v32, 4 }
 0x616   : > { %v8717_v4 = vsel %vm13258_vm3, %v8712_v23, %v8716_v3  ;;  %v8593_v23 = vld [vmem:[#allocation4 + $0x44] sm:$0x1] }
 0x617   : > { %10284 = vmatmul.mubr.msk.bf16.gmra.mrb[28].mxu1 %vm3609_vm0, %v9678_v50  ;;  %v8753_v50 = vshrl.u32 %v15233_v13, 16  ;;  %v9706_v7 = vcombine.low %v8717_v4, %v8727_v31 }
 0x618   : > { %10289 = vmatprep.mubr.msk.bf16.mxu1 %vm3609_vm0, %v9688_v62  ;;  %v8756_v62 = vshll.u32 %v15233_v13, 16 }
 0x619   : > { %v8755_v40 = vrot.slane %v8753_v50, 4  ;;  %v8750_v50 = vrot.slane %v8748_v2, 5  ;;  %v8908_v2 = vrot.slane %v15204_v20, 5 }
 0x61a   : > { %v8758_v52 = vrot.slane %v8756_v62, 5  ;;  %v8779_v62 = vrot.slane %v8777_v10, 4  ;;  %v8961_v10 = vsel %vm3628_vm14, %v9718_v9, 0 }
 0x61b   : > { %v8751_v0 = vsel %vm13258_vm3, %v8746_v34, %v8750_v50 }
 0x61c   : > { %v8759_v55 = vor.u32 %v8758_v52, %v8755_v40  ;;  %v8796_v40 = vshll.u32 %v8593_v23, 16 }
 0x61e   : > { %v8760_v12 = vrot.slane %v8759_v55, 4  ;;  %v8798_v32 = vrot.slane %v8796_v40, 5  ;;  %v8915_v55 = vrot.slane %v15224_v8, 5  ;;  %v8925_v8 = vrot.slane %v15252_v27, 5 }
 0x61f   : > { %10290 = vmatmul.mubr.msk.bf16.vlgmr.msra.gmra.mrb[24].mxu1 %vm3609_vm0, %v9689_v39  ;;  %v9699_v39 = vcombine.low %v15233_v13, %v15235_v28 }
 0x620   : > { %10298 = vmatpush3.bf16.msra.mxu1 %v8629_v22  ;;  %10293 = vmatprep.mubr.msk.bf16.mxu1 %vm3609_vm0, %v9690_v51  ;;  %v8764_v51 = vrot.slane %v8762_v56, 5  ;;  %v8768_v22 = vrot.slane %v8766_v60, 4  ;;  %v8782_v56 = vrot.slane %v8780_v43, 5  ;;  %v9714_v43 = vrot.slane %v15200_v11, 9 }
 0x621   : > { %10628 = vmatprep.subr.msk.bf16.mxu1 %vm3628_vm14, %v9705_v53  ;;  %v15257_v53 = vld [vmem:[#allocation4 + $0x40] sm:$0xf] }
 0x622   : > { %v8790_v45 = vshrl.u32 %v15257_v53, 16  ;;  %v8769_v3 = vor.u32 %v8768_v22, %v8764_v51  ;;  %v9700_v5 = vcombine.low %v15255_v17, %v15257_v53  ;;  %v8765_v52 = vsel %vm13258_vm3, %v8760_v12, %v8764_v51 }
 0x627   : > { %10294 = vmatmul.mubr.msk.bf16.gmra.mrb[28].mxu1 %vm3609_vm0, %v9691_v33  ;;  %v8735_v33 = vor.u32 %v8734_v37, %v8731_v30  ;;  %v8770_v30 = vrot.slane %v8769_v3, 4  ;;  %v8774_v37 = vrot.slane %v8772_v58, 5 }
 0x628   : > { %10299 = vmatprep.mubr.msk.bf16.mxu1 %vm3609_vm0, %v9697_v47  ;;  %v8786_v47 = vshll.u32 %v15257_v53, 16 }
 0x629   : > { %v8736_v41 = vrot.slane %v8735_v33, 4  ;;  %v8775_v22 = vsel %vm13258_vm3, %v8770_v30, %v8774_v37  ;;  %v9727_v37 = vld [vmem:[%s15380_s9] ss:$0 sm:$0xff] }
 0x62a   : > { %v8788_v60 = vrot.slane %v8786_v47, 5  ;;  %v9708_v31 = vcombine.low %v8765_v52, %v8775_v22  ;;  %v8910_v47 = vrot.slane %v8908_v2, 4 }
 0x62b   : > { %v8741_v24 = vsel %vm13258_vm3, %v8736_v41, %v8740_v63  ;;  %v8918_v41 = vrot.slane %v15243_v1, 5 }
 0x62c   : > { %v9707_v4 = vcombine.low %v8741_v24, %v8751_v0 }
 0x62f   : > { %10300 = vmatmul.mubr.msk.bf16.vlgmr.msra.gmra.mrb[24].mxu1 %vm3609_vm0, %v9698_v6  ;;  %v8792_v6 = vrot.slane %v8790_v45, 4  ;;  %v8911_v45 = vrot.slane %v15218_v44, 5  ;;  %v8922_v44 = vrot.slane %v15235_v28, 5 }
 0x630   : > { %10308 = vmatpush3.bf16.msra.mxu1 %v8827_v38  ;;  %10303 = vmatprep.mubr.msk.bf16.mxu1 %vm3609_vm0, %v9699_v39  ;;  %v8783_v38 = vor.u32 %v8782_v56, %v8779_v62  ;;  %v9717_v56 = vrot.slane %v15255_v17, 9 }
 0x631   : > { %10629 = vmatprep.subr.msk.bf16.mxu1 %vm3628_vm14, %v9718_v9  ;;  %v8793_v39 = vor.u32 %v8792_v6, %v8788_v60  ;;  %v8909_v9 = vsel %vm12949_vm15, %v9714_v43, %v8908_v2  ;;  %v8912_v11 = vsel %vm12949_vm15, %v8910_v47, %v8911_v45  ;;  %v8924_v34 = vrot.slane %v8922_v44, 4 }
 0x632   : > { %v8784_v33 = vrot.slane %v8783_v38, 4  ;;  %v9719_v58 = vcombine.low %v8909_v9, %v8912_v11  ;;  %v8923_v1 = vsel %vm12949_vm15, %v9716_v46, %v8922_v44  ;;  %v8932_v6 = vrot.slane %v8593_v23, 5 }
 0x633   : > { %v8794_v63 = vrot.slane %v8793_v39, 4  ;;  %v8926_v13 = vsel %vm12949_vm15, %v8924_v34, %v8925_v8 }
 0x634   : > { %v8789_v20 = vsel %vm13258_vm3, %v8784_v33, %v8788_v60  ;;  %v9721_v27 = vcombine.low %v8923_v1, %v8926_v13 }
 0x635   : > { %v8799_v51 = vsel %vm13258_vm3, %v8794_v63, %v8798_v32 }
 0x636   : > { %v9709_v3 = vcombine.low %v8789_v20, %v8799_v51 }
 0x637   : > { %10304 = vmatmul.mubr.msk.bf16.gmra.mrb[28].mxu1 %vm3609_vm0, %v9700_v5  ;;  %v9715_v5 = vrot.slane %v15222_v14, 9  ;;  %v8929_v14 = vrot.slane %v15257_v53, 5 }
 0x638   : > { %10309 = vmatprep.mubr.msk.bf16.mxu1 %vm3609_vm0, %v9706_v7  ;;  %v8917_v7 = vrot.slane %v8915_v55, 4 }
 0x639   : > { %v8916_v50 = vsel %vm12949_vm15, %v9715_v5, %v8915_v55  ;;  %v8931_v60 = vrot.slane %v8929_v14, 4  ;;  %v8930_v12 = vsel %vm12949_vm15, %v9717_v56, %v8929_v14 }
 0x63a   : > { %v8919_v28 = vsel %vm12949_vm15, %v8917_v7, %v8918_v41 }
 0x63b   : > { %v9720_v62 = vcombine.low %v8916_v50, %v8919_v28  ;;  %v8933_v53 = vsel %vm12949_vm15, %v8931_v60, %v8932_v6 }
 0x63c   : > { %v9722_v30 = vcombine.low %v8930_v12, %v8933_v53 }
 0x63f   : > { %10310 = vmatmul.mubr.msk.bf16.vlgmr.msra.gmra.mrb[24].mxu1 %vm3609_vm0, %v9707_v4 }
 0x640   : > { %10318 = vmatpush3.bf16.msra.mxu1 %v8961_v10  ;;  %10313 = vmatprep.mubr.msk.bf16.mxu1 %vm3609_vm0, %v9708_v31 }
 0x647   : > { %10314 = vmatmul.mubr.msk.bf16.gmra.mrb[28].mxu1 %vm3609_vm0, %v9709_v3 }
 0x648   : > { %10319 = vmatprep.mubr.msk.bf16.mxu1 %vm3609_vm0, %v9719_v58 }
 0x64f   : > { %10320 = vmatmul.mubr.msk.bf16.vlgmr.msra.gmra.mrb[24].mxu1 %vm3609_vm0, %v9720_v62 }
 0x650   : > { %10323 = vmatprep.mubr.msk.bf16.mxu1 %vm3609_vm0, %v9721_v27 }
 0x657   : > { %10324 = vmatmul.mubr.msk.bf16.gmra.mrb[28].mxu1 %vm3609_vm0, %v9722_v30 }
 0x722   : > { %v10321_v17 = vpop.f32.mrb[24].mxu1 }
 0x723   : > { %v9045_v24 = vadd.f32 %v10321_v17, %v9727_v37  ;;  %v8997_v23 = vpop.f32.mrb[25].mxu1 }
 0x724   : > { %v9043_v0 = vadd.f32 %v9727_v37, %v8997_v23  ;;  %v10322_v38 = vpop.f32.mrb[26].mxu1 }
 0x725   : > { %v9053_v39 = vmax.f32 %v9045_v24, 0.0  ;;  %v9046_v40 = vadd.f32 %v10322_v38, %v9727_v37  ;;  %v9000_v52 = vpop.f32.mrb[27].mxu1 }
 0x726   : > { %v9051_v22 = vmax.f32 %v9043_v0, 0.0  ;;  %v9044_v48 = vadd.f32 %v9727_v37, %v9000_v52 }
 0x727   : > { %v9061_v2 = vadd.f32 %v9053_v39, %v14798_v21  ;;  %v9054_v4 = vmax.f32 %v9046_v40, 0.0 }
 0x728   : > { %v9059_v31 = vadd.f32 %v9051_v22, %v14788_v18  ;;  %v9052_v33 = vmax.f32 %v9044_v48, 0.0 }
 0x729   : > { %v9069_v63 = vadd.f32 %v9061_v2, %v14873_v59  ;;  %v9062_v32 = vadd.f32 %v9054_v4, %v14800_v19 }
 0x72a   : > { %v9067_v10 = vadd.f32 %v9059_v31, %v14838_v16  ;;  %v9060_v43 = vadd.f32 %v9052_v33, %v14784_v25  ;;  %v10325_v47 = vpop.f32.mrb[28].mxu1 }
 0x72b   : > { %9077 = vst.msk [vmem:[%s10906_s18 + $0x10] sm:$0xff] %vm3609_vm0, %v9069_v63  ;;  %v9070_v45 = vadd.f32 %v9062_v32, %v14905_v15  ;;  %v9049_v21 = vadd.f32 %v10325_v47, %v9727_v37  ;;  %v9013_v20 = vpop.f32.mrb[29].mxu1 }
 0x72c   : > { %9075 = vst.msk [vmem:[%s10906_s18] sm:$0xff] %vm3609_vm0, %v9067_v10  ;;  %v9068_v18 = vadd.f32 %v9060_v43, %v14843_v36  ;;  %v9047_v51 = vadd.f32 %v9727_v37, %v9013_v20  ;;  %v10326_v59 = vpop.f32.mrb[30].mxu1 }
 0x72d   : > { %9078 = vst.msk [vmem:[%s10906_s18 + $0x18] sm:$0xff] %vm3609_vm0, %v9070_v45  ;;  %v9057_v19 = vmax.f32 %v9049_v21, 0.0  ;;  %v9050_v16 = vadd.f32 %v10326_v59, %v9727_v37  ;;  %v9016_v25 = vpop.f32.mrb[31].mxu1 }
 0x72e   : > { %9076 = vst.msk [vmem:[%s10906_s18 + $0x8] sm:$0xff] %vm3609_vm0, %v9068_v18  ;;  %v9055_v15 = vmax.f32 %v9047_v51, 0.0  ;;  %v9048_v55 = vadd.f32 %v9727_v37, %v9016_v25 }
 0x72f   : > { %v9065_v9 = vadd.f32 %v9057_v19, %v14815_v29  ;;  %v9058_v11 = vmax.f32 %v9050_v16, 0.0 }
 0x730   : > { %v9063_v36 = vadd.f32 %v9055_v15, %v14802_v57  ;;  %v9056_v44 = vmax.f32 %v9048_v55, 0.0 }
 0x731   : > { %v9073_v3 = vadd.f32 %v9065_v9, %v14912_v42  ;;  %v9066_v58 = vadd.f32 %v9058_v11, %v14817_v61 }
 0x732   : > { %v9071_v5 = vadd.f32 %v9063_v36, %v14864_v26  ;;  %v9064_v7 = vadd.f32 %v9056_v44, %v14796_v49 }
 0x733   : > { %9081 = vst.msk [vmem:[%s10906_s18 + $0x30] sm:$0xff] %vm3609_vm0, %v9073_v3  ;;  %v9074_v41 = vadd.f32 %v9066_v58, %v14923_v35 }
 0x734   : > { %9079 = vst.msk [vmem:[%s10906_s18 + $0x20] sm:$0xff] %vm3609_vm0, %v9071_v5  ;;  %v9072_v29 = vadd.f32 %v9064_v7, %v14902_v54 }
 0x735   : > { %9082 = vst.msk [vmem:[%s10906_s18 + $0x38] sm:$0xff] %vm3609_vm0, %v9074_v41 }
 0x736   : > { %9080 = vst.msk [vmem:[%s10906_s18 + $0x28] sm:$0xff] %vm3609_vm0, %v9072_v29 }
 0x737 PF: > { %s20_s17 = sadd.s32 1, %s10798_s17   ;;  %s15982_s26 = sld [smem:[#allocation5_spill]] }
 0x738   : > { %p17_p9 = scmp.ge.s32.totalorder %s20_s17, 10   ;;  %s15983_s28 = sld [smem:[#allocation6_spill]] }
 0x739   : > { %s15984_s13 = smov %s10790_s15  ;;  %s15985_s14 = smov %s10794_s16 }
 0x73a   :  { %19 = sbr.rel (!%p17_p9) target bundleno = 3 (0x3), region = 134 }
 0x73d   : > { %s15986_s15 = smov %s15982_s26 }
 0x73e   : > { %s15987_s16 = smov %s15983_s28 }

</bundles_post_ra>
